<compile_context>
chip_gen: v7x
topology: tpu7x:2x2x1
jax: 0.10.0
libtpu: 0.0.40
codegen_flags: <defaults>
</compile_context>

<pallas_src>
import functools

import numpy as np
import jax
import jax.numpy as jnp
from jax.experimental import pallas as pl
from jax.experimental.pallas import tpu as pltpu


# ---------------------------------------------------------------------------
# Kernel A: encoder LSTM + decoder LSTM + attention (sequential recurrence)
# ---------------------------------------------------------------------------
def seq2seq_rnn_kernel(enc_x_ref, dec_x0_ref,
                       wih_e_ref, whh_e_ref, b_e_ref,
                       w_dec0_ref, w_sum_ref, b_d_ref,
                       feat_ref,
                       gx_ref, enc_bt_ref,
                       *, D, S_enc, T_dec, B):
    # D = padded hidden dim (multiple of 128), B = padded batch (multiple of 8).
    # Gate columns are packed (in the wrapper) as lane-aligned i | f | o | g.

    def gates_to_hc(g, c):
        ifo = jax.nn.sigmoid(g[:, :3 * D])        # one wide sigmoid (i, f, o)
        gg = jnp.tanh(g[:, 3 * D:])               # g gate
        c_new = ifo[:, D:2 * D] * c + ifo[:, :D] * gg
        h_new = ifo[:, 2 * D:] * jnp.tanh(c_new)
        return h_new, c_new

    # ---- encoder: hoisted input projection (ONE big bf16 MXU matmul, bias folded)
    gx_ref[...] = (jnp.dot(enc_x_ref[...], wih_e_ref[...],
                           preferred_element_type=jnp.float32)
                   + b_e_ref[...])                # (S_enc*B, 4D) f32

    # ---- encoder recurrence: fully unrolled, static slices, direct batch-major stash
    h = jnp.zeros((B, D), jnp.float32)
    c = jnp.zeros((B, D), jnp.float32)
    for t in range(S_enc):
        g = gx_ref[t * B:(t + 1) * B, :] + jnp.dot(
            h, whh_e_ref[...], preferred_element_type=jnp.float32)   # f32 recurrent path
        h, c = gates_to_hc(g, c)
        enc_bt_ref[:, t, :] = h.astype(jnp.bfloat16)  # (B, S_enc, D) bf16, static index

    # ---- decoder: attention helper (bf16 MXU operands, f32 accumulation)
    def attend_and_stash(t, h_t):
        enc_bt = enc_bt_ref[...]                  # read from VMEM each step (bf16 slab)
        s3 = jnp.einsum('bqd,bkd->bqk', h_t.astype(jnp.bfloat16)[:, None, :],
                        enc_bt, preferred_element_type=jnp.float32)  # (B, 1, S_enc)
        s3 = s3 - jnp.max(s3, axis=-1, keepdims=True)
        p = jnp.exp(s3)
        p = p * pl.reciprocal(jnp.sum(p, axis=-1, keepdims=True), approx=True)
        attn = jnp.einsum('bqk,bkd->bqd', p.astype(jnp.bfloat16), enc_bt,
                          preferred_element_type=jnp.float32)[:, 0, :]  # (B, D)
        feat_ref[t] = jnp.concatenate([h_t, attn], axis=-1).astype(jnp.bfloat16)

    b_dec = jnp.broadcast_to(b_d_ref[...], (B, 4 * D))   # broadcast ONCE

    # step 0: input is dec_x0 (!= h) -> fused [x0, h_enc] @ [Wih_d ; Whh_d]
    xh0 = jnp.concatenate([dec_x0_ref[...], h], axis=-1)             # (B, 2D)
    g0 = jnp.dot(xh0, w_dec0_ref[...], preferred_element_type=jnp.float32) + b_dec
    h, c = gates_to_hc(g0, c)
    attend_and_stash(0, h)

    # steps t >= 1: x_t == h_{t-1}  ->  g = h @ (Wih_d + Whh_d) + b   (half the K, no concat)
    for t in range(1, T_dec):
        g = jnp.dot(h, w_sum_ref[...], preferred_element_type=jnp.float32) + b_dec
        h, c = gates_to_hc(g, c)
        attend_and_stash(t, h)


# ---------------------------------------------------------------------------
# Kernel B: batched vocab projection, (M, V)-tiled parallel grid
# ---------------------------------------------------------------------------
def vocab_proj_kernel(feat_ref, w_ref, b_ref, out_ref):
    out_ref[...] = (jnp.dot(feat_ref[...], w_ref[...],
                            preferred_element_type=jnp.float32)
                    + b_ref[...])


# ---------------------------------------------------------------------------
# Wrapper: embedding gather, padding / gate re-packing, pallas_call plumbing
# ---------------------------------------------------------------------------
def _round_up(x, m):
    return ((x + m - 1) // m) * m


def _nbytes(shape, dtype):
    return int(np.prod(shape)) * jnp.dtype(dtype).itemsize


def _pack_gate_w(w, D, D_pad):
    # (D, 4D) in torch order i,f,g,o  ->  (D_pad, 4*D_pad) in order i,f,o,g
    blocks = [w[:, k * D:(k + 1) * D] for k in range(4)]       # i, f, g, o
    order = (0, 1, 3, 2)                                       # i, f, o, g
    return jnp.concatenate(
        [jnp.pad(blocks[k], ((0, D_pad - D), (0, D_pad - D))) for k in order],
        axis=1)


def _pack_gate_b(b, D, D_pad):
    blocks = [b[:, k * D:(k + 1) * D] for k in range(4)]
    order = (0, 1, 3, 2)
    return jnp.concatenate(
        [jnp.pad(blocks[k], ((0, 0), (0, D_pad - D))) for k in order], axis=1)


def seq2seq_forward(params, encode_input, decode_input):
    emb = params['embedding']                        # (V, D)
    enc_embeds = emb[encode_input]                   # (B, S_enc, D) — gather is glue
    dec_embeds = emb[decode_input]                   # (B, T_dec, D)
    B, S_enc, D = enc_embeds.shape
    T_dec = dec_embeds.shape[1]
    V = params['b_proj'].shape[-1]

    B_pad = _round_up(B, 8)
    D_pad = _round_up(D, 128)
    V_pad = _round_up(V, 128)

    # ---- padded, time-major encoder inputs flattened over (time, batch); bf16 MXU operand
    enc_x = jnp.transpose(enc_embeds, (1, 0, 2))     # (S_enc, B, D)
    enc_x = jnp.pad(enc_x, ((0, 0), (0, B_pad - B), (0, D_pad - D)))
    enc_x2d = enc_x.reshape(S_enc * B_pad, D_pad).astype(jnp.bfloat16)
    dec_x0 = jnp.pad(dec_embeds[:, 0, :], ((0, B_pad - B), (0, D_pad - D)))

    # ---- lane-aligned (i|f|o|g) padded LSTM weights
    wih_e = _pack_gate_w(params['wih_e'], D, D_pad).astype(jnp.bfloat16)  # hoisted matmul
    whh_e = _pack_gate_w(params['whh_e'], D, D_pad)                       # f32 recurrent
    b_e = _pack_gate_b(params['b_e'], D, D_pad)
    wih_dp = _pack_gate_w(params['wih_d'], D, D_pad)
    whh_dp = _pack_gate_w(params['whh_d'], D, D_pad)
    b_d = _pack_gate_b(params['b_d'], D, D_pad)
    w_dec0 = jnp.concatenate([wih_dp, whh_dp], axis=0)  # (2*D_pad, 4*D_pad), t == 0 only
    w_sum = wih_dp + whh_dp                             # (D_pad, 4*D_pad), t >= 1 (x == h)

    # ---- padded vocab projection: feat=[h, attn] @ [[Wl],[Wa]] + b (bf16 weight stream)
    wp_full = jnp.concatenate([
        jnp.pad(params['wp_lstm'], ((0, D_pad - D), (0, V_pad - V))),
        jnp.pad(params['wp_attn'], ((0, D_pad - D), (0, V_pad - V)))],
        axis=0).astype(jnp.bfloat16)
    b_proj = jnp.pad(params['b_proj'], ((0, 0), (0, V_pad - V)))

    # ---- Kernel A: recurrence ------------------------------------------------
    feat_shape = (T_dec, B_pad, 2 * D_pad)
    gx_shape = (S_enc * B_pad, 4 * D_pad)
    enc_bt_shape = (B_pad, S_enc, D_pad)
    need_a = (_nbytes(enc_x2d.shape, jnp.bfloat16) + _nbytes(dec_x0.shape, jnp.float32)
              + _nbytes(wih_e.shape, jnp.bfloat16) + _nbytes(whh_e.shape, jnp.float32)
              + _nbytes(b_e.shape, jnp.float32) + _nbytes(w_dec0.shape, jnp.float32)
              + _nbytes(w_sum.shape, jnp.float32) + _nbytes(b_d.shape, jnp.float32)
              + _nbytes(feat_shape, jnp.bfloat16) + _nbytes(gx_shape, jnp.float32)
              + _nbytes(enc_bt_shape, jnp.bfloat16))
    # Shape-adaptive VMEM cap: plenty of headroom, but bounded (v5e/v6e have 128 MiB,
    # v7x only 64 MiB physical — at these small shapes this resolves to 32 MiB).
    vmem_a = max(32 << 20, min(int(1.5 * need_a) + (4 << 20), 100 << 20))

    kernel = functools.partial(seq2seq_rnn_kernel,
                               D=D_pad, S_enc=S_enc, T_dec=T_dec, B=B_pad)
    vmem = pl.BlockSpec(memory_space=pltpu.MemorySpace.VMEM)
    feat = pl.pallas_call(
        kernel,
        out_shape=jax.ShapeDtypeStruct(feat_shape, jnp.bfloat16),
        in_specs=[vmem] * 8,
        out_specs=vmem,
        scratch_shapes=[
            pltpu.VMEM(gx_shape, jnp.float32),        # hoisted encoder gate pre-activations
            pltpu.VMEM(enc_bt_shape, jnp.bfloat16),   # encoder outputs, batch-major, bf16
        ],
        compiler_params=pltpu.CompilerParams(vmem_limit_bytes=vmem_a),
    )(enc_x2d, dec_x0, wih_e, whh_e, b_e, w_dec0, w_sum, b_d)

    # ---- Kernel B: batched, (M, V)-tiled vocab projection ---------------------
    M = T_dec * B_pad
    feat2d = feat.reshape(M, 2 * D_pad)               # bf16 features
    TV = 512 if V_pad % 512 == 0 else (256 if V_pad % 256 == 0 else 128)
    TM = M if M <= 512 else (256 if M % 256 == 0 else (128 if M % 128 == 0 else M))

    def _wp_spec():
        # Deeper weight pipeline hides the HBM weight stream when M is small.
        buffered = getattr(pl, "Buffered", None)
        if buffered is not None:
            try:
                return pl.BlockSpec((2 * D_pad, TV), lambda i, j: (0, j),
                                    pipeline_mode=buffered(3))
            except TypeError:
                pass
        return pl.BlockSpec((2 * D_pad, TV), lambda i, j: (0, j))

    logits2d = pl.pallas_call(
        vocab_proj_kernel,
        out_shape=jax.ShapeDtypeStruct((M, V_pad), jnp.float32),
        grid=(M // TM, V_pad // TV),
        in_specs=[
            pl.BlockSpec((TM, 2 * D_pad), lambda i, j: (i, 0)),
            _wp_spec(),
            pl.BlockSpec((1, TV), lambda i, j: (0, j)),
        ],
        out_specs=pl.BlockSpec((TM, TV), lambda i, j: (i, j)),
        compiler_params=pltpu.CompilerParams(
            dimension_semantics=("parallel", "parallel"),
            vmem_limit_bytes=32 * 1024 * 1024),
        cost_estimate=pl.CostEstimate(
            flops=2 * M * (2 * D_pad) * V_pad,
            transcendentals=0,
            bytes_accessed=(2 * M * 2 * D_pad + 2 * (2 * D_pad) * V_pad
                            + 4 * V_pad + 4 * M * V_pad)),
    )(feat2d, wp_full, b_proj)

    logits = logits2d.reshape(T_dec, B_pad, V_pad)
    logits = jnp.transpose(logits, (1, 0, 2))[:B, :, :V]   # (B, T_dec, V)
    return logits


# ---------------------------------------------------------------------------
# Deterministic synthetic parameters (PyTorch-style gate order i,f,g,o)
# ---------------------------------------------------------------------------
def init_params(key, vocab_size, D):
    ks = jax.random.split(key, 11)
    s = 1.0 / np.sqrt(D)

    def u(k, shape):
        return jax.random.uniform(k, shape, jnp.float32, -s, s)

    return {
        'embedding': jax.random.normal(ks[0], (vocab_size, D), jnp.float32),
        # encoder LSTM (weights stored pre-transposed: x @ W)
        'wih_e': u(ks[1], (D, 4 * D)),
        'whh_e': u(ks[2], (D, 4 * D)),
        'b_e':   u(ks[3], (1, 4 * D)),        # combined b_ih + b_hh
        # decoder LSTM
        'wih_d': u(ks[4], (D, 4 * D)),
        'whh_d': u(ks[5], (D, 4 * D)),
        'b_d':   u(ks[6], (1, 4 * D)),
        # vocab projection Linear(2D, V) split into halves
        'wp_lstm': u(ks[7], (D, vocab_size)),
        'wp_attn': u(ks[8], (D, vocab_size)),
        'b_proj':  u(ks[9], (1, vocab_size)),
    }


# ---------------------------------------------------------------------------
# Pure-numpy reference (same math, batch_first layout, torch gate order)
# ---------------------------------------------------------------------------
def _sig(x):
    return 1.0 / (1.0 + np.exp(-x))


def seq2seq_ref(params, encode_input, decode_input):
    p = {k: np.asarray(v, np.float32) for k, v in params.items()}
    emb = p['embedding']
    enc_e = emb[encode_input]
    dec_e = emb[decode_input]
    B, S, D = enc_e.shape
    T = dec_e.shape[1]
    V = p['b_proj'].shape[-1]

    def cell(x, h, c, wih, whh, b):
        g = x @ wih + h @ whh + b
        i = _sig(g[:, :D]); f = _sig(g[:, D:2 * D])
        gg = np.tanh(g[:, 2 * D:3 * D]); o = _sig(g[:, 3 * D:])
        c = f * c + i * gg
        h = o * np.tanh(c)
        return h, c

    h = np.zeros((B, D), np.float32)
    c = np.zeros((B, D), np.float32)
    enc_out = np.zeros((B, S, D), np.float32)
    for t in range(S):
        h, c = cell(enc_e[:, t], h, c, p['wih_e'], p['whh_e'], p['b_e'])
        enc_out[:, t] = h

    x = dec_e[:, 0]
    logits = np.zeros((B, T, V), np.float32)
    for t in range(T):
        h, c = cell(x, h, c, p['wih_d'], p['whh_d'], p['b_d'])
        scores = np.einsum('bd,bsd->bs', h, enc_out)
        scores -= scores.max(-1, keepdims=True)
        w = np.exp(scores)
        w /= w.sum(-1, keepdims=True)
        attn = np.einsum('bs,bsd->bd', w, enc_out)
        logits[:, t] = h @ p['wp_lstm'] + attn @ p['wp_attn'] + p['b_proj']
        x = h
    return logits


# ---------------------------------------------------------------------------
if __name__ == "__main__":
    key = jax.random.PRNGKey(0)
    vocab_size, D = 64, 32
    B, S_enc, T_dec = 2, 8, 8

    kp, ke, kd = jax.random.split(key, 3)
    params = init_params(kp, vocab_size, D)
    encode_input = jax.random.randint(ke, (B, S_enc), 0, vocab_size)
    decode_input = jax.random.randint(kd, (B, T_dec), 0, vocab_size)

    out = jax.block_until_ready(seq2seq_forward(params, encode_input, decode_input))

    ref = seq2seq_ref(params, np.asarray(encode_input), np.asarray(decode_input))
    np.testing.assert_allclose(np.asarray(out), ref, rtol=1e-2, atol=1e-2)

    print("KERNEL_OK")
</pallas_src>

<mosaic_0001>
module attributes {stable_mosaic.version = 11 : i64} {
  func.func @seq2seq_rnn_kernel(%arg0: memref<64x128xbf16, #tpu.memory_space<vmem>>, %arg1: memref<8x128xf32, #tpu.memory_space<vmem>>, %arg2: memref<128x512xbf16, #tpu.memory_space<vmem>>, %arg3: memref<128x512xf32, #tpu.memory_space<vmem>>, %arg4: memref<1x512xf32, #tpu.memory_space<vmem>>, %arg5: memref<256x512xf32, #tpu.memory_space<vmem>>, %arg6: memref<128x512xf32, #tpu.memory_space<vmem>>, %arg7: memref<1x512xf32, #tpu.memory_space<vmem>>, %arg8: memref<8x8x256xbf16, #tpu.memory_space<vmem>>, %arg9: memref<64x512xf32, #tpu.memory_space<vmem>>, %arg10: memref<8x8x128xbf16, #tpu.memory_space<vmem>>) attributes {dimension_semantics = [], scalar_prefetch = 0 : i64, scratch_operands = 2 : i64, tpu.core_type = #tpu.core_type<tc>} {
    %c0 = arith.constant 0 : index
    %c0_0 = arith.constant 0 : index
    %0 = vector.load %arg0[%c0, %c0_0] : memref<64x128xbf16, #tpu.memory_space<vmem>>, vector<64x128xbf16>
    %c0_1 = arith.constant 0 : index
    %c0_2 = arith.constant 0 : index
    %1 = vector.load %arg2[%c0_1, %c0_2] : memref<128x512xbf16, #tpu.memory_space<vmem>>, vector<128x512xbf16>
    %cst = arith.constant dense<0.000000e+00> : vector<64x512xf32>
    %2 = tpu.matmul %0, %1, %cst {dimension_numbers = #tpu.dot_dimension_numbers<[1], [0], [0], [1], [0, 0, 1, 1], [], []>} : vector<64x128xbf16>, vector<128x512xbf16>, vector<64x512xf32> -> vector<64x512xf32>
    %c0_3 = arith.constant 0 : index
    %c0_4 = arith.constant 0 : index
    %3 = vector.load %arg4[%c0_3, %c0_4] : memref<1x512xf32, #tpu.memory_space<vmem>>, vector<1x512xf32>
    %4 = vector.broadcast %3 : vector<1x512xf32> to vector<64x512xf32>
    %5 = arith.addf %2, %4 : vector<64x512xf32>
    %c0_5 = arith.constant 0 : index
    %c0_6 = arith.constant 0 : index
    %6 = vector.load %arg9[%c0_5, %c0_6] : memref<64x512xf32, #tpu.memory_space<vmem>>, vector<64x512xf32>
    tpu.vector_store %arg9[%c0_5, %c0_6], %5 {strides = array<i32>} : memref<64x512xf32, #tpu.memory_space<vmem>>, vector<64x512xf32>,
    %cst_7 = arith.constant 0.000000e+00 : f32
    %7 = vector.broadcast %cst_7 : f32 to vector<8x128xf32>
    %cst_8 = arith.constant 0.000000e+00 : f32
    %8 = vector.broadcast %cst_8 : f32 to vector<8x128xf32>
    %c0_9 = arith.constant 0 : index
    %c0_10 = arith.constant 0 : index
    %9 = vector.load %arg9[%c0_9, %c0_10] : memref<64x512xf32, #tpu.memory_space<vmem>>, vector<8x512xf32>
    %c0_11 = arith.constant 0 : index
    %c0_12 = arith.constant 0 : index
    %10 = vector.load %arg3[%c0_11, %c0_12] : memref<128x512xf32, #tpu.memory_space<vmem>>, vector<128x512xf32>
    %cst_13 = arith.constant dense<0.000000e+00> : vector<8x512xf32>
    %11 = tpu.matmul %7, %10, %cst_13 {dimension_numbers = #tpu.dot_dimension_numbers<[1], [0], [0], [1], [0, 0, 1, 1], [], []>} : vector<8x128xf32>, vector<128x512xf32>, vector<8x512xf32> -> vector<8x512xf32>
    %12 = arith.addf %9, %11 : vector<8x512xf32>
    %13 = vector.extract_strided_slice %12 {offsets = [0, 0], sizes = [8, 384], strides = [1, 1]} : vector<8x512xf32> to vector<8x384xf32>
    %14 = arith.negf %13 : vector<8x384xf32>
    %15 = math.exp %14 : vector<8x384xf32>
    %cst_14 = arith.constant 1.000000e+00 : f32
    %16 = vector.broadcast %cst_14 : f32 to vector<8x384xf32>
    %17 = arith.addf %16, %15 : vector<8x384xf32>
    %18 = arith.divf %16, %17 : vector<8x384xf32>
    %19 = vector.extract_strided_slice %12 {offsets = [0, 384], sizes = [8, 128], strides = [1, 1]} : vector<8x512xf32> to vector<8x128xf32>
    %20 = math.tanh %19 : vector<8x128xf32>
    %21 = vector.extract_strided_slice %18 {offsets = [0, 128], sizes = [8, 128], strides = [1, 1]} : vector<8x384xf32> to vector<8x128xf32>
    %22 = arith.mulf %21, %8 : vector<8x128xf32>
    %23 = vector.extract_strided_slice %18 {offsets = [0, 0], sizes = [8, 128], strides = [1, 1]} : vector<8x384xf32> to vector<8x128xf32>
    %24 = arith.mulf %23, %20 : vector<8x128xf32>
    %25 = arith.addf %22, %24 : vector<8x128xf32>
    %26 = vector.extract_strided_slice %18 {offsets = [0, 256], sizes = [8, 128], strides = [1, 1]} : vector<8x384xf32> to vector<8x128xf32>
    %27 = math.tanh %25 : vector<8x128xf32>
    %28 = arith.mulf %26, %27 : vector<8x128xf32>
    %29 = arith.truncf %28 : vector<8x128xf32> to vector<8x128xbf16>
    %c0_15 = arith.constant 0 : index
    %c0_16 = arith.constant 0 : index
    %c0_17 = arith.constant 0 : index
    %30 = vector.load %arg10[%c0_15, %c0_16, %c0_17] : memref<8x8x128xbf16, #tpu.memory_space<vmem>>, vector<8x1x128xbf16>
    %31 = vector.shape_cast %30 : vector<8x1x128xbf16> to vector<8x128xbf16>
    %32 = vector.shape_cast %29 : vector<8x128xbf16> to vector<8x1x128xbf16>
    tpu.vector_store %arg10[%c0_15, %c0_16, %c0_17], %32 {strides = array<i32>} : memref<8x8x128xbf16, #tpu.memory_space<vmem>>, vector<8x1x128xbf16>,
    %c8 = arith.constant 8 : index
    %c0_18 = arith.constant 0 : index
    %33 = vector.load %arg9[%c8, %c0_18] : memref<64x512xf32, #tpu.memory_space<vmem>>, vector<8x512xf32>
    %c0_19 = arith.constant 0 : index
    %c0_20 = arith.constant 0 : index
    %34 = vector.load %arg3[%c0_19, %c0_20] : memref<128x512xf32, #tpu.memory_space<vmem>>, vector<128x512xf32>
    %cst_21 = arith.constant dense<0.000000e+00> : vector<8x512xf32>
    %35 = tpu.matmul %28, %34, %cst_21 {dimension_numbers = #tpu.dot_dimension_numbers<[1], [0], [0], [1], [0, 0, 1, 1], [], []>} : vector<8x128xf32>, vector<128x512xf32>, vector<8x512xf32> -> vector<8x512xf32>
    %36 = arith.addf %33, %35 : vector<8x512xf32>
    %37 = vector.extract_strided_slice %36 {offsets = [0, 0], sizes = [8, 384], strides = [1, 1]} : vector<8x512xf32> to vector<8x384xf32>
    %38 = arith.negf %37 : vector<8x384xf32>
    %39 = math.exp %38 : vector<8x384xf32>
    %cst_22 = arith.constant 1.000000e+00 : f32
    %40 = vector.broadcast %cst_22 : f32 to vector<8x384xf32>
    %41 = arith.addf %40, %39 : vector<8x384xf32>
    %42 = arith.divf %40, %41 : vector<8x384xf32>
    %43 = vector.extract_strided_slice %36 {offsets = [0, 384], sizes = [8, 128], strides = [1, 1]} : vector<8x512xf32> to vector<8x128xf32>
    %44 = math.tanh %43 : vector<8x128xf32>
    %45 = vector.extract_strided_slice %42 {offsets = [0, 128], sizes = [8, 128], strides = [1, 1]} : vector<8x384xf32> to vector<8x128xf32>
    %46 = arith.mulf %45, %25 : vector<8x128xf32>
    %47 = vector.extract_strided_slice %42 {offsets = [0, 0], sizes = [8, 128], strides = [1, 1]} : vector<8x384xf32> to vector<8x128xf32>
    %48 = arith.mulf %47, %44 : vector<8x128xf32>
    %49 = arith.addf %46, %48 : vector<8x128xf32>
    %50 = vector.extract_strided_slice %42 {offsets = [0, 256], sizes = [8, 128], strides = [1, 1]} : vector<8x384xf32> to vector<8x128xf32>
    %51 = math.tanh %49 : vector<8x128xf32>
    %52 = arith.mulf %50, %51 : vector<8x128xf32>
    %53 = arith.truncf %52 : vector<8x128xf32> to vector<8x128xbf16>
    %c0_23 = arith.constant 0 : index
    %c1 = arith.constant 1 : index
    %c0_24 = arith.constant 0 : index
    %54 = vector.load %arg10[%c0_23, %c1, %c0_24] : memref<8x8x128xbf16, #tpu.memory_space<vmem>>, vector<8x1x128xbf16>
    %55 = vector.shape_cast %54 : vector<8x1x128xbf16> to vector<8x128xbf16>
    %56 = vector.shape_cast %53 : vector<8x128xbf16> to vector<8x1x128xbf16>
    tpu.vector_store %arg10[%c0_23, %c1, %c0_24], %56 {strides = array<i32>} : memref<8x8x128xbf16, #tpu.memory_space<vmem>>, vector<8x1x128xbf16>,
    %c16 = arith.constant 16 : index
    %c0_25 = arith.constant 0 : index
    %57 = vector.load %arg9[%c16, %c0_25] : memref<64x512xf32, #tpu.memory_space<vmem>>, vector<8x512xf32>
    %c0_26 = arith.constant 0 : index
    %c0_27 = arith.constant 0 : index
    %58 = vector.load %arg3[%c0_26, %c0_27] : memref<128x512xf32, #tpu.memory_space<vmem>>, vector<128x512xf32>
    %cst_28 = arith.constant dense<0.000000e+00> : vector<8x512xf32>
    %59 = tpu.matmul %52, %58, %cst_28 {dimension_numbers = #tpu.dot_dimension_numbers<[1], [0], [0], [1], [0, 0, 1, 1], [], []>} : vector<8x128xf32>, vector<128x512xf32>, vector<8x512xf32> -> vector<8x512xf32>
    %60 = arith.addf %57, %59 : vector<8x512xf32>
    %61 = vector.extract_strided_slice %60 {offsets = [0, 0], sizes = [8, 384], strides = [1, 1]} : vector<8x512xf32> to vector<8x384xf32>
    %62 = arith.negf %61 : vector<8x384xf32>
    %63 = math.exp %62 : vector<8x384xf32>
    %cst_29 = arith.constant 1.000000e+00 : f32
    %64 = vector.broadcast %cst_29 : f32 to vector<8x384xf32>
    %65 = arith.addf %64, %63 : vector<8x384xf32>
    %66 = arith.divf %64, %65 : vector<8x384xf32>
    %67 = vector.extract_strided_slice %60 {offsets = [0, 384], sizes = [8, 128], strides = [1, 1]} : vector<8x512xf32> to vector<8x128xf32>
    %68 = math.tanh %67 : vector<8x128xf32>
    %69 = vector.extract_strided_slice %66 {offsets = [0, 128], sizes = [8, 128], strides = [1, 1]} : vector<8x384xf32> to vector<8x128xf32>
    %70 = arith.mulf %69, %49 : vector<8x128xf32>
    %71 = vector.extract_strided_slice %66 {offsets = [0, 0], sizes = [8, 128], strides = [1, 1]} : vector<8x384xf32> to vector<8x128xf32>
    %72 = arith.mulf %71, %68 : vector<8x128xf32>
    %73 = arith.addf %70, %72 : vector<8x128xf32>
    %74 = vector.extract_strided_slice %66 {offsets = [0, 256], sizes = [8, 128], strides = [1, 1]} : vector<8x384xf32> to vector<8x128xf32>
    %75 = math.tanh %73 : vector<8x128xf32>
    %76 = arith.mulf %74, %75 : vector<8x128xf32>
    %77 = arith.truncf %76 : vector<8x128xf32> to vector<8x128xbf16>
    %c0_30 = arith.constant 0 : index
    %c2 = arith.constant 2 : index
    %c0_31 = arith.constant 0 : index
    %78 = vector.load %arg10[%c0_30, %c2, %c0_31] : memref<8x8x128xbf16, #tpu.memory_space<vmem>>, vector<8x1x128xbf16>
    %79 = vector.shape_cast %78 : vector<8x1x128xbf16> to vector<8x128xbf16>
    %80 = vector.shape_cast %77 : vector<8x128xbf16> to vector<8x1x128xbf16>
    tpu.vector_store %arg10[%c0_30, %c2, %c0_31], %80 {strides = array<i32>} : memref<8x8x128xbf16, #tpu.memory_space<vmem>>, vector<8x1x128xbf16>,
    %c24 = arith.constant 24 : index
    %c0_32 = arith.constant 0 : index
    %81 = vector.load %arg9[%c24, %c0_32] : memref<64x512xf32, #tpu.memory_space<vmem>>, vector<8x512xf32>
    %c0_33 = arith.constant 0 : index
    %c0_34 = arith.constant 0 : index
    %82 = vector.load %arg3[%c0_33, %c0_34] : memref<128x512xf32, #tpu.memory_space<vmem>>, vector<128x512xf32>
    %cst_35 = arith.constant dense<0.000000e+00> : vector<8x512xf32>
    %83 = tpu.matmul %76, %82, %cst_35 {dimension_numbers = #tpu.dot_dimension_numbers<[1], [0], [0], [1], [0, 0, 1, 1], [], []>} : vector<8x128xf32>, vector<128x512xf32>, vector<8x512xf32> -> vector<8x512xf32>
    %84 = arith.addf %81, %83 : vector<8x512xf32>
    %85 = vector.extract_strided_slice %84 {offsets = [0, 0], sizes = [8, 384], strides = [1, 1]} : vector<8x512xf32> to vector<8x384xf32>
    %86 = arith.negf %85 : vector<8x384xf32>
    %87 = math.exp %86 : vector<8x384xf32>
    %cst_36 = arith.constant 1.000000e+00 : f32
    %88 = vector.broadcast %cst_36 : f32 to vector<8x384xf32>
    %89 = arith.addf %88, %87 : vector<8x384xf32>
    %90 = arith.divf %88, %89 : vector<8x384xf32>
    %91 = vector.extract_strided_slice %84 {offsets = [0, 384], sizes = [8, 128], strides = [1, 1]} : vector<8x512xf32> to vector<8x128xf32>
    %92 = math.tanh %91 : vector<8x128xf32>
    %93 = vector.extract_strided_slice %90 {offsets = [0, 128], sizes = [8, 128], strides = [1, 1]} : vector<8x384xf32> to vector<8x128xf32>
    %94 = arith.mulf %93, %73 : vector<8x128xf32>
    %95 = vector.extract_strided_slice %90 {offsets = [0, 0], sizes = [8, 128], strides = [1, 1]} : vector<8x384xf32> to vector<8x128xf32>
    %96 = arith.mulf %95, %92 : vector<8x128xf32>
    %97 = arith.addf %94, %96 : vector<8x128xf32>
    %98 = vector.extract_strided_slice %90 {offsets = [0, 256], sizes = [8, 128], strides = [1, 1]} : vector<8x384xf32> to vector<8x128xf32>
    %99 = math.tanh %97 : vector<8x128xf32>
    %100 = arith.mulf %98, %99 : vector<8x128xf32>
    %101 = arith.truncf %100 : vector<8x128xf32> to vector<8x128xbf16>
    %c0_37 = arith.constant 0 : index
    %c3 = arith.constant 3 : index
    %c0_38 = arith.constant 0 : index
    %102 = vector.load %arg10[%c0_37, %c3, %c0_38] : memref<8x8x128xbf16, #tpu.memory_space<vmem>>, vector<8x1x128xbf16>
    %103 = vector.shape_cast %102 : vector<8x1x128xbf16> to vector<8x128xbf16>
    %104 = vector.shape_cast %101 : vector<8x128xbf16> to vector<8x1x128xbf16>
    tpu.vector_store %arg10[%c0_37, %c3, %c0_38], %104 {strides = array<i32>} : memref<8x8x128xbf16, #tpu.memory_space<vmem>>, vector<8x1x128xbf16>,
    %c32 = arith.constant 32 : index
    %c0_39 = arith.constant 0 : index
    %105 = vector.load %arg9[%c32, %c0_39] : memref<64x512xf32, #tpu.memory_space<vmem>>, vector<8x512xf32>
    %c0_40 = arith.constant 0 : index
    %c0_41 = arith.constant 0 : index
    %106 = vector.load %arg3[%c0_40, %c0_41] : memref<128x512xf32, #tpu.memory_space<vmem>>, vector<128x512xf32>
    %cst_42 = arith.constant dense<0.000000e+00> : vector<8x512xf32>
    %107 = tpu.matmul %100, %106, %cst_42 {dimension_numbers = #tpu.dot_dimension_numbers<[1], [0], [0], [1], [0, 0, 1, 1], [], []>} : vector<8x128xf32>, vector<128x512xf32>, vector<8x512xf32> -> vector<8x512xf32>
    %108 = arith.addf %105, %107 : vector<8x512xf32>
    %109 = vector.extract_strided_slice %108 {offsets = [0, 0], sizes = [8, 384], strides = [1, 1]} : vector<8x512xf32> to vector<8x384xf32>
    %110 = arith.negf %109 : vector<8x384xf32>
    %111 = math.exp %110 : vector<8x384xf32>
    %cst_43 = arith.constant 1.000000e+00 : f32
    %112 = vector.broadcast %cst_43 : f32 to vector<8x384xf32>
    %113 = arith.addf %112, %111 : vector<8x384xf32>
    %114 = arith.divf %112, %113 : vector<8x384xf32>
    %115 = vector.extract_strided_slice %108 {offsets = [0, 384], sizes = [8, 128], strides = [1, 1]} : vector<8x512xf32> to vector<8x128xf32>
    %116 = math.tanh %115 : vector<8x128xf32>
    %117 = vector.extract_strided_slice %114 {offsets = [0, 128], sizes = [8, 128], strides = [1, 1]} : vector<8x384xf32> to vector<8x128xf32>
    %118 = arith.mulf %117, %97 : vector<8x128xf32>
    %119 = vector.extract_strided_slice %114 {offsets = [0, 0], sizes = [8, 128], strides = [1, 1]} : vector<8x384xf32> to vector<8x128xf32>
    %120 = arith.mulf %119, %116 : vector<8x128xf32>
    %121 = arith.addf %118, %120 : vector<8x128xf32>
    %122 = vector.extract_strided_slice %114 {offsets = [0, 256], sizes = [8, 128], strides = [1, 1]} : vector<8x384xf32> to vector<8x128xf32>
    %123 = math.tanh %121 : vector<8x128xf32>
    %124 = arith.mulf %122, %123 : vector<8x128xf32>
    %125 = arith.truncf %124 : vector<8x128xf32> to vector<8x128xbf16>
    %c0_44 = arith.constant 0 : index
    %c4 = arith.constant 4 : index
    %c0_45 = arith.constant 0 : index
    %126 = vector.load %arg10[%c0_44, %c4, %c0_45] : memref<8x8x128xbf16, #tpu.memory_space<vmem>>, vector<8x1x128xbf16>
    %127 = vector.shape_cast %126 : vector<8x1x128xbf16> to vector<8x128xbf16>
    %128 = vector.shape_cast %125 : vector<8x128xbf16> to vector<8x1x128xbf16>
    tpu.vector_store %arg10[%c0_44, %c4, %c0_45], %128 {strides = array<i32>} : memref<8x8x128xbf16, #tpu.memory_space<vmem>>, vector<8x1x128xbf16>,
    %c40 = arith.constant 40 : index
    %c0_46 = arith.constant 0 : index
    %129 = vector.load %arg9[%c40, %c0_46] : memref<64x512xf32, #tpu.memory_space<vmem>>, vector<8x512xf32>
    %c0_47 = arith.constant 0 : index
    %c0_48 = arith.constant 0 : index
    %130 = vector.load %arg3[%c0_47, %c0_48] : memref<128x512xf32, #tpu.memory_space<vmem>>, vector<128x512xf32>
    %cst_49 = arith.constant dense<0.000000e+00> : vector<8x512xf32>
    %131 = tpu.matmul %124, %130, %cst_49 {dimension_numbers = #tpu.dot_dimension_numbers<[1], [0], [0], [1], [0, 0, 1, 1], [], []>} : vector<8x128xf32>, vector<128x512xf32>, vector<8x512xf32> -> vector<8x512xf32>
    %132 = arith.addf %129, %131 : vector<8x512xf32>
    %133 = vector.extract_strided_slice %132 {offsets = [0, 0], sizes = [8, 384], strides = [1, 1]} : vector<8x512xf32> to vector<8x384xf32>
    %134 = arith.negf %133 : vector<8x384xf32>
    %135 = math.exp %134 : vector<8x384xf32>
    %cst_50 = arith.constant 1.000000e+00 : f32
    %136 = vector.broadcast %cst_50 : f32 to vector<8x384xf32>
    %137 = arith.addf %136, %135 : vector<8x384xf32>
    %138 = arith.divf %136, %137 : vector<8x384xf32>
    %139 = vector.extract_strided_slice %132 {offsets = [0, 384], sizes = [8, 128], strides = [1, 1]} : vector<8x512xf32> to vector<8x128xf32>
    %140 = math.tanh %139 : vector<8x128xf32>
    %141 = vector.extract_strided_slice %138 {offsets = [0, 128], sizes = [8, 128], strides = [1, 1]} : vector<8x384xf32> to vector<8x128xf32>
    %142 = arith.mulf %141, %121 : vector<8x128xf32>
    %143 = vector.extract_strided_slice %138 {offsets = [0, 0], sizes = [8, 128], strides = [1, 1]} : vector<8x384xf32> to vector<8x128xf32>
    %144 = arith.mulf %143, %140 : vector<8x128xf32>
    %145 = arith.addf %142, %144 : vector<8x128xf32>
    %146 = vector.extract_strided_slice %138 {offsets = [0, 256], sizes = [8, 128], strides = [1, 1]} : vector<8x384xf32> to vector<8x128xf32>
    %147 = math.tanh %145 : vector<8x128xf32>
    %148 = arith.mulf %146, %147 : vector<8x128xf32>
    %149 = arith.truncf %148 : vector<8x128xf32> to vector<8x128xbf16>
    %c0_51 = arith.constant 0 : index
    %c5 = arith.constant 5 : index
    %c0_52 = arith.constant 0 : index
    %150 = vector.load %arg10[%c0_51, %c5, %c0_52] : memref<8x8x128xbf16, #tpu.memory_space<vmem>>, vector<8x1x128xbf16>
    %151 = vector.shape_cast %150 : vector<8x1x128xbf16> to vector<8x128xbf16>
    %152 = vector.shape_cast %149 : vector<8x128xbf16> to vector<8x1x128xbf16>
    tpu.vector_store %arg10[%c0_51, %c5, %c0_52], %152 {strides = array<i32>} : memref<8x8x128xbf16, #tpu.memory_space<vmem>>, vector<8x1x128xbf16>,
    %c48 = arith.constant 48 : index
    %c0_53 = arith.constant 0 : index
    %153 = vector.load %arg9[%c48, %c0_53] : memref<64x512xf32, #tpu.memory_space<vmem>>, vector<8x512xf32>
    %c0_54 = arith.constant 0 : index
    %c0_55 = arith.constant 0 : index
    %154 = vector.load %arg3[%c0_54, %c0_55] : memref<128x512xf32, #tpu.memory_space<vmem>>, vector<128x512xf32>
    %cst_56 = arith.constant dense<0.000000e+00> : vector<8x512xf32>
    %155 = tpu.matmul %148, %154, %cst_56 {dimension_numbers = #tpu.dot_dimension_numbers<[1], [0], [0], [1], [0, 0, 1, 1], [], []>} : vector<8x128xf32>, vector<128x512xf32>, vector<8x512xf32> -> vector<8x512xf32>
    %156 = arith.addf %153, %155 : vector<8x512xf32>
    %157 = vector.extract_strided_slice %156 {offsets = [0, 0], sizes = [8, 384], strides = [1, 1]} : vector<8x512xf32> to vector<8x384xf32>
    %158 = arith.negf %157 : vector<8x384xf32>
    %159 = math.exp %158 : vector<8x384xf32>
    %cst_57 = arith.constant 1.000000e+00 : f32
    %160 = vector.broadcast %cst_57 : f32 to vector<8x384xf32>
    %161 = arith.addf %160, %159 : vector<8x384xf32>
    %162 = arith.divf %160, %161 : vector<8x384xf32>
    %163 = vector.extract_strided_slice %156 {offsets = [0, 384], sizes = [8, 128], strides = [1, 1]} : vector<8x512xf32> to vector<8x128xf32>
    %164 = math.tanh %163 : vector<8x128xf32>
    %165 = vector.extract_strided_slice %162 {offsets = [0, 128], sizes = [8, 128], strides = [1, 1]} : vector<8x384xf32> to vector<8x128xf32>
    %166 = arith.mulf %165, %145 : vector<8x128xf32>
    %167 = vector.extract_strided_slice %162 {offsets = [0, 0], sizes = [8, 128], strides = [1, 1]} : vector<8x384xf32> to vector<8x128xf32>
    %168 = arith.mulf %167, %164 : vector<8x128xf32>
    %169 = arith.addf %166, %168 : vector<8x128xf32>
    %170 = vector.extract_strided_slice %162 {offsets = [0, 256], sizes = [8, 128], strides = [1, 1]} : vector<8x384xf32> to vector<8x128xf32>
    %171 = math.tanh %169 : vector<8x128xf32>
    %172 = arith.mulf %170, %171 : vector<8x128xf32>
    %173 = arith.truncf %172 : vector<8x128xf32> to vector<8x128xbf16>
    %c0_58 = arith.constant 0 : index
    %c6 = arith.constant 6 : index
    %c0_59 = arith.constant 0 : index
    %174 = vector.load %arg10[%c0_58, %c6, %c0_59] : memref<8x8x128xbf16, #tpu.memory_space<vmem>>, vector<8x1x128xbf16>
    %175 = vector.shape_cast %174 : vector<8x1x128xbf16> to vector<8x128xbf16>
    %176 = vector.shape_cast %173 : vector<8x128xbf16> to vector<8x1x128xbf16>
    tpu.vector_store %arg10[%c0_58, %c6, %c0_59], %176 {strides = array<i32>} : memref<8x8x128xbf16, #tpu.memory_space<vmem>>, vector<8x1x128xbf16>,
    %c56 = arith.constant 56 : index
    %c0_60 = arith.constant 0 : index
    %177 = vector.load %arg9[%c56, %c0_60] : memref<64x512xf32, #tpu.memory_space<vmem>>, vector<8x512xf32>
    %c0_61 = arith.constant 0 : index
    %c0_62 = arith.constant 0 : index
    %178 = vector.load %arg3[%c0_61, %c0_62] : memref<128x512xf32, #tpu.memory_space<vmem>>, vector<128x512xf32>
    %cst_63 = arith.constant dense<0.000000e+00> : vector<8x512xf32>
    %179 = tpu.matmul %172, %178, %cst_63 {dimension_numbers = #tpu.dot_dimension_numbers<[1], [0], [0], [1], [0, 0, 1, 1], [], []>} : vector<8x128xf32>, vector<128x512xf32>, vector<8x512xf32> -> vector<8x512xf32>
    %180 = arith.addf %177, %179 : vector<8x512xf32>
    %181 = vector.extract_strided_slice %180 {offsets = [0, 0], sizes = [8, 384], strides = [1, 1]} : vector<8x512xf32> to vector<8x384xf32>
    %182 = arith.negf %181 : vector<8x384xf32>
    %183 = math.exp %182 : vector<8x384xf32>
    %cst_64 = arith.constant 1.000000e+00 : f32
    %184 = vector.broadcast %cst_64 : f32 to vector<8x384xf32>
    %185 = arith.addf %184, %183 : vector<8x384xf32>
    %186 = arith.divf %184, %185 : vector<8x384xf32>
    %187 = vector.extract_strided_slice %180 {offsets = [0, 384], sizes = [8, 128], strides = [1, 1]} : vector<8x512xf32> to vector<8x128xf32>
    %188 = math.tanh %187 : vector<8x128xf32>
    %189 = vector.extract_strided_slice %186 {offsets = [0, 128], sizes = [8, 128], strides = [1, 1]} : vector<8x384xf32> to vector<8x128xf32>
    %190 = arith.mulf %189, %169 : vector<8x128xf32>
    %191 = vector.extract_strided_slice %186 {offsets = [0, 0], sizes = [8, 128], strides = [1, 1]} : vector<8x384xf32> to vector<8x128xf32>
    %192 = arith.mulf %191, %188 : vector<8x128xf32>
    %193 = arith.addf %190, %192 : vector<8x128xf32>
    %194 = vector.extract_strided_slice %186 {offsets = [0, 256], sizes = [8, 128], strides = [1, 1]} : vector<8x384xf32> to vector<8x128xf32>
    %195 = math.tanh %193 : vector<8x128xf32>
    %196 = arith.mulf %194, %195 : vector<8x128xf32>
    %197 = arith.truncf %196 : vector<8x128xf32> to vector<8x128xbf16>
    %c0_65 = arith.constant 0 : index
    %c7 = arith.constant 7 : index
    %c0_66 = arith.constant 0 : index
    %198 = vector.load %arg10[%c0_65, %c7, %c0_66] : memref<8x8x128xbf16, #tpu.memory_space<vmem>>, vector<8x1x128xbf16>
    %199 = vector.shape_cast %198 : vector<8x1x128xbf16> to vector<8x128xbf16>
    %200 = vector.shape_cast %197 : vector<8x128xbf16> to vector<8x1x128xbf16>
    tpu.vector_store %arg10[%c0_65, %c7, %c0_66], %200 {strides = array<i32>} : memref<8x8x128xbf16, #tpu.memory_space<vmem>>, vector<8x1x128xbf16>,
    %c0_67 = arith.constant 0 : index
    %c0_68 = arith.constant 0 : index
    %201 = vector.load %arg7[%c0_67, %c0_68] : memref<1x512xf32, #tpu.memory_space<vmem>>, vector<1x512xf32>
    %202 = vector.shape_cast %201 : vector<1x512xf32> to vector<1x512xf32>
    %203 = vector.broadcast %202 : vector<1x512xf32> to vector<8x512xf32>
    %c0_69 = arith.constant 0 : index
    %c0_70 = arith.constant 0 : index
    %204 = vector.load %arg1[%c0_69, %c0_70] : memref<8x128xf32, #tpu.memory_space<vmem>>, vector<8x128xf32>
    %205 = tpu.concatenate %204, %196 in 1 : vector<8x128xf32>, vector<8x128xf32> -> vector<8x256xf32>
    %c0_71 = arith.constant 0 : index
    %c0_72 = arith.constant 0 : index
    %206 = vector.load %arg5[%c0_71, %c0_72] : memref<256x512xf32, #tpu.memory_space<vmem>>, vector<256x512xf32>
    %cst_73 = arith.constant dense<0.000000e+00> : vector<8x512xf32>
    %207 = tpu.matmul %205, %206, %cst_73 {dimension_numbers = #tpu.dot_dimension_numbers<[1], [0], [0], [1], [0, 0, 1, 1], [], []>} : vector<8x256xf32>, vector<256x512xf32>, vector<8x512xf32> -> vector<8x512xf32>
    %208 = arith.addf %207, %203 : vector<8x512xf32>
    %209 = vector.extract_strided_slice %208 {offsets = [0, 0], sizes = [8, 384], strides = [1, 1]} : vector<8x512xf32> to vector<8x384xf32>
    %210 = arith.negf %209 : vector<8x384xf32>
    %211 = math.exp %210 : vector<8x384xf32>
    %cst_74 = arith.constant 1.000000e+00 : f32
    %212 = vector.broadcast %cst_74 : f32 to vector<8x384xf32>
    %213 = arith.addf %212, %211 : vector<8x384xf32>
    %214 = arith.divf %212, %213 : vector<8x384xf32>
    %215 = vector.extract_strided_slice %208 {offsets = [0, 384], sizes = [8, 128], strides = [1, 1]} : vector<8x512xf32> to vector<8x128xf32>
    %216 = math.tanh %215 : vector<8x128xf32>
    %217 = vector.extract_strided_slice %214 {offsets = [0, 128], sizes = [8, 128], strides = [1, 1]} : vector<8x384xf32> to vector<8x128xf32>
    %218 = arith.mulf %217, %193 : vector<8x128xf32>
    %219 = vector.extract_strided_slice %214 {offsets = [0, 0], sizes = [8, 128], strides = [1, 1]} : vector<8x384xf32> to vector<8x128xf32>
    %220 = arith.mulf %219, %216 : vector<8x128xf32>
    %221 = arith.addf %218, %220 : vector<8x128xf32>
    %222 = vector.extract_strided_slice %214 {offsets = [0, 256], sizes = [8, 128], strides = [1, 1]} : vector<8x384xf32> to vector<8x128xf32>
    %223 = math.tanh %221 : vector<8x128xf32>
    %224 = arith.mulf %222, %223 : vector<8x128xf32>
    %c0_75 = arith.constant 0 : index
    %c0_76 = arith.constant 0 : index
    %c0_77 = arith.constant 0 : index
    %225 = vector.load %arg10[%c0_75, %c0_76, %c0_77] : memref<8x8x128xbf16, #tpu.memory_space<vmem>>, vector<8x8x128xbf16>
    %226 = arith.truncf %224 : vector<8x128xf32> to vector<8x128xbf16>
    %227 = vector.shape_cast %226 : vector<8x128xbf16> to vector<8x1x128xbf16>
    "tpu.trace_start"() <{level = 10 : i32, message = "bqd,bkd->bqk"}> : () -> ()
    %cst_78 = arith.constant dense<0.000000e+00> : vector<8x1x8xf32>
    %228 = tpu.matmul %227, %225, %cst_78 {dimension_numbers = #tpu.dot_dimension_numbers<[2], [2], [1], [1], [0, 0, 0, 1, 1, 1], [0], [0]>} : vector<8x1x128xbf16>, vector<8x8x128xbf16>, vector<8x1x8xf32> -> vector<8x1x8xf32>
    "tpu.trace_stop"() : () -> ()
    %cst_79 = arith.constant dense<0xFF800000> : vector<8x1xf32>
    %229 = vector.multi_reduction <maximumf>, %228, %cst_79 [2] : vector<8x1x8xf32> to vector<8x1xf32>
    %230 = vector.shape_cast %229 : vector<8x1xf32> to vector<8x1x1xf32>
    %231 = vector.broadcast %230 : vector<8x1x1xf32> to vector<8x1x8xf32>
    %232 = arith.subf %228, %231 : vector<8x1x8xf32>
    %233 = math.exp %232 : vector<8x1x8xf32>
    %cst_80 = arith.constant dense<0.000000e+00> : vector<8x1xf32>
    %234 = vector.multi_reduction <add>, %233, %cst_80 [2] : vector<8x1x8xf32> to vector<8x1xf32>
    %235 = vector.shape_cast %234 : vector<8x1xf32> to vector<8x1x1xf32>
    %236 = tpu.reciprocal %235 {approx = true} : vector<8x1x1xf32> -> vector<8x1x1xf32>
    %237 = vector.broadcast %236 : vector<8x1x1xf32> to vector<8x1x8xf32>
    %238 = arith.mulf %233, %237 : vector<8x1x8xf32>
    %239 = arith.truncf %238 : vector<8x1x8xf32> to vector<8x1x8xbf16>
    "tpu.trace_start"() <{level = 10 : i32, message = "bqk,bkd->bqd"}> : () -> ()
    %cst_81 = arith.constant dense<0.000000e+00> : vector<8x1x128xf32>
    %240 = tpu.matmul %239, %225, %cst_81 {dimension_numbers = #tpu.dot_dimension_numbers<[2], [1], [1], [2], [0, 0, 0, 1, 1, 2], [0], [0]>} : vector<8x1x8xbf16>, vector<8x8x128xbf16>, vector<8x1x128xf32> -> vector<8x1x128xf32>
    "tpu.trace_stop"() : () -> ()
    %241 = vector.shape_cast %240 : vector<8x1x128xf32> to vector<8x128xf32>
    %242 = tpu.concatenate %224, %241 in 1 : vector<8x128xf32>, vector<8x128xf32> -> vector<8x256xf32>
    %243 = arith.truncf %242 : vector<8x256xf32> to vector<8x256xbf16>
    %c0_82 = arith.constant 0 : index
    %c0_83 = arith.constant 0 : index
    %c0_84 = arith.constant 0 : index
    %244 = vector.load %arg8[%c0_82, %c0_83, %c0_84] : memref<8x8x256xbf16, #tpu.memory_space<vmem>>, vector<1x8x256xbf16>
    %245 = vector.shape_cast %244 : vector<1x8x256xbf16> to vector<8x256xbf16>
    %246 = vector.shape_cast %243 : vector<8x256xbf16> to vector<1x8x256xbf16>
    tpu.vector_store %arg8[%c0_82, %c0_83, %c0_84], %246 {strides = array<i32>} : memref<8x8x256xbf16, #tpu.memory_space<vmem>>, vector<1x8x256xbf16>,
    %c0_85 = arith.constant 0 : index
    %c0_86 = arith.constant 0 : index
    %247 = vector.load %arg6[%c0_85, %c0_86] : memref<128x512xf32, #tpu.memory_space<vmem>>, vector<128x512xf32>
    %cst_87 = arith.constant dense<0.000000e+00> : vector<8x512xf32>
    %248 = tpu.matmul %224, %247, %cst_87 {dimension_numbers = #tpu.dot_dimension_numbers<[1], [0], [0], [1], [0, 0, 1, 1], [], []>} : vector<8x128xf32>, vector<128x512xf32>, vector<8x512xf32> -> vector<8x512xf32>
    %249 = arith.addf %248, %203 : vector<8x512xf32>
    %250 = vector.extract_strided_slice %249 {offsets = [0, 0], sizes = [8, 384], strides = [1, 1]} : vector<8x512xf32> to vector<8x384xf32>
    %251 = arith.negf %250 : vector<8x384xf32>
    %252 = math.exp %251 : vector<8x384xf32>
    %cst_88 = arith.constant 1.000000e+00 : f32
    %253 = vector.broadcast %cst_88 : f32 to vector<8x384xf32>
    %254 = arith.addf %253, %252 : vector<8x384xf32>
    %255 = arith.divf %253, %254 : vector<8x384xf32>
    %256 = vector.extract_strided_slice %249 {offsets = [0, 384], sizes = [8, 128], strides = [1, 1]} : vector<8x512xf32> to vector<8x128xf32>
    %257 = math.tanh %256 : vector<8x128xf32>
    %258 = vector.extract_strided_slice %255 {offsets = [0, 128], sizes = [8, 128], strides = [1, 1]} : vector<8x384xf32> to vector<8x128xf32>
    %259 = arith.mulf %258, %221 : vector<8x128xf32>
    %260 = vector.extract_strided_slice %255 {offsets = [0, 0], sizes = [8, 128], strides = [1, 1]} : vector<8x384xf32> to vector<8x128xf32>
    %261 = arith.mulf %260, %257 : vector<8x128xf32>
    %262 = arith.addf %259, %261 : vector<8x128xf32>
    %263 = vector.extract_strided_slice %255 {offsets = [0, 256], sizes = [8, 128], strides = [1, 1]} : vector<8x384xf32> to vector<8x128xf32>
    %264 = math.tanh %262 : vector<8x128xf32>
    %265 = arith.mulf %263, %264 : vector<8x128xf32>
    %c0_89 = arith.constant 0 : index
    %c0_90 = arith.constant 0 : index
    %c0_91 = arith.constant 0 : index
    %266 = vector.load %arg10[%c0_89, %c0_90, %c0_91] : memref<8x8x128xbf16, #tpu.memory_space<vmem>>, vector<8x8x128xbf16>
    %267 = arith.truncf %265 : vector<8x128xf32> to vector<8x128xbf16>
    %268 = vector.shape_cast %267 : vector<8x128xbf16> to vector<8x1x128xbf16>
    "tpu.trace_start"() <{level = 10 : i32, message = "bqd,bkd->bqk"}> : () -> ()
    %cst_92 = arith.constant dense<0.000000e+00> : vector<8x1x8xf32>
    %269 = tpu.matmul %268, %266, %cst_92 {dimension_numbers = #tpu.dot_dimension_numbers<[2], [2], [1], [1], [0, 0, 0, 1, 1, 1], [0], [0]>} : vector<8x1x128xbf16>, vector<8x8x128xbf16>, vector<8x1x8xf32> -> vector<8x1x8xf32>
    "tpu.trace_stop"() : () -> ()
    %cst_93 = arith.constant dense<0xFF800000> : vector<8x1xf32>
    %270 = vector.multi_reduction <maximumf>, %269, %cst_93 [2] : vector<8x1x8xf32> to vector<8x1xf32>
    %271 = vector.shape_cast %270 : vector<8x1xf32> to vector<8x1x1xf32>
    %272 = vector.broadcast %271 : vector<8x1x1xf32> to vector<8x1x8xf32>
    %273 = arith.subf %269, %272 : vector<8x1x8xf32>
    %274 = math.exp %273 : vector<8x1x8xf32>
    %cst_94 = arith.constant dense<0.000000e+00> : vector<8x1xf32>
    %275 = vector.multi_reduction <add>, %274, %cst_94 [2] : vector<8x1x8xf32> to vector<8x1xf32>
    %276 = vector.shape_cast %275 : vector<8x1xf32> to vector<8x1x1xf32>
    %277 = tpu.reciprocal %276 {approx = true} : vector<8x1x1xf32> -> vector<8x1x1xf32>
    %278 = vector.broadcast %277 : vector<8x1x1xf32> to vector<8x1x8xf32>
    %279 = arith.mulf %274, %278 : vector<8x1x8xf32>
    %280 = arith.truncf %279 : vector<8x1x8xf32> to vector<8x1x8xbf16>
    "tpu.trace_start"() <{level = 10 : i32, message = "bqk,bkd->bqd"}> : () -> ()
    %cst_95 = arith.constant dense<0.000000e+00> : vector<8x1x128xf32>
    %281 = tpu.matmul %280, %266, %cst_95 {dimension_numbers = #tpu.dot_dimension_numbers<[2], [1], [1], [2], [0, 0, 0, 1, 1, 2], [0], [0]>} : vector<8x1x8xbf16>, vector<8x8x128xbf16>, vector<8x1x128xf32> -> vector<8x1x128xf32>
    "tpu.trace_stop"() : () -> ()
    %282 = vector.shape_cast %281 : vector<8x1x128xf32> to vector<8x128xf32>
    %283 = tpu.concatenate %265, %282 in 1 : vector<8x128xf32>, vector<8x128xf32> -> vector<8x256xf32>
    %284 = arith.truncf %283 : vector<8x256xf32> to vector<8x256xbf16>
    %c1_96 = arith.constant 1 : index
    %c0_97 = arith.constant 0 : index
    %c0_98 = arith.constant 0 : index
    %285 = vector.load %arg8[%c1_96, %c0_97, %c0_98] : memref<8x8x256xbf16, #tpu.memory_space<vmem>>, vector<1x8x256xbf16>
    %286 = vector.shape_cast %285 : vector<1x8x256xbf16> to vector<8x256xbf16>
    %287 = vector.shape_cast %284 : vector<8x256xbf16> to vector<1x8x256xbf16>
    tpu.vector_store %arg8[%c1_96, %c0_97, %c0_98], %287 {strides = array<i32>} : memref<8x8x256xbf16, #tpu.memory_space<vmem>>, vector<1x8x256xbf16>,
    %c0_99 = arith.constant 0 : index
    %c0_100 = arith.constant 0 : index
    %288 = vector.load %arg6[%c0_99, %c0_100] : memref<128x512xf32, #tpu.memory_space<vmem>>, vector<128x512xf32>
    %cst_101 = arith.constant dense<0.000000e+00> : vector<8x512xf32>
    %289 = tpu.matmul %265, %288, %cst_101 {dimension_numbers = #tpu.dot_dimension_numbers<[1], [0], [0], [1], [0, 0, 1, 1], [], []>} : vector<8x128xf32>, vector<128x512xf32>, vector<8x512xf32> -> vector<8x512xf32>
    %290 = arith.addf %289, %203 : vector<8x512xf32>
    %291 = vector.extract_strided_slice %290 {offsets = [0, 0], sizes = [8, 384], strides = [1, 1]} : vector<8x512xf32> to vector<8x384xf32>
    %292 = arith.negf %291 : vector<8x384xf32>
    %293 = math.exp %292 : vector<8x384xf32>
    %cst_102 = arith.constant 1.000000e+00 : f32
    %294 = vector.broadcast %cst_102 : f32 to vector<8x384xf32>
    %295 = arith.addf %294, %293 : vector<8x384xf32>
    %296 = arith.divf %294, %295 : vector<8x384xf32>
    %297 = vector.extract_strided_slice %290 {offsets = [0, 384], sizes = [8, 128], strides = [1, 1]} : vector<8x512xf32> to vector<8x128xf32>
    %298 = math.tanh %297 : vector<8x128xf32>
    %299 = vector.extract_strided_slice %296 {offsets = [0, 128], sizes = [8, 128], strides = [1, 1]} : vector<8x384xf32> to vector<8x128xf32>
    %300 = arith.mulf %299, %262 : vector<8x128xf32>
    %301 = vector.extract_strided_slice %296 {offsets = [0, 0], sizes = [8, 128], strides = [1, 1]} : vector<8x384xf32> to vector<8x128xf32>
    %302 = arith.mulf %301, %298 : vector<8x128xf32>
    %303 = arith.addf %300, %302 : vector<8x128xf32>
    %304 = vector.extract_strided_slice %296 {offsets = [0, 256], sizes = [8, 128], strides = [1, 1]} : vector<8x384xf32> to vector<8x128xf32>
    %305 = math.tanh %303 : vector<8x128xf32>
    %306 = arith.mulf %304, %305 : vector<8x128xf32>
    %c0_103 = arith.constant 0 : index
    %c0_104 = arith.constant 0 : index
    %c0_105 = arith.constant 0 : index
    %307 = vector.load %arg10[%c0_103, %c0_104, %c0_105] : memref<8x8x128xbf16, #tpu.memory_space<vmem>>, vector<8x8x128xbf16>
    %308 = arith.truncf %306 : vector<8x128xf32> to vector<8x128xbf16>
    %309 = vector.shape_cast %308 : vector<8x128xbf16> to vector<8x1x128xbf16>
    "tpu.trace_start"() <{level = 10 : i32, message = "bqd,bkd->bqk"}> : () -> ()
    %cst_106 = arith.constant dense<0.000000e+00> : vector<8x1x8xf32>
    %310 = tpu.matmul %309, %307, %cst_106 {dimension_numbers = #tpu.dot_dimension_numbers<[2], [2], [1], [1], [0, 0, 0, 1, 1, 1], [0], [0]>} : vector<8x1x128xbf16>, vector<8x8x128xbf16>, vector<8x1x8xf32> -> vector<8x1x8xf32>
    "tpu.trace_stop"() : () -> ()
    %cst_107 = arith.constant dense<0xFF800000> : vector<8x1xf32>
    %311 = vector.multi_reduction <maximumf>, %310, %cst_107 [2] : vector<8x1x8xf32> to vector<8x1xf32>
    %312 = vector.shape_cast %311 : vector<8x1xf32> to vector<8x1x1xf32>
    %313 = vector.broadcast %312 : vector<8x1x1xf32> to vector<8x1x8xf32>
    %314 = arith.subf %310, %313 : vector<8x1x8xf32>
    %315 = math.exp %314 : vector<8x1x8xf32>
    %cst_108 = arith.constant dense<0.000000e+00> : vector<8x1xf32>
    %316 = vector.multi_reduction <add>, %315, %cst_108 [2] : vector<8x1x8xf32> to vector<8x1xf32>
    %317 = vector.shape_cast %316 : vector<8x1xf32> to vector<8x1x1xf32>
    %318 = tpu.reciprocal %317 {approx = true} : vector<8x1x1xf32> -> vector<8x1x1xf32>
    %319 = vector.broadcast %318 : vector<8x1x1xf32> to vector<8x1x8xf32>
    %320 = arith.mulf %315, %319 : vector<8x1x8xf32>
    %321 = arith.truncf %320 : vector<8x1x8xf32> to vector<8x1x8xbf16>
    "tpu.trace_start"() <{level = 10 : i32, message = "bqk,bkd->bqd"}> : () -> ()
    %cst_109 = arith.constant dense<0.000000e+00> : vector<8x1x128xf32>
    %322 = tpu.matmul %321, %307, %cst_109 {dimension_numbers = #tpu.dot_dimension_numbers<[2], [1], [1], [2], [0, 0, 0, 1, 1, 2], [0], [0]>} : vector<8x1x8xbf16>, vector<8x8x128xbf16>, vector<8x1x128xf32> -> vector<8x1x128xf32>
    "tpu.trace_stop"() : () -> ()
    %323 = vector.shape_cast %322 : vector<8x1x128xf32> to vector<8x128xf32>
    %324 = tpu.concatenate %306, %323 in 1 : vector<8x128xf32>, vector<8x128xf32> -> vector<8x256xf32>
    %325 = arith.truncf %324 : vector<8x256xf32> to vector<8x256xbf16>
    %c2_110 = arith.constant 2 : index
    %c0_111 = arith.constant 0 : index
    %c0_112 = arith.constant 0 : index
    %326 = vector.load %arg8[%c2_110, %c0_111, %c0_112] : memref<8x8x256xbf16, #tpu.memory_space<vmem>>, vector<1x8x256xbf16>
    %327 = vector.shape_cast %326 : vector<1x8x256xbf16> to vector<8x256xbf16>
    %328 = vector.shape_cast %325 : vector<8x256xbf16> to vector<1x8x256xbf16>
    tpu.vector_store %arg8[%c2_110, %c0_111, %c0_112], %328 {strides = array<i32>} : memref<8x8x256xbf16, #tpu.memory_space<vmem>>, vector<1x8x256xbf16>,
    %c0_113 = arith.constant 0 : index
    %c0_114 = arith.constant 0 : index
    %329 = vector.load %arg6[%c0_113, %c0_114] : memref<128x512xf32, #tpu.memory_space<vmem>>, vector<128x512xf32>
    %cst_115 = arith.constant dense<0.000000e+00> : vector<8x512xf32>
    %330 = tpu.matmul %306, %329, %cst_115 {dimension_numbers = #tpu.dot_dimension_numbers<[1], [0], [0], [1], [0, 0, 1, 1], [], []>} : vector<8x128xf32>, vector<128x512xf32>, vector<8x512xf32> -> vector<8x512xf32>
    %331 = arith.addf %330, %203 : vector<8x512xf32>
    %332 = vector.extract_strided_slice %331 {offsets = [0, 0], sizes = [8, 384], strides = [1, 1]} : vector<8x512xf32> to vector<8x384xf32>
    %333 = arith.negf %332 : vector<8x384xf32>
    %334 = math.exp %333 : vector<8x384xf32>
    %cst_116 = arith.constant 1.000000e+00 : f32
    %335 = vector.broadcast %cst_116 : f32 to vector<8x384xf32>
    %336 = arith.addf %335, %334 : vector<8x384xf32>
    %337 = arith.divf %335, %336 : vector<8x384xf32>
    %338 = vector.extract_strided_slice %331 {offsets = [0, 384], sizes = [8, 128], strides = [1, 1]} : vector<8x512xf32> to vector<8x128xf32>
    %339 = math.tanh %338 : vector<8x128xf32>
    %340 = vector.extract_strided_slice %337 {offsets = [0, 128], sizes = [8, 128], strides = [1, 1]} : vector<8x384xf32> to vector<8x128xf32>
    %341 = arith.mulf %340, %303 : vector<8x128xf32>
    %342 = vector.extract_strided_slice %337 {offsets = [0, 0], sizes = [8, 128], strides = [1, 1]} : vector<8x384xf32> to vector<8x128xf32>
    %343 = arith.mulf %342, %339 : vector<8x128xf32>
    %344 = arith.addf %341, %343 : vector<8x128xf32>
    %345 = vector.extract_strided_slice %337 {offsets = [0, 256], sizes = [8, 128], strides = [1, 1]} : vector<8x384xf32> to vector<8x128xf32>
    %346 = math.tanh %344 : vector<8x128xf32>
    %347 = arith.mulf %345, %346 : vector<8x128xf32>
    %c0_117 = arith.constant 0 : index
    %c0_118 = arith.constant 0 : index
    %c0_119 = arith.constant 0 : index
    %348 = vector.load %arg10[%c0_117, %c0_118, %c0_119] : memref<8x8x128xbf16, #tpu.memory_space<vmem>>, vector<8x8x128xbf16>
    %349 = arith.truncf %347 : vector<8x128xf32> to vector<8x128xbf16>
    %350 = vector.shape_cast %349 : vector<8x128xbf16> to vector<8x1x128xbf16>
    "tpu.trace_start"() <{level = 10 : i32, message = "bqd,bkd->bqk"}> : () -> ()
    %cst_120 = arith.constant dense<0.000000e+00> : vector<8x1x8xf32>
    %351 = tpu.matmul %350, %348, %cst_120 {dimension_numbers = #tpu.dot_dimension_numbers<[2], [2], [1], [1], [0, 0, 0, 1, 1, 1], [0], [0]>} : vector<8x1x128xbf16>, vector<8x8x128xbf16>, vector<8x1x8xf32> -> vector<8x1x8xf32>
    "tpu.trace_stop"() : () -> ()
    %cst_121 = arith.constant dense<0xFF800000> : vector<8x1xf32>
    %352 = vector.multi_reduction <maximumf>, %351, %cst_121 [2] : vector<8x1x8xf32> to vector<8x1xf32>
    %353 = vector.shape_cast %352 : vector<8x1xf32> to vector<8x1x1xf32>
    %354 = vector.broadcast %353 : vector<8x1x1xf32> to vector<8x1x8xf32>
    %355 = arith.subf %351, %354 : vector<8x1x8xf32>
    %356 = math.exp %355 : vector<8x1x8xf32>
    %cst_122 = arith.constant dense<0.000000e+00> : vector<8x1xf32>
    %357 = vector.multi_reduction <add>, %356, %cst_122 [2] : vector<8x1x8xf32> to vector<8x1xf32>
    %358 = vector.shape_cast %357 : vector<8x1xf32> to vector<8x1x1xf32>
    %359 = tpu.reciprocal %358 {approx = true} : vector<8x1x1xf32> -> vector<8x1x1xf32>
    %360 = vector.broadcast %359 : vector<8x1x1xf32> to vector<8x1x8xf32>
    %361 = arith.mulf %356, %360 : vector<8x1x8xf32>
    %362 = arith.truncf %361 : vector<8x1x8xf32> to vector<8x1x8xbf16>
    "tpu.trace_start"() <{level = 10 : i32, message = "bqk,bkd->bqd"}> : () -> ()
    %cst_123 = arith.constant dense<0.000000e+00> : vector<8x1x128xf32>
    %363 = tpu.matmul %362, %348, %cst_123 {dimension_numbers = #tpu.dot_dimension_numbers<[2], [1], [1], [2], [0, 0, 0, 1, 1, 2], [0], [0]>} : vector<8x1x8xbf16>, vector<8x8x128xbf16>, vector<8x1x128xf32> -> vector<8x1x128xf32>
    "tpu.trace_stop"() : () -> ()
    %364 = vector.shape_cast %363 : vector<8x1x128xf32> to vector<8x128xf32>
    %365 = tpu.concatenate %347, %364 in 1 : vector<8x128xf32>, vector<8x128xf32> -> vector<8x256xf32>
    %366 = arith.truncf %365 : vector<8x256xf32> to vector<8x256xbf16>
    %c3_124 = arith.constant 3 : index
    %c0_125 = arith.constant 0 : index
    %c0_126 = arith.constant 0 : index
    %367 = vector.load %arg8[%c3_124, %c0_125, %c0_126] : memref<8x8x256xbf16, #tpu.memory_space<vmem>>, vector<1x8x256xbf16>
    %368 = vector.shape_cast %367 : vector<1x8x256xbf16> to vector<8x256xbf16>
    %369 = vector.shape_cast %366 : vector<8x256xbf16> to vector<1x8x256xbf16>
    tpu.vector_store %arg8[%c3_124, %c0_125, %c0_126], %369 {strides = array<i32>} : memref<8x8x256xbf16, #tpu.memory_space<vmem>>, vector<1x8x256xbf16>,
    %c0_127 = arith.constant 0 : index
    %c0_128 = arith.constant 0 : index
    %370 = vector.load %arg6[%c0_127, %c0_128] : memref<128x512xf32, #tpu.memory_space<vmem>>, vector<128x512xf32>
    %cst_129 = arith.constant dense<0.000000e+00> : vector<8x512xf32>
    %371 = tpu.matmul %347, %370, %cst_129 {dimension_numbers = #tpu.dot_dimension_numbers<[1], [0], [0], [1], [0, 0, 1, 1], [], []>} : vector<8x128xf32>, vector<128x512xf32>, vector<8x512xf32> -> vector<8x512xf32>
    %372 = arith.addf %371, %203 : vector<8x512xf32>
    %373 = vector.extract_strided_slice %372 {offsets = [0, 0], sizes = [8, 384], strides = [1, 1]} : vector<8x512xf32> to vector<8x384xf32>
    %374 = arith.negf %373 : vector<8x384xf32>
    %375 = math.exp %374 : vector<8x384xf32>
    %cst_130 = arith.constant 1.000000e+00 : f32
    %376 = vector.broadcast %cst_130 : f32 to vector<8x384xf32>
    %377 = arith.addf %376, %375 : vector<8x384xf32>
    %378 = arith.divf %376, %377 : vector<8x384xf32>
    %379 = vector.extract_strided_slice %372 {offsets = [0, 384], sizes = [8, 128], strides = [1, 1]} : vector<8x512xf32> to vector<8x128xf32>
    %380 = math.tanh %379 : vector<8x128xf32>
    %381 = vector.extract_strided_slice %378 {offsets = [0, 128], sizes = [8, 128], strides = [1, 1]} : vector<8x384xf32> to vector<8x128xf32>
    %382 = arith.mulf %381, %344 : vector<8x128xf32>
    %383 = vector.extract_strided_slice %378 {offsets = [0, 0], sizes = [8, 128], strides = [1, 1]} : vector<8x384xf32> to vector<8x128xf32>
    %384 = arith.mulf %383, %380 : vector<8x128xf32>
    %385 = arith.addf %382, %384 : vector<8x128xf32>
    %386 = vector.extract_strided_slice %378 {offsets = [0, 256], sizes = [8, 128], strides = [1, 1]} : vector<8x384xf32> to vector<8x128xf32>
    %387 = math.tanh %385 : vector<8x128xf32>
    %388 = arith.mulf %386, %387 : vector<8x128xf32>
    %c0_131 = arith.constant 0 : index
    %c0_132 = arith.constant 0 : index
    %c0_133 = arith.constant 0 : index
    %389 = vector.load %arg10[%c0_131, %c0_132, %c0_133] : memref<8x8x128xbf16, #tpu.memory_space<vmem>>, vector<8x8x128xbf16>
    %390 = arith.truncf %388 : vector<8x128xf32> to vector<8x128xbf16>
    %391 = vector.shape_cast %390 : vector<8x128xbf16> to vector<8x1x128xbf16>
    "tpu.trace_start"() <{level = 10 : i32, message = "bqd,bkd->bqk"}> : () -> ()
    %cst_134 = arith.constant dense<0.000000e+00> : vector<8x1x8xf32>
    %392 = tpu.matmul %391, %389, %cst_134 {dimension_numbers = #tpu.dot_dimension_numbers<[2], [2], [1], [1], [0, 0, 0, 1, 1, 1], [0], [0]>} : vector<8x1x128xbf16>, vector<8x8x128xbf16>, vector<8x1x8xf32> -> vector<8x1x8xf32>
    "tpu.trace_stop"() : () -> ()
    %cst_135 = arith.constant dense<0xFF800000> : vector<8x1xf32>
    %393 = vector.multi_reduction <maximumf>, %392, %cst_135 [2] : vector<8x1x8xf32> to vector<8x1xf32>
    %394 = vector.shape_cast %393 : vector<8x1xf32> to vector<8x1x1xf32>
    %395 = vector.broadcast %394 : vector<8x1x1xf32> to vector<8x1x8xf32>
    %396 = arith.subf %392, %395 : vector<8x1x8xf32>
    %397 = math.exp %396 : vector<8x1x8xf32>
    %cst_136 = arith.constant dense<0.000000e+00> : vector<8x1xf32>
    %398 = vector.multi_reduction <add>, %397, %cst_136 [2] : vector<8x1x8xf32> to vector<8x1xf32>
    %399 = vector.shape_cast %398 : vector<8x1xf32> to vector<8x1x1xf32>
    %400 = tpu.reciprocal %399 {approx = true} : vector<8x1x1xf32> -> vector<8x1x1xf32>
    %401 = vector.broadcast %400 : vector<8x1x1xf32> to vector<8x1x8xf32>
    %402 = arith.mulf %397, %401 : vector<8x1x8xf32>
    %403 = arith.truncf %402 : vector<8x1x8xf32> to vector<8x1x8xbf16>
    "tpu.trace_start"() <{level = 10 : i32, message = "bqk,bkd->bqd"}> : () -> ()
    %cst_137 = arith.constant dense<0.000000e+00> : vector<8x1x128xf32>
    %404 = tpu.matmul %403, %389, %cst_137 {dimension_numbers = #tpu.dot_dimension_numbers<[2], [1], [1], [2], [0, 0, 0, 1, 1, 2], [0], [0]>} : vector<8x1x8xbf16>, vector<8x8x128xbf16>, vector<8x1x128xf32> -> vector<8x1x128xf32>
    "tpu.trace_stop"() : () -> ()
    %405 = vector.shape_cast %404 : vector<8x1x128xf32> to vector<8x128xf32>
    %406 = tpu.concatenate %388, %405 in 1 : vector<8x128xf32>, vector<8x128xf32> -> vector<8x256xf32>
    %407 = arith.truncf %406 : vector<8x256xf32> to vector<8x256xbf16>
    %c4_138 = arith.constant 4 : index
    %c0_139 = arith.constant 0 : index
    %c0_140 = arith.constant 0 : index
    %408 = vector.load %arg8[%c4_138, %c0_139, %c0_140] : memref<8x8x256xbf16, #tpu.memory_space<vmem>>, vector<1x8x256xbf16>
    %409 = vector.shape_cast %408 : vector<1x8x256xbf16> to vector<8x256xbf16>
    %410 = vector.shape_cast %407 : vector<8x256xbf16> to vector<1x8x256xbf16>
    tpu.vector_store %arg8[%c4_138, %c0_139, %c0_140], %410 {strides = array<i32>} : memref<8x8x256xbf16, #tpu.memory_space<vmem>>, vector<1x8x256xbf16>,
    %c0_141 = arith.constant 0 : index
    %c0_142 = arith.constant 0 : index
    %411 = vector.load %arg6[%c0_141, %c0_142] : memref<128x512xf32, #tpu.memory_space<vmem>>, vector<128x512xf32>
    %cst_143 = arith.constant dense<0.000000e+00> : vector<8x512xf32>
    %412 = tpu.matmul %388, %411, %cst_143 {dimension_numbers = #tpu.dot_dimension_numbers<[1], [0], [0], [1], [0, 0, 1, 1], [], []>} : vector<8x128xf32>, vector<128x512xf32>, vector<8x512xf32> -> vector<8x512xf32>
    %413 = arith.addf %412, %203 : vector<8x512xf32>
    %414 = vector.extract_strided_slice %413 {offsets = [0, 0], sizes = [8, 384], strides = [1, 1]} : vector<8x512xf32> to vector<8x384xf32>
    %415 = arith.negf %414 : vector<8x384xf32>
    %416 = math.exp %415 : vector<8x384xf32>
    %cst_144 = arith.constant 1.000000e+00 : f32
    %417 = vector.broadcast %cst_144 : f32 to vector<8x384xf32>
    %418 = arith.addf %417, %416 : vector<8x384xf32>
    %419 = arith.divf %417, %418 : vector<8x384xf32>
    %420 = vector.extract_strided_slice %413 {offsets = [0, 384], sizes = [8, 128], strides = [1, 1]} : vector<8x512xf32> to vector<8x128xf32>
    %421 = math.tanh %420 : vector<8x128xf32>
    %422 = vector.extract_strided_slice %419 {offsets = [0, 128], sizes = [8, 128], strides = [1, 1]} : vector<8x384xf32> to vector<8x128xf32>
    %423 = arith.mulf %422, %385 : vector<8x128xf32>
    %424 = vector.extract_strided_slice %419 {offsets = [0, 0], sizes = [8, 128], strides = [1, 1]} : vector<8x384xf32> to vector<8x128xf32>
    %425 = arith.mulf %424, %421 : vector<8x128xf32>
    %426 = arith.addf %423, %425 : vector<8x128xf32>
    %427 = vector.extract_strided_slice %419 {offsets = [0, 256], sizes = [8, 128], strides = [1, 1]} : vector<8x384xf32> to vector<8x128xf32>
    %428 = math.tanh %426 : vector<8x128xf32>
    %429 = arith.mulf %427, %428 : vector<8x128xf32>
    %c0_145 = arith.constant 0 : index
    %c0_146 = arith.constant 0 : index
    %c0_147 = arith.constant 0 : index
    %430 = vector.load %arg10[%c0_145, %c0_146, %c0_147] : memref<8x8x128xbf16, #tpu.memory_space<vmem>>, vector<8x8x128xbf16>
    %431 = arith.truncf %429 : vector<8x128xf32> to vector<8x128xbf16>
    %432 = vector.shape_cast %431 : vector<8x128xbf16> to vector<8x1x128xbf16>
    "tpu.trace_start"() <{level = 10 : i32, message = "bqd,bkd->bqk"}> : () -> ()
    %cst_148 = arith.constant dense<0.000000e+00> : vector<8x1x8xf32>
    %433 = tpu.matmul %432, %430, %cst_148 {dimension_numbers = #tpu.dot_dimension_numbers<[2], [2], [1], [1], [0, 0, 0, 1, 1, 1], [0], [0]>} : vector<8x1x128xbf16>, vector<8x8x128xbf16>, vector<8x1x8xf32> -> vector<8x1x8xf32>
    "tpu.trace_stop"() : () -> ()
    %cst_149 = arith.constant dense<0xFF800000> : vector<8x1xf32>
    %434 = vector.multi_reduction <maximumf>, %433, %cst_149 [2] : vector<8x1x8xf32> to vector<8x1xf32>
    %435 = vector.shape_cast %434 : vector<8x1xf32> to vector<8x1x1xf32>
    %436 = vector.broadcast %435 : vector<8x1x1xf32> to vector<8x1x8xf32>
    %437 = arith.subf %433, %436 : vector<8x1x8xf32>
    %438 = math.exp %437 : vector<8x1x8xf32>
    %cst_150 = arith.constant dense<0.000000e+00> : vector<8x1xf32>
    %439 = vector.multi_reduction <add>, %438, %cst_150 [2] : vector<8x1x8xf32> to vector<8x1xf32>
    %440 = vector.shape_cast %439 : vector<8x1xf32> to vector<8x1x1xf32>
    %441 = tpu.reciprocal %440 {approx = true} : vector<8x1x1xf32> -> vector<8x1x1xf32>
    %442 = vector.broadcast %441 : vector<8x1x1xf32> to vector<8x1x8xf32>
    %443 = arith.mulf %438, %442 : vector<8x1x8xf32>
    %444 = arith.truncf %443 : vector<8x1x8xf32> to vector<8x1x8xbf16>
    "tpu.trace_start"() <{level = 10 : i32, message = "bqk,bkd->bqd"}> : () -> ()
    %cst_151 = arith.constant dense<0.000000e+00> : vector<8x1x128xf32>
    %445 = tpu.matmul %444, %430, %cst_151 {dimension_numbers = #tpu.dot_dimension_numbers<[2], [1], [1], [2], [0, 0, 0, 1, 1, 2], [0], [0]>} : vector<8x1x8xbf16>, vector<8x8x128xbf16>, vector<8x1x128xf32> -> vector<8x1x128xf32>
    "tpu.trace_stop"() : () -> ()
    %446 = vector.shape_cast %445 : vector<8x1x128xf32> to vector<8x128xf32>
    %447 = tpu.concatenate %429, %446 in 1 : vector<8x128xf32>, vector<8x128xf32> -> vector<8x256xf32>
    %448 = arith.truncf %447 : vector<8x256xf32> to vector<8x256xbf16>
    %c5_152 = arith.constant 5 : index
    %c0_153 = arith.constant 0 : index
    %c0_154 = arith.constant 0 : index
    %449 = vector.load %arg8[%c5_152, %c0_153, %c0_154] : memref<8x8x256xbf16, #tpu.memory_space<vmem>>, vector<1x8x256xbf16>
    %450 = vector.shape_cast %449 : vector<1x8x256xbf16> to vector<8x256xbf16>
    %451 = vector.shape_cast %448 : vector<8x256xbf16> to vector<1x8x256xbf16>
    tpu.vector_store %arg8[%c5_152, %c0_153, %c0_154], %451 {strides = array<i32>} : memref<8x8x256xbf16, #tpu.memory_space<vmem>>, vector<1x8x256xbf16>,
    %c0_155 = arith.constant 0 : index
    %c0_156 = arith.constant 0 : index
    %452 = vector.load %arg6[%c0_155, %c0_156] : memref<128x512xf32, #tpu.memory_space<vmem>>, vector<128x512xf32>
    %cst_157 = arith.constant dense<0.000000e+00> : vector<8x512xf32>
    %453 = tpu.matmul %429, %452, %cst_157 {dimension_numbers = #tpu.dot_dimension_numbers<[1], [0], [0], [1], [0, 0, 1, 1], [], []>} : vector<8x128xf32>, vector<128x512xf32>, vector<8x512xf32> -> vector<8x512xf32>
    %454 = arith.addf %453, %203 : vector<8x512xf32>
    %455 = vector.extract_strided_slice %454 {offsets = [0, 0], sizes = [8, 384], strides = [1, 1]} : vector<8x512xf32> to vector<8x384xf32>
    %456 = arith.negf %455 : vector<8x384xf32>
    %457 = math.exp %456 : vector<8x384xf32>
    %cst_158 = arith.constant 1.000000e+00 : f32
    %458 = vector.broadcast %cst_158 : f32 to vector<8x384xf32>
    %459 = arith.addf %458, %457 : vector<8x384xf32>
    %460 = arith.divf %458, %459 : vector<8x384xf32>
    %461 = vector.extract_strided_slice %454 {offsets = [0, 384], sizes = [8, 128], strides = [1, 1]} : vector<8x512xf32> to vector<8x128xf32>
    %462 = math.tanh %461 : vector<8x128xf32>
    %463 = vector.extract_strided_slice %460 {offsets = [0, 128], sizes = [8, 128], strides = [1, 1]} : vector<8x384xf32> to vector<8x128xf32>
    %464 = arith.mulf %463, %426 : vector<8x128xf32>
    %465 = vector.extract_strided_slice %460 {offsets = [0, 0], sizes = [8, 128], strides = [1, 1]} : vector<8x384xf32> to vector<8x128xf32>
    %466 = arith.mulf %465, %462 : vector<8x128xf32>
    %467 = arith.addf %464, %466 : vector<8x128xf32>
    %468 = vector.extract_strided_slice %460 {offsets = [0, 256], sizes = [8, 128], strides = [1, 1]} : vector<8x384xf32> to vector<8x128xf32>
    %469 = math.tanh %467 : vector<8x128xf32>
    %470 = arith.mulf %468, %469 : vector<8x128xf32>
    %c0_159 = arith.constant 0 : index
    %c0_160 = arith.constant 0 : index
    %c0_161 = arith.constant 0 : index
    %471 = vector.load %arg10[%c0_159, %c0_160, %c0_161] : memref<8x8x128xbf16, #tpu.memory_space<vmem>>, vector<8x8x128xbf16>
    %472 = arith.truncf %470 : vector<8x128xf32> to vector<8x128xbf16>
    %473 = vector.shape_cast %472 : vector<8x128xbf16> to vector<8x1x128xbf16>
    "tpu.trace_start"() <{level = 10 : i32, message = "bqd,bkd->bqk"}> : () -> ()
    %cst_162 = arith.constant dense<0.000000e+00> : vector<8x1x8xf32>
    %474 = tpu.matmul %473, %471, %cst_162 {dimension_numbers = #tpu.dot_dimension_numbers<[2], [2], [1], [1], [0, 0, 0, 1, 1, 1], [0], [0]>} : vector<8x1x128xbf16>, vector<8x8x128xbf16>, vector<8x1x8xf32> -> vector<8x1x8xf32>
    "tpu.trace_stop"() : () -> ()
    %cst_163 = arith.constant dense<0xFF800000> : vector<8x1xf32>
    %475 = vector.multi_reduction <maximumf>, %474, %cst_163 [2] : vector<8x1x8xf32> to vector<8x1xf32>
    %476 = vector.shape_cast %475 : vector<8x1xf32> to vector<8x1x1xf32>
    %477 = vector.broadcast %476 : vector<8x1x1xf32> to vector<8x1x8xf32>
    %478 = arith.subf %474, %477 : vector<8x1x8xf32>
    %479 = math.exp %478 : vector<8x1x8xf32>
    %cst_164 = arith.constant dense<0.000000e+00> : vector<8x1xf32>
    %480 = vector.multi_reduction <add>, %479, %cst_164 [2] : vector<8x1x8xf32> to vector<8x1xf32>
    %481 = vector.shape_cast %480 : vector<8x1xf32> to vector<8x1x1xf32>
    %482 = tpu.reciprocal %481 {approx = true} : vector<8x1x1xf32> -> vector<8x1x1xf32>
    %483 = vector.broadcast %482 : vector<8x1x1xf32> to vector<8x1x8xf32>
    %484 = arith.mulf %479, %483 : vector<8x1x8xf32>
    %485 = arith.truncf %484 : vector<8x1x8xf32> to vector<8x1x8xbf16>
    "tpu.trace_start"() <{level = 10 : i32, message = "bqk,bkd->bqd"}> : () -> ()
    %cst_165 = arith.constant dense<0.000000e+00> : vector<8x1x128xf32>
    %486 = tpu.matmul %485, %471, %cst_165 {dimension_numbers = #tpu.dot_dimension_numbers<[2], [1], [1], [2], [0, 0, 0, 1, 1, 2], [0], [0]>} : vector<8x1x8xbf16>, vector<8x8x128xbf16>, vector<8x1x128xf32> -> vector<8x1x128xf32>
    "tpu.trace_stop"() : () -> ()
    %487 = vector.shape_cast %486 : vector<8x1x128xf32> to vector<8x128xf32>
    %488 = tpu.concatenate %470, %487 in 1 : vector<8x128xf32>, vector<8x128xf32> -> vector<8x256xf32>
    %489 = arith.truncf %488 : vector<8x256xf32> to vector<8x256xbf16>
    %c6_166 = arith.constant 6 : index
    %c0_167 = arith.constant 0 : index
    %c0_168 = arith.constant 0 : index
    %490 = vector.load %arg8[%c6_166, %c0_167, %c0_168] : memref<8x8x256xbf16, #tpu.memory_space<vmem>>, vector<1x8x256xbf16>
    %491 = vector.shape_cast %490 : vector<1x8x256xbf16> to vector<8x256xbf16>
    %492 = vector.shape_cast %489 : vector<8x256xbf16> to vector<1x8x256xbf16>
    tpu.vector_store %arg8[%c6_166, %c0_167, %c0_168], %492 {strides = array<i32>} : memref<8x8x256xbf16, #tpu.memory_space<vmem>>, vector<1x8x256xbf16>,
    %c0_169 = arith.constant 0 : index
    %c0_170 = arith.constant 0 : index
    %493 = vector.load %arg6[%c0_169, %c0_170] : memref<128x512xf32, #tpu.memory_space<vmem>>, vector<128x512xf32>
    %cst_171 = arith.constant dense<0.000000e+00> : vector<8x512xf32>
    %494 = tpu.matmul %470, %493, %cst_171 {dimension_numbers = #tpu.dot_dimension_numbers<[1], [0], [0], [1], [0, 0, 1, 1], [], []>} : vector<8x128xf32>, vector<128x512xf32>, vector<8x512xf32> -> vector<8x512xf32>
    %495 = arith.addf %494, %203 : vector<8x512xf32>
    %496 = vector.extract_strided_slice %495 {offsets = [0, 0], sizes = [8, 384], strides = [1, 1]} : vector<8x512xf32> to vector<8x384xf32>
    %497 = arith.negf %496 : vector<8x384xf32>
    %498 = math.exp %497 : vector<8x384xf32>
    %cst_172 = arith.constant 1.000000e+00 : f32
    %499 = vector.broadcast %cst_172 : f32 to vector<8x384xf32>
    %500 = arith.addf %499, %498 : vector<8x384xf32>
    %501 = arith.divf %499, %500 : vector<8x384xf32>
    %502 = vector.extract_strided_slice %495 {offsets = [0, 384], sizes = [8, 128], strides = [1, 1]} : vector<8x512xf32> to vector<8x128xf32>
    %503 = math.tanh %502 : vector<8x128xf32>
    %504 = vector.extract_strided_slice %501 {offsets = [0, 128], sizes = [8, 128], strides = [1, 1]} : vector<8x384xf32> to vector<8x128xf32>
    %505 = arith.mulf %504, %467 : vector<8x128xf32>
    %506 = vector.extract_strided_slice %501 {offsets = [0, 0], sizes = [8, 128], strides = [1, 1]} : vector<8x384xf32> to vector<8x128xf32>
    %507 = arith.mulf %506, %503 : vector<8x128xf32>
    %508 = arith.addf %505, %507 : vector<8x128xf32>
    %509 = vector.extract_strided_slice %501 {offsets = [0, 256], sizes = [8, 128], strides = [1, 1]} : vector<8x384xf32> to vector<8x128xf32>
    %510 = math.tanh %508 : vector<8x128xf32>
    %511 = arith.mulf %509, %510 : vector<8x128xf32>
    %c0_173 = arith.constant 0 : index
    %c0_174 = arith.constant 0 : index
    %c0_175 = arith.constant 0 : index
    %512 = vector.load %arg10[%c0_173, %c0_174, %c0_175] : memref<8x8x128xbf16, #tpu.memory_space<vmem>>, vector<8x8x128xbf16>
    %513 = arith.truncf %511 : vector<8x128xf32> to vector<8x128xbf16>
    %514 = vector.shape_cast %513 : vector<8x128xbf16> to vector<8x1x128xbf16>
    "tpu.trace_start"() <{level = 10 : i32, message = "bqd,bkd->bqk"}> : () -> ()
    %cst_176 = arith.constant dense<0.000000e+00> : vector<8x1x8xf32>
    %515 = tpu.matmul %514, %512, %cst_176 {dimension_numbers = #tpu.dot_dimension_numbers<[2], [2], [1], [1], [0, 0, 0, 1, 1, 1], [0], [0]>} : vector<8x1x128xbf16>, vector<8x8x128xbf16>, vector<8x1x8xf32> -> vector<8x1x8xf32>
    "tpu.trace_stop"() : () -> ()
    %cst_177 = arith.constant dense<0xFF800000> : vector<8x1xf32>
    %516 = vector.multi_reduction <maximumf>, %515, %cst_177 [2] : vector<8x1x8xf32> to vector<8x1xf32>
    %517 = vector.shape_cast %516 : vector<8x1xf32> to vector<8x1x1xf32>
    %518 = vector.broadcast %517 : vector<8x1x1xf32> to vector<8x1x8xf32>
    %519 = arith.subf %515, %518 : vector<8x1x8xf32>
    %520 = math.exp %519 : vector<8x1x8xf32>
    %cst_178 = arith.constant dense<0.000000e+00> : vector<8x1xf32>
    %521 = vector.multi_reduction <add>, %520, %cst_178 [2] : vector<8x1x8xf32> to vector<8x1xf32>
    %522 = vector.shape_cast %521 : vector<8x1xf32> to vector<8x1x1xf32>
    %523 = tpu.reciprocal %522 {approx = true} : vector<8x1x1xf32> -> vector<8x1x1xf32>
    %524 = vector.broadcast %523 : vector<8x1x1xf32> to vector<8x1x8xf32>
    %525 = arith.mulf %520, %524 : vector<8x1x8xf32>
    %526 = arith.truncf %525 : vector<8x1x8xf32> to vector<8x1x8xbf16>
    "tpu.trace_start"() <{level = 10 : i32, message = "bqk,bkd->bqd"}> : () -> ()
    %cst_179 = arith.constant dense<0.000000e+00> : vector<8x1x128xf32>
    %527 = tpu.matmul %526, %512, %cst_179 {dimension_numbers = #tpu.dot_dimension_numbers<[2], [1], [1], [2], [0, 0, 0, 1, 1, 2], [0], [0]>} : vector<8x1x8xbf16>, vector<8x8x128xbf16>, vector<8x1x128xf32> -> vector<8x1x128xf32>
    "tpu.trace_stop"() : () -> ()
    %528 = vector.shape_cast %527 : vector<8x1x128xf32> to vector<8x128xf32>
    %529 = tpu.concatenate %511, %528 in 1 : vector<8x128xf32>, vector<8x128xf32> -> vector<8x256xf32>
    %530 = arith.truncf %529 : vector<8x256xf32> to vector<8x256xbf16>
    %c7_180 = arith.constant 7 : index
    %c0_181 = arith.constant 0 : index
    %c0_182 = arith.constant 0 : index
    %531 = vector.load %arg8[%c7_180, %c0_181, %c0_182] : memref<8x8x256xbf16, #tpu.memory_space<vmem>>, vector<1x8x256xbf16>
    %532 = vector.shape_cast %531 : vector<1x8x256xbf16> to vector<8x256xbf16>
    %533 = vector.shape_cast %530 : vector<8x256xbf16> to vector<1x8x256xbf16>
    tpu.vector_store %arg8[%c7_180, %c0_181, %c0_182], %533 {strides = array<i32>} : memref<8x8x256xbf16, #tpu.memory_space<vmem>>, vector<1x8x256xbf16>,
    return
  }
}

</mosaic_0001>

<bundles_post_ra>
// kernel: tpu_custom_call.1
= control target key start
LH: loop header
LB: loop body
LE: loop exit
PB: predicated region body
PF: predicated region fallthrough
CT: control target
= control target key end

     0   :  { %13 = vsyncpa [#allocation5], 0  ;;  %s18502_s0 = inlined_call_operand.hbm [shape: bf16[64,128], index: 0, kind: input, shape index: {}]   ;;  %s18503_s1 = inlined_call_operand.hbm [shape: f32[8,128], index: 1, kind: input, shape index: {}]   ;;  %s18504_s2 = inlined_call_operand.hbm [shape: bf16[128,512], index: 2, kind: input, shape index: {}]   ;;  %s18505_s3 = inlined_call_operand.hbm [shape: f32[128,512], index: 3, kind: input, shape index: {}]   ;;  %s18506_s4 = inlined_call_operand.vmem [shape: f32[1,512], index: 4, kind: input, shape index: {}]   ;;  %s18507_s5 = inlined_call_operand.hbm [shape: f32[256,512], index: 5, kind: input, shape index: {}]   ;;  %s18508_s6 = inlined_call_operand.hbm [shape: f32[128,512], index: 6, kind: input, shape index: {}]   ;;  %s18509_s7 = inlined_call_operand.vmem [shape: f32[1,512], index: 7, kind: input, shape index: {}]   ;;  %s18510_s8 = inlined_call_operand.hbm [shape: bf16[8,8,256], index: 8, kind: output, shape index: {}]  }
   0x1   :  { %14 = vsyncpa [#allocation8], 0 }
   0x2   :  { %15 = vsyncpa [#allocation11], 0 }
   0x3   :  { %16 = vsyncpa [#allocation14], 0 }
   0x4   :  { %17 = vsyncpa [#allocation6], 0  ;;  %s15783_s27 = smov [#allocation7]   ;;  %s15784_s29 = smov [#allocation10]  }
   0x5   :  { %s36_s28 = sshll.u32 %s15783_s27, 4  ;;  %s57_s30 = sshll.u32 %s15784_s29, 4  ;;  %s37_s28 = int_to_ptr.vmem [resolvable:$true] %s36_s28  ;;  %s15848_s30 = int_to_ptr.vmem [resolvable:$true] %s57_s30 }
   0x6   :  { %s15619_s11 = scalar_lea.hbm %s18503_s1, 128 }
   0x7   :  { %p15620_p0 = scmp.ne.s32.totalorder %s18503_s1, %s15619_s11  ;;  %p15623_p1 = scmp.lt.u32.totalorder %s15619_s11, %s18503_s1 }
   0x9   :  { %p15625_p2 = pnand %p15623_p1, %p15620_p0 }
   0xb   :  { %15628 = shalt.err (!%p15625_p2)
}
   0xc   :  { %s15629_s16 = scalar_lea.vmem %s37_s28, 128  ;;  %p15634_p4 = scmp.lt.s32.totalorder %s37_s28, %s37_s28 }
   0xd   :  { %p15630_p3 = scmp.ne.s32.totalorder %s37_s28, %s15629_s16  ;;  %p15635_p5 = scmp.lt.s32.totalorder %s15629_s16, %s15629_s16 }
   0xf   :  { %p15636_p6 = por %p15635_p5, %p15634_p4 }
  0x11   :  { %p15637_p7 = pnand %p15636_p6, %p15630_p3 }
  0x13   :  { %15640 = shalt.err (!%p15637_p7)
}
  0x14   :  { %39 = dma.hbm_to_vmem [thread:$0]  %s18503_s1, 128, %s37_s28, [#allocation8]  }
  0x15   :  { %s15641_s21 = scalar_lea.hbm %s18505_s3, 8192 }
  0x16   :  { %p15642_p8 = scmp.ne.s32.totalorder %s18505_s3, %s15641_s21  ;;  %p15645_p9 = scmp.lt.u32.totalorder %s15641_s21, %s18505_s3 }
  0x18   :  { %p15647_p10 = pnand %p15645_p9, %p15642_p8 }
  0x1a   :  { %15650 = shalt.err (!%p15647_p10)
}
  0x1b   :  { %s15651_s26 = scalar_lea.vmem %s15848_s30, 8192  ;;  %p15656_p12 = scmp.lt.s32.totalorder %s15848_s30, %s15848_s30 }
  0x1c   :  { %p15652_p11 = scmp.ne.s32.totalorder %s15848_s30, %s15651_s26  ;;  %p15657_p13 = scmp.lt.s32.totalorder %s15651_s26, %s15651_s26 }
  0x1e   :  { %p15658_p0 = por %p15657_p13, %p15656_p12 }
  0x20   :  { %p15659_p1 = pnand %p15658_p0, %p15652_p11 }
  0x22   :  { %15662 = shalt.err (!%p15659_p1)
}
  0x23   :  { %s15785_s1 = smov 512   ;;  %s15786_s27 = smov 32  }
  0x24   :  { %63 = dma.hbm_to_vmem [thread:$0]  %s18505_s3, 8192, %s15848_s30, [#allocation11], %s15785_s1, %s15785_s1, %s15786_s27  }
  0x25   :  { %s15787_s9 = smov [#allocation4]   ;;  %s15663_s13 = scalar_lea.hbm %s18502_s0, 512 }
  0x26   :  { %s23_s10 = sshll.u32 %s15787_s9, 4  ;;  %p15664_p2 = scmp.ne.s32.totalorder %s18502_s0, %s15663_s13  ;;  %s24_s10 = int_to_ptr.vmem [resolvable:$true] %s23_s10 }
  0x27   :  { %p15667_p3 = scmp.lt.u32.totalorder %s15663_s13, %s18502_s0 }
  0x29   :  { %p15669_p4 = pnand %p15667_p3, %p15664_p2 }
  0x2b   :  { %15672 = shalt.err (!%p15669_p4)
}
  0x2c   :  { %s15673_s18 = scalar_lea.vmem %s24_s10, 512  ;;  %p15678_p6 = scmp.lt.s32.totalorder %s24_s10, %s24_s10 }
  0x2d   :  { %p15674_p5 = scmp.ne.s32.totalorder %s24_s10, %s15673_s18  ;;  %p15679_p7 = scmp.lt.s32.totalorder %s15673_s18, %s15673_s18 }
  0x2f   :  { %p15680_p8 = por %p15679_p7, %p15678_p6 }
  0x31   :  { %p15681_p9 = pnand %p15680_p8, %p15674_p5 }
  0x33   :  { %15684 = shalt.err (!%p15681_p9)
}
  0x34   :  { %s15788_s3 = smov 64   ;;  %s15789_s30 = smov 4  }
  0x35   :  { %29 = dma.hbm_to_vmem [thread:$0]  %s18502_s0, 512, %s24_s10, [#allocation5], %s15788_s3, %s15788_s3, %s15789_s30  }
  0x36   :  { %s15790_s21 = smov [#allocation9]   ;;  %s15685_s25 = scalar_lea.hbm %s18504_s2, 4096 }
  0x37   :  { %s45_s22 = sshll.u32 %s15790_s21, 4  ;;  %p15686_p10 = scmp.ne.s32.totalorder %s18504_s2, %s15685_s25  ;;  %s46_s22 = int_to_ptr.vmem [resolvable:$true] %s45_s22 }
  0x38   :  { %p15689_p11 = scmp.lt.u32.totalorder %s15685_s25, %s18504_s2 }
  0x3a   :  { %p15691_p12 = pnand %p15689_p11, %p15686_p10 }
  0x3c   :  { %15694 = shalt.err (!%p15691_p12)
}
  0x3d   :  { %s15695_s11 = scalar_lea.vmem %s46_s22, 4096  ;;  %p15700_p0 = scmp.lt.s32.totalorder %s46_s22, %s46_s22 }
  0x3e   :  { %p15696_p13 = scmp.ne.s32.totalorder %s46_s22, %s15695_s11  ;;  %p15701_p1 = scmp.lt.s32.totalorder %s15695_s11, %s15695_s11 }
  0x40   :  { %p15702_p2 = por %p15701_p1, %p15700_p0 }
  0x42   :  { %p15703_p3 = pnand %p15702_p2, %p15696_p13 }
  0x44   :  { %15706 = shalt.err (!%p15703_p3)
}
  0x45   :  { %s15791_s0 = smov 256   ;;  %s15792_s10 = smov 16  }
  0x46   :  { %51 = dma.hbm_to_vmem [thread:$0]  %s18504_s2, 4096, %s46_s22, [#allocation8], %s15791_s0, %s15791_s0, %s15792_s10  }
  0x47   :  { %s15793_s14 = smov [#allocation12]   ;;  %s15794_s16 = smov [#allocation13]  }
  0x48   :  { %s71_s15 = sshll.u32 %s15793_s14, 4  ;;  %s83_s17 = sshll.u32 %s15794_s16, 4  ;;  %s72_s15 = int_to_ptr.vmem [resolvable:$true] %s71_s15  ;;  %s15906_s17 = int_to_ptr.vmem [resolvable:$true] %s83_s17 }
  0x49   :  { %s15707_s30 = scalar_lea.hbm %s18507_s5, 16384 }
  0x4a   :  { %p15708_p4 = scmp.ne.s32.totalorder %s18507_s5, %s15707_s30  ;;  %p15711_p5 = scmp.lt.u32.totalorder %s15707_s30, %s18507_s5 }
  0x4c   :  { %p15713_p6 = pnand %p15711_p5, %p15708_p4 }
  0x4e   :  { %15716 = shalt.err (!%p15713_p6)
}
  0x4f   :  { %s15717_s2 = scalar_lea.vmem %s72_s15, 16384  ;;  %p15722_p8 = scmp.lt.s32.totalorder %s72_s15, %s72_s15 }
  0x50   :  { %p15718_p7 = scmp.ne.s32.totalorder %s72_s15, %s15717_s2  ;;  %p15723_p9 = scmp.lt.s32.totalorder %s15717_s2, %s15717_s2 }
  0x52   :  { %p15724_p10 = por %p15723_p9, %p15722_p8 }
  0x54   :  { %p15725_p11 = pnand %p15724_p10, %p15718_p7 }
  0x56   :  { %15728 = shalt.err (!%p15725_p11)
}
  0x57   :  { %77 = dma.hbm_to_vmem [thread:$0]  %s18507_s5, 16384, %s72_s15, [#allocation11], %s15785_s1, %s15785_s1, %s15786_s27  }
  0x58   :  { %s15729_s28 = scalar_lea.hbm %s18508_s6, 8192 }
  0x59   :  { %p15730_p12 = scmp.ne.s32.totalorder %s18508_s6, %s15729_s28  ;;  %p15733_p13 = scmp.lt.u32.totalorder %s15729_s28, %s18508_s6 }
  0x5b   :  { %p15735_p0 = pnand %p15733_p13, %p15730_p12 }
  0x5d   :  { %15738 = shalt.err (!%p15735_p0)
}
  0x5e   :  { %s15739_s10 = scalar_lea.vmem %s15906_s17, 8192  ;;  %p15744_p2 = scmp.lt.s32.totalorder %s15906_s17, %s15906_s17 }
  0x5f   :  { %p15740_p1 = scmp.ne.s32.totalorder %s15906_s17, %s15739_s10  ;;  %p15745_p3 = scmp.lt.s32.totalorder %s15739_s10, %s15739_s10 }
  0x61   :  { %p15746_p4 = por %p15745_p3, %p15744_p2 }
  0x63   :  { %p15747_p5 = pnand %p15746_p4, %p15740_p1 }
  0x65   :  { %15750 = shalt.err (!%p15747_p5)
}
  0x66   :  { %89 = dma.hbm_to_vmem [thread:$0]  %s18508_s6, 8192, %s15906_s17, [#allocation14], %s15785_s1, %s15785_s1, %s15786_s27  }
  0x67   :  { %15773 = dma.done.wait [#allocation5], 512  }
  0x68   :  { %15774 = vsyncadd [#allocation5], 4294966784 }
  0x69   :  { %15775 = dma.done.wait [#allocation8], 4224  }
  0x6a   :  { %15776 = vsyncadd [#allocation8], 4294963072 }
  0x6b   :  { %15777 = dma.done.wait [#allocation11], 24576  }
  0x6c   :  { %15778 = vsyncadd [#allocation11], 4294942720 }
  0x6d   :  { %15779 = dma.done.wait [#allocation14], 8192  }
  0x6e   :  { %15780 = vsyncadd [#allocation14], 4294959104  ;;  %v15795_v0 = vmov 0   ;;  %v15055_v1 = vld [vmem:[#allocation9 + $0x4] ss:$16 sps:$4 sm:$0xff]   ;;  %v540_v31 = vld [vmem:[#allocation10 + $0x8] sm:$0xff] }
  0x6f   :  { %389 = vmatprep.mubr.bf16.mxu0 %v15795_v0  ;;  %462 = vmatprep.mubr.bf16.mxu1 %v15795_v0  ;;  %v15057_v2 = vld [vmem:[#allocation9 + $0xc] ss:$16 sps:$4 sm:$0xff]   ;;  %v15059_v3 = vld [vmem:[#allocation9] ss:$16 sps:$4 sm:$0xff]   ;;  %v15060_v4 = vld [vmem:[#allocation9 + $0x8] ss:$16 sps:$4 sm:$0xff]  }
  0x70   :  { %357 = vmatprep.subr.bf16.mxu0 %v15055_v1  ;;  %430 = vmatprep.subr.bf16.mxu1 %v15057_v2  ;;  %v15061_v5 = vld [vmem:[#allocation9 + $0x24] ss:$16 sps:$4 sm:$0xff]   ;;  %v15063_v6 = vld [vmem:[#allocation9 + $0x2c] ss:$16 sps:$4 sm:$0xff]   ;;  %v15065_v7 = vld [vmem:[#allocation9 + $0x20] ss:$16 sps:$4 sm:$0xff]  }
  0x71   :  { %358 = vmatpush1.bf16.msra.mxu0 %v15059_v3  ;;  %431 = vmatpush1.bf16.msra.mxu1 %v15060_v4  ;;  %v15066_v8 = vld [vmem:[#allocation9 + $0x28] ss:$16 sps:$4 sm:$0xff]   ;;  %v15067_v9 = vld [vmem:[#allocation9 + $0x44] ss:$16 sps:$4 sm:$0xff]   ;;  %v15069_v10 = vld [vmem:[#allocation9 + $0x4c] ss:$16 sps:$4 sm:$0xff]  }
  0x72   :  { %359 = vmatprep.subr.bf16.mxu0 %v15061_v5  ;;  %432 = vmatprep.subr.bf16.mxu1 %v15063_v6  ;;  %v15071_v11 = vld [vmem:[#allocation9 + $0x40] ss:$16 sps:$4 sm:$0xff]   ;;  %v15072_v12 = vld [vmem:[#allocation9 + $0x48] ss:$16 sps:$4 sm:$0xff]   ;;  %v15073_v13 = vld [vmem:[#allocation9 + $0x64] ss:$16 sps:$4 sm:$0xff]  }
  0x73   :  { %v15075_v14 = vld [vmem:[#allocation9 + $0x6c] ss:$16 sps:$4 sm:$0xff]   ;;  %v15077_v15 = vld [vmem:[#allocation9 + $0x60] ss:$16 sps:$4 sm:$0xff]   ;;  %v15078_v16 = vld [vmem:[#allocation9 + $0x68] ss:$16 sps:$4 sm:$0xff]  }
  0x74   :  { %v15079_v17 = vld [vmem:[#allocation9 + $0x84] ss:$16 sps:$4 sm:$0xff]   ;;  %v15081_v18 = vld [vmem:[#allocation9 + $0x8c] ss:$16 sps:$4 sm:$0xff]   ;;  %v15083_v19 = vld [vmem:[#allocation9 + $0x80] ss:$16 sps:$4 sm:$0xff]  }
  0x75   :  { %360 = vmatpush1.bf16.msra.mxu0 %v15065_v7  ;;  %433 = vmatpush1.bf16.msra.mxu1 %v15066_v8  ;;  %v15084_v20 = vld [vmem:[#allocation9 + $0x88] ss:$16 sps:$4 sm:$0xff]   ;;  %v15085_v21 = vld [vmem:[#allocation9 + $0xa4] ss:$16 sps:$4 sm:$0xff]   ;;  %v15087_v22 = vld [vmem:[#allocation9 + $0xac] ss:$16 sps:$4 sm:$0xff]  }
  0x76   :  { %361 = vmatprep.subr.bf16.mxu0 %v15067_v9  ;;  %434 = vmatprep.subr.bf16.mxu1 %v15069_v10  ;;  %v15089_v23 = vld [vmem:[#allocation9 + $0xa0] ss:$16 sps:$4 sm:$0xff]   ;;  %v15090_v24 = vld [vmem:[#allocation9 + $0xa8] ss:$16 sps:$4 sm:$0xff]   ;;  %v15091_v25 = vld [vmem:[#allocation9 + $0xc4] ss:$16 sps:$4 sm:$0xff]  }
  0x77   :  { %v15093_v26 = vld [vmem:[#allocation9 + $0xcc] ss:$16 sps:$4 sm:$0xff]   ;;  %v15095_v27 = vld [vmem:[#allocation9 + $0xc0] ss:$16 sps:$4 sm:$0xff]   ;;  %v15096_v28 = vld [vmem:[#allocation9 + $0xc8] ss:$16 sps:$4 sm:$0xff]  }
  0x78   :  { %v15097_v29 = vld [vmem:[#allocation9 + $0xe4] ss:$16 sps:$4 sm:$0xff]   ;;  %v15099_v30 = vld [vmem:[#allocation9 + $0xec] ss:$16 sps:$4 sm:$0xff]   ;;  %v15101_v35 = vld [vmem:[#allocation9 + $0xe0] ss:$16 sps:$4 sm:$0xff]  }
  0x79   :  { %362 = vmatpush1.bf16.msra.mxu0 %v15071_v11  ;;  %435 = vmatpush1.bf16.msra.mxu1 %v15072_v12  ;;  %v544_v32 = vld [vmem:[#allocation10 + $0x28] sm:$0xff]  ;;  %v542_v33 = vld [vmem:[#allocation10 + $0x18] sm:$0xff]  ;;  %v539_v37 = vld [vmem:[#allocation10] sm:$0xff]  ;;  %vm879_vm0 = vcmask 1040384   ;;  %vm880_vm1 = vsmask.f32 256 }
  0x7a   :  { %363 = vmatprep.subr.bf16.mxu0 %v15073_v13  ;;  %436 = vmatprep.subr.bf16.mxu1 %v15075_v14  ;;  %v546_v34 = vld [vmem:[#allocation10 + $0x38] sm:$0xff]  ;;  %v543_v38 = vld [vmem:[#allocation10 + $0x20] sm:$0xff]  ;;  %v15945_v39 = vpack.c.bf16 %v544_v32, %v540_v31  ;;  %v541_v41 = vld [vmem:[#allocation10 + $0x10] sm:$0xff]  ;;  %vm1250_vm3 = vsmask.f32 7938  ;;  %vm1620_vm5 = vcmask 1041409  }
  0x7b   :  { %v15102_v36 = vld [vmem:[#allocation9 + $0xe8] ss:$16 sps:$4 sm:$0xff]   ;;  %v15947_v40 = vpack.c.bf16 %v546_v34, %v542_v33  ;;  %v545_v42 = vld [vmem:[#allocation10 + $0x30] sm:$0xff]  ;;  %v547_v48 = vld [vmem:[#allocation10 + $0x40] sm:$0xff]  ;;  %v15949_v49 = vpack.c.bf16 %v543_v38, %v539_v37  ;;  %vm1621_vm6 = vsmask.f32 1280 }
  0x7c   :  { %v548_v43 = vld [vmem:[#allocation10 + $0x48] sm:$0xff]  ;;  %v550_v45 = vld [vmem:[#allocation10 + $0x58] sm:$0xff]  ;;  %v15951_v50 = vpack.c.bf16 %v545_v42, %v541_v41  ;;  %v551_v51 = vld [vmem:[#allocation10 + $0x60] sm:$0xff]  ;;  %vm1991_vm8 = vsmask.f32 7942  ;;  %vm2361_vm10 = vcmask 1042434  }
  0x7d   :  { %364 = vmatpush1.bf16.msra.mxu0 %v15077_v15  ;;  %437 = vmatpush1.bf16.msra.mxu1 %v15078_v16  ;;  %v552_v44 = vld [vmem:[#allocation10 + $0x68] sm:$0xff]  ;;  %v554_v46 = vld [vmem:[#allocation10 + $0x78] sm:$0xff]  ;;  %v549_v52 = vld [vmem:[#allocation10 + $0x50] sm:$0xff]  ;;  %v15961_v60 = vpack.c.bf16 %v551_v51, %v547_v48  ;;  %vm2362_vm11 = vsmask.f32 2304  ;;  %vm3102_vm15 = vcmask 1043459  }
  0x7e   :  { %365 = vmatprep.subr.bf16.mxu0 %v15079_v17  ;;  %438 = vmatprep.subr.bf16.mxu1 %v15081_v18  ;;  %v15103_v47 = vld [vmem:[#allocation4] sm:$0xff]   ;;  %v553_v53 = vld [vmem:[#allocation10 + $0x70] sm:$0xff]  ;;  %v15955_v54 = vpack.c.bf16 %v552_v44, %v548_v43  ;;  %v15957_v55 = vpack.c.bf16 %v554_v46, %v550_v45  ;;  %v556_v56 = vld [vmem:[#allocation10 + $0x88] sm:$0xff]  ;;  %vm2732_vm13 = vsmask.f32 7946 }
  0x7f   :  { %v560_v57 = vld [vmem:[#allocation10 + $0xa8] sm:$0xff]  ;;  %v558_v58 = vld [vmem:[#allocation10 + $0x98] sm:$0xff]  ;;  %v15963_v61 = vpack.c.bf16 %v553_v53, %v549_v52  ;;  %v555_v62 = vld [vmem:[#allocation10 + $0x80] sm:$0xff] }
  0x80   :  { %v562_v59 = vld [vmem:[#allocation10 + $0xb8] sm:$0xff]  ;;  %v559_v63 = vld [vmem:[#allocation10 + $0xa0] sm:$0xff]  ;;  %v15967_v1 = vpack.c.bf16 %v560_v57, %v556_v56  ;;  %v557_v3 = vld [vmem:[#allocation10 + $0x90] sm:$0xff] }
  0x81   :  { %366 = vmatpush1.bf16.msra.mxu0 %v15083_v19  ;;  %439 = vmatpush1.bf16.msra.mxu1 %v15084_v20  ;;  %v15969_v2 = vpack.c.bf16 %v562_v59, %v558_v58  ;;  %v561_v4 = vld [vmem:[#allocation10 + $0xb0] sm:$0xff]  ;;  %v564_v5 = vld [vmem:[#allocation10 + $0xc8] sm:$0xff]  ;;  %v566_v7 = vld [vmem:[#allocation10 + $0xd8] sm:$0xff]  ;;  %v15975_v11 = vpack.c.bf16 %v559_v63, %v555_v62 }
  0x82   :  { %367 = vmatprep.subr.bf16.mxu0 %v15085_v21  ;;  %440 = vmatprep.subr.bf16.mxu1 %v15087_v22  ;;  %v568_v6 = vld [vmem:[#allocation10 + $0xe8] sm:$0xff]  ;;  %v570_v8 = vld [vmem:[#allocation10 + $0xf8] sm:$0xff]  ;;  %v15104_v9 = vld [vmem:[#allocation4 + $0x8] sm:$0xff]   ;;  %v15977_v12 = vpack.c.bf16 %v561_v4, %v557_v3 }
  0x83   :  { %v563_v10 = vld [vmem:[#allocation10 + $0xc0] sm:$0xff]  ;;  %v15981_v14 = vpack.c.bf16 %v568_v6, %v564_v5  ;;  %v15983_v15 = vpack.c.bf16 %v570_v8, %v566_v7  ;;  %v565_v16 = vld [vmem:[#allocation10 + $0xd0] sm:$0xff]  ;;  %v572_v18 = vld [vmem:[#allocation10 + $0x108] sm:$0xff] }
  0x84   :  { %v567_v13 = vld [vmem:[#allocation10 + $0xe0] sm:$0xff]  ;;  %v569_v17 = vld [vmem:[#allocation10 + $0xf0] sm:$0xff]  ;;  %v576_v19 = vld [vmem:[#allocation10 + $0x128] sm:$0xff] }
  0x85   :  { %368 = vmatpush1.bf16.msra.mxu0 %v15089_v23  ;;  %441 = vmatpush1.bf16.msra.mxu1 %v15090_v24  ;;  %v574_v20 = vld [vmem:[#allocation10 + $0x118] sm:$0xff]  ;;  %v15987_v22 = vpack.c.bf16 %v567_v13, %v563_v10  ;;  %v15989_v23 = vpack.c.bf16 %v569_v17, %v565_v16  ;;  %v571_v24 = vld [vmem:[#allocation10 + $0x100] sm:$0xff]  ;;  %v584_v31 = vld [vmem:[#allocation10 + $0x168] sm:$0xff] }
  0x86   :  { %369 = vmatprep.subr.bf16.mxu0 %v15091_v25  ;;  %442 = vmatprep.subr.bf16.mxu1 %v15093_v26  ;;  %v578_v21 = vld [vmem:[#allocation10 + $0x138] sm:$0xff]  ;;  %v575_v25 = vld [vmem:[#allocation10 + $0x120] sm:$0xff]  ;;  %v15993_v26 = vpack.c.bf16 %v576_v19, %v572_v18  ;;  %v15105_v34 = vld [vmem:[#allocation4 + $0x10] sm:$0xff]  }
  0x87   :  { %v582_v32 = vld [vmem:[#allocation10 + $0x158] sm:$0xff]  ;;  %v579_v37 = vld [vmem:[#allocation10 + $0x140] sm:$0xff]  ;;  %v581_v43 = vld [vmem:[#allocation10 + $0x150] sm:$0xff] }
  0x88   :  { %v586_v33 = vld [vmem:[#allocation10 + $0x178] sm:$0xff]  ;;  %v583_v38 = vld [vmem:[#allocation10 + $0x160] sm:$0xff]  ;;  %v585_v44 = vld [vmem:[#allocation10 + $0x170] sm:$0xff] }
  0x89   :  { %370 = vmatpush1.bf16.msra.mxu0 %v15095_v27  ;;  %443 = vmatpush1.bf16.msra.mxu1 %v15096_v28  ;;  %v15995_v27 = vpack.c.bf16 %v578_v21, %v574_v20  ;;  %v573_v28 = vld [vmem:[#allocation10 + $0x110] sm:$0xff]  ;;  %v16009_v42 = vpack.c.bf16 %v586_v33, %v582_v32  ;;  %v588_v45 = vld [vmem:[#allocation10 + $0x188] sm:$0xff]  ;;  %v594_v48 = vld [vmem:[#allocation10 + $0x1b8] sm:$0xff]  ;;  %v16013_v51 = vpack.c.bf16 %v583_v38, %v579_v37  ;;  %v18514_v20 = vmov 0.0  }
  0x8a   :  { %371 = vmatprep.subr.bf16.mxu0 %v15097_v29  ;;  %444 = vmatprep.subr.bf16.mxu1 %v15099_v30  ;;  %v577_v29 = vld [vmem:[#allocation10 + $0x130] sm:$0xff]  ;;  %v580_v30 = vld [vmem:[#allocation10 + $0x148] sm:$0xff]  ;;  %v16015_v52 = vpack.c.bf16 %v585_v44, %v581_v43  ;;  %v587_v53 = vld [vmem:[#allocation10 + $0x180] sm:$0xff]  ;;  %v153_v21 = vlaneseq }
  0x8b   :  { %v16007_v41 = vpack.c.bf16 %v584_v31, %v580_v30  ;;  %v592_v46 = vld [vmem:[#allocation10 + $0x1a8] sm:$0xff]  ;;  %v591_v56 = vld [vmem:[#allocation10 + $0x1a0] sm:$0xff]  ;;  %v589_v59 = vld [vmem:[#allocation10 + $0x190] sm:$0xff] }
  0x8c   :  { %v16019_v57 = vpack.c.bf16 %v592_v46, %v588_v45  ;;  %v593_v62 = vld [vmem:[#allocation10 + $0x1b0] sm:$0xff]  ;;  %v596_v63 = vld [vmem:[#allocation10 + $0x1c8] sm:$0xff]  ;;  %v598_v4 = vld [vmem:[#allocation10 + $0x1d8] sm:$0xff]  ;;  %v16027_v7 = vpack.c.bf16 %v591_v56, %v587_v53 }
  0x8d   :  { %372 = vmatpush1.bf16.msra.mxu0 %v15101_v35  ;;  %445 = vmatpush1.bf16.msra.mxu1 %v15102_v36  ;;  %v16001_v35 = vpack.c.bf16 %v575_v25, %v571_v24  ;;  %v16003_v36 = vpack.c.bf16 %v577_v29, %v573_v28  ;;  %v600_v3 = vld [vmem:[#allocation10 + $0x1e8] sm:$0xff]  ;;  %v602_v5 = vld [vmem:[#allocation10 + $0x1f8] sm:$0xff]  ;;  %v15106_v6 = vld [vmem:[#allocation4 + $0x18] sm:$0xff]   ;;  %v16029_v8 = vpack.c.bf16 %v593_v62, %v589_v59  ;;  %v16087_v24 = vshrl.u32 %v153_v21, 7 }
  0x8e   :  { %13948 = vmatprep.subr.bf16.mxu0 %v15945_v39  ;;  %13980 = vmatprep.subr.bf16.mxu1 %v15947_v40  ;;  %v16033_v10 = vpack.c.bf16 %v600_v3, %v596_v63  ;;  %v599_v13 = vld [vmem:[#allocation10 + $0x1e0] sm:$0xff]  ;;  %v597_v16 = vld [vmem:[#allocation10 + $0x1d0] sm:$0xff]  ;;  %v151_v30 = vld [vmem:[%s18506_s4] sm:$0xf] }
  0x8f   :  { %v601_v17 = vld [vmem:[#allocation10 + $0x1f0] sm:$0xff]  ;;  %v18512_v25 = vsub.s32 2, %v16087_v24  ;;  %v18511_v28 = vsub.s32 3, %v16087_v24  ;;  %v16092_v29 = vsub.s32 0, %v16087_v24  ;;  %v18513_v31 = vsub.s32 1, %v16087_v24  ;;  %vm16210_vm2 = vmand %vm879_vm0, %vm880_vm1 }
  0x90   :  { %390 = vmatmul.mubr.bf16.vlgmr.msra.gmra.mrb[0].mxu0 %v15103_v47  ;;  %463 = vmatmul.mubr.bf16.vlgmr.msra.gmra.mrb[0].mxu1 %v15103_v47  ;;  %v590_v47 = vld [vmem:[#allocation10 + $0x198] sm:$0xff]  ;;  %v16041_v19 = vpack.c.bf16 %v601_v17, %v597_v16  ;;  %vm16274_vm4 = vmand %vm879_vm0, %vm1250_vm3  ;;  %vm3103_vm0 = vsmask.f32 3328 }
  0x91   :  { %13950 = vmatpush1.bf16.msra.mxu0 %v15949_v49  ;;  %13982 = vmatpush1.bf16.msra.mxu1 %v15951_v50  ;;  %v16021_v58 = vpack.c.bf16 %v594_v48, %v590_v47  ;;  %18544 = vst [vmem:[#allocation21_spill] sm:$0xff] %v16092_v29  ;;  %v16108_v33 = vrot.slane %v151_v30, %v18511_v28  ;;  %vm16422_vm7 = vmand %vm1620_vm5, %vm1621_vm6  ;;  %vm4327_vm6 = vcmask 1043456  }
  0x92   :  { %13952 = vmatprep.subr.bf16.mxu0 %v15955_v54  ;;  %13984 = vmatprep.subr.bf16.mxu1 %v15957_v55  ;;  %v160_v43 = vrot.slane %v151_v30, %v18513_v31  ;;  %vm16496_vm9 = vmand %vm1620_vm5, %vm1991_vm8  ;;  %vm4323_vm8 = vcmask 64512  }
  0x93   :  { %399 = vmatprep.mubr.bf16.mxu0 %v15795_v0  ;;  %472 = vmatprep.mubr.bf16.mxu1 %v15795_v0  ;;  %vm16560_vm12 = vmand %vm2361_vm10, %vm2362_vm11  ;;  %vm4714_vm11 = vcmask 1045509  }
  0x94   :  { %vm16708_vm14 = vmand %vm2361_vm10, %vm2732_vm13  ;;  %vm4720_vm13 = vcmask 1047559  }
  0x95   :  { %13954 = vmatpush1.bf16.msra.mxu0 %v15961_v60  ;;  %13986 = vmatpush1.bf16.msra.mxu1 %v15963_v61  ;;  %vm16771_vm1 = vmand %vm3102_vm15, %vm3103_vm0 }
  0x96   :  { %13956 = vmatprep.subr.bf16.mxu0 %v15967_v1  ;;  %13988 = vmatprep.subr.bf16.mxu1 %v15969_v2 }
  0x98   :  { %400 = vmatmul.mubr.bf16.gmra.mrb[4].mxu0 %v15104_v9  ;;  %473 = vmatmul.mubr.bf16.gmra.mrb[4].mxu1 %v15104_v9  ;;  %v595_v9 = vld [vmem:[#allocation10 + $0x1c0] sm:$0xff] }
  0x99   :  { %13958 = vmatpush1.bf16.msra.mxu0 %v15975_v11  ;;  %13990 = vmatpush1.bf16.msra.mxu1 %v15977_v12  ;;  %v16039_v18 = vpack.c.bf16 %v599_v13, %v595_v9 }
  0x9a   :  { %13960 = vmatprep.subr.bf16.mxu0 %v15981_v14  ;;  %13992 = vmatprep.subr.bf16.mxu1 %v15983_v15 }
  0x9b   :  { %409 = vmatprep.mubr.bf16.mxu0 %v15795_v0  ;;  %482 = vmatprep.mubr.bf16.mxu1 %v15795_v0 }
  0x9d   :  { %13962 = vmatpush1.bf16.msra.mxu0 %v15987_v22  ;;  %13994 = vmatpush1.bf16.msra.mxu1 %v15989_v23 }
  0x9e   :  { %13964 = vmatprep.subr.bf16.mxu0 %v15993_v26  ;;  %13996 = vmatprep.subr.bf16.mxu1 %v15995_v27 }
  0xa0   :  { %410 = vmatmul.mubr.bf16.gmra.mrb[8].mxu0 %v15105_v34  ;;  %483 = vmatmul.mubr.bf16.gmra.mrb[8].mxu1 %v15105_v34  ;;  %v156_v34 = vrot.slane %v151_v30, %v16092_v29 }
  0xa1   :  { %13966 = vmatpush1.bf16.msra.mxu0 %v16001_v35  ;;  %13998 = vmatpush1.bf16.msra.mxu1 %v16003_v36 }
  0xa2   :  { %13968 = vmatprep.subr.bf16.mxu0 %v16007_v41  ;;  %14000 = vmatprep.subr.bf16.mxu1 %v16009_v42 }
  0xa3   :  { %419 = vmatprep.mubr.bf16.mxu0 %v15795_v0  ;;  %492 = vmatprep.mubr.bf16.mxu1 %v15795_v0  ;;  %v16035_v0 = vpack.c.bf16 %v602_v5, %v598_v4 }
  0xa5   :  { %13970 = vmatpush1.bf16.msra.mxu0 %v16013_v51  ;;  %14002 = vmatpush1.bf16.msra.mxu1 %v16015_v52 }
  0xa6   :  { %13972 = vmatprep.subr.bf16.mxu0 %v16019_v57  ;;  %14004 = vmatprep.subr.bf16.mxu1 %v16021_v58 }
  0xa8   :  { %420 = vmatmul.mubr.bf16.gmra.mrb[12].mxu0 %v15106_v6  ;;  %493 = vmatmul.mubr.bf16.gmra.mrb[12].mxu1 %v15106_v6 }
  0xa9   :  { %13974 = vmatpush1.bf16.msra.mxu0 %v16027_v7  ;;  %14006 = vmatpush1.bf16.msra.mxu1 %v16029_v8 }
  0xaa   :  { %13976 = vmatprep.subr.bf16.mxu0 %v16033_v10  ;;  %14008 = vmatprep.subr.bf16.mxu1 %v16035_v0 }
  0xab   :  { %667 = vmatprep.mubr.f32.mxu0 %v18514_v20  ;;  %738 = vmatprep.mubr.f32.mxu1 %v18514_v20 }
  0xad   :  { %13978 = vmatpush1.bf16.msra.mxu0 %v16039_v18  ;;  %14010 = vmatpush1.bf16.msra.mxu1 %v16041_v19 }
  0xae   :  { %14012 = vmatprep.subr.bf16.mxu0 %v15945_v39  ;;  %14044 = vmatprep.subr.bf16.mxu1 %v15947_v40 }
  0xb0   :  { %668 = vmatmul.mubr.f32.vlgmr.msra.gmra.mrb[16].mxu0 %v18514_v20  ;;  %739 = vmatmul.mubr.f32.vlgmr.msra.gmra.mrb[16].mxu1 %v18514_v20 }
  0xb1   :  { %14014 = vmatpush1.bf16.msra.mxu0 %v15949_v49  ;;  %14046 = vmatpush1.bf16.msra.mxu1 %v15951_v50 }
  0xb2   :  { %14016 = vmatprep.subr.bf16.mxu0 %v15955_v54  ;;  %14048 = vmatprep.subr.bf16.mxu1 %v15957_v55 }
  0xb3   :  { %1038 = vmatprep.mubr.f32.mxu0 %v18514_v20  ;;  %1109 = vmatprep.mubr.f32.mxu1 %v18514_v20 }
  0xb5   :  { %14018 = vmatpush1.bf16.msra.mxu0 %v15961_v60  ;;  %14050 = vmatpush1.bf16.msra.mxu1 %v15963_v61 }
  0xb6   :  { %14020 = vmatprep.subr.bf16.mxu0 %v15967_v1  ;;  %14052 = vmatprep.subr.bf16.mxu1 %v15969_v2 }
  0xb9   :  { %14022 = vmatpush1.bf16.msra.mxu0 %v15975_v11  ;;  %14054 = vmatpush1.bf16.msra.mxu1 %v15977_v12 }
  0xba   :  { %14024 = vmatprep.subr.bf16.mxu0 %v15981_v14  ;;  %14056 = vmatprep.subr.bf16.mxu1 %v15983_v15 }
  0xbd   :  { %14026 = vmatpush1.bf16.msra.mxu0 %v15987_v22  ;;  %14058 = vmatpush1.bf16.msra.mxu1 %v15989_v23 }
  0xbe   :  { %14028 = vmatprep.subr.bf16.mxu0 %v15993_v26  ;;  %14060 = vmatprep.subr.bf16.mxu1 %v15995_v27 }
  0xc1   :  { %14030 = vmatpush1.bf16.msra.mxu0 %v16001_v35  ;;  %14062 = vmatpush1.bf16.msra.mxu1 %v16003_v36 }
  0xc2   :  { %14032 = vmatprep.subr.bf16.mxu0 %v16007_v41  ;;  %14064 = vmatprep.subr.bf16.mxu1 %v16009_v42 }
  0xc5   :  { %14034 = vmatpush1.bf16.msra.mxu0 %v16013_v51  ;;  %14066 = vmatpush1.bf16.msra.mxu1 %v16015_v52 }
  0xc6   :  { %14036 = vmatprep.subr.bf16.mxu0 %v16019_v57  ;;  %14068 = vmatprep.subr.bf16.mxu1 %v16021_v58 }
  0xc9   :  { %14038 = vmatpush1.bf16.msra.mxu0 %v16027_v7  ;;  %14070 = vmatpush1.bf16.msra.mxu1 %v16029_v8 }
  0xca   :  { %14040 = vmatprep.subr.bf16.mxu0 %v16033_v10  ;;  %14072 = vmatprep.subr.bf16.mxu1 %v16035_v0 }
  0xcd   :  { %14042 = vmatpush1.bf16.msra.mxu0 %v16039_v18  ;;  %14074 = vmatpush1.bf16.msra.mxu1 %v16041_v19 }
  0xce   :  { %14076 = vmatprep.subr.bf16.mxu0 %v15945_v39  ;;  %14108 = vmatprep.subr.bf16.mxu1 %v15947_v40  ;;  %v16100_v39 = vrot.slane %v151_v30, %v18512_v25 }
 0x163   :  { %v16102_v40 = vpop.f32.mrb[0].mxu0  ;;  %v16104_v32 = vpop.f32.mrb[0].mxu1 }
 0x164   :  { %v393_v37 = vpop.f32.mrb[1].mxu0  ;;  %v466_v38 = vpop.f32.mrb[1].mxu1 }
 0x165   :  { %v395_v44 = vpop.f32.mrb[2].mxu0  ;;  %v468_v45 = vpop.f32.mrb[2].mxu1 }
 0x166   :  { %v16113_v46 = vadd.f32 %v395_v44, %v156_v34  ;;  %v397_v47 = vpop.f32.mrb[3].mxu0  ;;  %v16116_v48 = vadd.f32 %v468_v45, %v16100_v39  ;;  %v470_v53 = vpop.f32.mrb[3].mxu1 }
 0x167   :  { %v16118_v56 = vadd.f32 %v397_v47, %v160_v43  ;;  %v16121_v59 = vadd.f32 %v470_v53, %v16108_v33 }
 0x16b   :  { %v401_v62 = vpop.f32.mrb[4].mxu0  ;;  %v474_v63 = vpop.f32.mrb[4].mxu1 }
 0x16c   :  { %v16123_v3 = vadd.f32 %v401_v62, %v156_v34  ;;  %v403_v4 = vpop.f32.mrb[5].mxu0  ;;  %v16126_v5 = vadd.f32 %v474_v63, %v16100_v39  ;;  %v476_v6 = vpop.f32.mrb[5].mxu1 }
 0x16d   :  { %v16128_v9 = vadd.f32 %v403_v4, %v160_v43  ;;  %v405_v13 = vpop.f32.mrb[6].mxu0  ;;  %v16131_v16 = vadd.f32 %v476_v6, %v16108_v33  ;;  %v478_v17 = vpop.f32.mrb[6].mxu1 }
 0x16e   :  { %v16133_v21 = vadd.f32 %v405_v13, %v156_v34  ;;  %v407_v30 = vpop.f32.mrb[7].mxu0  ;;  %v16136_v44 = vadd.f32 %v478_v17, %v16100_v39  ;;  %v480_v45 = vpop.f32.mrb[7].mxu1 }
 0x16f   :  { %v16138_v47 = vadd.f32 %v407_v30, %v160_v43  ;;  %v16141_v53 = vadd.f32 %v480_v45, %v16108_v33 }
 0x170   :  { %18545 = vst [vmem:[#allocation22_spill] sm:$0xff] %v16136_v44 }
 0x171   :  { %18546 = vst [vmem:[#allocation23_spill] sm:$0xff] %v16138_v47  ;;  %18547 = vst [vmem:[#allocation24_spill] sm:$0xff] %v16141_v53 }
 0x173   :  { %v411_v62 = vpop.f32.mrb[8].mxu0  ;;  %v484_v63 = vpop.f32.mrb[8].mxu1 }
 0x174   :  { %v16143_v4 = vadd.f32 %v411_v62, %v156_v34  ;;  %v413_v28 = vpop.f32.mrb[9].mxu0  ;;  %v16146_v6 = vadd.f32 %v484_v63, %v16100_v39  ;;  %v486_v13 = vpop.f32.mrb[9].mxu1 }
 0x175   :  { %v16148_v25 = vadd.f32 %v413_v28, %v160_v43  ;;  %v415_v31 = vpop.f32.mrb[10].mxu0  ;;  %v16151_v17 = vadd.f32 %v486_v13, %v16108_v33  ;;  %v488_v30 = vpop.f32.mrb[10].mxu1 }
 0x176   :  { %18548 = vst [vmem:[#allocation25_spill] sm:$0xff] %v16143_v4  ;;  %18549 = vst [vmem:[#allocation26_spill] sm:$0xff] %v16146_v6  ;;  %v16153_v20 = vadd.f32 %v415_v31, %v156_v34  ;;  %v417_v45 = vpop.f32.mrb[11].mxu0  ;;  %v16156_v29 = vadd.f32 %v488_v30, %v16100_v39  ;;  %v490_v62 = vpop.f32.mrb[11].mxu1 }
 0x177   :  { %18550 = vst [vmem:[#allocation27_spill] sm:$0xff] %v16148_v25  ;;  %18551 = vst [vmem:[#allocation28_spill] sm:$0xff] %v16151_v17  ;;  %v16158_v4 = vadd.f32 %v417_v45, %v160_v43  ;;  %v16161_v63 = vadd.f32 %v490_v62, %v16108_v33 }
 0x178   :  { %18552 = vst [vmem:[#allocation29_spill] sm:$0xff] %v16153_v20  ;;  %18553 = vst [vmem:[#allocation30_spill] sm:$0xff] %v16156_v29 }
 0x179   :  { %18554 = vst [vmem:[#allocation31_spill] sm:$0xff] %v16158_v4  ;;  %18555 = vst [vmem:[#allocation32_spill] sm:$0xff] %v16161_v63 }
 0x17b   :  { %v421_v6 = vpop.f32.mrb[12].mxu0  ;;  %v494_v28 = vpop.f32.mrb[12].mxu1 }
 0x17c   :  { %v16163_v25 = vadd.f32 %v421_v6, %v156_v34  ;;  %v423_v53 = vpop.f32.mrb[13].mxu0  ;;  %v16166_v13 = vadd.f32 %v494_v28, %v16100_v39  ;;  %v496_v31 = vpop.f32.mrb[13].mxu1 }
 0x17d   :  { %v16168_v20 = vadd.f32 %v423_v53, %v160_v43  ;;  %v425_v17 = vpop.f32.mrb[14].mxu0  ;;  %v16171_v30 = vadd.f32 %v496_v31, %v16108_v33  ;;  %v498_v45 = vpop.f32.mrb[14].mxu1  ;;  %v392_v53 = vadd.f32 %v16102_v40, %v156_v34  ;;  %v394_v31 = vadd.f32 %v393_v37, %v160_v43 }
 0x17e   :  { %18556 = vst [vmem:[#allocation33_spill] sm:$0xff] %v16163_v25  ;;  %18557 = vst [vmem:[#allocation34_spill] sm:$0xff] %v16166_v13  ;;  %v16173_v4 = vadd.f32 %v425_v17, %v156_v34  ;;  %v427_v62 = vpop.f32.mrb[15].mxu0  ;;  %v16176_v63 = vadd.f32 %v498_v45, %v16100_v39  ;;  %v500_v6 = vpop.f32.mrb[15].mxu1 }
 0x17f   :  { %18558 = vst [vmem:[#allocation35_spill] sm:$0xff] %v16168_v20  ;;  %18559 = vst [vmem:[#allocation36_spill] sm:$0xff] %v16171_v30  ;;  %v16178_v25 = vadd.f32 %v427_v62, %v160_v43  ;;  %v16181_v28 = vadd.f32 %v500_v6, %v16108_v33  ;;  %v465_v20 = vadd.f32 %v16104_v32, %v16100_v39 }
 0x180   :  { %18560 = vst [vmem:[#allocation37_spill] sm:$0xff] %v16173_v4  ;;  %18561 = vst [vmem:[#allocation38_spill] sm:$0xff] %v16176_v63  ;;  %v467_v30 = vadd.f32 %v466_v38, %v16108_v33 }
 0x181   :  { %18562 = vst [vmem:[#allocation39_spill] sm:$0xff] %v16178_v25 }
 0x183   :  { %v669_v17 = vpop.f32.mrb[16].mxu0  ;;  %v740_v4 = vpop.f32.mrb[16].mxu1 }
 0x184   :  { %v745_v13 = vadd.f32 %v669_v17, %v392_v53  ;;  %v747_v29 = vadd.f32 %v740_v4, %v465_v20  ;;  %v671_v45 = vpop.f32.mrb[17].mxu0  ;;  %v742_v63 = vpop.f32.mrb[17].mxu1  ;;  %v15798_v53 = vmov 286326784  }
 0x185   :  { %v746_v47 = vadd.f32 %v671_v45, %v394_v31  ;;  %v748_v62 = vadd.f32 %v742_v63, %v467_v30  ;;  %v816_v31 = vunpack.c.l.s4 %v15798_v53  ;;  %v894_v53 = vld [vmem:[#allocation3 + $0x10] sm:$0x1] }
 0x186   :  { %v12731_v25 = vmul.f32 -1.442695, %v745_v13  ;;  %v12733_v6 = vmul.f32 -1.442695, %v747_v29 }
 0x187   :  { %v12732_v44 = vmul.f32 -1.442695, %v746_v47 }
 0x188   :  { %15107 = vpow2.f32 %v12731_v25  ;;  %v15797_v25 = vmov 1966171168  }
 0x189   :  { %15109 = vpow2.f32 %v12732_v44  ;;  %v776_v29 = vunpack.c.l.s4 %v15797_v25 }
 0x18a   :  { %15111 = vtanh.f32 %v748_v62 }
 0x18b   :  { %15113 = vpow2.f32 %v12733_v6  ;;  %v777_v44 = vunpack.c.0.s8 %v776_v29  ;;  %v817_v6 = vunpack.c.0.s8 %v816_v31 }
 0x18d   :  { %v16191_v45 = vsub.s32 %v777_v44, %v16087_v24 }
 0x18f   :  { %18563 = vst [vmem:[#allocation40_spill] sm:$0xff] %v16191_v45 }
 0x192   :  { %v15108_v40 = vpop.eup %15107 }
 0x193   :  { %v758_v34 = vadd.f32 1.0, %v15108_v40  ;;  %v15110_v39 = vpop.eup %15109 }
 0x194   :  { %v759_v32 = vadd.f32 1.0, %v15110_v39  ;;  %v15112_v33 = vpop.eup %15111 }
 0x195   :  { %15115 = vrcp.f32 %v758_v34  ;;  %v15114_v37 = vpop.eup %15113  ;;  %v18564_v34 = vmov 0.0  }
 0x196   :  { %15117 = vrcp.f32 %v759_v32  ;;  %v760_v4 = vadd.f32 1.0, %v15114_v37 }
 0x198   :  { %15119 = vrcp.f32 %v760_v4 }
 0x19f   :  { %v15116_v20 = vpop.eup %15115 }
 0x1a0   :  { %v769_v38 = vmul.f32 %v15116_v20, %v15112_v33  ;;  %v15118_v43 = vpop.eup %15117  ;;  %v16202_v33 = vsub.s32 %v817_v6, %v16087_v24  ;;  %v897_v6 = vld [vmem:[#allocation3 + $0x14] sm:$0x1] }
 0x1a1   :  { %v768_v63 = vmul.f32 0.0, %v15118_v43 }
 0x1a2   :  { %v15120_v47 = vpop.eup %15119 }
 0x1a3   :  { %v16187_v13 = vadd.f32 %v769_v38, %v768_v63 }
 0x1a5   :  { %15121 = vtanh.f32 %v16187_v13 }
 0x1af   :  { %v15122_v30 = vpop.eup %15121 }
 0x1b0   :  { %v772_v17 = vmul.f32 %v15122_v30, %v15120_v47  ;;  %v885_v47 = vld [vmem:[#allocation3 + $0x4] sm:$0x1]  ;;  %v888_v30 = vld [vmem:[#allocation3 + $0x8] sm:$0x1] }
 0x1b2   :  { %v773_v62 = vpack.c.bf16 %v772_v17, %v772_v17  ;;  %1039 = vmatmul.mubr.f32.vlgmr.msra.gmra.mrb[18].mxu0 %v772_v17  ;;  %1110 = vmatmul.mubr.f32.vlgmr.msra.gmra.mrb[18].mxu1 %v772_v17 }
 0x1b3   :  { %14078 = vmatpush1.bf16.msra.mxu0 %v15949_v49  ;;  %14110 = vmatpush1.bf16.msra.mxu1 %v15951_v50 }
 0x1b4   :  { %v781_v40 = vrot.slane %v773_v62, %v16191_v45  ;;  %14080 = vmatprep.subr.bf16.mxu0 %v15955_v54  ;;  %14112 = vmatprep.subr.bf16.mxu1 %v15957_v55 }
 0x1b5   :  { %1408 = vmatprep.mubr.f32.mxu0 %v18564_v34  ;;  %1479 = vmatprep.mubr.f32.mxu1 %v18564_v34 }
 0x1b6   :  { %v782_v39 = vcombine.high %v781_v40, %v781_v40  ;;  %v789_v32 = vrot.slane %v781_v40, %v16191_v45  ;;  %v900_v40 = vld [vmem:[#allocation3 + $0x18] sm:$0x1] }
 0x1b7   :  { %14082 = vmatpush1.bf16.msra.mxu0 %v15961_v60  ;;  %14114 = vmatpush1.bf16.msra.mxu1 %v15963_v61  ;;  %v882_v60 = vld [vmem:[#allocation3] sm:$0x1] }
 0x1b8   :  { %v796_v49 = vrot.slane %v782_v39, %v16191_v45  ;;  %v797_v50 = vcombine.high %v789_v32, %v789_v32  ;;  %v800_v54 = vunpack.i.h.s16 %v789_v32  ;;  %v12734_v55 = vpack.i.b16 %v789_v32, %v789_v32  ;;  %14084 = vmatprep.subr.bf16.mxu0 %v15967_v1  ;;  %14116 = vmatprep.subr.bf16.mxu1 %v15969_v2 }
 0x1ba   :  { %v798_v37 = vcombine.high %v796_v49, %v796_v49  ;;  %v802_v20 = vunpack.i.h.s16 %v796_v49  ;;  %v804_v38 = vunpack.i.h.s16 %v797_v50  ;;  %v808_v43 = vpack.i.b16 %v800_v54, %v800_v54 }
 0x1bb   :  { %v12735_v61 = vpack.i.b16 %v796_v49, %v796_v49  ;;  %v12736_v63 = vpack.i.b16 %v797_v50, %v797_v50  ;;  %v821_v25 = vrot.slane %v12734_v55, %v16202_v33  ;;  %14086 = vmatpush1.bf16.msra.mxu0 %v15975_v11  ;;  %14118 = vmatpush1.bf16.msra.mxu1 %v15977_v12  ;;  %v891_v12 = vld [vmem:[#allocation3 + $0xc] sm:$0x1]  ;;  %v903_v55 = vld [vmem:[#allocation3 + $0x1c] sm:$0x1] }
 0x1bc   :  { %v806_v1 = vunpack.i.h.s16 %v798_v37  ;;  %v810_v2 = vpack.i.b16 %v802_v20, %v802_v20  ;;  %v812_v29 = vpack.i.b16 %v804_v38, %v804_v38  ;;  %v12737_v44 = vpack.i.b16 %v798_v37, %v798_v37  ;;  %14088 = vmatprep.subr.bf16.mxu0 %v15981_v14  ;;  %14120 = vmatprep.subr.bf16.mxu1 %v15983_v15 }
 0x1bd   :  { %v828_v31 = vrot.slane %v808_v43, %v16202_v33  ;;  %v835_v17 = vrot.slane %v12735_v61, %v16202_v33  ;;  %v849_v62 = vrot.slane %v12736_v63, %v16202_v33  ;;  %v883_v11 = vsel %vm16210_vm2, %v821_v25, %v882_v60 }
 0x1be   :  { %v814_v39 = vpack.i.b16 %v806_v1, %v806_v1  ;;  %v842_v32 = vrot.slane %v810_v2, %v16202_v33  ;;  %v856_v49 = vrot.slane %v812_v29, %v16202_v33  ;;  %v863_v14 = vrot.slane %v12737_v44, %v16202_v33  ;;  %884 = vst [vmem:[#allocation3] sm:$0x1] %v883_v11 }
 0x1bf   :  { %v886_v15 = vsel %vm16210_vm2, %v828_v31, %v885_v47  ;;  %v889_v50 = vsel %vm16210_vm2, %v835_v17, %v888_v30  ;;  %v895_v54 = vsel %vm16210_vm2, %v849_v62, %v894_v53  ;;  %14090 = vmatpush1.bf16.msra.mxu0 %v15987_v22  ;;  %14122 = vmatpush1.bf16.msra.mxu1 %v15989_v23 }
 0x1c0   :  { %v870_v37 = vrot.slane %v814_v39, %v16202_v33  ;;  %887 = vst [vmem:[#allocation3 + $0x4] sm:$0x1] %v886_v15  ;;  %890 = vst [vmem:[#allocation3 + $0x8] sm:$0x1] %v889_v50  ;;  %v892_v20 = vsel %vm16210_vm2, %v842_v32, %v891_v12  ;;  %v898_v38 = vsel %vm16210_vm2, %v856_v49, %v897_v6  ;;  %14092 = vmatprep.subr.bf16.mxu0 %v15993_v26  ;;  %v1661_v12 = vld [vmem:[#allocation10 + $0x50] sm:$0xff] }
 0x1c1   :  { %896 = vst [vmem:[#allocation3 + $0x10] sm:$0x1] %v895_v54  ;;  %v901_v43 = vsel %vm16210_vm2, %v863_v14, %v900_v40  ;;  %893 = vst [vmem:[#allocation3 + $0xc] sm:$0x1] %v892_v20  ;;  %14124 = vmatprep.subr.bf16.mxu1 %v15995_v27 }
 0x1c2   :  { %899 = vst [vmem:[#allocation3 + $0x14] sm:$0x1] %v898_v38  ;;  %902 = vst [vmem:[#allocation3 + $0x18] sm:$0x1] %v901_v43  ;;  %v904_v22 = vsel %vm16210_vm2, %v870_v37, %v903_v55  ;;  %vm3473_vm2 = vsmask.f32 7950 }
 0x1c3   :  { %905 = vst [vmem:[#allocation3 + $0x1c] sm:$0x1] %v904_v22  ;;  %14094 = vmatpush1.bf16.msra.mxu0 %v16001_v35  ;;  %14126 = vmatpush1.bf16.msra.mxu1 %v16003_v36  ;;  %vm16813_vm3 = vmand %vm3102_vm15, %vm3473_vm2 }
 0x1c4   :  { %14096 = vmatprep.subr.bf16.mxu0 %v16007_v41  ;;  %14128 = vmatprep.subr.bf16.mxu1 %v16009_v42 }
 0x1c5   :  { %v1252_v50 = vld [vmem:[#allocation3] sm:$0x1] }
 0x1c7   :  { %14098 = vmatpush1.bf16.msra.mxu0 %v16013_v51  ;;  %14130 = vmatpush1.bf16.msra.mxu1 %v16015_v52 }
 0x1c8   :  { %14100 = vmatprep.subr.bf16.mxu0 %v16019_v57  ;;  %14132 = vmatprep.subr.bf16.mxu1 %v16021_v58 }
 0x1cb   :  { %14102 = vmatpush1.bf16.msra.mxu0 %v16027_v7  ;;  %14134 = vmatpush1.bf16.msra.mxu1 %v16029_v8 }
 0x1cc   :  { %14104 = vmatprep.subr.bf16.mxu0 %v16033_v10  ;;  %14136 = vmatprep.subr.bf16.mxu1 %v16035_v0 }
 0x1cf   :  { %14106 = vmatpush1.bf16.msra.mxu0 %v16039_v18  ;;  %14138 = vmatpush1.bf16.msra.mxu1 %v16041_v19 }
 0x285   :  { %v1040_v23 = vpop.f32.mrb[18].mxu0  ;;  %v1111_v26 = vpop.f32.mrb[18].mxu1 }
 0x286   :  { %v1116_v27 = vadd.f32 %v1040_v23, %v16113_v46  ;;  %v1118_v35 = vadd.f32 %v1111_v26, %v16116_v48  ;;  %v1042_v36 = vpop.f32.mrb[19].mxu0  ;;  %v1113_v41 = vpop.f32.mrb[19].mxu1  ;;  %v1255_v26 = vld [vmem:[#allocation3 + $0x4] sm:$0x1] }
 0x287   :  { %v1117_v42 = vadd.f32 %v1042_v36, %v16118_v56  ;;  %v1119_v51 = vadd.f32 %v1113_v41, %v16121_v59 }
 0x288   :  { %v12738_v52 = vmul.f32 -1.442695, %v1116_v27  ;;  %v12740_v58 = vmul.f32 -1.442695, %v1118_v35  ;;  %v1258_v27 = vld [vmem:[#allocation3 + $0x8] sm:$0x1] }
 0x289   :  { %v12739_v57 = vmul.f32 -1.442695, %v1117_v42  ;;  %v1264_v35 = vld [vmem:[#allocation3 + $0x10] sm:$0x1]  ;;  %v1261_v42 = vld [vmem:[#allocation3 + $0xc] sm:$0x1] }
 0x28a   :  { %15123 = vpow2.f32 %v12738_v52  ;;  %v1267_v52 = vld [vmem:[#allocation3 + $0x14] sm:$0x1] }
 0x28b   :  { %15125 = vpow2.f32 %v12739_v57  ;;  %v1270_v57 = vld [vmem:[#allocation3 + $0x18] sm:$0x1] }
 0x28c   :  { %15127 = vtanh.f32 %v1119_v51 }
 0x28d   :  { %15129 = vpow2.f32 %v12740_v58 }
 0x294   :  { %v15124_v7 = vpop.eup %15123 }
 0x295   :  { %v1129_v8 = vadd.f32 1.0, %v15124_v7  ;;  %v15126_v10 = vpop.eup %15125 }
 0x296   :  { %v1130_v0 = vadd.f32 1.0, %v15126_v10  ;;  %v15128_v18 = vpop.eup %15127 }
 0x297   :  { %15131 = vrcp.f32 %v1129_v8  ;;  %v15130_v19 = vpop.eup %15129 }
 0x298   :  { %15133 = vrcp.f32 %v1130_v0  ;;  %v1131_v4 = vadd.f32 1.0, %v15130_v19  ;;  %v1273_v0 = vld [vmem:[#allocation3 + $0x1c] sm:$0x1]  ;;  %v1652_v19 = vld [vmem:[#allocation10 + $0x8] sm:$0xff] }
 0x29a   :  { %15135 = vrcp.f32 %v1131_v4  ;;  %v1658_v4 = vld [vmem:[#allocation10 + $0x38] sm:$0xff] }
 0x2a1   :  { %v15132_v46 = vpop.eup %15131 }
 0x2a2   :  { %v1140_v48 = vmul.f32 %v15132_v46, %v15128_v18  ;;  %v15134_v56 = vpop.eup %15133  ;;  %v1656_v46 = vld [vmem:[#allocation10 + $0x28] sm:$0xff] }
 0x2a3   :  { %v1139_v59 = vmul.f32 %v15134_v56, %v16187_v13  ;;  %v16302_v56 = vpack.c.bf16 %v1656_v46, %v1652_v19  ;;  %v1683_v19 = vld [vmem:[#allocation10 + $0x100] sm:$0xff] }
 0x2a4   :  { %v15136_v61 = vpop.eup %15135  ;;  %v1687_v46 = vld [vmem:[#allocation10 + $0x120] sm:$0xff] }
 0x2a5   :  { %v16265_v60 = vadd.f32 %v1140_v48, %v1139_v59  ;;  %v1654_v48 = vld [vmem:[#allocation10 + $0x18] sm:$0xff]  ;;  %v1651_v59 = vld [vmem:[#allocation10] sm:$0xff]  ;;  %14140 = vmatprep.subr.bf16.mxu0 %v16302_v56 }
 0x2a7   :  { %15137 = vtanh.f32 %v16265_v60 }
 0x2b1   :  { %v15138_v63 = vpop.eup %15137 }
 0x2b2   :  { %v1143_v25 = vmul.f32 %v15138_v63, %v15136_v61  ;;  %v1655_v61 = vld [vmem:[#allocation10 + $0x20] sm:$0xff]  ;;  %v16304_v63 = vpack.c.bf16 %v1658_v4, %v1654_v48  ;;  %v16354_v4 = vpack.c.bf16 %v1687_v46, %v1683_v19 }
 0x2b3   :  { %v1707_v19 = vld [vmem:[#allocation10 + $0x1c0] sm:$0xff] }
 0x2b4   :  { %v1144_v1 = vpack.c.bf16 %v1143_v25, %v1143_v25  ;;  %1409 = vmatmul.mubr.f32.vlgmr.msra.gmra.mrb[20].mxu0 %v1143_v25  ;;  %1480 = vmatmul.mubr.f32.vlgmr.msra.gmra.mrb[20].mxu1 %v1143_v25  ;;  %v16306_v25 = vpack.c.bf16 %v1655_v61, %v1651_v59  ;;  %v1685_v59 = vld [vmem:[#allocation10 + $0x110] sm:$0xff] }
 0x2b5   :  { %1779 = vmatprep.mubr.f32.mxu0 %v18564_v34  ;;  %1850 = vmatprep.mubr.f32.mxu1 %v18564_v34  ;;  %v1689_v61 = vld [vmem:[#allocation10 + $0x130] sm:$0xff] }
 0x2b6   :  { %v1152_v2 = vrot.slane %v1144_v1, %v16191_v45  ;;  %v1653_v1 = vld [vmem:[#allocation10 + $0x10] sm:$0xff]  ;;  %14172 = vmatprep.subr.bf16.mxu1 %v16304_v63  ;;  %14142 = vmatpush1.bf16.msra.mxu0 %v16306_v25 }
 0x2b8   :  { %v1153_v29 = vcombine.high %v1152_v2, %v1152_v2  ;;  %v1160_v13 = vrot.slane %v1152_v2, %v16191_v45  ;;  %v1657_v2 = vld [vmem:[#allocation10 + $0x30] sm:$0xff] }
 0x2ba   :  { %v1167_v44 = vrot.slane %v1153_v29, %v16191_v45  ;;  %v1168_v47 = vcombine.high %v1160_v13, %v1160_v13  ;;  %v1171_v30 = vunpack.i.h.s16 %v1160_v13  ;;  %v12741_v53 = vpack.i.b16 %v1160_v13, %v1160_v13  ;;  %v1660_v13 = vld [vmem:[#allocation10 + $0x48] sm:$0xff] }
 0x2bb   :  { %v16309_v29 = vpack.c.bf16 %v1657_v2, %v1653_v1  ;;  %v16357_v1 = vpack.c.bf16 %v1689_v61, %v1685_v59  ;;  %v1692_v2 = vld [vmem:[#allocation10 + $0x148] sm:$0xff]  ;;  %v1711_v59 = vld [vmem:[#allocation10 + $0x1e0] sm:$0xff]  ;;  %v1709_v61 = vld [vmem:[#allocation10 + $0x1d0] sm:$0xff] }
 0x2bc   :  { %v1169_v31 = vcombine.high %v1167_v44, %v1167_v44  ;;  %v1173_v17 = vunpack.i.h.s16 %v1167_v44  ;;  %v1175_v62 = vunpack.i.h.s16 %v1168_v47  ;;  %v1179_v11 = vpack.i.b16 %v1171_v30, %v1171_v30 }
 0x2bd   :  { %v12742_v6 = vpack.i.b16 %v1167_v44, %v1167_v44  ;;  %v12743_v40 = vpack.i.b16 %v1168_v47, %v1168_v47  ;;  %v1192_v39 = vrot.slane %v12741_v53, %v16202_v33  ;;  %v1664_v44 = vld [vmem:[#allocation10 + $0x68] sm:$0xff]  ;;  %v1662_v47 = vld [vmem:[#allocation10 + $0x58] sm:$0xff]  ;;  %14174 = vmatpush1.bf16.msra.mxu1 %v16309_v29 }
 0x2be   :  { %v1177_v32 = vunpack.i.h.s16 %v1169_v31  ;;  %v1181_v49 = vpack.i.b16 %v1173_v17, %v1173_v17  ;;  %v1183_v14 = vpack.i.b16 %v1175_v62, %v1175_v62  ;;  %v12744_v15 = vpack.i.b16 %v1169_v31, %v1169_v31  ;;  %v1666_v53 = vld [vmem:[#allocation10 + $0x78] sm:$0xff]  ;;  %v1659_v31 = vld [vmem:[#allocation10 + $0x40] sm:$0xff] }
 0x2bf   :  { %v1199_v54 = vrot.slane %v1179_v11, %v16202_v33  ;;  %v1206_v55 = vrot.slane %v12742_v6, %v16202_v33  ;;  %v1220_v37 = vrot.slane %v12743_v40, %v16202_v33  ;;  %v1253_v20 = vsel %vm16274_vm4, %v1192_v39, %v1252_v50  ;;  %v1663_v17 = vld [vmem:[#allocation10 + $0x60] sm:$0xff]  ;;  %v1665_v6 = vld [vmem:[#allocation10 + $0x70] sm:$0xff]  ;;  %v1668_v39 = vld [vmem:[#allocation10 + $0x88] sm:$0xff] }
 0x2c0   :  { %v1185_v38 = vpack.i.b16 %v1177_v32, %v1177_v32  ;;  %v1213_v43 = vrot.slane %v1181_v49, %v16202_v33  ;;  %v1227_v22 = vrot.slane %v1183_v14, %v16202_v33  ;;  %v1234_v23 = vrot.slane %v12744_v15, %v16202_v33  ;;  %1254 = vst [vmem:[#allocation3] sm:$0x1] %v1253_v20  ;;  %v1672_v32 = vld [vmem:[#allocation10 + $0xa8] sm:$0xff]  ;;  %v1670_v49 = vld [vmem:[#allocation10 + $0x98] sm:$0xff]  ;;  %v1667_v50 = vld [vmem:[#allocation10 + $0x80] sm:$0xff] }
 0x2c1   :  { %v1256_v36 = vsel %vm16274_vm4, %v1199_v54, %v1255_v26  ;;  %v1259_v41 = vsel %vm16274_vm4, %v1206_v55, %v1258_v27  ;;  %v1265_v51 = vsel %vm16274_vm4, %v1220_v37, %v1264_v35  ;;  %v16314_v30 = vpack.c.bf16 %v1664_v44, %v1660_v13  ;;  %v1674_v15 = vld [vmem:[#allocation10 + $0xb8] sm:$0xff]  ;;  %v1671_v54 = vld [vmem:[#allocation10 + $0xa0] sm:$0xff]  ;;  %v1669_v20 = vld [vmem:[#allocation10 + $0x90] sm:$0xff] }
 0x2c2   :  { %v1241_v58 = vrot.slane %v1185_v38, %v16202_v33  ;;  %1257 = vst [vmem:[#allocation3 + $0x4] sm:$0x1] %v1256_v36  ;;  %1260 = vst [vmem:[#allocation3 + $0x8] sm:$0x1] %v1259_v41  ;;  %v1262_v7 = vsel %vm16274_vm4, %v1213_v43, %v1261_v42  ;;  %v1268_v8 = vsel %vm16274_vm4, %v1227_v22, %v1267_v52  ;;  %v1673_v38 = vld [vmem:[#allocation10 + $0xb0] sm:$0xff]  ;;  %v1676_v22 = vld [vmem:[#allocation10 + $0xc8] sm:$0xff] }
 0x2c3   :  { %1266 = vst [vmem:[#allocation3 + $0x10] sm:$0x1] %v1265_v51  ;;  %v1271_v10 = vsel %vm16274_vm4, %v1234_v23, %v1270_v57  ;;  %1263 = vst [vmem:[#allocation3 + $0xc] sm:$0x1] %v1262_v7  ;;  %v16316_v62 = vpack.c.bf16 %v1666_v53, %v1662_v47  ;;  %v16318_v11 = vpack.c.bf16 %v1663_v17, %v1659_v31  ;;  %14144 = vmatprep.subr.bf16.mxu0 %v16314_v30  ;;  %v1680_v23 = vld [vmem:[#allocation10 + $0xe8] sm:$0xff]  ;;  %v1678_v26 = vld [vmem:[#allocation10 + $0xd8] sm:$0xff] }
 0x2c4   :  { %1269 = vst [vmem:[#allocation3 + $0x14] sm:$0x1] %v1268_v8  ;;  %1272 = vst [vmem:[#allocation3 + $0x18] sm:$0x1] %v1271_v10  ;;  %v1274_v18 = vsel %vm16274_vm4, %v1241_v58, %v1273_v0  ;;  %v16321_v40 = vpack.c.bf16 %v1665_v6, %v1661_v12  ;;  %v16326_v14 = vpack.c.bf16 %v1672_v32, %v1668_v39  ;;  %v1682_v35 = vld [vmem:[#allocation10 + $0xf8] sm:$0xff]  ;;  %v1675_v36 = vld [vmem:[#allocation10 + $0xc0] sm:$0xff] }
 0x2c5   :  { %1275 = vst [vmem:[#allocation3 + $0x1c] sm:$0x1] %v1274_v18  ;;  %14176 = vmatprep.subr.bf16.mxu1 %v16316_v62  ;;  %14146 = vmatpush1.bf16.msra.mxu0 %v16318_v11  ;;  %v16328_v55 = vpack.c.bf16 %v1674_v15, %v1670_v49  ;;  %v16330_v37 = vpack.c.bf16 %v1671_v54, %v1667_v50  ;;  %v1679_v41 = vld [vmem:[#allocation10 + $0xe0] sm:$0xff]  ;;  %v1677_v52 = vld [vmem:[#allocation10 + $0xd0] sm:$0xff]  ;;  %v1684_v7 = vld [vmem:[#allocation10 + $0x108] sm:$0xff]  ;;  %vm15799_vm4 = vmmov 0  }
 0x2c6   :  { %14178 = vmatpush1.bf16.msra.mxu1 %v16321_v40  ;;  %14148 = vmatprep.subr.bf16.mxu0 %v16326_v14  ;;  %v16333_v43 = vpack.c.bf16 %v1673_v38, %v1669_v20  ;;  %v16338_v27 = vpack.c.bf16 %v1680_v23, %v1676_v22  ;;  %v16340_v42 = vpack.c.bf16 %v1682_v35, %v1678_v26  ;;  %v1681_v57 = vld [vmem:[#allocation10 + $0xf0] sm:$0xff]  ;;  %v1688_v8 = vld [vmem:[#allocation10 + $0x128] sm:$0xff]  ;;  %v1686_v10 = vld [vmem:[#allocation10 + $0x118] sm:$0xff] }
 0x2c7   :  { %14180 = vmatprep.subr.bf16.mxu1 %v16328_v55  ;;  %v16342_v51 = vpack.c.bf16 %v1679_v41, %v1675_v36  ;;  %v16345_v58 = vpack.c.bf16 %v1681_v57, %v1677_v52  ;;  %v16350_v0 = vpack.c.bf16 %v1688_v8, %v1684_v7  ;;  %v1690_v18 = vld [vmem:[#allocation10 + $0x138] sm:$0xff]  ;;  %v1696_v13 = vld [vmem:[#allocation10 + $0x168] sm:$0xff]  ;;  %v1691_v31 = vld [vmem:[#allocation10 + $0x140] sm:$0xff] }
 0x2c8   :  { %v16352_v48 = vpack.c.bf16 %v1690_v18, %v1686_v10  ;;  %v1694_v44 = vld [vmem:[#allocation10 + $0x158] sm:$0xff]  ;;  %v16362_v47 = vpack.c.bf16 %v1696_v13, %v1692_v2  ;;  %v1695_v17 = vld [vmem:[#allocation10 + $0x160] sm:$0xff]  ;;  %v1693_v39 = vld [vmem:[#allocation10 + $0x150] sm:$0xff]  ;;  %v16389_v13 = vpack.c.bf16 %v1711_v59, %v1707_v19 }
 0x2c9   :  { %14150 = vmatpush1.bf16.msra.mxu0 %v16330_v37  ;;  %v1698_v53 = vld [vmem:[#allocation10 + $0x178] sm:$0xff]  ;;  %v16366_v6 = vpack.c.bf16 %v1695_v17, %v1691_v31  ;;  %v1697_v32 = vld [vmem:[#allocation10 + $0x170] sm:$0xff]  ;;  %v1700_v49 = vld [vmem:[#allocation10 + $0x188] sm:$0xff] }
 0x2ca   :  { %14182 = vmatpush1.bf16.msra.mxu1 %v16333_v43  ;;  %14152 = vmatprep.subr.bf16.mxu0 %v16338_v27  ;;  %v16364_v12 = vpack.c.bf16 %v1698_v53, %v1694_v44  ;;  %v16369_v15 = vpack.c.bf16 %v1697_v32, %v1693_v39  ;;  %v1704_v50 = vld [vmem:[#allocation10 + $0x1a8] sm:$0xff]  ;;  %v1702_v54 = vld [vmem:[#allocation10 + $0x198] sm:$0xff]  ;;  %v1699_v23 = vld [vmem:[#allocation10 + $0x180] sm:$0xff] }
 0x2cb   :  { %14184 = vmatprep.subr.bf16.mxu1 %v16340_v42  ;;  %v1706_v20 = vld [vmem:[#allocation10 + $0x1b8] sm:$0xff]  ;;  %v16373_v38 = vpack.c.bf16 %v1704_v50, %v1700_v49  ;;  %v1703_v26 = vld [vmem:[#allocation10 + $0x1a0] sm:$0xff]  ;;  %v1701_v35 = vld [vmem:[#allocation10 + $0x190] sm:$0xff] }
 0x2cc   :  { %v16375_v22 = vpack.c.bf16 %v1706_v20, %v1702_v54  ;;  %v16378_v36 = vpack.c.bf16 %v1703_v26, %v1699_v23  ;;  %v1705_v41 = vld [vmem:[#allocation10 + $0x1b0] sm:$0xff]  ;;  %v1708_v52 = vld [vmem:[#allocation10 + $0x1c8] sm:$0xff]  ;;  %v1710_v10 = vld [vmem:[#allocation10 + $0x1d8] sm:$0xff] }
 0x2cd   :  { %14154 = vmatpush1.bf16.msra.mxu0 %v16342_v51  ;;  %v1712_v57 = vld [vmem:[#allocation10 + $0x1e8] sm:$0xff]  ;;  %v16382_v7 = vpack.c.bf16 %v1705_v41, %v1701_v35  ;;  %v1714_v18 = vld [vmem:[#allocation10 + $0x1f8] sm:$0xff]  ;;  %v1713_v2 = vld [vmem:[#allocation10 + $0x1f0] sm:$0xff] }
 0x2ce   :  { %14186 = vmatpush1.bf16.msra.mxu1 %v16345_v58  ;;  %14156 = vmatprep.subr.bf16.mxu0 %v16350_v0  ;;  %v16384_v8 = vpack.c.bf16 %v1712_v57, %v1708_v52  ;;  %v16386_v46 = vpack.c.bf16 %v1714_v18, %v1710_v10  ;;  %v16393_v44 = vpack.c.bf16 %v1713_v2, %v1709_v61 }
 0x2cf   :  { %14188 = vmatprep.subr.bf16.mxu1 %v16352_v48 }
 0x2d1   :  { %14158 = vmatpush1.bf16.msra.mxu0 %v16354_v4 }
 0x2d2   :  { %14190 = vmatpush1.bf16.msra.mxu1 %v16357_v1  ;;  %14160 = vmatprep.subr.bf16.mxu0 %v16362_v47 }
 0x2d3   :  { %14192 = vmatprep.subr.bf16.mxu1 %v16364_v12 }
 0x2d5   :  { %14162 = vmatpush1.bf16.msra.mxu0 %v16366_v6 }
 0x2d6   :  { %14194 = vmatpush1.bf16.msra.mxu1 %v16369_v15  ;;  %14164 = vmatprep.subr.bf16.mxu0 %v16373_v38 }
 0x2d7   :  { %14196 = vmatprep.subr.bf16.mxu1 %v16375_v22 }
 0x2d9   :  { %14166 = vmatpush1.bf16.msra.mxu0 %v16378_v36 }
 0x2da   :  { %14198 = vmatpush1.bf16.msra.mxu1 %v16382_v7  ;;  %14168 = vmatprep.subr.bf16.mxu0 %v16384_v8 }
 0x2db   :  { %14200 = vmatprep.subr.bf16.mxu1 %v16386_v46 }
 0x2dd   :  { %14170 = vmatpush1.bf16.msra.mxu0 %v16389_v13 }
 0x2de   :  { %14202 = vmatpush1.bf16.msra.mxu1 %v16393_v44  ;;  %14204 = vmatprep.subr.bf16.mxu0 %v16302_v56 }
 0x2df   :  { %14236 = vmatprep.subr.bf16.mxu1 %v16304_v63 }
 0x387   :  { %v1410_v53 = vpop.f32.mrb[20].mxu0  ;;  %v1481_v31 = vpop.f32.mrb[20].mxu1 }
 0x388   :  { %v1486_v17 = vadd.f32 %v1410_v53, %v16123_v3  ;;  %v1488_v39 = vadd.f32 %v1481_v31, %v16126_v5  ;;  %v1412_v32 = vpop.f32.mrb[21].mxu0  ;;  %v1483_v49 = vpop.f32.mrb[21].mxu1 }
 0x389   :  { %v1487_v50 = vadd.f32 %v1412_v32, %v16128_v9  ;;  %v1489_v54 = vadd.f32 %v1483_v49, %v16131_v16 }
 0x38a   :  { %v12745_v20 = vmul.f32 -1.442695, %v1486_v17  ;;  %v12747_v26 = vmul.f32 -1.442695, %v1488_v39 }
 0x38b   :  { %v12746_v23 = vmul.f32 -1.442695, %v1487_v50 }
 0x38c   :  { %15139 = vpow2.f32 %v12745_v20 }
 0x38d   :  { %15141 = vpow2.f32 %v12746_v23 }
 0x38e   :  { %15143 = vtanh.f32 %v1489_v54 }
 0x38f   :  { %15145 = vpow2.f32 %v12747_v26 }
 0x396   :  { %v15140_v35 = vpop.eup %15139 }
 0x397   :  { %v1499_v41 = vadd.f32 1.0, %v15140_v35  ;;  %v15142_v52 = vpop.eup %15141 }
 0x398   :  { %v1500_v3 = vadd.f32 1.0, %v15142_v52  ;;  %v15144_v5 = vpop.eup %15143  ;;  %v1623_v52 = vld [vmem:[#allocation3] sm:$0x2] }
 0x399   :  { %15147 = vrcp.f32 %v1499_v41  ;;  %v15146_v57 = vpop.eup %15145 }
 0x39a   :  { %15149 = vrcp.f32 %v1500_v3  ;;  %v1501_v19 = vadd.f32 1.0, %v15146_v57 }
 0x39c   :  { %15151 = vrcp.f32 %v1501_v19 }
 0x3a3   :  { %v15148_v10 = vpop.eup %15147 }
 0x3a4   :  { %v1510_v18 = vmul.f32 %v15148_v10, %v15144_v5  ;;  %v15150_v9 = vpop.eup %15149 }
 0x3a5   :  { %v1509_v16 = vmul.f32 %v15150_v9, %v16265_v60 }
 0x3a6   :  { %v15152_v61 = vpop.eup %15151 }
 0x3a7   :  { %v16405_v59 = vadd.f32 %v1510_v18, %v1509_v16  ;;  %v1626_v16 = vld [vmem:[#allocation3 + $0x4] sm:$0x2] }
 0x3a9   :  { %15153 = vtanh.f32 %v16405_v59 }
 0x3b3   :  { %v15154_v2 = vpop.eup %15153 }
 0x3b4   :  { %v1513_v53 = vmul.f32 %v15154_v2, %v15152_v61  ;;  %v1629_v61 = vld [vmem:[#allocation3 + $0x8] sm:$0x2]  ;;  %v1635_v2 = vld [vmem:[#allocation3 + $0x10] sm:$0x2] }
 0x3b6   :  { %v1514_v31 = vpack.c.bf16 %v1513_v53, %v1513_v53  ;;  %1780 = vmatmul.mubr.f32.vlgmr.msra.gmra.mrb[22].mxu0 %v1513_v53  ;;  %1851 = vmatmul.mubr.f32.vlgmr.msra.gmra.mrb[22].mxu1 %v1513_v53 }
 0x3b7   :  { %14206 = vmatpush1.bf16.msra.mxu0 %v16306_v25  ;;  %14238 = vmatpush1.bf16.msra.mxu1 %v16309_v29 }
 0x3b8   :  { %v1522_v17 = vrot.slane %v1514_v31, %v16191_v45  ;;  %14208 = vmatprep.subr.bf16.mxu0 %v16314_v30  ;;  %14240 = vmatprep.subr.bf16.mxu1 %v16316_v62 }
 0x3b9   :  { %2149 = vmatprep.mubr.f32.mxu0 %v18564_v34  ;;  %2220 = vmatprep.mubr.f32.mxu1 %v18564_v34 }
 0x3ba   :  { %v1523_v60 = vcombine.high %v1522_v17, %v1522_v17  ;;  %v1530_v39 = vrot.slane %v1522_v17, %v16191_v45 }
 0x3bb   :  { %14210 = vmatpush1.bf16.msra.mxu0 %v16318_v11  ;;  %14242 = vmatpush1.bf16.msra.mxu1 %v16321_v40 }
 0x3bc   :  { %v1537_v32 = vrot.slane %v1523_v60, %v16191_v45  ;;  %v1538_v49 = vcombine.high %v1530_v39, %v1530_v39  ;;  %v1541_v50 = vunpack.i.h.s16 %v1530_v39  ;;  %v12748_v54 = vpack.i.b16 %v1530_v39, %v1530_v39  ;;  %14212 = vmatprep.subr.bf16.mxu0 %v16326_v14  ;;  %14244 = vmatprep.subr.bf16.mxu1 %v16328_v55  ;;  %v1632_v39 = vld [vmem:[#allocation3 + $0xc] sm:$0x2] }
 0x3be   :  { %v1539_v20 = vcombine.high %v1537_v32, %v1537_v32  ;;  %v1543_v23 = vunpack.i.h.s16 %v1537_v32  ;;  %v1545_v26 = vunpack.i.h.s16 %v1538_v49  ;;  %v1549_v35 = vpack.i.b16 %v1541_v50, %v1541_v50 }
 0x3bf   :  { %v12749_v3 = vpack.i.b16 %v1537_v32, %v1537_v32  ;;  %v12750_v5 = vpack.i.b16 %v1538_v49, %v1538_v49  ;;  %v1562_v57 = vrot.slane %v12748_v54, %v16202_v33  ;;  %14214 = vmatpush1.bf16.msra.mxu0 %v16330_v37  ;;  %14246 = vmatpush1.bf16.msra.mxu1 %v16333_v43  ;;  %v1638_v32 = vld [vmem:[#allocation3 + $0x14] sm:$0x2]  ;;  %v1641_v49 = vld [vmem:[#allocation3 + $0x18] sm:$0x2] }
 0x3c0   :  { %v1547_v10 = vunpack.i.h.s16 %v1539_v20  ;;  %v1551_v18 = vpack.i.b16 %v1543_v23, %v1543_v23  ;;  %v1553_v9 = vpack.i.b16 %v1545_v26, %v1545_v26  ;;  %v12751_v19 = vpack.i.b16 %v1539_v20, %v1539_v20  ;;  %14216 = vmatprep.subr.bf16.mxu0 %v16338_v27  ;;  %14248 = vmatprep.subr.bf16.mxu1 %v16340_v42 }
 0x3c1   :  { %v1569_v53 = vrot.slane %v1549_v35, %v16202_v33  ;;  %v1576_v31 = vrot.slane %v12749_v3, %v16202_v33  ;;  %v1590_v17 = vrot.slane %v12750_v5, %v16202_v33  ;;  %v1624_v60 = vsel %vm16422_vm7, %v1562_v57, %v1623_v52  ;;  %v1644_v3 = vld [vmem:[#allocation3 + $0x1c] sm:$0x2] }
 0x3c2   :  { %v1555_v50 = vpack.i.b16 %v1547_v10, %v1547_v10  ;;  %v1583_v54 = vrot.slane %v1551_v18, %v16202_v33  ;;  %v1597_v20 = vrot.slane %v1553_v9, %v16202_v33  ;;  %v1604_v23 = vrot.slane %v12751_v19, %v16202_v33  ;;  %1625 = vst [vmem:[#allocation3] sm:$0x2] %v1624_v60 }
 0x3c3   :  { %v1627_v26 = vsel %vm16422_vm7, %v1569_v53, %v1626_v16  ;;  %v1630_v35 = vsel %vm16422_vm7, %v1576_v31, %v1629_v61  ;;  %v1636_v52 = vsel %vm16422_vm7, %v1590_v17, %v1635_v2  ;;  %14218 = vmatpush1.bf16.msra.mxu0 %v16342_v51  ;;  %14250 = vmatpush1.bf16.msra.mxu1 %v16345_v58  ;;  %v18571_v61 = vld [vmem:[#allocation22_spill] sm:$0xff]  ;;  %v18572_v17 = vld [vmem:[#allocation23_spill] sm:$0xff] }
 0x3c4   :  { %v1611_v5 = vrot.slane %v1555_v50, %v16202_v33  ;;  %1628 = vst [vmem:[#allocation3 + $0x4] sm:$0x2] %v1627_v26  ;;  %1631 = vst [vmem:[#allocation3 + $0x8] sm:$0x2] %v1630_v35  ;;  %v1633_v57 = vsel %vm16422_vm7, %v1583_v54, %v1632_v39  ;;  %v1639_v10 = vsel %vm16422_vm7, %v1597_v20, %v1638_v32  ;;  %14220 = vmatprep.subr.bf16.mxu0 %v16350_v0  ;;  %v18573_v39 = vld [vmem:[#allocation24_spill] sm:$0xff] }
 0x3c5   :  { %1637 = vst [vmem:[#allocation3 + $0x10] sm:$0x2] %v1636_v52  ;;  %v1642_v18 = vsel %vm16422_vm7, %v1604_v23, %v1641_v49  ;;  %1634 = vst [vmem:[#allocation3 + $0xc] sm:$0x2] %v1633_v57  ;;  %14252 = vmatprep.subr.bf16.mxu1 %v16352_v48 }
 0x3c6   :  { %1640 = vst [vmem:[#allocation3 + $0x14] sm:$0x2] %v1639_v10  ;;  %1643 = vst [vmem:[#allocation3 + $0x18] sm:$0x2] %v1642_v18  ;;  %v1645_v9 = vsel %vm16422_vm7, %v1611_v5, %v1644_v3  ;;  %vm4226_vm7 = vcmask 57344  }
 0x3c7   :  { %1646 = vst [vmem:[#allocation3 + $0x1c] sm:$0x2] %v1645_v9  ;;  %14222 = vmatpush1.bf16.msra.mxu0 %v16354_v4  ;;  %14254 = vmatpush1.bf16.msra.mxu1 %v16357_v1 }
 0x3c8   :  { %14224 = vmatprep.subr.bf16.mxu0 %v16362_v47  ;;  %14256 = vmatprep.subr.bf16.mxu1 %v16364_v12 }
 0x3cb   :  { %14226 = vmatpush1.bf16.msra.mxu0 %v16366_v6  ;;  %14258 = vmatpush1.bf16.msra.mxu1 %v16369_v15 }
 0x3cc   :  { %14228 = vmatprep.subr.bf16.mxu0 %v16373_v38  ;;  %14260 = vmatprep.subr.bf16.mxu1 %v16375_v22 }
 0x3cf   :  { %14230 = vmatpush1.bf16.msra.mxu0 %v16378_v36  ;;  %14262 = vmatpush1.bf16.msra.mxu1 %v16382_v7 }
 0x3d0   :  { %14232 = vmatprep.subr.bf16.mxu0 %v16384_v8  ;;  %14264 = vmatprep.subr.bf16.mxu1 %v16386_v46 }
 0x3d3   :  { %14234 = vmatpush1.bf16.msra.mxu0 %v16389_v13  ;;  %14266 = vmatpush1.bf16.msra.mxu1 %v16393_v44 }
 0x3d4   :  { %14268 = vmatprep.subr.bf16.mxu0 %v16302_v56  ;;  %14300 = vmatprep.subr.bf16.mxu1 %v16304_v63 }
 0x489   :  { %v1781_v41 = vpop.f32.mrb[22].mxu0  ;;  %v1852_v19 = vpop.f32.mrb[22].mxu1 }
 0x48a   :  { %v1857_v16 = vadd.f32 %v1781_v41, %v16133_v21  ;;  %v1859_v2 = vadd.f32 %v1852_v19, %v18571_v61  ;;  %v1783_v53 = vpop.f32.mrb[23].mxu0  ;;  %v1854_v31 = vpop.f32.mrb[23].mxu1 }
 0x48b   :  { %v1858_v60 = vadd.f32 %v1783_v53, %v18572_v17  ;;  %v1860_v32 = vadd.f32 %v1854_v31, %v18573_v39 }
 0x48c   :  { %v12752_v49 = vmul.f32 -1.442695, %v1857_v16  ;;  %v12754_v54 = vmul.f32 -1.442695, %v1859_v2 }
 0x48d   :  { %v12753_v50 = vmul.f32 -1.442695, %v1858_v60 }
 0x48e   :  { %15155 = vpow2.f32 %v12752_v49 }
 0x48f   :  { %15157 = vpow2.f32 %v12753_v50  ;;  %v1993_v50 = vld [vmem:[#allocation3] sm:$0x2] }
 0x490   :  { %15159 = vtanh.f32 %v1860_v32 }
 0x491   :  { %15161 = vpow2.f32 %v12754_v54 }
 0x498   :  { %v15156_v56 = vpop.eup %15155 }
 0x499   :  { %v1870_v20 = vadd.f32 1.0, %v15156_v56  ;;  %v15158_v63 = vpop.eup %15157 }
 0x49a   :  { %v1871_v21 = vadd.f32 1.0, %v15158_v63  ;;  %v15160_v23 = vpop.eup %15159 }
 0x49b   :  { %15163 = vrcp.f32 %v1870_v20  ;;  %v15162_v26 = vpop.eup %15161 }
 0x49c   :  { %15165 = vrcp.f32 %v1871_v21  ;;  %v1872_v5 = vadd.f32 1.0, %v15162_v26  ;;  %v1999_v26 = vld [vmem:[#allocation3 + $0x8] sm:$0x2] }
 0x49e   :  { %15167 = vrcp.f32 %v1872_v5 }
 0x4a5   :  { %v15164_v35 = vpop.eup %15163 }
 0x4a6   :  { %v1881_v52 = vmul.f32 %v15164_v35, %v15160_v23  ;;  %v15166_v3 = vpop.eup %15165 }
 0x4a7   :  { %v1880_v57 = vmul.f32 %v15166_v3, %v16405_v59  ;;  %v2002_v3 = vld [vmem:[#allocation3 + $0xc] sm:$0x2] }
 0x4a8   :  { %v15168_v18 = vpop.eup %15167 }
 0x4a9   :  { %v16479_v10 = vadd.f32 %v1881_v52, %v1880_v57  ;;  %v2008_v57 = vld [vmem:[#allocation3 + $0x14] sm:$0x2] }
 0x4ab   :  { %15169 = vtanh.f32 %v16479_v10 }
 0x4b5   :  { %v15170_v9 = vpop.eup %15169 }
 0x4b6   :  { %v1884_v41 = vmul.f32 %v15170_v9, %v15168_v18  ;;  %v2011_v18 = vld [vmem:[#allocation3 + $0x18] sm:$0x2] }
 0x4b8   :  { %v1885_v19 = vpack.c.bf16 %v1884_v41, %v1884_v41  ;;  %2150 = vmatmul.mubr.f32.vlgmr.msra.gmra.mrb[24].mxu0 %v1884_v41  ;;  %2221 = vmatmul.mubr.f32.vlgmr.msra.gmra.mrb[24].mxu1 %v1884_v41 }
 0x4b9   :  { %14270 = vmatpush1.bf16.msra.mxu0 %v16306_v25  ;;  %14302 = vmatpush1.bf16.msra.mxu1 %v16309_v29 }
 0x4ba   :  { %v1893_v16 = vrot.slane %v1885_v19, %v16191_v45  ;;  %14272 = vmatprep.subr.bf16.mxu0 %v16314_v30  ;;  %14304 = vmatprep.subr.bf16.mxu1 %v16316_v62 }
 0x4bb   :  { %2520 = vmatprep.mubr.f32.mxu0 %v18564_v34  ;;  %2591 = vmatprep.mubr.f32.mxu1 %v18564_v34 }
 0x4bc   :  { %v1894_v59 = vcombine.high %v1893_v16, %v1893_v16  ;;  %v1901_v61 = vrot.slane %v1893_v16, %v16191_v45 }
 0x4bd   :  { %14274 = vmatpush1.bf16.msra.mxu0 %v16318_v11  ;;  %14306 = vmatpush1.bf16.msra.mxu1 %v16321_v40 }
 0x4be   :  { %v1908_v25 = vrot.slane %v1894_v59, %v16191_v45  ;;  %v1909_v29 = vcombine.high %v1901_v61, %v1901_v61  ;;  %v1912_v2 = vunpack.i.h.s16 %v1901_v61  ;;  %v12755_v53 = vpack.i.b16 %v1901_v61, %v1901_v61  ;;  %14276 = vmatprep.subr.bf16.mxu0 %v16326_v14  ;;  %14308 = vmatprep.subr.bf16.mxu1 %v16328_v55  ;;  %v2014_v59 = vld [vmem:[#allocation3 + $0x1c] sm:$0x2] }
 0x4c0   :  { %v1910_v30 = vcombine.high %v1908_v25, %v1908_v25  ;;  %v1914_v62 = vunpack.i.h.s16 %v1908_v25  ;;  %v1916_v31 = vunpack.i.h.s16 %v1909_v29  ;;  %v1920_v17 = vpack.i.b16 %v1912_v2, %v1912_v2 }
 0x4c1   :  { %v12756_v11 = vpack.i.b16 %v1908_v25, %v1908_v25  ;;  %v12757_v40 = vpack.i.b16 %v1909_v29, %v1909_v29  ;;  %v1933_v39 = vrot.slane %v12755_v53, %v16202_v33  ;;  %14278 = vmatpush1.bf16.msra.mxu0 %v16330_v37  ;;  %14310 = vmatpush1.bf16.msra.mxu1 %v16333_v43 }
 0x4c2   :  { %v1918_v14 = vunpack.i.h.s16 %v1910_v30  ;;  %v1922_v32 = vpack.i.b16 %v1914_v62, %v1914_v62  ;;  %v1924_v55 = vpack.i.b16 %v1916_v31, %v1916_v31  ;;  %v12758_v49 = vpack.i.b16 %v1910_v30, %v1910_v30  ;;  %14280 = vmatprep.subr.bf16.mxu0 %v16338_v27  ;;  %14312 = vmatprep.subr.bf16.mxu1 %v16340_v42  ;;  %v1996_v27 = vld [vmem:[#allocation3 + $0x4] sm:$0x2]  ;;  %v2005_v42 = vld [vmem:[#allocation3 + $0x10] sm:$0x2] }
 0x4c3   :  { %v1940_v54 = vrot.slane %v1920_v17, %v16202_v33  ;;  %v1947_v56 = vrot.slane %v12756_v11, %v16202_v33  ;;  %v1961_v20 = vrot.slane %v12757_v40, %v16202_v33  ;;  %v1994_v37 = vsel %vm16496_vm9, %v1933_v39, %v1993_v50 }
 0x4c4   :  { %v1926_v63 = vpack.i.b16 %v1918_v14, %v1918_v14  ;;  %v1954_v43 = vrot.slane %v1922_v32, %v16202_v33  ;;  %v1968_v21 = vrot.slane %v1924_v55, %v16202_v33  ;;  %v1975_v23 = vrot.slane %v12758_v49, %v16202_v33  ;;  %1995 = vst [vmem:[#allocation3] sm:$0x2] %v1994_v37 }
 0x4c5   :  { %v1997_v35 = vsel %vm16496_vm9, %v1940_v54, %v1996_v27  ;;  %v2000_v52 = vsel %vm16496_vm9, %v1947_v56, %v1999_v26  ;;  %v2006_v5 = vsel %vm16496_vm9, %v1961_v20, %v2005_v42  ;;  %14282 = vmatpush1.bf16.msra.mxu0 %v16342_v51  ;;  %14314 = vmatpush1.bf16.msra.mxu1 %v16345_v58 }
 0x4c6   :  { %v1982_v9 = vrot.slane %v1926_v63, %v16202_v33  ;;  %1998 = vst [vmem:[#allocation3 + $0x4] sm:$0x2] %v1997_v35  ;;  %2001 = vst [vmem:[#allocation3 + $0x8] sm:$0x2] %v2000_v52  ;;  %v2003_v41 = vsel %vm16496_vm9, %v1954_v43, %v2002_v3  ;;  %v2009_v19 = vsel %vm16496_vm9, %v1968_v21, %v2008_v57  ;;  %14284 = vmatprep.subr.bf16.mxu0 %v16350_v0  ;;  %v2367_v57 = vld [vmem:[#allocation3 + $0x4] sm:$0x4] }
 0x4c7   :  { %2007 = vst [vmem:[#allocation3 + $0x10] sm:$0x2] %v2006_v5  ;;  %v2012_v16 = vsel %vm16496_vm9, %v1975_v23, %v2011_v18  ;;  %2004 = vst [vmem:[#allocation3 + $0xc] sm:$0x2] %v2003_v41  ;;  %14316 = vmatprep.subr.bf16.mxu1 %v16352_v48  ;;  %v18576_v48 = vld [vmem:[#allocation25_spill] sm:$0xff]  ;;  %v2781_v21 = vld [vmem:[#allocation10 + $0x98] sm:$0xff] }
 0x4c8   :  { %2010 = vst [vmem:[#allocation3 + $0x14] sm:$0x2] %v2009_v19  ;;  %2013 = vst [vmem:[#allocation3 + $0x18] sm:$0x2] %v2012_v16  ;;  %v2015_v51 = vsel %vm16496_vm9, %v1982_v9, %v2014_v59  ;;  %v2364_v23 = vld [vmem:[#allocation3] sm:$0x4] }
 0x4c9   :  { %2016 = vst [vmem:[#allocation3 + $0x1c] sm:$0x2] %v2015_v51  ;;  %14286 = vmatpush1.bf16.msra.mxu0 %v16354_v4  ;;  %14318 = vmatpush1.bf16.msra.mxu1 %v16357_v1  ;;  %v18577_v1 = vld [vmem:[#allocation26_spill] sm:$0xff]  ;;  %v2370_v18 = vld [vmem:[#allocation3 + $0x8] sm:$0x4]  ;;  %vm4711_vm9 = vcmask 1044484  }
 0x4ca   :  { %14288 = vmatprep.subr.bf16.mxu0 %v16362_v47  ;;  %14320 = vmatprep.subr.bf16.mxu1 %v16364_v12  ;;  %v2376_v9 = vld [vmem:[#allocation3 + $0x10] sm:$0x4]  ;;  %v2373_v51 = vld [vmem:[#allocation3 + $0xc] sm:$0x4] }
 0x4cd   :  { %14290 = vmatpush1.bf16.msra.mxu0 %v16366_v6  ;;  %14322 = vmatpush1.bf16.msra.mxu1 %v16369_v15  ;;  %v18578_v15 = vld [vmem:[#allocation27_spill] sm:$0xff] }
 0x4ce   :  { %14292 = vmatprep.subr.bf16.mxu0 %v16373_v38  ;;  %14324 = vmatprep.subr.bf16.mxu1 %v16375_v22  ;;  %v18579_v22 = vld [vmem:[#allocation28_spill] sm:$0xff] }
 0x4d1   :  { %14294 = vmatpush1.bf16.msra.mxu0 %v16378_v36  ;;  %14326 = vmatpush1.bf16.msra.mxu1 %v16382_v7 }
 0x4d2   :  { %14296 = vmatprep.subr.bf16.mxu0 %v16384_v8  ;;  %14328 = vmatprep.subr.bf16.mxu1 %v16386_v46 }
 0x4d5   :  { %14298 = vmatpush1.bf16.msra.mxu0 %v16389_v13  ;;  %14330 = vmatpush1.bf16.msra.mxu1 %v16393_v44 }
 0x58b   :  { %v2151_v58 = vpop.f32.mrb[24].mxu0  ;;  %v2222_v0 = vpop.f32.mrb[24].mxu1 }
 0x58c   :  { %v2227_v4 = vadd.f32 %v2151_v58, %v18576_v48  ;;  %v2229_v47 = vadd.f32 %v2222_v0, %v18577_v1  ;;  %v2153_v12 = vpop.f32.mrb[25].mxu0  ;;  %v2224_v6 = vpop.f32.mrb[25].mxu1  ;;  %v2379_v58 = vld [vmem:[#allocation3 + $0x14] sm:$0x4]  ;;  %v2382_v0 = vld [vmem:[#allocation3 + $0x18] sm:$0x4] }
 0x58d   :  { %v2228_v38 = vadd.f32 %v2153_v12, %v18578_v15  ;;  %v2230_v36 = vadd.f32 %v2224_v6, %v18579_v22 }
 0x58e   :  { %v12759_v7 = vmul.f32 -1.442695, %v2227_v4  ;;  %v12761_v46 = vmul.f32 -1.442695, %v2229_v47 }
 0x58f   :  { %v12760_v8 = vmul.f32 -1.442695, %v2228_v38  ;;  %v2385_v38 = vld [vmem:[#allocation3 + $0x1c] sm:$0x4] }
 0x590   :  { %15171 = vpow2.f32 %v12759_v7 }
 0x591   :  { %15173 = vpow2.f32 %v12760_v8 }
 0x592   :  { %15175 = vtanh.f32 %v2230_v36 }
 0x593   :  { %15177 = vpow2.f32 %v12761_v46 }
 0x59a   :  { %v15172_v13 = vpop.eup %15171 }
 0x59b   :  { %v2240_v61 = vadd.f32 1.0, %v15172_v13  ;;  %v15174_v44 = vpop.eup %15173  ;;  %v2763_v13 = vld [vmem:[#allocation10 + $0x8] sm:$0xff] }
 0x59c   :  { %v2241_v25 = vadd.f32 1.0, %v15174_v44  ;;  %v15176_v29 = vpop.eup %15175  ;;  %v2765_v44 = vld [vmem:[#allocation10 + $0x18] sm:$0xff] }
 0x59d   :  { %15179 = vrcp.f32 %v2240_v61  ;;  %v15178_v2 = vpop.eup %15177  ;;  %v2767_v61 = vld [vmem:[#allocation10 + $0x28] sm:$0xff] }
 0x59e   :  { %15181 = vrcp.f32 %v2241_v25  ;;  %v2242_v31 = vadd.f32 1.0, %v15178_v2  ;;  %v16588_v25 = vpack.c.bf16 %v2767_v61, %v2763_v13  ;;  %v2762_v2 = vld [vmem:[#allocation10] sm:$0xff]  ;;  %v2800_v13 = vld [vmem:[#allocation10 + $0x130] sm:$0xff] }
 0x5a0   :  { %15183 = vrcp.f32 %v2242_v31  ;;  %v2764_v31 = vld [vmem:[#allocation10 + $0x10] sm:$0xff]  ;;  %14332 = vmatprep.subr.bf16.mxu0 %v16588_v25 }
 0x5a7   :  { %v15180_v53 = vpop.eup %15179 }
 0x5a8   :  { %v2251_v30 = vmul.f32 %v15180_v53, %v15176_v29  ;;  %v15182_v62 = vpop.eup %15181  ;;  %v2769_v29 = vld [vmem:[#allocation10 + $0x38] sm:$0xff]  ;;  %v2766_v53 = vld [vmem:[#allocation10 + $0x20] sm:$0xff] }
 0x5a9   :  { %v2250_v17 = vmul.f32 %v15182_v62, %v16479_v10  ;;  %v16592_v62 = vpack.c.bf16 %v2766_v53, %v2762_v2  ;;  %v2805_v2 = vld [vmem:[#allocation10 + $0x158] sm:$0xff] }
 0x5aa   :  { %v15184_v11 = vpop.eup %15183 }
 0x5ab   :  { %v16551_v60 = vadd.f32 %v2251_v30, %v2250_v17  ;;  %v16590_v30 = vpack.c.bf16 %v2769_v29, %v2765_v44  ;;  %v2768_v17 = vld [vmem:[#allocation10 + $0x30] sm:$0xff]  ;;  %v2803_v44 = vld [vmem:[#allocation10 + $0x148] sm:$0xff] }
 0x5ac   :  { %v2807_v29 = vld [vmem:[#allocation10 + $0x168] sm:$0xff] }
 0x5ad   :  { %15185 = vtanh.f32 %v16551_v60  ;;  %14364 = vmatprep.subr.bf16.mxu1 %v16590_v30  ;;  %v16648_v53 = vpack.c.bf16 %v2807_v29, %v2803_v44  ;;  %v18582_v44 = vld [vmem:[#allocation29_spill] sm:$0xff] }
 0x5b7   :  { %v15186_v40 = vpop.eup %15185 }
 0x5b8   :  { %v2254_v39 = vmul.f32 %v15186_v40, %v15184_v11  ;;  %v16595_v11 = vpack.c.bf16 %v2768_v17, %v2764_v31  ;;  %v2771_v40 = vld [vmem:[#allocation10 + $0x48] sm:$0xff]  ;;  %v2809_v31 = vld [vmem:[#allocation10 + $0x178] sm:$0xff]  ;;  %v2802_v17 = vld [vmem:[#allocation10 + $0x140] sm:$0xff] }
 0x5ba   :  { %v2255_v14 = vpack.c.bf16 %v2254_v39, %v2254_v39  ;;  %2521 = vmatmul.mubr.f32.vlgmr.msra.gmra.mrb[26].mxu0 %v2254_v39  ;;  %2592 = vmatmul.mubr.f32.vlgmr.msra.gmra.mrb[26].mxu1 %v2254_v39  ;;  %v2775_v39 = vld [vmem:[#allocation10 + $0x68] sm:$0xff] }
 0x5bb   :  { %2890 = vmatprep.mubr.f32.mxu0 %v18564_v34  ;;  %2961 = vmatprep.mubr.f32.mxu1 %v18564_v34 }
 0x5bc   :  { %v2263_v32 = vrot.slane %v2255_v14, %v16191_v45  ;;  %14334 = vmatpush1.bf16.msra.mxu0 %v16592_v62  ;;  %v2773_v14 = vld [vmem:[#allocation10 + $0x58] sm:$0xff]  ;;  %14366 = vmatpush1.bf16.msra.mxu1 %v16595_v11 }
 0x5be   :  { %v2264_v55 = vcombine.high %v2263_v32, %v2263_v32  ;;  %v2271_v10 = vrot.slane %v2263_v32, %v16191_v45  ;;  %v16600_v32 = vpack.c.bf16 %v2775_v39, %v2771_v40  ;;  %v2806_v40 = vld [vmem:[#allocation10 + $0x160] sm:$0xff]  ;;  %v16650_v39 = vpack.c.bf16 %v2809_v31, %v2805_v2  ;;  %v18583_v2 = vld [vmem:[#allocation30_spill] sm:$0xff] }
 0x5c0   :  { %v2278_v49 = vrot.slane %v2264_v55, %v16191_v45  ;;  %v2279_v50 = vcombine.high %v2271_v10, %v2271_v10  ;;  %v2282_v54 = vunpack.i.h.s16 %v2271_v10  ;;  %v12762_v56 = vpack.i.b16 %v2271_v10, %v2271_v10  ;;  %v2777_v55 = vld [vmem:[#allocation10 + $0x78] sm:$0xff]  ;;  %v2770_v10 = vld [vmem:[#allocation10 + $0x40] sm:$0xff]  ;;  %14336 = vmatprep.subr.bf16.mxu0 %v16600_v32 }
 0x5c2   :  { %v2280_v20 = vcombine.high %v2278_v49, %v2278_v49  ;;  %v2284_v37 = vunpack.i.h.s16 %v2278_v49  ;;  %v2286_v63 = vunpack.i.h.s16 %v2279_v50  ;;  %v2290_v43 = vpack.i.b16 %v2282_v54, %v2282_v54 }
 0x5c3   :  { %v12763_v27 = vpack.i.b16 %v2278_v49, %v2278_v49  ;;  %v12764_v26 = vpack.i.b16 %v2279_v50, %v2279_v50  ;;  %v2303_v42 = vrot.slane %v12762_v56, %v16202_v33  ;;  %v2774_v49 = vld [vmem:[#allocation10 + $0x60] sm:$0xff]  ;;  %v16602_v50 = vpack.c.bf16 %v2777_v55, %v2773_v14  ;;  %v2772_v56 = vld [vmem:[#allocation10 + $0x50] sm:$0xff] }
 0x5c4   :  { %v2288_v35 = vunpack.i.h.s16 %v2280_v20  ;;  %v2292_v52 = vpack.i.b16 %v2284_v37, %v2284_v37  ;;  %v2294_v3 = vpack.i.b16 %v2286_v63, %v2286_v63  ;;  %v12765_v5 = vpack.i.b16 %v2280_v20, %v2280_v20  ;;  %v2776_v20 = vld [vmem:[#allocation10 + $0x70] sm:$0xff]  ;;  %v2779_v63 = vld [vmem:[#allocation10 + $0x88] sm:$0xff] }
 0x5c5   :  { %v2310_v41 = vrot.slane %v2290_v43, %v16202_v33  ;;  %v2317_v19 = vrot.slane %v12763_v27, %v16202_v33  ;;  %v2331_v16 = vrot.slane %v12764_v26, %v16202_v33  ;;  %v2365_v59 = vsel %vm16560_vm12, %v2303_v42, %v2364_v23  ;;  %14368 = vmatprep.subr.bf16.mxu1 %v16602_v50  ;;  %v2783_v43 = vld [vmem:[#allocation10 + $0xa8] sm:$0xff]  ;;  %v2785_v27 = vld [vmem:[#allocation10 + $0xb8] sm:$0xff]  ;;  %v2778_v26 = vld [vmem:[#allocation10 + $0x80] sm:$0xff] }
 0x5c6   :  { %v2296_v48 = vpack.i.b16 %v2288_v35, %v2288_v35  ;;  %v2324_v4 = vrot.slane %v2292_v52, %v16202_v33  ;;  %v2338_v1 = vrot.slane %v2294_v3, %v16202_v33  ;;  %v2345_v47 = vrot.slane %v12765_v5, %v16202_v33  ;;  %2366 = vst [vmem:[#allocation3] sm:$0x4] %v2365_v59  ;;  %v2782_v42 = vld [vmem:[#allocation10 + $0xa0] sm:$0xff]  ;;  %v2780_v3 = vld [vmem:[#allocation10 + $0x90] sm:$0xff] }
 0x5c7   :  { %v2368_v12 = vsel %vm16560_vm12, %v2310_v41, %v2367_v57  ;;  %v2371_v6 = vsel %vm16560_vm12, %v2317_v19, %v2370_v18  ;;  %v2377_v15 = vsel %vm16560_vm12, %v2331_v16, %v2376_v9  ;;  %v16604_v54 = vpack.c.bf16 %v2774_v49, %v2770_v10  ;;  %v2784_v5 = vld [vmem:[#allocation10 + $0xb0] sm:$0xff]  ;;  %v2787_v18 = vld [vmem:[#allocation10 + $0xc8] sm:$0xff]  ;;  %v2789_v41 = vld [vmem:[#allocation10 + $0xd8] sm:$0xff] }
 0x5c8   :  { %v2352_v22 = vrot.slane %v2296_v48, %v16202_v33  ;;  %2369 = vst [vmem:[#allocation3 + $0x4] sm:$0x4] %v2368_v12  ;;  %2372 = vst [vmem:[#allocation3 + $0x8] sm:$0x4] %v2371_v6  ;;  %v2374_v36 = vsel %vm16560_vm12, %v2324_v4, %v2373_v51  ;;  %v2380_v7 = vsel %vm16560_vm12, %v2338_v1, %v2379_v58  ;;  %v2791_v9 = vld [vmem:[#allocation10 + $0xe8] sm:$0xff]  ;;  %v2793_v16 = vld [vmem:[#allocation10 + $0xf8] sm:$0xff] }
 0x5c9   :  { %2378 = vst [vmem:[#allocation3 + $0x10] sm:$0x4] %v2377_v15  ;;  %v2383_v8 = vsel %vm16560_vm12, %v2345_v47, %v2382_v0  ;;  %2375 = vst [vmem:[#allocation3 + $0xc] sm:$0x4] %v2374_v36  ;;  %v16607_v37 = vpack.c.bf16 %v2776_v20, %v2772_v56  ;;  %14338 = vmatpush1.bf16.msra.mxu0 %v16604_v54  ;;  %v16612_v23 = vpack.c.bf16 %v2783_v43, %v2779_v63  ;;  %v2786_v59 = vld [vmem:[#allocation10 + $0xc0] sm:$0xff]  ;;  %v2788_v48 = vld [vmem:[#allocation10 + $0xd0] sm:$0xff] }
 0x5ca   :  { %2381 = vst [vmem:[#allocation3 + $0x14] sm:$0x4] %v2380_v7  ;;  %2384 = vst [vmem:[#allocation3 + $0x18] sm:$0x4] %v2383_v8  ;;  %v2386_v46 = vsel %vm16560_vm12, %v2352_v22, %v2385_v38  ;;  %v16614_v35 = vpack.c.bf16 %v2785_v27, %v2781_v21  ;;  %v16616_v52 = vpack.c.bf16 %v2782_v42, %v2778_v26  ;;  %v2790_v51 = vld [vmem:[#allocation10 + $0xe0] sm:$0xff]  ;;  %v2792_v4 = vld [vmem:[#allocation10 + $0xf0] sm:$0xff] }
 0x5cb   :  { %2387 = vst [vmem:[#allocation3 + $0x1c] sm:$0x4] %v2386_v46  ;;  %14370 = vmatpush1.bf16.msra.mxu1 %v16607_v37  ;;  %14340 = vmatprep.subr.bf16.mxu0 %v16612_v23  ;;  %v16619_v57 = vpack.c.bf16 %v2784_v5, %v2780_v3  ;;  %v16624_v19 = vpack.c.bf16 %v2791_v9, %v2787_v18  ;;  %v2795_v47 = vld [vmem:[#allocation10 + $0x108] sm:$0xff]  ;;  %v2797_v6 = vld [vmem:[#allocation10 + $0x118] sm:$0xff]  ;;  %v2794_v22 = vld [vmem:[#allocation10 + $0x100] sm:$0xff]  ;;  %vm4717_vm12 = vcmask 1046534  }
 0x5cc   :  { %14372 = vmatprep.subr.bf16.mxu1 %v16614_v35  ;;  %v16626_v58 = vpack.c.bf16 %v2793_v16, %v2789_v41  ;;  %v16628_v0 = vpack.c.bf16 %v2790_v51, %v2786_v59  ;;  %v16631_v1 = vpack.c.bf16 %v2792_v4, %v2788_v48  ;;  %v2799_v12 = vld [vmem:[#allocation10 + $0x128] sm:$0xff]  ;;  %v2801_v38 = vld [vmem:[#allocation10 + $0x138] sm:$0xff]  ;;  %v2798_v36 = vld [vmem:[#allocation10 + $0x120] sm:$0xff]  ;;  %v16652_v14 = vpack.c.bf16 %v2806_v40, %v2802_v17 }
 0x5cd   :  { %14342 = vmatpush1.bf16.msra.mxu0 %v16616_v52  ;;  %v16636_v15 = vpack.c.bf16 %v2799_v12, %v2795_v47  ;;  %v16638_v7 = vpack.c.bf16 %v2801_v38, %v2797_v6  ;;  %v16640_v8 = vpack.c.bf16 %v2798_v36, %v2794_v22  ;;  %v2796_v46 = vld [vmem:[#allocation10 + $0x110] sm:$0xff]  ;;  %v2811_v49 = vld [vmem:[#allocation10 + $0x188] sm:$0xff]  ;;  %v2813_v63 = vld [vmem:[#allocation10 + $0x198] sm:$0xff] }
 0x5ce   :  { %14344 = vmatprep.subr.bf16.mxu0 %v16624_v19  ;;  %v16643_v61 = vpack.c.bf16 %v2800_v13, %v2796_v46  ;;  %v2804_v55 = vld [vmem:[#allocation10 + $0x150] sm:$0xff]  ;;  %v2815_v20 = vld [vmem:[#allocation10 + $0x1a8] sm:$0xff]  ;;  %v2817_v43 = vld [vmem:[#allocation10 + $0x1b8] sm:$0xff] }
 0x5cf   :  { %14374 = vmatpush1.bf16.msra.mxu1 %v16619_v57  ;;  %v2808_v10 = vld [vmem:[#allocation10 + $0x170] sm:$0xff]  ;;  %v16659_v21 = vpack.c.bf16 %v2815_v20, %v2811_v49  ;;  %v16661_v27 = vpack.c.bf16 %v2817_v43, %v2813_v63  ;;  %v2810_v26 = vld [vmem:[#allocation10 + $0x180] sm:$0xff]  ;;  %v2819_v9 = vld [vmem:[#allocation10 + $0x1c8] sm:$0xff] }
 0x5d0   :  { %14376 = vmatprep.subr.bf16.mxu1 %v16626_v58  ;;  %v16655_v56 = vpack.c.bf16 %v2808_v10, %v2804_v55  ;;  %v2814_v42 = vld [vmem:[#allocation10 + $0x1a0] sm:$0xff]  ;;  %v2812_v3 = vld [vmem:[#allocation10 + $0x190] sm:$0xff]  ;;  %v2823_v41 = vld [vmem:[#allocation10 + $0x1e8] sm:$0xff] }
 0x5d1   :  { %14346 = vmatpush1.bf16.msra.mxu0 %v16628_v0  ;;  %v16664_v5 = vpack.c.bf16 %v2814_v42, %v2810_v26  ;;  %v2816_v18 = vld [vmem:[#allocation10 + $0x1b0] sm:$0xff]  ;;  %v16670_v59 = vpack.c.bf16 %v2823_v41, %v2819_v9  ;;  %v2821_v51 = vld [vmem:[#allocation10 + $0x1d8] sm:$0xff]  ;;  %v2818_v4 = vld [vmem:[#allocation10 + $0x1c0] sm:$0xff] }
 0x5d2   :  { %14348 = vmatprep.subr.bf16.mxu0 %v16636_v15  ;;  %v16668_v16 = vpack.c.bf16 %v2816_v18, %v2812_v3  ;;  %v2825_v48 = vld [vmem:[#allocation10 + $0x1f8] sm:$0xff]  ;;  %v2822_v12 = vld [vmem:[#allocation10 + $0x1e0] sm:$0xff]  ;;  %v2820_v6 = vld [vmem:[#allocation10 + $0x1d0] sm:$0xff] }
 0x5d3   :  { %14378 = vmatpush1.bf16.msra.mxu1 %v16631_v1  ;;  %v16672_v47 = vpack.c.bf16 %v2825_v48, %v2821_v51  ;;  %v2824_v38 = vld [vmem:[#allocation10 + $0x1f0] sm:$0xff]  ;;  %v16675_v22 = vpack.c.bf16 %v2822_v12, %v2818_v4  ;;  %v18585_v49 = vld [vmem:[#allocation32_spill] sm:$0xff] }
 0x5d4   :  { %14380 = vmatprep.subr.bf16.mxu1 %v16638_v7  ;;  %v16679_v36 = vpack.c.bf16 %v2824_v38, %v2820_v6  ;;  %v18584_v55 = vld [vmem:[#allocation31_spill] sm:$0xff] }
 0x5d5   :  { %14350 = vmatpush1.bf16.msra.mxu0 %v16640_v8 }
 0x5d6   :  { %14352 = vmatprep.subr.bf16.mxu0 %v16648_v53 }
 0x5d7   :  { %14382 = vmatpush1.bf16.msra.mxu1 %v16643_v61 }
 0x5d8   :  { %14384 = vmatprep.subr.bf16.mxu1 %v16650_v39 }
 0x5d9   :  { %14354 = vmatpush1.bf16.msra.mxu0 %v16652_v14 }
 0x5da   :  { %14356 = vmatprep.subr.bf16.mxu0 %v16659_v21 }
 0x5db   :  { %14386 = vmatpush1.bf16.msra.mxu1 %v16655_v56 }
 0x5dc   :  { %14388 = vmatprep.subr.bf16.mxu1 %v16661_v27 }
 0x5dd   :  { %14358 = vmatpush1.bf16.msra.mxu0 %v16664_v5 }
 0x5de   :  { %14360 = vmatprep.subr.bf16.mxu0 %v16670_v59 }
 0x5df   :  { %14390 = vmatpush1.bf16.msra.mxu1 %v16668_v16 }
 0x5e0   :  { %14392 = vmatprep.subr.bf16.mxu1 %v16672_v47 }
 0x5e1   :  { %14362 = vmatpush1.bf16.msra.mxu0 %v16675_v22 }
 0x5e2   :  { %14396 = vmatprep.subr.bf16.mxu0 %v16588_v25 }
 0x5e3   :  { %14394 = vmatpush1.bf16.msra.mxu1 %v16679_v36 }
 0x5e4   :  { %14428 = vmatprep.subr.bf16.mxu1 %v16590_v30 }
 0x68d   :  { %v2522_v46 = vpop.f32.mrb[26].mxu0  ;;  %v2593_v13 = vpop.f32.mrb[26].mxu1 }
 0x68e   :  { %v2598_v29 = vadd.f32 %v2522_v46, %v18582_v44  ;;  %v2600_v31 = vadd.f32 %v2593_v13, %v18583_v2  ;;  %v2524_v17 = vpop.f32.mrb[27].mxu0  ;;  %v2595_v40 = vpop.f32.mrb[27].mxu1 }
 0x68f   :  { %v2599_v10 = vadd.f32 %v2524_v17, %v18584_v55  ;;  %v2601_v20 = vadd.f32 %v2595_v40, %v18585_v49 }
 0x690   :  { %v12766_v63 = vmul.f32 -1.442695, %v2598_v29  ;;  %v12768_v26 = vmul.f32 -1.442695, %v2600_v31 }
 0x691   :  { %v12767_v43 = vmul.f32 -1.442695, %v2599_v10 }
 0x692   :  { %15187 = vpow2.f32 %v12766_v63 }
 0x693   :  { %15189 = vpow2.f32 %v12767_v43  ;;  %v2734_v43 = vld [vmem:[#allocation3] sm:$0x4] }
 0x694   :  { %15191 = vtanh.f32 %v2601_v20 }
 0x695   :  { %15193 = vpow2.f32 %v12768_v26 }
 0x69c   :  { %v15188_v25 = vpop.eup %15187 }
 0x69d   :  { %v2611_v42 = vadd.f32 1.0, %v15188_v25  ;;  %v15190_v30 = vpop.eup %15189 }
 0x69e   :  { %v2612_v3 = vadd.f32 1.0, %v15190_v30  ;;  %v15192_v18 = vpop.eup %15191 }
 0x69f   :  { %15195 = vrcp.f32 %v2611_v42  ;;  %v15194_v9 = vpop.eup %15193 }
 0x6a0   :  { %15197 = vrcp.f32 %v2612_v3  ;;  %v2613_v4 = vadd.f32 1.0, %v15194_v9  ;;  %v2740_v9 = vld [vmem:[#allocation3 + $0x8] sm:$0x4] }
 0x6a2   :  { %15199 = vrcp.f32 %v2613_v4 }
 0x6a9   :  { %v15196_v41 = vpop.eup %15195 }
 0x6aa   :  { %v2622_v51 = vmul.f32 %v15196_v41, %v15192_v18  ;;  %v15198_v48 = vpop.eup %15197 }
 0x6ab   :  { %v2621_v12 = vmul.f32 %v15198_v48, %v16551_v60  ;;  %v2743_v48 = vld [vmem:[#allocation3 + $0xc] sm:$0x4] }
 0x6ac   :  { %v15200_v38 = vpop.eup %15199 }
 0x6ad   :  { %v16691_v6 = vadd.f32 %v2622_v51, %v2621_v12  ;;  %v2749_v12 = vld [vmem:[#allocation3 + $0x14] sm:$0x4] }
 0x6af   :  { %15201 = vtanh.f32 %v16691_v6 }
 0x6b9   :  { %v15202_v46 = vpop.eup %15201 }
 0x6ba   :  { %v2625_v13 = vmul.f32 %v15202_v46, %v15200_v38  ;;  %v2752_v38 = vld [vmem:[#allocation3 + $0x18] sm:$0x4] }
 0x6bc   :  { %v2626_v44 = vpack.c.bf16 %v2625_v13, %v2625_v13  ;;  %2891 = vmatmul.mubr.f32.vlgmr.msra.gmra.mrb[28].mxu0 %v2625_v13  ;;  %2962 = vmatmul.mubr.f32.vlgmr.msra.gmra.mrb[28].mxu1 %v2625_v13 }
 0x6bd   :  { %14398 = vmatpush1.bf16.msra.mxu0 %v16592_v62  ;;  %14430 = vmatpush1.bf16.msra.mxu1 %v16595_v11 }
 0x6be   :  { %v2634_v29 = vrot.slane %v2626_v44, %v16191_v45  ;;  %14400 = vmatprep.subr.bf16.mxu0 %v16600_v32  ;;  %14432 = vmatprep.subr.bf16.mxu1 %v16602_v50 }
 0x6bf   :  { %3261 = vmatprep.mubr.f32.mxu0 %v18564_v34  ;;  %3332 = vmatprep.mubr.f32.mxu1 %v18564_v34 }
 0x6c0   :  { %v2635_v60 = vcombine.high %v2634_v29, %v2634_v29  ;;  %v2642_v2 = vrot.slane %v2634_v29, %v16191_v45 }
 0x6c1   :  { %14402 = vmatpush1.bf16.msra.mxu0 %v16604_v54  ;;  %14434 = vmatpush1.bf16.msra.mxu1 %v16607_v37 }
 0x6c2   :  { %v2649_v62 = vrot.slane %v2635_v60, %v16191_v45  ;;  %v2650_v11 = vcombine.high %v2642_v2, %v2642_v2  ;;  %v2653_v31 = vunpack.i.h.s16 %v2642_v2  ;;  %v12769_v17 = vpack.i.b16 %v2642_v2, %v2642_v2  ;;  %14404 = vmatprep.subr.bf16.mxu0 %v16612_v23  ;;  %14436 = vmatprep.subr.bf16.mxu1 %v16614_v35  ;;  %v2755_v60 = vld [vmem:[#allocation3 + $0x1c] sm:$0x4]  ;;  %v18591_v2 = vld [vmem:[#allocation36_spill] sm:$0xff] }
 0x6c4   :  { %v2651_v32 = vcombine.high %v2649_v62, %v2649_v62  ;;  %v2655_v50 = vunpack.i.h.s16 %v2649_v62  ;;  %v2657_v40 = vunpack.i.h.s16 %v2650_v11  ;;  %v2661_v55 = vpack.i.b16 %v2653_v31, %v2653_v31 }
 0x6c5   :  { %v12770_v54 = vpack.i.b16 %v2649_v62, %v2649_v62  ;;  %v12771_v37 = vpack.i.b16 %v2650_v11, %v2650_v11  ;;  %v2674_v49 = vrot.slane %v12769_v17, %v16202_v33  ;;  %14406 = vmatpush1.bf16.msra.mxu0 %v16616_v52  ;;  %14438 = vmatpush1.bf16.msra.mxu1 %v16619_v57 }
 0x6c6   :  { %v2659_v23 = vunpack.i.h.s16 %v2651_v32  ;;  %v2663_v20 = vpack.i.b16 %v2655_v50, %v2655_v50  ;;  %v2665_v35 = vpack.i.b16 %v2657_v40, %v2657_v40  ;;  %v12772_v63 = vpack.i.b16 %v2651_v32, %v2651_v32  ;;  %14408 = vmatprep.subr.bf16.mxu0 %v16624_v19  ;;  %14440 = vmatprep.subr.bf16.mxu1 %v16626_v58  ;;  %v2737_v19 = vld [vmem:[#allocation3 + $0x4] sm:$0x4]  ;;  %v2746_v58 = vld [vmem:[#allocation3 + $0x10] sm:$0x4] }
 0x6c7   :  { %v2681_v26 = vrot.slane %v2661_v55, %v16202_v33  ;;  %v2688_v25 = vrot.slane %v12770_v54, %v16202_v33  ;;  %v2702_v42 = vrot.slane %v12771_v37, %v16202_v33  ;;  %v2735_v52 = vsel %vm16708_vm14, %v2674_v49, %v2734_v43  ;;  %v3526_v43 = vld [vmem:[#allocation12 + $0x20] sm:$0xff] }
 0x6c8   :  { %v2667_v30 = vpack.i.b16 %v2659_v23, %v2659_v23  ;;  %v2695_v57 = vrot.slane %v2663_v20, %v16202_v33  ;;  %v2709_v3 = vrot.slane %v2665_v35, %v16202_v33  ;;  %v2716_v18 = vrot.slane %v12772_v63, %v16202_v33  ;;  %2736 = vst [vmem:[#allocation3] sm:$0x4] %v2735_v52  ;;  %v3522_v63 = vld [vmem:[#allocation12] sm:$0xff]  ;;  %v3535_v52 = vld [vmem:[#allocation12 + $0x68] sm:$0xff] }
 0x6c9   :  { %v2738_v41 = vsel %vm16708_vm14, %v2681_v26, %v2737_v19  ;;  %v2741_v51 = vsel %vm16708_vm14, %v2688_v25, %v2740_v9  ;;  %v2747_v4 = vsel %vm16708_vm14, %v2702_v42, %v2746_v58  ;;  %14410 = vmatpush1.bf16.msra.mxu0 %v16628_v0  ;;  %14442 = vmatpush1.bf16.msra.mxu1 %v16631_v1  ;;  %v3523_v1 = vld [vmem:[#allocation12 + $0x8] sm:$0xff]  ;;  %v3524_v26 = vld [vmem:[#allocation12 + $0x10] sm:$0xff]  ;;  %v3530_v58 = vld [vmem:[#allocation12 + $0x40] sm:$0xff] }
 0x6ca   :  { %v2723_v46 = vrot.slane %v2667_v30, %v16202_v33  ;;  %2739 = vst [vmem:[#allocation3 + $0x4] sm:$0x4] %v2738_v41  ;;  %2742 = vst [vmem:[#allocation3 + $0x8] sm:$0x4] %v2741_v51  ;;  %v2744_v13 = vsel %vm16708_vm14, %v2695_v57, %v2743_v48  ;;  %v2750_v44 = vsel %vm16708_vm14, %v2709_v3, %v2749_v12  ;;  %14412 = vmatprep.subr.bf16.mxu0 %v16636_v15  ;;  %v3527_v15 = vld [vmem:[#allocation12 + $0x28] sm:$0xff]  ;;  %v3528_v25 = vld [vmem:[#allocation12 + $0x30] sm:$0xff] }
 0x6cb   :  { %2748 = vst [vmem:[#allocation3 + $0x10] sm:$0x4] %v2747_v4  ;;  %v2753_v29 = vsel %vm16708_vm14, %v2716_v18, %v2752_v38  ;;  %2745 = vst [vmem:[#allocation3 + $0xc] sm:$0x4] %v2744_v13  ;;  %14444 = vmatprep.subr.bf16.mxu1 %v16638_v7  ;;  %v14459_v7 = vpack.c.bf16 %v3527_v15, %v3523_v1  ;;  %v3531_v42 = vld [vmem:[#allocation12 + $0x48] sm:$0xff]  ;;  %v14461_v3 = vpack.c.bf16 %v3526_v43, %v3522_v63  ;;  %v3534_v41 = vld [vmem:[#allocation12 + $0x60] sm:$0xff] }
 0x6cc   :  { %2751 = vst [vmem:[#allocation3 + $0x14] sm:$0x4] %v2750_v44  ;;  %2754 = vst [vmem:[#allocation3 + $0x18] sm:$0x4] %v2753_v29  ;;  %v2756_v0 = vsel %vm16708_vm14, %v2723_v46, %v2755_v60  ;;  %v14525_v18 = vpack.c.bf16 %v3528_v25, %v3524_v26  ;;  %v14463_v9 = vpack.c.bf16 %v3535_v52, %v3531_v42  ;;  %v3543_v51 = vld [vmem:[#allocation12 + $0xa8] sm:$0xff]  ;;  %v3538_v12 = vld [vmem:[#allocation12 + $0x80] sm:$0xff] }
 0x6cd   :  { %2757 = vst [vmem:[#allocation3 + $0x1c] sm:$0x4] %v2756_v0  ;;  %14414 = vmatpush1.bf16.msra.mxu0 %v16640_v8  ;;  %14446 = vmatpush1.bf16.msra.mxu1 %v16643_v61  ;;  %v3525_v8 = vld [vmem:[#allocation12 + $0x18] sm:$0xff]  ;;  %v14465_v4 = vpack.c.bf16 %v3534_v41, %v3530_v58  ;;  %v3542_v13 = vld [vmem:[#allocation12 + $0xa0] sm:$0xff]  ;;  %v3547_v44 = vld [vmem:[#allocation12 + $0xc8] sm:$0xff] }
 0x6ce   :  { %14416 = vmatprep.subr.bf16.mxu0 %v16648_v53  ;;  %14448 = vmatprep.subr.bf16.mxu1 %v16650_v39  ;;  %v3529_v61 = vld [vmem:[#allocation12 + $0x38] sm:$0xff]  ;;  %v3551_v29 = vld [vmem:[#allocation12 + $0xe8] sm:$0xff]  ;;  %v14469_v1 = vpack.c.bf16 %v3542_v13, %v3538_v12 }
 0x6cf   :  { %v14523_v53 = vpack.c.bf16 %v3529_v61, %v3525_v8  ;;  %v14471_v15 = vpack.c.bf16 %v3551_v29, %v3547_v44  ;;  %v3555_v41 = vld [vmem:[#allocation12 + $0x108] sm:$0xff]  ;;  %v3532_v44 = vld [vmem:[#allocation12 + $0x50] sm:$0xff] }
 0x6d0   :  { %v3536_v29 = vld [vmem:[#allocation12 + $0x70] sm:$0xff] }
 0x6d1   :  { %14418 = vmatpush1.bf16.msra.mxu0 %v16652_v14  ;;  %14450 = vmatpush1.bf16.msra.mxu1 %v16655_v56  ;;  %v18588_v56 = vld [vmem:[#allocation33_spill] sm:$0xff] }
 0x6d2   :  { %14420 = vmatprep.subr.bf16.mxu0 %v16659_v21  ;;  %14452 = vmatprep.subr.bf16.mxu1 %v16661_v27  ;;  %v18589_v27 = vld [vmem:[#allocation34_spill] sm:$0xff] }
 0x6d5   :  { %14422 = vmatpush1.bf16.msra.mxu0 %v16664_v5  ;;  %14454 = vmatpush1.bf16.msra.mxu1 %v16668_v16 }
 0x6d6   :  { %14424 = vmatprep.subr.bf16.mxu0 %v16670_v59  ;;  %14456 = vmatprep.subr.bf16.mxu1 %v16672_v47  ;;  %v18590_v47 = vld [vmem:[#allocation35_spill] sm:$0xff] }
 0x6d9   :  { %14426 = vmatpush1.bf16.msra.mxu0 %v16675_v22  ;;  %14458 = vmatpush1.bf16.msra.mxu1 %v16679_v36 }
 0x6da   :  { %14460 = vmatprep.subr.bf16.mxu0 %v14459_v7  ;;  %14524 = vmatprep.subr.bf16.mxu1 %v14523_v53 }
 0x78f   :  { %v2892_v39 = vpop.f32.mrb[28].mxu0  ;;  %v2963_v14 = vpop.f32.mrb[28].mxu1 }
 0x790   :  { %v2968_v21 = vadd.f32 %v2892_v39, %v18588_v56  ;;  %v2970_v5 = vadd.f32 %v2963_v14, %v18589_v27  ;;  %v2894_v16 = vpop.f32.mrb[29].mxu0  ;;  %v2965_v59 = vpop.f32.mrb[29].mxu1  ;;  %v3546_v39 = vld [vmem:[#allocation12 + $0xc0] sm:$0xff] }
 0x791   :  { %v2969_v22 = vadd.f32 %v2894_v16, %v18590_v47  ;;  %v2971_v36 = vadd.f32 %v2965_v59, %v18591_v2  ;;  %v3550_v14 = vld [vmem:[#allocation12 + $0xe0] sm:$0xff]  ;;  %v3105_v59 = vld [vmem:[#allocation3] sm:$0x8]  ;;  %v3575_v16 = vld [vmem:[#allocation12 + $0x1a8] sm:$0xff] }
 0x792   :  { %v12773_v62 = vmul.f32 -1.442695, %v2968_v21  ;;  %v12775_v31 = vmul.f32 -1.442695, %v2970_v5 }
 0x793   :  { %v12774_v11 = vmul.f32 -1.442695, %v2969_v22 }
 0x794   :  { %15203 = vpow2.f32 %v12773_v62 }
 0x795   :  { %15205 = vpow2.f32 %v12774_v11 }
 0x796   :  { %15207 = vtanh.f32 %v2971_v36  ;;  %v14473_v36 = vpack.c.bf16 %v3550_v14, %v3546_v39  ;;  %v3545_v39 = vld [vmem:[#allocation12 + $0xb8] sm:$0xff] }
 0x797   :  { %15209 = vpow2.f32 %v12775_v31 }
 0x79e   :  { %v15204_v17 = vpop.eup %15203 }
 0x79f   :  { %v2981_v32 = vadd.f32 1.0, %v15204_v17  ;;  %v15206_v50 = vpop.eup %15205 }
 0x7a0   :  { %v2982_v40 = vadd.f32 1.0, %v15206_v50  ;;  %v15208_v55 = vpop.eup %15207  ;;  %v3111_v50 = vld [vmem:[#allocation3 + $0x8] sm:$0x8] }
 0x7a1   :  { %15211 = vrcp.f32 %v2981_v32  ;;  %v15210_v10 = vpop.eup %15209  ;;  %v3108_v32 = vld [vmem:[#allocation3 + $0x4] sm:$0x8] }
 0x7a2   :  { %15213 = vrcp.f32 %v2982_v40  ;;  %v2983_v23 = vadd.f32 1.0, %v15210_v10  ;;  %v3117_v40 = vld [vmem:[#allocation3 + $0x10] sm:$0x8] }
 0x7a4   :  { %15215 = vrcp.f32 %v2983_v23  ;;  %v3120_v23 = vld [vmem:[#allocation3 + $0x14] sm:$0x8] }
 0x7ab   :  { %v15212_v54 = vpop.eup %15211 }
 0x7ac   :  { %v2992_v37 = vmul.f32 %v15212_v54, %v15208_v55  ;;  %v15214_v49 = vpop.eup %15213 }
 0x7ad   :  { %v2991_v20 = vmul.f32 %v15214_v49, %v16691_v6  ;;  %v3539_v6 = vld [vmem:[#allocation12 + $0x88] sm:$0xff]  ;;  %v3114_v49 = vld [vmem:[#allocation3 + $0xc] sm:$0x8] }
 0x7ae   :  { %v15216_v30 = vpop.eup %15215  ;;  %v14467_v46 = vpack.c.bf16 %v3543_v51, %v3539_v6  ;;  %v3559_v6 = vld [vmem:[#allocation12 + $0x128] sm:$0xff] }
 0x7af   :  { %v16763_v35 = vadd.f32 %v2992_v37, %v2991_v20  ;;  %v3123_v20 = vld [vmem:[#allocation3 + $0x18] sm:$0x8]  ;;  %v14475_v51 = vpack.c.bf16 %v3559_v6, %v3555_v41 }
 0x7b0   :  { %v3568_v41 = vld [vmem:[#allocation12 + $0x170] sm:$0xff] }
 0x7b1   :  { %15217 = vtanh.f32 %v16763_v35 }
 0x7bb   :  { %v15218_v57 = vpop.eup %15217 }
 0x7bc   :  { %v2995_v19 = vmul.f32 %v15218_v57, %v15216_v30  ;;  %v3126_v57 = vld [vmem:[#allocation3 + $0x1c] sm:$0x8] }
 0x7be   :  { %v2996_v48 = vpack.c.bf16 %v2995_v19, %v2995_v19  ;;  %3262 = vmatmul.mubr.f32.vlgmr.msra.gmra.mrb[30].mxu0 %v2995_v19  ;;  %3333 = vmatmul.mubr.f32.vlgmr.msra.gmra.mrb[30].mxu1 %v2995_v19 }
 0x7bf   :  { %14462 = vmatpush1.bf16.msra.mxu0 %v14461_v3  ;;  %14526 = vmatpush1.bf16.msra.mxu1 %v14525_v18 }
 0x7c0   :  { %v3004_v38 = vrot.slane %v2996_v48, %v16191_v45  ;;  %14464 = vmatprep.subr.bf16.mxu0 %v14463_v9  ;;  %v3554_v48 = vld [vmem:[#allocation12 + $0x100] sm:$0xff] }
 0x7c2   :  { %v3005_v60 = vcombine.high %v3004_v38, %v3004_v38  ;;  %v3012_v0 = vrot.slane %v3004_v38, %v16191_v45  ;;  %v3533_v38 = vld [vmem:[#allocation12 + $0x58] sm:$0xff] }
 0x7c3   :  { %14466 = vmatpush1.bf16.msra.mxu0 %v14465_v4  ;;  %v3558_v4 = vld [vmem:[#allocation12 + $0x120] sm:$0xff] }
 0x7c4   :  { %v3019_v7 = vrot.slane %v3005_v60, %v16191_v45  ;;  %v3020_v8 = vcombine.high %v3012_v0, %v3012_v0  ;;  %v3023_v61 = vunpack.i.h.s16 %v3012_v0  ;;  %v12776_v53 = vpack.i.b16 %v3012_v0, %v3012_v0  ;;  %14468 = vmatprep.subr.bf16.mxu0 %v14467_v46  ;;  %v3537_v46 = vld [vmem:[#allocation12 + $0x78] sm:$0xff]  ;;  %v3563_v0 = vld [vmem:[#allocation12 + $0x148] sm:$0xff] }
 0x7c5   :  { %v14477_v12 = vpack.c.bf16 %v3558_v4, %v3554_v48  ;;  %v14527_v13 = vpack.c.bf16 %v3537_v46, %v3533_v38  ;;  %v14529_v60 = vpack.c.bf16 %v3536_v29, %v3532_v44  ;;  %v3599_v48 = vld [vmem:[#allocation12 + $0x268] sm:$0xff]  ;;  %v3598_v38 = vld [vmem:[#allocation12 + $0x260] sm:$0xff]  ;;  %v3577_v44 = vld [vmem:[#allocation12 + $0x1b8] sm:$0xff] }
 0x7c6   :  { %v3021_v56 = vcombine.high %v3019_v7, %v3019_v7  ;;  %v3025_v21 = vunpack.i.h.s16 %v3019_v7  ;;  %v3027_v27 = vunpack.i.h.s16 %v3020_v8  ;;  %v3031_v5 = vpack.i.b16 %v3023_v61, %v3023_v61 }
 0x7c7   :  { %v12777_v47 = vpack.i.b16 %v3019_v7, %v3019_v7  ;;  %v12778_v22 = vpack.i.b16 %v3020_v8, %v3020_v8  ;;  %v3044_v2 = vrot.slane %v12776_v53, %v16202_v33  ;;  %14470 = vmatpush1.bf16.msra.mxu0 %v14469_v1  ;;  %v3567_v1 = vld [vmem:[#allocation12 + $0x168] sm:$0xff]  ;;  %14528 = vmatprep.subr.bf16.mxu1 %v14527_v13  ;;  %v3562_v7 = vld [vmem:[#allocation12 + $0x140] sm:$0xff]  ;;  %v3541_v53 = vld [vmem:[#allocation12 + $0x98] sm:$0xff] }
 0x7c8   :  { %v3029_v62 = vunpack.i.h.s16 %v3021_v56  ;;  %v3033_v11 = vpack.i.b16 %v3025_v21, %v3025_v21  ;;  %v3035_v31 = vpack.i.b16 %v3027_v27, %v3027_v27  ;;  %v12779_v17 = vpack.i.b16 %v3021_v56, %v3021_v56  ;;  %14472 = vmatprep.subr.bf16.mxu0 %v14471_v15  ;;  %v3566_v8 = vld [vmem:[#allocation12 + $0x160] sm:$0xff]  ;;  %14530 = vmatpush1.bf16.msra.mxu1 %v14529_v60  ;;  %v3540_v56 = vld [vmem:[#allocation12 + $0x90] sm:$0xff]  ;;  %v3573_v13 = vld [vmem:[#allocation12 + $0x198] sm:$0xff] }
 0x7c9   :  { %v3051_v55 = vrot.slane %v3031_v5, %v16202_v33  ;;  %v3058_v10 = vrot.slane %v12777_v47, %v16202_v33  ;;  %v3072_v54 = vrot.slane %v12778_v22, %v16202_v33  ;;  %v3106_v37 = vsel %vm16771_vm1, %v3044_v2, %v3105_v59  ;;  %v3544_v21 = vld [vmem:[#allocation12 + $0xb0] sm:$0xff]  ;;  %v3571_v5 = vld [vmem:[#allocation12 + $0x188] sm:$0xff]  ;;  %v3570_v47 = vld [vmem:[#allocation12 + $0x180] sm:$0xff] }
 0x7ca   :  { %v3037_v63 = vpack.i.b16 %v3029_v62, %v3029_v62  ;;  %v3065_v43 = vrot.slane %v3033_v11, %v16202_v33  ;;  %v3079_v26 = vrot.slane %v3035_v31, %v16202_v33  ;;  %v3086_v25 = vrot.slane %v12779_v17, %v16202_v33  ;;  %3107 = vst [vmem:[#allocation3] sm:$0x8] %v3106_v37  ;;  %v3574_v22 = vld [vmem:[#allocation12 + $0x1a0] sm:$0xff]  ;;  %v3553_v62 = vld [vmem:[#allocation12 + $0xf8] sm:$0xff]  ;;  %v3548_v31 = vld [vmem:[#allocation12 + $0xd0] sm:$0xff] }
 0x7cb   :  { %v3109_v42 = vsel %vm16771_vm1, %v3051_v55, %v3108_v32  ;;  %v3112_v52 = vsel %vm16771_vm1, %v3058_v10, %v3111_v50  ;;  %v3118_v30 = vsel %vm16771_vm1, %v3072_v54, %v3117_v40  ;;  %14474 = vmatpush1.bf16.msra.mxu0 %v14473_v36  ;;  %v14479_v15 = vpack.c.bf16 %v3567_v1, %v3563_v0  ;;  %v3549_v36 = vld [vmem:[#allocation12 + $0xd8] sm:$0xff]  ;;  %v3552_v17 = vld [vmem:[#allocation12 + $0xf0] sm:$0xff]  ;;  %v3579_v50 = vld [vmem:[#allocation12 + $0x1c8] sm:$0xff] }
 0x7cc   :  { %v3093_v3 = vrot.slane %v3037_v63, %v16202_v33  ;;  %3110 = vst [vmem:[#allocation3 + $0x4] sm:$0x8] %v3109_v42  ;;  %3113 = vst [vmem:[#allocation3 + $0x8] sm:$0x8] %v3112_v52  ;;  %v3115_v18 = vsel %vm16771_vm1, %v3065_v43, %v3114_v49  ;;  %v3121_v19 = vsel %vm16771_vm1, %v3079_v26, %v3120_v23  ;;  %14476 = vmatprep.subr.bf16.mxu0 %v14475_v51  ;;  %v3583_v40 = vld [vmem:[#allocation12 + $0x1e8] sm:$0xff]  ;;  %v3578_v10 = vld [vmem:[#allocation12 + $0x1c0] sm:$0xff] }
 0x7cd   :  { %3119 = vst [vmem:[#allocation3 + $0x10] sm:$0x8] %v3118_v30  ;;  %v3124_v9 = vsel %vm16771_vm1, %v3086_v25, %v3123_v20  ;;  %3116 = vst [vmem:[#allocation3 + $0xc] sm:$0x8] %v3115_v18  ;;  %v14481_v61 = vpack.c.bf16 %v3566_v8, %v3562_v7  ;;  %v14531_v14 = vpack.c.bf16 %v3545_v39, %v3541_v53  ;;  %v3582_v54 = vld [vmem:[#allocation12 + $0x1e0] sm:$0xff]  ;;  %v3557_v49 = vld [vmem:[#allocation12 + $0x118] sm:$0xff] }
 0x7ce   :  { %3122 = vst [vmem:[#allocation3 + $0x14] sm:$0x8] %v3121_v19  ;;  %3125 = vst [vmem:[#allocation3 + $0x18] sm:$0x8] %v3124_v9  ;;  %v3127_v58 = vsel %vm16771_vm1, %v3093_v3, %v3126_v57  ;;  %v14533_v27 = vpack.c.bf16 %v3544_v21, %v3540_v56  ;;  %v14483_v59 = vpack.c.bf16 %v3575_v16, %v3571_v5  ;;  %v3561_v23 = vld [vmem:[#allocation12 + $0x138] sm:$0xff]  ;;  %v3556_v63 = vld [vmem:[#allocation12 + $0x110] sm:$0xff] }
 0x7cf   :  { %3128 = vst [vmem:[#allocation3 + $0x1c] sm:$0x8] %v3127_v58  ;;  %14478 = vmatpush1.bf16.msra.mxu0 %v14477_v12  ;;  %14532 = vmatprep.subr.bf16.mxu1 %v14531_v14  ;;  %v14485_v2 = vpack.c.bf16 %v3574_v22, %v3570_v47  ;;  %v14535_v11 = vpack.c.bf16 %v3553_v62, %v3549_v36  ;;  %v3560_v43 = vld [vmem:[#allocation12 + $0x130] sm:$0xff]  ;;  %v3587_v25 = vld [vmem:[#allocation12 + $0x208] sm:$0xff]  ;;  %v3586_v30 = vld [vmem:[#allocation12 + $0x200] sm:$0xff] }
 0x7d0   :  { %14480 = vmatprep.subr.bf16.mxu0 %v14479_v15  ;;  %14534 = vmatpush1.bf16.msra.mxu1 %v14533_v27  ;;  %v14537_v32 = vpack.c.bf16 %v3552_v17, %v3548_v31  ;;  %v14487_v55 = vpack.c.bf16 %v3583_v40, %v3579_v50  ;;  %v14489_v37 = vpack.c.bf16 %v3582_v54, %v3578_v10  ;;  %v3591_v42 = vld [vmem:[#allocation12 + $0x228] sm:$0xff]  ;;  %v3590_v57 = vld [vmem:[#allocation12 + $0x220] sm:$0xff]  ;;  %v3565_v18 = vld [vmem:[#allocation12 + $0x158] sm:$0xff] }
 0x7d1   :  { %14536 = vmatprep.subr.bf16.mxu1 %v14535_v11  ;;  %v14539_v20 = vpack.c.bf16 %v3561_v23, %v3557_v49  ;;  %v14541_v26 = vpack.c.bf16 %v3560_v43, %v3556_v63  ;;  %v14491_v52 = vpack.c.bf16 %v3591_v42, %v3587_v25  ;;  %v14493_v3 = vpack.c.bf16 %v3590_v57, %v3586_v30  ;;  %v3569_v19 = vld [vmem:[#allocation12 + $0x178] sm:$0xff]  ;;  %v3564_v58 = vld [vmem:[#allocation12 + $0x150] sm:$0xff]  ;;  %v3595_v51 = vld [vmem:[#allocation12 + $0x248] sm:$0xff] }
 0x7d2   :  { %v14543_v9 = vpack.c.bf16 %v3569_v19, %v3565_v18  ;;  %v14545_v6 = vpack.c.bf16 %v3568_v41, %v3564_v58  ;;  %v14495_v4 = vpack.c.bf16 %v3599_v48, %v3595_v51  ;;  %v3594_v12 = vld [vmem:[#allocation12 + $0x240] sm:$0xff]  ;;  %v14547_v29 = vpack.c.bf16 %v3577_v44, %v3573_v13  ;;  %v3572_v60 = vld [vmem:[#allocation12 + $0x190] sm:$0xff]  ;;  %v3603_v15 = vld [vmem:[#allocation12 + $0x288] sm:$0xff] }
 0x7d3   :  { %14482 = vmatpush1.bf16.msra.mxu0 %v14481_v61  ;;  %v14497_v46 = vpack.c.bf16 %v3598_v38, %v3594_v12  ;;  %v3576_v0 = vld [vmem:[#allocation12 + $0x1b0] sm:$0xff]  ;;  %v3607_v7 = vld [vmem:[#allocation12 + $0x2a8] sm:$0xff]  ;;  %v3602_v61 = vld [vmem:[#allocation12 + $0x280] sm:$0xff] }
 0x7d4   :  { %14484 = vmatprep.subr.bf16.mxu0 %v14483_v59  ;;  %14538 = vmatpush1.bf16.msra.mxu1 %v14537_v32  ;;  %v14549_v1 = vpack.c.bf16 %v3576_v0, %v3572_v60  ;;  %v14499_v8 = vpack.c.bf16 %v3607_v7, %v3603_v15  ;;  %v3606_v53 = vld [vmem:[#allocation12 + $0x2a0] sm:$0xff]  ;;  %v3581_v14 = vld [vmem:[#allocation12 + $0x1d8] sm:$0xff]  ;;  %v3580_v27 = vld [vmem:[#allocation12 + $0x1d0] sm:$0xff] }
 0x7d5   :  { %14540 = vmatprep.subr.bf16.mxu1 %v14539_v20  ;;  %v14501_v39 = vpack.c.bf16 %v3606_v53, %v3602_v61  ;;  %v3585_v56 = vld [vmem:[#allocation12 + $0x1f8] sm:$0xff]  ;;  %v3584_v5 = vld [vmem:[#allocation12 + $0x1f0] sm:$0xff]  ;;  %v3611_v59 = vld [vmem:[#allocation12 + $0x2c8] sm:$0xff] }
 0x7d6   :  { %v14551_v21 = vpack.c.bf16 %v3585_v56, %v3581_v14  ;;  %v14553_v16 = vpack.c.bf16 %v3584_v5, %v3580_v27  ;;  %v3615_v47 = vld [vmem:[#allocation12 + $0x2e8] sm:$0xff]  ;;  %v3614_v36 = vld [vmem:[#allocation12 + $0x2e0] sm:$0xff]  ;;  %v3589_v11 = vld [vmem:[#allocation12 + $0x218] sm:$0xff] }
 0x7d7   :  { %14486 = vmatpush1.bf16.msra.mxu0 %v14485_v2  ;;  %v14503_v22 = vpack.c.bf16 %v3615_v47, %v3611_v59  ;;  %v3610_v2 = vld [vmem:[#allocation12 + $0x2c0] sm:$0xff]  ;;  %v3593_v31 = vld [vmem:[#allocation12 + $0x238] sm:$0xff]  ;;  %v3588_v32 = vld [vmem:[#allocation12 + $0x210] sm:$0xff] }
 0x7d8   :  { %14488 = vmatprep.subr.bf16.mxu0 %v14487_v55  ;;  %14542 = vmatpush1.bf16.msra.mxu1 %v14541_v26  ;;  %v14505_v62 = vpack.c.bf16 %v3614_v36, %v3610_v2  ;;  %v14555_v17 = vpack.c.bf16 %v3593_v31, %v3589_v11  ;;  %v3592_v50 = vld [vmem:[#allocation12 + $0x230] sm:$0xff]  ;;  %v3619_v55 = vld [vmem:[#allocation12 + $0x308] sm:$0xff]  ;;  %v3622_v49 = vld [vmem:[#allocation12 + $0x320] sm:$0xff] }
 0x7d9   :  { %14544 = vmatprep.subr.bf16.mxu1 %v14543_v9  ;;  %v14557_v40 = vpack.c.bf16 %v3592_v50, %v3588_v32  ;;  %v3623_v10 = vld [vmem:[#allocation12 + $0x328] sm:$0xff]  ;;  %v3597_v23 = vld [vmem:[#allocation12 + $0x258] sm:$0xff]  ;;  %v3596_v43 = vld [vmem:[#allocation12 + $0x250] sm:$0xff] }
 0x7da   :  { %v14507_v54 = vpack.c.bf16 %v3623_v10, %v3619_v55  ;;  %v3601_v63 = vld [vmem:[#allocation12 + $0x278] sm:$0xff]  ;;  %v3600_v26 = vld [vmem:[#allocation12 + $0x270] sm:$0xff]  ;;  %v3631_v30 = vld [vmem:[#allocation12 + $0x368] sm:$0xff] }
 0x7db   :  { %14490 = vmatpush1.bf16.msra.mxu0 %v14489_v37  ;;  %v3618_v37 = vld [vmem:[#allocation12 + $0x300] sm:$0xff]  ;;  %v14559_v25 = vpack.c.bf16 %v3601_v63, %v3597_v23  ;;  %v14561_v42 = vpack.c.bf16 %v3600_v26, %v3596_v43  ;;  %v3605_v19 = vld [vmem:[#allocation12 + $0x298] sm:$0xff]  ;;  %v3608_v51 = vld [vmem:[#allocation12 + $0x2b0] sm:$0xff] }
 0x7dc   :  { %14492 = vmatprep.subr.bf16.mxu0 %v14491_v52  ;;  %14546 = vmatpush1.bf16.msra.mxu1 %v14545_v6  ;;  %v14509_v20 = vpack.c.bf16 %v3622_v49, %v3618_v37  ;;  %v3627_v52 = vld [vmem:[#allocation12 + $0x348] sm:$0xff]  ;;  %v3626_v57 = vld [vmem:[#allocation12 + $0x340] sm:$0xff]  ;;  %v3609_v9 = vld [vmem:[#allocation12 + $0x2b8] sm:$0xff] }
 0x7dd   :  { %14548 = vmatprep.subr.bf16.mxu1 %v14547_v29  ;;  %v3630_v18 = vld [vmem:[#allocation12 + $0x360] sm:$0xff]  ;;  %v14563_v41 = vpack.c.bf16 %v3609_v9, %v3605_v19  ;;  %v3604_v6 = vld [vmem:[#allocation12 + $0x290] sm:$0xff]  ;;  %v3635_v48 = vld [vmem:[#allocation12 + $0x388] sm:$0xff] }
 0x7de   :  { %v14513_v58 = vpack.c.bf16 %v3630_v18, %v3626_v57  ;;  %v3639_v12 = vld [vmem:[#allocation12 + $0x3a8] sm:$0xff]  ;;  %v3634_v38 = vld [vmem:[#allocation12 + $0x380] sm:$0xff]  ;;  %v3613_v44 = vld [vmem:[#allocation12 + $0x2d8] sm:$0xff] }
 0x7df   :  { %14494 = vmatpush1.bf16.msra.mxu0 %v14493_v3  ;;  %v14511_v3 = vpack.c.bf16 %v3631_v30, %v3627_v52  ;;  %v14515_v13 = vpack.c.bf16 %v3639_v12, %v3635_v48  ;;  %v3617_v29 = vld [vmem:[#allocation12 + $0x2f8] sm:$0xff]  ;;  %v3612_v60 = vld [vmem:[#allocation12 + $0x2d0] sm:$0xff]  ;;  %v3643_v7 = vld [vmem:[#allocation12 + $0x3c8] sm:$0xff] }
 0x7e0   :  { %14496 = vmatprep.subr.bf16.mxu0 %v14495_v4  ;;  %14550 = vmatpush1.bf16.msra.mxu1 %v14549_v1  ;;  %v14565_v4 = vpack.c.bf16 %v3608_v51, %v3604_v6  ;;  %v14567_v1 = vpack.c.bf16 %v3617_v29, %v3613_v44  ;;  %v3616_v15 = vld [vmem:[#allocation12 + $0x2f0] sm:$0xff]  ;;  %v3642_v53 = vld [vmem:[#allocation12 + $0x3c0] sm:$0xff]  ;;  %v3621_v14 = vld [vmem:[#allocation12 + $0x318] sm:$0xff] }
 0x7e1   :  { %14552 = vmatprep.subr.bf16.mxu1 %v14551_v21  ;;  %v14569_v56 = vpack.c.bf16 %v3616_v15, %v3612_v60  ;;  %v3625_v21 = vld [vmem:[#allocation12 + $0x338] sm:$0xff]  ;;  %v3624_v59 = vld [vmem:[#allocation12 + $0x330] sm:$0xff]  ;;  %v18595_v52 = vld [vmem:[#allocation38_spill] sm:$0xff] }
 0x7e2   :  { %v14571_v27 = vpack.c.bf16 %v3625_v21, %v3621_v14  ;;  %v3633_v2 = vld [vmem:[#allocation12 + $0x378] sm:$0xff]  ;;  %v3632_v11 = vld [vmem:[#allocation12 + $0x370] sm:$0xff] }
 0x7e3   :  { %14498 = vmatpush1.bf16.msra.mxu0 %v14497_v46  ;;  %v3638_v46 = vld [vmem:[#allocation12 + $0x3a0] sm:$0xff]  ;;  %v3641_v32 = vld [vmem:[#allocation12 + $0x3b8] sm:$0xff]  ;;  %v3640_v55 = vld [vmem:[#allocation12 + $0x3b0] sm:$0xff] }
 0x7e4   :  { %14500 = vmatprep.subr.bf16.mxu0 %v14499_v8  ;;  %14554 = vmatpush1.bf16.msra.mxu1 %v14553_v16  ;;  %v14517_v0 = vpack.c.bf16 %v3638_v46, %v3634_v38  ;;  %v3647_v8 = vld [vmem:[#allocation12 + $0x3e8] sm:$0xff]  ;;  %v3620_v16 = vld [vmem:[#allocation12 + $0x310] sm:$0xff]  ;;  %v3649_v37 = vld [vmem:[#allocation12 + $0x3f8] sm:$0xff] }
 0x7e5   :  { %14556 = vmatprep.subr.bf16.mxu1 %v14555_v17  ;;  %v14519_v61 = vpack.c.bf16 %v3647_v8, %v3643_v7  ;;  %v14573_v47 = vpack.c.bf16 %v3624_v59, %v3620_v16  ;;  %v3637_v17 = vld [vmem:[#allocation12 + $0x398] sm:$0xff]  ;;  %v3644_v23 = vld [vmem:[#allocation12 + $0x3d0] sm:$0xff] }
 0x7e6   :  { %v14579_v50 = vpack.c.bf16 %v3641_v32, %v3637_v17  ;;  %v18596_v18 = vld [vmem:[#allocation39_spill] sm:$0xff]  ;;  %v3521_v8 = vld [vmem:[#allocation7] sm:$0xff] }
 0x7e7   :  { %14502 = vmatpush1.bf16.msra.mxu0 %v14501_v39  ;;  %v3646_v39 = vld [vmem:[#allocation12 + $0x3e0] sm:$0xff] }
 0x7e8   :  { %14504 = vmatprep.subr.bf16.mxu0 %v14503_v22  ;;  %14558 = vmatpush1.bf16.msra.mxu1 %v14557_v40  ;;  %v14521_v5 = vpack.c.bf16 %v3646_v39, %v3642_v53  ;;  %v3629_v22 = vld [vmem:[#allocation12 + $0x358] sm:$0xff]  ;;  %v3636_v40 = vld [vmem:[#allocation12 + $0x390] sm:$0xff] }
 0x7e9   :  { %14560 = vmatprep.subr.bf16.mxu1 %v14559_v25  ;;  %v14575_v36 = vpack.c.bf16 %v3633_v2, %v3629_v22  ;;  %v14581_v10 = vpack.c.bf16 %v3640_v55, %v3636_v40  ;;  %v18594_v25 = vld [vmem:[#allocation37_spill] sm:$0xff] }
 0x7eb   :  { %14506 = vmatpush1.bf16.msra.mxu0 %v14505_v62  ;;  %v3628_v62 = vld [vmem:[#allocation12 + $0x350] sm:$0xff] }
 0x7ec   :  { %14508 = vmatprep.subr.bf16.mxu0 %v14507_v54  ;;  %14562 = vmatpush1.bf16.msra.mxu1 %v14561_v42  ;;  %v14577_v31 = vpack.c.bf16 %v3632_v11, %v3628_v62  ;;  %v3645_v54 = vld [vmem:[#allocation12 + $0x3d8] sm:$0xff] }
 0x7ed   :  { %14564 = vmatprep.subr.bf16.mxu1 %v14563_v41  ;;  %v14583_v49 = vpack.c.bf16 %v3649_v37, %v3645_v54 }
 0x7ef   :  { %14510 = vmatpush1.bf16.msra.mxu0 %v14509_v20  ;;  %v3648_v20 = vld [vmem:[#allocation12 + $0x3f0] sm:$0xff] }
 0x7f0   :  { %14512 = vmatprep.subr.bf16.mxu0 %v14511_v3  ;;  %14566 = vmatpush1.bf16.msra.mxu1 %v14565_v4  ;;  %v14585_v63 = vpack.c.bf16 %v3648_v20, %v3644_v23 }
 0x7f1   :  { %14568 = vmatprep.subr.bf16.mxu1 %v14567_v1 }
 0x7f3   :  { %14514 = vmatpush1.bf16.msra.mxu0 %v14513_v58 }
 0x7f4   :  { %14516 = vmatprep.subr.bf16.mxu0 %v14515_v13  ;;  %14570 = vmatpush1.bf16.msra.mxu1 %v14569_v56 }
 0x7f5   :  { %14572 = vmatprep.subr.bf16.mxu1 %v14571_v27 }
 0x7f7   :  { %14518 = vmatpush1.bf16.msra.mxu0 %v14517_v0 }
 0x7f8   :  { %14520 = vmatprep.subr.bf16.mxu0 %v14519_v61  ;;  %14574 = vmatpush1.bf16.msra.mxu1 %v14573_v47 }
 0x7f9   :  { %14576 = vmatprep.subr.bf16.mxu1 %v14575_v36 }
 0x7fb   :  { %14522 = vmatpush1.bf16.msra.mxu0 %v14521_v5 }
 0x7fc   :  { %13179 = vmatprep.subr.bf16.mxu0 %v18564_v34  ;;  %14578 = vmatpush1.bf16.msra.mxu1 %v14577_v31 }
 0x7fd   :  { %14580 = vmatprep.subr.bf16.mxu1 %v14579_v50  ;;  %v3475_v50 = vld [vmem:[#allocation3] sm:$0x8] }
 0x800   :  { %14582 = vmatpush1.bf16.msra.mxu1 %v14581_v10 }
 0x801   :  { %14584 = vmatprep.subr.bf16.mxu1 %v14583_v49 }
 0x804   :  { %14586 = vmatpush1.bf16.msra.mxu1 %v14585_v63  ;;  %v3478_v63 = vld [vmem:[#allocation3 + $0x4] sm:$0x8] }
 0x805   :  { %13185 = vmatprep.subr.bf16.mxu1 %v18564_v34 }
 0x891   :  { %v3263_v43 = vpop.f32.mrb[30].mxu0  ;;  %v3334_v26 = vpop.f32.mrb[30].mxu1 }
 0x892   :  { %v3339_v42 = vadd.f32 %v3263_v43, %v18594_v25  ;;  %v3341_v30 = vadd.f32 %v3334_v26, %v18595_v52  ;;  %v3265_v57 = vpop.f32.mrb[31].mxu0  ;;  %v3336_v3 = vpop.f32.mrb[31].mxu1  ;;  %v3481_v43 = vld [vmem:[#allocation3 + $0x8] sm:$0x8]  ;;  %v3487_v26 = vld [vmem:[#allocation3 + $0x10] sm:$0x8] }
 0x893   :  { %v3340_v19 = vadd.f32 %v3265_v57, %v18596_v18  ;;  %v3342_v9 = vadd.f32 %v3336_v3, %v16181_v28  ;;  %v3484_v52 = vld [vmem:[#allocation3 + $0xc] sm:$0x8]  ;;  %v3490_v57 = vld [vmem:[#allocation3 + $0x14] sm:$0x8]  ;;  %v3493_v3 = vld [vmem:[#allocation3 + $0x18] sm:$0x8] }
 0x894   :  { %v12780_v58 = vmul.f32 -1.442695, %v3339_v42  ;;  %v12782_v6 = vmul.f32 -1.442695, %v3341_v30 }
 0x895   :  { %v12781_v41 = vmul.f32 -1.442695, %v3340_v19 }
 0x896   :  { %15219 = vpow2.f32 %v12780_v58 }
 0x897   :  { %15221 = vpow2.f32 %v12781_v41  ;;  %v3496_v41 = vld [vmem:[#allocation3 + $0x1c] sm:$0x8] }
 0x898   :  { %15223 = vtanh.f32 %v3342_v9 }
 0x899   :  { %15225 = vpow2.f32 %v12782_v6 }
 0x8a0   :  { %v15220_v51 = vpop.eup %15219 }
 0x8a1   :  { %v3352_v48 = vadd.f32 1.0, %v15220_v51  ;;  %v15222_v4 = vpop.eup %15221 }
 0x8a2   :  { %v3353_v12 = vadd.f32 1.0, %v15222_v4  ;;  %v15224_v38 = vpop.eup %15223  ;;  %v18599_v4 = vld [vmem:[#allocation21_spill] sm:$0xff] }
 0x8a3   :  { %15227 = vrcp.f32 %v3352_v48  ;;  %v15226_v46 = vpop.eup %15225  ;;  %v3499_v48 = vld [vmem:[%s18509_s7] sm:$0xf]  ;;  %s15800_s7 = smov [#allocation15]  }
 0x8a4   :  { %15229 = vrcp.f32 %v3353_v12  ;;  %v3354_v60 = vadd.f32 1.0, %v15226_v46  ;;  %v16857_v12 = vrot.slane %v3499_v48, %v18599_v4  ;;  %s12680_s13 = sshll.u32 %s15800_s7, 4  ;;  %s12681_s13 = int_to_ptr.vmem [resolvable:$true] %s12680_s13 }
 0x8a5   :  { %s15751_s14 = scalar_lea.vmem %s12681_s13, 1024  ;;  %p15756_p7 = scmp.lt.s32.totalorder %s12681_s13, %s12681_s13 }
 0x8a6   :  { %15231 = vrcp.f32 %v3354_v60  ;;  %18600 = vst [vmem:[#allocation22_spill] sm:$0xff] %v16857_v12  ;;  %p15752_p6 = scmp.ne.s32.totalorder %s12681_s13, %s15751_s14  ;;  %p15757_p8 = scmp.lt.s32.totalorder %s15751_s14, %s15751_s14 }
 0x8a8   :  { %p15758_p9 = por %p15757_p8, %p15756_p7 }
 0x8aa   :  { %p15759_p10 = pnand %p15758_p9, %p15752_p6 }
 0x8ad   :  { %v15228_v13 = vpop.eup %15227 }
 0x8ae   :  { %v3363_v44 = vmul.f32 %v15228_v13, %v15224_v38  ;;  %v15230_v29 = vpop.eup %15229  ;;  %v18601_v38 = vsub.s32 1, %v16087_v24 }
 0x8af   :  { %v3362_v28 = vmul.f32 %v15230_v29, %v16763_v35 }
 0x8b0   :  { %v15232_v1 = vpop.eup %15231  ;;  %v16861_v46 = vrot.slane %v3499_v48, %v18601_v38 }
 0x8b1   :  { %v16806_v0 = vadd.f32 %v3363_v44, %v3362_v28 }
 0x8b2   :  { %18602 = vst [vmem:[#allocation23_spill] sm:$0xff] %v16861_v46 }
 0x8b3   :  { %15233 = vtanh.f32 %v16806_v0 }
 0x8bd   :  { %v15234_v15 = vpop.eup %15233 }
 0x8be   :  { %v3366_v7 = vmul.f32 %v15234_v15, %v15232_v1 }
 0x8c0   :  { %v3367_v61 = vpack.c.bf16 %v3366_v7, %v3366_v7  ;;  %3714 = vmatprep.mubr.f32.mxu0 %v3366_v7  ;;  %3785 = vmatprep.mubr.f32.mxu1 %v3366_v7  ;;  %v18603_v7 = vsub.s32 2, %v16087_v24 }
 0x8c1   :  { %3715 = vmatmul.mubr.f32.vlgmr.msra.gmra.mrb[32].mxu0 %v3521_v8  ;;  %3786 = vmatmul.mubr.f32.vlgmr.msra.gmra.mrb[32].mxu1 %v3521_v8 }
 0x8c2   :  { %v3375_v53 = vrot.slane %v3367_v61, %v16191_v45  ;;  %13181 = vmatprep.mubr.msk.bf16.mxu0 %vm15799_vm4, %v18564_v34  ;;  %13187 = vmatprep.mubr.msk.bf16.mxu1 %vm15799_vm4, %v18564_v34  ;;  %v16867_v8 = vrot.slane %v3499_v48, %v18603_v7 }
 0x8c4   :  { %v3376_v39 = vcombine.high %v3375_v53, %v3375_v53  ;;  %v3383_v14 = vrot.slane %v3375_v53, %v16191_v45  ;;  %18604 = vst [vmem:[#allocation24_spill] sm:$0xff] %v16867_v8 }
 0x8c6   :  { %v3390_v35 = vrot.slane %v3376_v39, %v16191_v45  ;;  %v3391_v56 = vcombine.high %v3383_v14, %v3383_v14  ;;  %v3394_v21 = vunpack.i.h.s16 %v3383_v14  ;;  %v12783_v27 = vpack.i.b16 %v3383_v14, %v3383_v14 }
 0x8c7   :  { %v18605_v39 = vsub.s32 3, %v16087_v24 }
 0x8c8   :  { %v3392_v5 = vcombine.high %v3390_v35, %v3390_v35  ;;  %v3396_v16 = vunpack.i.h.s16 %v3390_v35  ;;  %v3398_v59 = vunpack.i.h.s16 %v3391_v56  ;;  %v3402_v47 = vpack.i.b16 %v3394_v21, %v3394_v21 }
 0x8c9   :  { %v12784_v2 = vpack.i.b16 %v3390_v35, %v3390_v35  ;;  %v12785_v36 = vpack.i.b16 %v3391_v56, %v3391_v56  ;;  %v3415_v62 = vrot.slane %v12783_v27, %v16202_v33  ;;  %v16872_v14 = vrot.slane %v3499_v48, %v18605_v39 }
 0x8ca   :  { %v3400_v11 = vunpack.i.h.s16 %v3392_v5  ;;  %v3404_v31 = vpack.i.b16 %v3396_v16, %v3396_v16  ;;  %v3406_v17 = vpack.i.b16 %v3398_v59, %v3398_v59  ;;  %v12786_v32 = vpack.i.b16 %v3392_v5, %v3392_v5 }
 0x8cb   :  { %v3422_v40 = vrot.slane %v3402_v47, %v16202_v33  ;;  %v3429_v55 = vrot.slane %v12784_v2, %v16202_v33  ;;  %v3443_v10 = vrot.slane %v12785_v36, %v16202_v33  ;;  %v3476_v54 = vsel %vm16813_vm3, %v3415_v62, %v3475_v50  ;;  %18606 = vst [vmem:[#allocation25_spill] sm:$0xff] %v16872_v14 }
 0x8cc   :  { %v3408_v37 = vpack.i.b16 %v3400_v11, %v3400_v11  ;;  %v3436_v49 = vrot.slane %v3404_v31, %v16202_v33  ;;  %v3450_v23 = vrot.slane %v3406_v17, %v16202_v33  ;;  %v3457_v20 = vrot.slane %v12786_v32, %v16202_v33  ;;  %3477 = vst [vmem:[#allocation3] sm:$0x8] %v3476_v54 }
 0x8cd   :  { %v3479_v25 = vsel %vm16813_vm3, %v3422_v40, %v3478_v63  ;;  %v3482_v42 = vsel %vm16813_vm3, %v3429_v55, %v3481_v43  ;;  %v3488_v30 = vsel %vm16813_vm3, %v3443_v10, %v3487_v26 }
 0x8ce   :  { %v3464_v18 = vrot.slane %v3408_v37, %v16202_v33  ;;  %3480 = vst [vmem:[#allocation3 + $0x4] sm:$0x8] %v3479_v25  ;;  %3483 = vst [vmem:[#allocation3 + $0x8] sm:$0x8] %v3482_v42  ;;  %v3485_v19 = vsel %vm16813_vm3, %v3436_v49, %v3484_v52  ;;  %v3491_v9 = vsel %vm16813_vm3, %v3450_v23, %v3490_v57 }
 0x8cf   :  { %3489 = vst [vmem:[#allocation3 + $0x10] sm:$0x8] %v3488_v30  ;;  %v3494_v58 = vsel %vm16813_vm3, %v3457_v20, %v3493_v3  ;;  %3486 = vst [vmem:[#allocation3 + $0xc] sm:$0x8] %v3485_v19 }
 0x8d0   :  { %3492 = vst [vmem:[#allocation3 + $0x14] sm:$0x8] %v3491_v9  ;;  %3495 = vst [vmem:[#allocation3 + $0x18] sm:$0x8] %v3494_v58  ;;  %v3497_v6 = vsel %vm16813_vm3, %v3464_v18, %v3496_v41 }
 0x8d1   :  { %3498 = vst [vmem:[#allocation3 + $0x1c] sm:$0x8] %v3497_v6 }
 0x8d3   :  { %v16841_v33 = vld [vmem:[#allocation3] sm:$0xf] }
 0x8d4   :  { %13180 = vmatpush3.bf16.xpose.msra.mxu0 %v16841_v33 }
 0x8d5   :  { %v16844_v51 = vld [vmem:[#allocation3 + $0x4] sm:$0xf]  ;;  %13191 = vmatprep.subr.bf16.mxu0 %v18564_v34  ;;  %v16887_v20 = vld [vmem:[#allocation3 + $0x8] sm:$0xf] }
 0x8d6   :  { %13186 = vmatpush3.bf16.xpose.msra.mxu1 %v16844_v51  ;;  %v16893_v26 = vld [vmem:[#allocation3 + $0xc] sm:$0xf]  ;;  %v16901_v57 = vld [vmem:[#allocation3 + $0x10] sm:$0xf]  ;;  %v4375_v7 = vsel %vm4327_vm6, %v16844_v51, 0 }
 0x8d7   :  { %13197 = vmatprep.subr.bf16.mxu1 %v18564_v34  ;;  %v16907_v19 = vld [vmem:[#allocation3 + $0x14] sm:$0xf]  ;;  %v16915_v48 = vld [vmem:[#allocation3 + $0x18] sm:$0xf] }
 0x994   :  { %v3716_v13 = vpop.f32.mrb[32].mxu0  ;;  %v3787_v44 = vpop.f32.mrb[32].mxu1 }
 0x995   :  { %v3717_v29 = vadd.f32 %v3716_v13, %v16857_v12  ;;  %v3718_v60 = vpop.f32.mrb[33].mxu0  ;;  %v3789_v28 = vpop.f32.mrb[33].mxu1  ;;  %v3788_v53 = vadd.f32 %v3787_v44, %v16867_v8  ;;  %v16921_v44 = vld [vmem:[#allocation3 + $0x1c] sm:$0xf] }
 0x996   :  { %v3719_v1 = vadd.f32 %v3718_v60, %v16861_v46  ;;  %v3790_v56 = vadd.f32 %v3789_v28, %v16872_v14 }
 0x997   :  { %v12787_v15 = vmul.f32 -1.442695, %v3717_v29  ;;  %v12789_v35 = vmul.f32 -1.442695, %v3788_v53 }
 0x998   :  { %v12788_v61 = vmul.f32 -1.442695, %v3719_v1  ;;  %v4329_v1 = vsel %vm4327_vm6, %v16841_v33, 0 }
 0x999   :  { %15235 = vpow2.f32 %v12787_v15 }
 0x99a   :  { %15237 = vpow2.f32 %v12788_v61 }
 0x99b   :  { %15239 = vpow2.f32 %v12789_v35 }
 0x99c   :  { %15241 = vtanh.f32 %v3790_v56 }
 0x9a3   :  { %v15236_v21 = vpop.eup %15235 }
 0x9a4   :  { %v15238_v27 = vpop.eup %15237  ;;  %v3801_v5 = vadd.f32 1.0, %v15236_v21 }
 0x9a5   :  { %v3802_v16 = vadd.f32 1.0, %v15238_v27  ;;  %v15240_v59 = vpop.eup %15239 }
 0x9a6   :  { %15243 = vrcp.f32 %v3801_v5  ;;  %v15242_v47 = vpop.eup %15241  ;;  %v3803_v2 = vadd.f32 1.0, %v15240_v59 }
 0x9a7   :  { %15245 = vrcp.f32 %v3802_v16 }
 0x9a8   :  { %15247 = vrcp.f32 %v3803_v2 }
 0x9b0   :  { %v15244_v22 = vpop.eup %15243 }
 0x9b1   :  { %v15246_v36 = vpop.eup %15245  ;;  %v3812_v62 = vmul.f32 %v15244_v22, %v15242_v47 }
 0x9b2   :  { %v3811_v24 = vmul.f32 %v15246_v36, %v16806_v0  ;;  %v15248_v31 = vpop.eup %15247 }
 0x9b4   :  { %v16876_v11 = vadd.f32 %v3812_v62, %v3811_v24 }
 0x9b6   :  { %15249 = vtanh.f32 %v16876_v11 }
 0x9c0   :  { %v15250_v17 = vpop.eup %15249 }
 0x9c1   :  { %v16879_v32 = vmul.f32 %v15250_v17, %v15248_v31 }
 0x9c3   :  { %v3824_v50 = vpack.c.bf16 %v16879_v32, %v16879_v32 }
 0x9c5   :  { %v3832_v40 = vrot.slane %v3824_v50, %v16191_v45 }
 0x9c7   :  { %v3840_v55 = vrot.slane %v3832_v40, %v16191_v45  ;;  %v3833_v10 = vcombine.high %v3832_v40, %v3832_v40 }
 0x9c9   :  { %v12790_v54 = vpack.i.b16 %v3840_v55, %v3840_v55  ;;  %v3851_v37 = vunpack.i.h.s16 %v3840_v55  ;;  %v3847_v0 = vrot.slane %v3833_v10, %v16191_v45  ;;  %v3848_v52 = vcombine.high %v3840_v55, %v3840_v55 }
 0x9cb   :  { %v3862_v49 = vrot.slane %v12790_v54, %v18599_v4  ;;  %v3904_v23 = vpack.i.b16 %v3851_v37, %v3851_v37  ;;  %v3853_v43 = vunpack.i.h.s16 %v3847_v0  ;;  %v12791_v25 = vpack.i.b16 %v3847_v0, %v3847_v0 }
 0x9cc   :  { %v3855_v18 = vunpack.i.h.s16 %v3848_v52  ;;  %v12792_v9 = vpack.i.b16 %v3848_v52, %v3848_v52  ;;  %v3849_v41 = vcombine.high %v3847_v0, %v3847_v0 }
 0x9cd   :  { %13182 = vmatmul.mubr.bf16.vlgmr.msra.gmra.mrb[36].mxu0 %v3862_v49  ;;  %v3908_v63 = vrot.slane %v3904_v23, %v18599_v4  ;;  %v3996_v42 = vpack.i.b16 %v3853_v43, %v3853_v43  ;;  %v3954_v30 = vrot.slane %v12791_v25, %v18599_v4 }
 0x9ce   :  { %13192 = vmatpush3.bf16.xpose.msra.mxu0 %v16887_v20  ;;  %13193 = vmatprep.mubr.msk.bf16.mxu0 %vm15799_vm4, %v18564_v34  ;;  %v4088_v58 = vpack.i.b16 %v3855_v18, %v3855_v18  ;;  %v4046_v6 = vrot.slane %v12792_v9, %v18599_v4  ;;  %v3857_v13 = vunpack.i.h.s16 %v3849_v41  ;;  %v12793_v29 = vpack.i.b16 %v3849_v41, %v3849_v41 }
 0x9cf   :  { %13188 = vmatmul.mubr.bf16.vlgmr.msra.gmra.mrb[36].mxu1 %v3908_v63  ;;  %13203 = vmatprep.subr.bf16.mxu0 %v18564_v34  ;;  %v4000_v3 = vrot.slane %v3996_v42, %v18599_v4 }
 0x9d0   :  { %13198 = vmatpush3.bf16.xpose.msra.mxu1 %v16893_v26  ;;  %13199 = vmatprep.mubr.msk.bf16.mxu1 %vm15799_vm4, %v18564_v34  ;;  %v4092_v38 = vrot.slane %v4088_v58, %v18599_v4  ;;  %v4180_v60 = vpack.i.b16 %v3857_v13, %v3857_v13  ;;  %v4138_v28 = vrot.slane %v12793_v29, %v18599_v4 }
 0x9d1   :  { %13209 = vmatprep.subr.bf16.mxu1 %v18564_v34 }
 0x9d2   :  { %v4184_v15 = vrot.slane %v4180_v60, %v18599_v4 }
 0x9d5   :  { %13194 = vmatmul.mubr.bf16.vlgmr.msra.gmra.mrb[40].mxu0 %v3954_v30 }
 0x9d6   :  { %13204 = vmatpush3.bf16.xpose.msra.mxu0 %v16901_v57  ;;  %13205 = vmatprep.mubr.msk.bf16.mxu0 %vm15799_vm4, %v18564_v34 }
 0x9d7   :  { %13200 = vmatmul.mubr.bf16.vlgmr.msra.gmra.mrb[40].mxu1 %v4000_v3  ;;  %13215 = vmatprep.subr.bf16.mxu0 %v18564_v34 }
 0x9d8   :  { %13210 = vmatpush3.bf16.xpose.msra.mxu1 %v16907_v19  ;;  %13211 = vmatprep.mubr.msk.bf16.mxu1 %vm15799_vm4, %v18564_v34 }
 0x9d9   :  { %13221 = vmatprep.subr.bf16.mxu1 %v18564_v34 }
 0x9dd   :  { %13206 = vmatmul.mubr.bf16.vlgmr.msra.gmra.mrb[44].mxu0 %v4046_v6 }
 0x9de   :  { %13216 = vmatpush3.bf16.xpose.msra.mxu0 %v16915_v48  ;;  %13217 = vmatprep.mubr.msk.bf16.mxu0 %vm15799_vm4, %v18564_v34 }
 0x9df   :  { %13212 = vmatmul.mubr.bf16.vlgmr.msra.gmra.mrb[44].mxu1 %v4092_v38  ;;  %13227 = vmatprep.subr.bf16.mxu0 %v18564_v34 }
 0x9e0   :  { %13222 = vmatpush3.bf16.xpose.msra.mxu1 %v16921_v44  ;;  %13223 = vmatprep.mubr.msk.bf16.mxu1 %vm15799_vm4, %v18564_v34 }
 0x9e1   :  { %13233 = vmatprep.subr.bf16.mxu1 %v18564_v34 }
 0x9e5   :  { %13218 = vmatmul.mubr.bf16.vlgmr.msra.gmra.mrb[48].mxu0 %v4138_v28 }
 0x9e6   :  { %13228 = vmatpush3.bf16.msra.mxu0 %v4329_v1  ;;  %13229 = vmatprep.mubr.msk.bf16.mxu0 %vm15799_vm4, %v18564_v34 }
 0x9e7   :  { %13224 = vmatmul.mubr.bf16.vlgmr.msra.gmra.mrb[48].mxu1 %v4184_v15  ;;  %13239 = vmatprep.subr.bf16.mxu0 %v18564_v34 }
 0x9e8   :  { %13234 = vmatpush3.bf16.msra.mxu1 %v4375_v7  ;;  %13235 = vmatprep.mubr.msk.bf16.mxu1 %vm15799_vm4, %v18564_v34 }
 0x9e9   :  { %13245 = vmatprep.subr.bf16.mxu1 %v18564_v34 }
 0xaa0   :  { %v3898_v33 = vpop.f32.mrb[36].mxu0 }
 0xaa1   :  { %v13183_v61 = vpop.f32.mrb[37].mxu0  ;;  %v4227_v53 = vsel %vm4226_vm7, %v3898_v33, -inf }
 0xaa2   :  { %4228 = vmax.xlane.f32.xlu0 %v4227_v53  ;;  %v3901_v39 = vpop.f32.mrb[38].mxu0  ;;  %v3944_v35 = vpop.f32.mrb[36].mxu1 }
 0xaa3   :  { %v13184_v56 = vpop.f32.mrb[39].mxu0  ;;  %v13189_v21 = vpop.f32.mrb[37].mxu1  ;;  %v4230_v51 = vsel %vm4226_vm7, %v3944_v35, -inf }
 0xaa4   :  { %4231 = vmax.xlane.f32.xlu1 %v4230_v51  ;;  %v3947_v27 = vpop.f32.mrb[38].mxu1 }
 0xaa5   :  { %v13190_v5 = vpop.f32.mrb[39].mxu1 }
 0xaa8   :  { %v3990_v16 = vpop.f32.mrb[40].mxu0 }
 0xaa9   :  { %v13195_v59 = vpop.f32.mrb[41].mxu0  ;;  %v4233_v47 = vsel %vm4226_vm7, %v3990_v16, -inf }
 0xaaa   :  { %4234 = vmax.xlane.f32.xlu0 %v4233_v47  ;;  %v3993_v22 = vpop.f32.mrb[42].mxu0  ;;  %v4036_v2 = vpop.f32.mrb[40].mxu1 }
 0xaab   :  { %v13196_v36 = vpop.f32.mrb[43].mxu0  ;;  %v13201_v62 = vpop.f32.mrb[41].mxu1  ;;  %v4236_v17 = vsel %vm4226_vm7, %v4036_v2, -inf }
 0xaac   :  { %v4039_v24 = vpop.f32.mrb[42].mxu1 }
 0xaad   :  { %v13202_v31 = vpop.f32.mrb[43].mxu1 }
 0xaae   :  { %4237 = vmax.xlane.f32.xlu0 %v4236_v17 }
 0xab0   :  { %v4082_v50 = vpop.f32.mrb[44].mxu0 }
 0xab1   :  { %v13207_v40 = vpop.f32.mrb[45].mxu0  ;;  %v4239_v55 = vsel %vm4226_vm7, %v4082_v50, -inf }
 0xab2   :  { %4240 = vmax.xlane.f32.xlu1 %v4239_v55  ;;  %v4085_v10 = vpop.f32.mrb[46].mxu0  ;;  %v4128_v54 = vpop.f32.mrb[44].mxu1 }
 0xab3   :  { %v13208_v37 = vpop.f32.mrb[47].mxu0  ;;  %v13213_v0 = vpop.f32.mrb[45].mxu1  ;;  %v4242_v49 = vsel %vm4226_vm7, %v4128_v54, -inf }
 0xab4   :  { %4243 = vmax.xlane.f32.xlu0 %v4242_v49  ;;  %v4131_v23 = vpop.f32.mrb[46].mxu1 }
 0xab5   :  { %v13214_v63 = vpop.f32.mrb[47].mxu1 }
 0xab8   :  { %v4174_v43 = vpop.f32.mrb[48].mxu0 }
 0xab9   :  { %v13219_v25 = vpop.f32.mrb[49].mxu0  ;;  %v4245_v42 = vsel %vm4226_vm7, %v4174_v43, -inf }
 0xaba   :  { %4246 = vmax.xlane.f32.xlu1 %v4245_v42  ;;  %v4177_v52 = vpop.f32.mrb[50].mxu0  ;;  %v4220_v30 = vpop.f32.mrb[48].mxu1 }
 0xabb   :  { %v13220_v3 = vpop.f32.mrb[51].mxu0  ;;  %v13225_v18 = vpop.f32.mrb[49].mxu1  ;;  %v4248_v41 = vsel %vm4226_vm7, %v4220_v30, -inf }
 0xabc   :  { %v4223_v9 = vpop.f32.mrb[50].mxu1 }
 0xabd   :  { %v13226_v58 = vpop.f32.mrb[51].mxu1 }
 0xabe   :  { %4249 = vmax.xlane.f32.xlu1 %v4248_v41  ;;  %v4421_v41 = vsel %vm4327_vm6, %v16887_v20, 0 }
 0xb2f   :  { %v4229_v6 = vpop.xlane.xlu0 %4228 }
 0xb30   :  { %v4251_v38 = vsub.f32 %v3898_v33, %v4229_v6 }
 0xb31   :  { %v4232_v13 = vpop.xlane.xlu1 %4231 }
 0xb32   :  { %v4259_v29 = vmul.f32 1.442695, %v4251_v38  ;;  %v4252_v60 = vsub.f32 %v3944_v35, %v4232_v13 }
 0xb34   :  { %15251 = vpow2.f32 %v4259_v29  ;;  %v4261_v28 = vmul.f32 1.442695, %v4252_v60 }
 0xb36   :  { %15253 = vpow2.f32 %v4261_v28  ;;  %v4467_v28 = vsel %vm4327_vm6, %v16893_v26, 0 }
 0xb37   :  { %v4235_v1 = vpop.xlane.xlu0 %4234 }
 0xb38   :  { %v4253_v15 = vsub.f32 %v3990_v16, %v4235_v1 }
 0xb3a   :  { %v4263_v7 = vmul.f32 1.442695, %v4253_v15 }
 0xb3b   :  { %v4238_v61 = vpop.xlane.xlu0 %4237 }
 0xb3c   :  { %15255 = vpow2.f32 %v4263_v7  ;;  %v4254_v53 = vsub.f32 %v4036_v2, %v4238_v61  ;;  %v4513_v7 = vsel %vm4327_vm6, %v16901_v57, 0 }
 0xb3e   :  { %v15252_v39 = vpop.eup %15251  ;;  %v4265_v56 = vmul.f32 1.442695, %v4254_v53 }
 0xb3f   :  { %v4241_v21 = vpop.xlane.xlu1 %4240  ;;  %v4275_v51 = vsel %vm4226_vm7, %v15252_v39, 0.0 }
 0xb40   :  { %v15254_v27 = vpop.eup %15253  ;;  %15257 = vpow2.f32 %v4265_v56  ;;  %v4255_v33 = vsub.f32 %v4082_v50, %v4241_v21  ;;  %4276 = vadd.xlane.f32.xlu0 %v4275_v51  ;;  %v4731_v56 = vld [vmem:[#allocation13 + $0x8] sm:$0xff]  ;;  %v4559_v51 = vsel %vm4327_vm6, %v16907_v19, 0  ;;  %v4605_v19 = vsel %vm4327_vm6, %v16915_v48, 0 }
 0xb41   :  { %v4244_v5 = vpop.xlane.xlu0 %4243  ;;  %v4278_v47 = vsel %vm4226_vm7, %v15254_v27, 0.0  ;;  %v4735_v21 = vld [vmem:[#allocation13 + $0x28] sm:$0xff] }
 0xb42   :  { %v4267_v35 = vmul.f32 1.442695, %v4255_v33  ;;  %v4256_v59 = vsub.f32 %v4128_v54, %v4244_v5 }
 0xb44   :  { %15259 = vpow2.f32 %v4267_v35  ;;  %v4269_v16 = vmul.f32 1.442695, %v4256_v59  ;;  %4279 = vadd.xlane.f32.xlu0 %v4278_v47  ;;  %v16990_v59 = vpack.c.bf16 %v4735_v21, %v4731_v56  ;;  %v4733_v47 = vld [vmem:[#allocation13 + $0x18] sm:$0xff]  ;;  %v4763_v56 = vld [vmem:[#allocation13 + $0x108] sm:$0xff] }
 0xb45   :  { %v4767_v21 = vld [vmem:[#allocation13 + $0x128] sm:$0xff] }
 0xb46   :  { %v15256_v22 = vpop.eup %15255  ;;  %15261 = vpow2.f32 %v4269_v16  ;;  %v4737_v16 = vld [vmem:[#allocation13 + $0x38] sm:$0xff] }
 0xb47   :  { %v4247_v2 = vpop.xlane.xlu1 %4246  ;;  %v4281_v36 = vsel %vm4226_vm7, %v15256_v22, 0.0 }
 0xb48   :  { %v4257_v62 = vsub.f32 %v4174_v43, %v4247_v2  ;;  %4282 = vadd.xlane.f32.xlu1 %v4281_v36  ;;  %v4730_v2 = vld [vmem:[#allocation13] sm:$0xff] }
 0xb49   :  { %v4734_v36 = vld [vmem:[#allocation13 + $0x20] sm:$0xff] }
 0xb4a   :  { %v15258_v24 = vpop.eup %15257  ;;  %v4271_v31 = vmul.f32 1.442695, %v4257_v62  ;;  %v16998_v62 = vpack.c.bf16 %v4737_v16, %v4733_v47  ;;  %v17046_v47 = vpack.c.bf16 %v4767_v21, %v4763_v56 }
 0xb4b   :  { %v4250_v17 = vpop.xlane.xlu1 %4249  ;;  %v4284_v50 = vsel %vm4226_vm7, %v15258_v24, 0.0 }
 0xb4c   :  { %15263 = vpow2.f32 %v4271_v31  ;;  %v4258_v40 = vsub.f32 %v4220_v30, %v4250_v17  ;;  %4285 = vadd.xlane.f32.xlu0 %v4284_v50  ;;  %v4739_v31 = vld [vmem:[#allocation13 + $0x48] sm:$0xff]  ;;  %v4651_v50 = vsel %vm4327_vm6, %v16921_v44, 0 }
 0xb4d   :  { %v4743_v17 = vld [vmem:[#allocation13 + $0x68] sm:$0xff] }
 0xb4e   :  { %v15260_v55 = vpop.eup %15259  ;;  %v4273_v10 = vmul.f32 1.442695, %v4258_v40  ;;  %v17004_v40 = vpack.c.bf16 %v4734_v36, %v4730_v2  ;;  %v4751_v44 = vld [vmem:[#allocation13 + $0xa8] sm:$0xff] }
 0xb4f   :  { %v4287_v54 = vsel %vm4226_vm7, %v15260_v55, 0.0  ;;  %v4771_v2 = vld [vmem:[#allocation13 + $0x148] sm:$0xff] }
 0xb50   :  { %v16953_v37 = vpop.eup %15261  ;;  %15265 = vpow2.f32 %v4273_v10  ;;  %4288 = vadd.xlane.f32.xlu1 %v4287_v54  ;;  %v4742_v10 = vld [vmem:[#allocation13 + $0x60] sm:$0xff]  ;;  %v4775_v36 = vld [vmem:[#allocation13 + $0x168] sm:$0xff] }
 0xb51   :  { %v4290_v0 = vsel %vm4226_vm7, %v16953_v37, 0.0 }
 0xb52   :  { %4291 = vadd.xlane.f32.xlu0 %v4290_v0  ;;  %v4732_v0 = vld [vmem:[#allocation13 + $0x10] sm:$0xff] }
 0xb56   :  { %v16957_v49 = vpop.eup %15263 }
 0xb57   :  { %v4293_v23 = vsel %vm4226_vm7, %v16957_v49, 0.0 }
 0xb58   :  { %4294 = vadd.xlane.f32.xlu1 %v4293_v23  ;;  %v4736_v23 = vld [vmem:[#allocation13 + $0x30] sm:$0xff] }
 0xb5a   :  { %v16961_v63 = vpop.eup %15265 }
 0xb5b   :  { %v4296_v43 = vsel %vm4226_vm7, %v16961_v63, 0.0 }
 0xb5c   :  { %4297 = vadd.xlane.f32.xlu1 %v4296_v43  ;;  %v4747_v43 = vld [vmem:[#allocation13 + $0x88] sm:$0xff] }
 0xbcd   :  { %v4277_v25 = vpop.xlane.xlu0 %4276 }
 0xbce   :  { %15267 = vrcp.f32 %v4277_v25 }
 0xbd1   :  { %v4280_v42 = vpop.xlane.xlu0 %4279 }
 0xbd2   :  { %15269 = vrcp.f32 %v4280_v42  ;;  %v4741_v42 = vld [vmem:[#allocation13 + $0x58] sm:$0xff] }
 0xbd5   :  { %v4283_v52 = vpop.xlane.xlu1 %4282 }
 0xbd6   :  { %15271 = vrcp.f32 %v4283_v52 }
 0xbd8   :  { %v15268_v30 = vpop.eup %15267 }
 0xbd9   :  { %v4286_v3 = vpop.xlane.xlu0 %4285  ;;  %v4307_v18 = vmul.f32 %v15268_v30, %v15252_v39 }
 0xbda   :  { %15273 = vrcp.f32 %v4286_v3  ;;  %v17016_v3 = vpack.c.bf16 %v4736_v23, %v4732_v0  ;;  %v4764_v0 = vld [vmem:[#allocation13 + $0x110] sm:$0xff] }
 0xbdb   :  { %v4315_v9 = vpack.c.bf16 %v4307_v18, %v4307_v18  ;;  %v4746_v18 = vld [vmem:[#allocation13 + $0x80] sm:$0xff]  ;;  %v4768_v23 = vld [vmem:[#allocation13 + $0x130] sm:$0xff] }
 0xbdc   :  { %v15270_v58 = vpop.eup %15269 }
 0xbdd   :  { %13230 = vmatmul.mubr.msk.bf16.vlgmr.msra.gmra.mrb[52].mxu0 %vm4323_vm8, %v4315_v9  ;;  %v4289_v6 = vpop.xlane.xlu1 %4288  ;;  %v4308_v38 = vmul.f32 %v15270_v58, %v15254_v27  ;;  %v4750_v9 = vld [vmem:[#allocation13 + $0xa0] sm:$0xff] }
 0xbde   :  { %13240 = vmatpush3.bf16.msra.mxu0 %v4421_v41  ;;  %15275 = vrcp.f32 %v4289_v6  ;;  %13241 = vmatprep.mubr.msk.bf16.mxu0 %vm15799_vm4, %v18564_v34  ;;  %v17020_v41 = vpack.c.bf16 %v4751_v44, %v4747_v43  ;;  %v4779_v43 = vld [vmem:[#allocation13 + $0x188] sm:$0xff]  ;;  %v4773_v44 = vld [vmem:[#allocation13 + $0x158] sm:$0xff] }
 0xbdf   :  { %v4292_v13 = vpop.xlane.xlu0 %4291  ;;  %v4316_v29 = vpack.c.bf16 %v4308_v38, %v4308_v38  ;;  %13251 = vmatprep.subr.bf16.mxu0 %v18564_v34  ;;  %v4740_v38 = vld [vmem:[#allocation13 + $0x50] sm:$0xff] }
 0xbe0   :  { %v15272_v60 = vpop.eup %15271  ;;  %15277 = vrcp.f32 %v4292_v13  ;;  %v4744_v13 = vld [vmem:[#allocation13 + $0x70] sm:$0xff] }
 0xbe1   :  { %13236 = vmatmul.mubr.msk.bf16.vlgmr.msra.gmra.mrb[52].mxu1 %vm4323_vm8, %v4316_v29  ;;  %v4309_v1 = vmul.f32 %v15272_v60, %v15256_v22  ;;  %v4759_v29 = vld [vmem:[#allocation13 + $0xe8] sm:$0xff]  ;;  %v4749_v60 = vld [vmem:[#allocation13 + $0x98] sm:$0xff] }
 0xbe2   :  { %13246 = vmatpush3.bf16.msra.mxu1 %v4467_v28  ;;  %13247 = vmatprep.mubr.msk.bf16.mxu1 %vm15799_vm4, %v18564_v34  ;;  %v4753_v28 = vld [vmem:[#allocation13 + $0xb8] sm:$0xff] }
 0xbe3   :  { %v4317_v20 = vpack.c.bf16 %v4309_v1, %v4309_v1  ;;  %13257 = vmatprep.subr.bf16.mxu1 %v18564_v34  ;;  %v17027_v1 = vpack.c.bf16 %v4750_v9, %v4746_v18  ;;  %v4778_v18 = vld [vmem:[#allocation13 + $0x180] sm:$0xff] }
 0xbe4   :  { %v15274_v15 = vpop.eup %15273  ;;  %v4782_v9 = vld [vmem:[#allocation13 + $0x1a0] sm:$0xff] }
 0xbe5   :  { %13242 = vmatmul.mubr.msk.bf16.vlgmr.msra.gmra.mrb[56].mxu0 %vm4323_vm8, %v4317_v20  ;;  %v4295_v61 = vpop.xlane.xlu1 %4294  ;;  %v4310_v53 = vmul.f32 %v15274_v15, %v15258_v24  ;;  %v17029_v20 = vpack.c.bf16 %v4744_v13, %v4740_v38  ;;  %v4754_v15 = vld [vmem:[#allocation13 + $0xc0] sm:$0xff]  ;;  %v4772_v13 = vld [vmem:[#allocation13 + $0x150] sm:$0xff] }
 0xbe6   :  { %13252 = vmatpush3.bf16.msra.mxu0 %v4513_v7  ;;  %15279 = vrcp.f32 %v4295_v61  ;;  %13253 = vmatprep.mubr.msk.bf16.mxu0 %vm15799_vm4, %v18564_v34  ;;  %v4758_v7 = vld [vmem:[#allocation13 + $0xe0] sm:$0xff] }
 0xbe7   :  { %v4318_v26 = vpack.c.bf16 %v4310_v53, %v4310_v53  ;;  %13263 = vmatprep.subr.bf16.mxu0 %v18564_v34  ;;  %v17035_v53 = vpack.c.bf16 %v4753_v28, %v4749_v60  ;;  %v4791_v60 = vld [vmem:[#allocation13 + $0x1e8] sm:$0xff]  ;;  %v4781_v28 = vld [vmem:[#allocation13 + $0x198] sm:$0xff] }
 0xbe8   :  { %v15276_v39 = vpop.eup %15275 }
 0xbe9   :  { %13248 = vmatmul.mubr.msk.bf16.vlgmr.msra.gmra.mrb[56].mxu1 %vm4323_vm8, %v4318_v26  ;;  %v4298_v27 = vpop.xlane.xlu1 %4297  ;;  %v4311_v57 = vmul.f32 %v15276_v39, %v15260_v55  ;;  %v4738_v55 = vld [vmem:[#allocation13 + $0x40] sm:$0xff]  ;;  %v4748_v26 = vld [vmem:[#allocation13 + $0x90] sm:$0xff] }
 0xbea   :  { %v15278_v33 = vpop.eup %15277  ;;  %13258 = vmatpush3.bf16.msra.mxu1 %v4559_v51  ;;  %15281 = vrcp.f32 %v4298_v27  ;;  %13259 = vmatprep.mubr.msk.bf16.mxu1 %vm15799_vm4, %v18564_v34  ;;  %v17014_v30 = vpack.c.bf16 %v4742_v10, %v4738_v55  ;;  %v4752_v39 = vld [vmem:[#allocation13 + $0xb0] sm:$0xff]  ;;  %v4757_v51 = vld [vmem:[#allocation13 + $0xd8] sm:$0xff]  ;;  %v4774_v55 = vld [vmem:[#allocation13 + $0x160] sm:$0xff]  ;;  %v17058_v10 = vpack.c.bf16 %v4775_v36, %v4771_v2 }
 0xbeb   :  { %v4319_v5 = vpack.c.bf16 %v4311_v57, %v4311_v57  ;;  %13269 = vmatprep.subr.bf16.mxu1 %v18564_v34  ;;  %v4312_v35 = vmul.f32 %v15278_v33, %v16953_v37  ;;  %v17008_v37 = vpack.c.bf16 %v4743_v17, %v4739_v31  ;;  %v4761_v27 = vld [vmem:[#allocation13 + $0xf8] sm:$0xff]  ;;  %v17040_v57 = vpack.c.bf16 %v4758_v7, %v4754_v15 }
 0xbec   :  { %v17042_v33 = vpack.c.bf16 %v4752_v39, %v4748_v26  ;;  %v17048_v16 = vpack.c.bf16 %v4761_v27, %v4757_v51  ;;  %v4769_v31 = vld [vmem:[#allocation13 + $0x138] sm:$0xff]  ;;  %v17076_v7 = vpack.c.bf16 %v4782_v9, %v4778_v18  ;;  %v4786_v39 = vld [vmem:[#allocation13 + $0x1c0] sm:$0xff]  ;;  %v4780_v27 = vld [vmem:[#allocation13 + $0x190] sm:$0xff] }
 0xbed   :  { %13254 = vmatmul.mubr.msk.bf16.vlgmr.msra.gmra.mrb[60].mxu0 %vm4323_vm8, %v4319_v5  ;;  %v4320_v22 = vpack.c.bf16 %v4312_v35, %v4312_v35  ;;  %v4762_v5 = vld [vmem:[#allocation13 + $0x100] sm:$0xff]  ;;  %v4785_v15 = vld [vmem:[#allocation13 + $0x1b8] sm:$0xff] }
 0xbee   :  { %13264 = vmatpush3.bf16.msra.mxu0 %v4605_v19  ;;  %13265 = vmatprep.mubr.msk.bf16.mxu0 %vm15799_vm4, %v18564_v34  ;;  %v4766_v35 = vld [vmem:[#allocation13 + $0x120] sm:$0xff]  ;;  %v4756_v19 = vld [vmem:[#allocation13 + $0xd0] sm:$0xff]  ;;  %v17084_v21 = vpack.c.bf16 %v4785_v15, %v4781_v28 }
 0xbef   :  { %14588 = vmatprep.subr.bf16.mxu0 %v16990_v59  ;;  %v17052_v17 = vpack.c.bf16 %v4766_v35, %v4762_v5  ;;  %v4790_v51 = vld [vmem:[#allocation13 + $0x1e0] sm:$0xff]  ;;  %v4784_v5 = vld [vmem:[#allocation13 + $0x1b0] sm:$0xff]  ;;  %v4789_v35 = vld [vmem:[#allocation13 + $0x1d8] sm:$0xff] }
 0xbf0   :  { %v15280_v24 = vpop.eup %15279  ;;  %v17090_v2 = vpack.c.bf16 %v4784_v5, %v4780_v27 }
 0xbf1   :  { %13260 = vmatmul.mubr.msk.bf16.vlgmr.msra.gmra.mrb[60].mxu1 %vm4323_vm8, %v4320_v22  ;;  %v4313_v48 = vmul.f32 %v15280_v24, %v16957_v49  ;;  %v4745_v49 = vld [vmem:[#allocation13 + $0x78] sm:$0xff]  ;;  %v4760_v22 = vld [vmem:[#allocation13 + $0xf0] sm:$0xff] }
 0xbf2   :  { %13270 = vmatpush3.bf16.msra.mxu1 %v4651_v50  ;;  %13271 = vmatprep.mubr.msk.bf16.mxu1 %vm15799_vm4, %v18564_v34  ;;  %v17022_v6 = vpack.c.bf16 %v4745_v49, %v4741_v42  ;;  %v4765_v24 = vld [vmem:[#allocation13 + $0x118] sm:$0xff]  ;;  %v17054_v50 = vpack.c.bf16 %v4760_v22, %v4756_v19  ;;  %v17088_v22 = vpack.c.bf16 %v4790_v51, %v4786_v39 }
 0xbf3   :  { %v4321_v54 = vpack.c.bf16 %v4313_v48, %v4313_v48  ;;  %14620 = vmatprep.subr.bf16.mxu1 %v16998_v62  ;;  %v4770_v48 = vld [vmem:[#allocation13 + $0x140] sm:$0xff]  ;;  %v4777_v42 = vld [vmem:[#allocation13 + $0x178] sm:$0xff] }
 0xbf4   :  { %v15282_v25 = vpop.eup %15281  ;;  %v17064_v49 = vpack.c.bf16 %v4774_v55, %v4770_v48  ;;  %v17072_v38 = vpack.c.bf16 %v4777_v42, %v4773_v44  ;;  %v4793_v19 = vld [vmem:[#allocation13 + $0x1f8] sm:$0xff] }
 0xbf5   :  { %13266 = vmatmul.mubr.msk.bf16.vlgmr.msra.gmra.mrb[64].mxu0 %vm4323_vm8, %v4321_v54  ;;  %v4314_v52 = vmul.f32 %v15282_v25, %v16961_v63  ;;  %v4755_v63 = vld [vmem:[#allocation13 + $0xc8] sm:$0xff]  ;;  %v17060_v54 = vpack.c.bf16 %v4769_v31, %v4765_v24  ;;  %v17094_v36 = vpack.c.bf16 %v4793_v19, %v4789_v35  ;;  %v4788_v24 = vld [vmem:[#allocation13 + $0x1d0] sm:$0xff]  ;;  %v17108_v55 = vld [vmem:[#allocation3] sm:$0xf] }
 0xbf6   :  { %14590 = vmatpush1.bf16.msra.mxu0 %v17004_v40  ;;  %4858 = vmatprep.mubr.f32.mxu0 %v18564_v34  ;;  %v17033_v61 = vpack.c.bf16 %v4759_v29, %v4755_v63  ;;  %v4783_v25 = vld [vmem:[#allocation13 + $0x1a8] sm:$0xff]  ;;  %v4776_v63 = vld [vmem:[#allocation13 + $0x170] sm:$0xff] }
 0xbf7   :  { %14592 = vmatprep.subr.bf16.mxu0 %v17008_v37  ;;  %v4322_v58 = vpack.c.bf16 %v4314_v52, %v4314_v52  ;;  %v17066_v52 = vpack.c.bf16 %v4768_v23, %v4764_v0  ;;  %v4787_v29 = vld [vmem:[#allocation13 + $0x1c8] sm:$0xff]  ;;  %v17078_v26 = vpack.c.bf16 %v4776_v63, %v4772_v13  ;;  %v4792_v31 = vld [vmem:[#allocation13 + $0x1f0] sm:$0xff]  ;;  %v17114_v0 = vld [vmem:[#allocation3 + $0x4] sm:$0xf] }
 0xbf8   :  { %v17082_v56 = vpack.c.bf16 %v4791_v60, %v4787_v29  ;;  %v17098_v48 = vpack.c.bf16 %v4792_v31, %v4788_v24 }
 0xbf9   :  { %13272 = vmatmul.mubr.msk.bf16.vlgmr.msra.gmra.mrb[64].mxu1 %vm4323_vm8, %v4322_v58  ;;  %v17070_v58 = vpack.c.bf16 %v4783_v25, %v4779_v43 }
 0xbfa   :  { %14594 = vmatpush1.bf16.msra.mxu0 %v17014_v30  ;;  %14622 = vmatpush1.bf16.msra.mxu1 %v17016_v3 }
 0xbfb   :  { %14596 = vmatprep.subr.bf16.mxu0 %v17020_v41  ;;  %14624 = vmatprep.subr.bf16.mxu1 %v17022_v6 }
 0xbfc   :  { %4929 = vmatprep.mubr.f32.mxu1 %v18564_v34 }
 0xbfe   :  { %14598 = vmatpush1.bf16.msra.mxu0 %v17027_v1  ;;  %14626 = vmatpush1.bf16.msra.mxu1 %v17029_v20 }
 0xbff   :  { %14600 = vmatprep.subr.bf16.mxu0 %v17033_v61  ;;  %14628 = vmatprep.subr.bf16.mxu1 %v17035_v53 }
 0xc02   :  { %14602 = vmatpush1.bf16.msra.mxu0 %v17040_v57  ;;  %14630 = vmatpush1.bf16.msra.mxu1 %v17042_v33 }
 0xc03   :  { %14604 = vmatprep.subr.bf16.mxu0 %v17046_v47  ;;  %14632 = vmatprep.subr.bf16.mxu1 %v17048_v16 }
 0xc06   :  { %14606 = vmatpush1.bf16.msra.mxu0 %v17052_v17  ;;  %14634 = vmatpush1.bf16.msra.mxu1 %v17054_v50 }
 0xc07   :  { %14608 = vmatprep.subr.bf16.mxu0 %v17058_v10  ;;  %14636 = vmatprep.subr.bf16.mxu1 %v17060_v54 }
 0xc0a   :  { %14610 = vmatpush1.bf16.msra.mxu0 %v17064_v49  ;;  %14638 = vmatpush1.bf16.msra.mxu1 %v17066_v52 }
 0xc0b   :  { %14612 = vmatprep.subr.bf16.mxu0 %v17070_v58  ;;  %14640 = vmatprep.subr.bf16.mxu1 %v17072_v38 }
 0xc0e   :  { %14614 = vmatpush1.bf16.msra.mxu0 %v17076_v7  ;;  %14642 = vmatpush1.bf16.msra.mxu1 %v17078_v26 }
 0xc0f   :  { %14616 = vmatprep.subr.bf16.mxu0 %v17082_v56  ;;  %14644 = vmatprep.subr.bf16.mxu1 %v17084_v21 }
 0xc12   :  { %14618 = vmatpush1.bf16.msra.mxu0 %v17088_v22  ;;  %14646 = vmatpush1.bf16.msra.mxu1 %v17090_v2 }
 0xc13   :  { %14648 = vmatprep.subr.bf16.mxu1 %v17094_v36  ;;  %13275 = vmatprep.subr.bf16.mxu0 %v18564_v34 }
 0xc15   :  { %4859 = vmatmul.mubr.f32.vlgmr.msra.gmra.mrb[34].mxu0 %v16879_v32 }
 0xc16   :  { %14650 = vmatpush1.bf16.msra.mxu1 %v17098_v48  ;;  %13277 = vmatprep.mubr.msk.bf16.mxu0 %vm15799_vm4, %v18564_v34 }
 0xc17   :  { %13281 = vmatprep.subr.bf16.mxu1 %v18564_v34 }
 0xc19   :  { %4930 = vmatmul.mubr.f32.vlgmr.msra.gmra.mrb[34].mxu1 %v16879_v32 }
 0xc1a   :  { %13283 = vmatprep.mubr.msk.bf16.mxu1 %vm15799_vm4, %v18564_v34 }
 0xc1b   :  { %13276 = vmatpush3.bf16.xpose.msra.mxu0 %v17108_v55 }
 0xc1c   :  { %13287 = vmatprep.subr.bf16.mxu0 %v18564_v34 }
 0xc1f   :  { %13282 = vmatpush3.bf16.xpose.msra.mxu1 %v17114_v0 }
 0xc20   :  { %13293 = vmatprep.subr.bf16.mxu1 %v18564_v34 }
 0xcb0   :  { %v4365_v23 = vpop.f32.mrb[52].mxu0 }
 0xcb1   :  { %v13231_v43 = vpop.f32.mrb[53].mxu0 }
 0xcb2   :  { %v4368_v25 = vpop.f32.mrb[54].mxu0 }
 0xcb3   :  { %v13232_v44 = vpop.f32.mrb[55].mxu0 }
 0xcb4   :  { %v4411_v42 = vpop.f32.mrb[52].mxu1 }
 0xcb5   :  { %v4701_v18 = vrot.slane %v4411_v42, 7  ;;  %v13237_v9 = vpop.f32.mrb[53].mxu1 }
 0xcb6   :  { %v4414_v13 = vpop.f32.mrb[54].mxu1 }
 0xcb7   :  { %v4703_v63 = vsel %vm1620_vm5, %v4701_v18, %v4365_v23  ;;  %v13238_v29 = vpop.f32.mrb[55].mxu1 }
 0xcb8   :  { %v4457_v60 = vpop.f32.mrb[56].mxu0 }
 0xcb9   :  { %v4704_v28 = vrot.slane %v4457_v60, 6  ;;  %v13243_v15 = vpop.f32.mrb[57].mxu0 }
 0xcba   :  { %v4460_v39 = vpop.f32.mrb[58].mxu0 }
 0xcbb   :  { %v4706_v51 = vsel %vm2361_vm10, %v4704_v28, %v4703_v63  ;;  %v13244_v27 = vpop.f32.mrb[59].mxu0 }
 0xcbc   :  { %v4503_v5 = vpop.f32.mrb[56].mxu1 }
 0xcbd   :  { %v4707_v35 = vrot.slane %v4503_v5, 5  ;;  %v13249_v19 = vpop.f32.mrb[57].mxu1 }
 0xcbe   :  { %v4506_v24 = vpop.f32.mrb[58].mxu1 }
 0xcbf   :  { %v4709_v31 = vsel %vm3102_vm15, %v4707_v35, %v4706_v51  ;;  %v13250_v43 = vpop.f32.mrb[59].mxu1 }
 0xcc0   :  { %v4549_v25 = vpop.f32.mrb[60].mxu0 }
 0xcc1   :  { %v4710_v44 = vrot.slane %v4549_v25, 4  ;;  %v13255_v42 = vpop.f32.mrb[61].mxu0 }
 0xcc2   :  { %v4552_v23 = vpop.f32.mrb[62].mxu0 }
 0xcc3   :  { %v4712_v18 = vsel %vm4711_vm9, %v4710_v44, %v4709_v31  ;;  %v13256_v9 = vpop.f32.mrb[63].mxu0 }
 0xcc4   :  { %v4595_v13 = vpop.f32.mrb[60].mxu1 }
 0xcc5   :  { %v4713_v29 = vrot.slane %v4595_v13, 3  ;;  %v13261_v63 = vpop.f32.mrb[61].mxu1 }
 0xcc6   :  { %v4598_v60 = vpop.f32.mrb[62].mxu1 }
 0xcc7   :  { %v4715_v28 = vsel %vm4714_vm11, %v4713_v29, %v4712_v18  ;;  %v13262_v15 = vpop.f32.mrb[63].mxu1 }
 0xcc8   :  { %v4641_v39 = vpop.f32.mrb[64].mxu0 }
 0xcc9   :  { %v4716_v51 = vrot.slane %v4641_v39, 2  ;;  %v13267_v27 = vpop.f32.mrb[65].mxu0 }
 0xcca   :  { %v4644_v5 = vpop.f32.mrb[66].mxu0 }
 0xccb   :  { %v4718_v35 = vsel %vm4717_vm12, %v4716_v51, %v4715_v28  ;;  %v13268_v19 = vpop.f32.mrb[67].mxu0 }
 0xccc   :  { %v4687_v24 = vpop.f32.mrb[64].mxu1 }
 0xccd   :  { %v4719_v31 = vrot.slane %v4687_v24, 1  ;;  %v13273_v43 = vpop.f32.mrb[65].mxu1 }
 0xcce   :  { %v4690_v25 = vpop.f32.mrb[66].mxu1 }
 0xccf   :  { %v4721_v44 = vsel %vm4720_vm13, %v4719_v31, %v4718_v35  ;;  %v13274_v42 = vpop.f32.mrb[67].mxu1 }
 0xcd0   :  { %v12915_v23 = vpack.c.bf16 %v4721_v44, %v16879_v32 }
 0xcd2   :  { %4729 = vst [vmem:[#allocation15] sm:$0xff] %v12915_v23 }
 0xce8   :  { %v4860_v18 = vpop.f32.mrb[34].mxu0 }
 0xce9   :  { %v4861_v9 = vadd.f32 %v4860_v18, %v16857_v12  ;;  %v4862_v13 = vpop.f32.mrb[35].mxu0 }
 0xcea   :  { %v4863_v29 = vadd.f32 %v4862_v13, %v16861_v46 }
 0xceb   :  { %v12803_v63 = vmul.f32 -1.442695, %v4861_v9 }
 0xcec   :  { %v12804_v60 = vmul.f32 -1.442695, %v4863_v29  ;;  %v4931_v28 = vpop.f32.mrb[34].mxu1 }
 0xced   :  { %15283 = vpow2.f32 %v12803_v63  ;;  %v4933_v15 = vpop.f32.mrb[35].mxu1  ;;  %v4932_v39 = vadd.f32 %v4931_v28, %v16867_v8 }
 0xcee   :  { %15285 = vpow2.f32 %v12804_v60  ;;  %v4934_v27 = vadd.f32 %v4933_v15, %v16872_v14 }
 0xcef   :  { %v12805_v51 = vmul.f32 -1.442695, %v4932_v39 }
 0xcf1   :  { %15287 = vpow2.f32 %v12805_v51 }
 0xcf2   :  { %15289 = vtanh.f32 %v4934_v27 }
 0xcf7   :  { %v15284_v5 = vpop.eup %15283 }
 0xcf8   :  { %v15286_v32 = vpop.eup %15285  ;;  %v4945_v35 = vadd.f32 1.0, %v15284_v5 }
 0xcf9   :  { %v4946_v19 = vadd.f32 1.0, %v15286_v32  ;;  %v17142_v32 = vld [vmem:[#allocation3 + $0x8] sm:$0xf] }
 0xcfa   :  { %15291 = vrcp.f32 %v4945_v35 }
 0xcfb   :  { %15293 = vrcp.f32 %v4946_v19  ;;  %v15288_v24 = vpop.eup %15287 }
 0xcfc   :  { %v15290_v31 = vpop.eup %15289  ;;  %v4947_v44 = vadd.f32 1.0, %v15288_v24  ;;  %v17148_v24 = vld [vmem:[#allocation3 + $0xc] sm:$0xf] }
 0xcfe   :  { %15295 = vrcp.f32 %v4947_v44 }
 0xd04   :  { %v15292_v43 = vpop.eup %15291 }
 0xd05   :  { %v15294_v25 = vpop.eup %15293  ;;  %v4956_v42 = vmul.f32 %v15292_v43, %v15290_v31 }
 0xd06   :  { %v4955_v23 = vmul.f32 %v15294_v25, %v16876_v11 }
 0xd08   :  { %v17131_v18 = vadd.f32 %v4956_v42, %v4955_v23  ;;  %v15296_v9 = vpop.eup %15295  ;;  %v17156_v42 = vld [vmem:[#allocation3 + $0x10] sm:$0xf] }
 0xd0a   :  { %18607 = vst [vmem:[#allocation26_spill] sm:$0xff] %v17131_v18  ;;  %15297 = vtanh.f32 %v17131_v18 }
 0xd14   :  { %v15298_v13 = vpop.eup %15297 }
 0xd15   :  { %v17134_v29 = vmul.f32 %v15298_v13, %v15296_v9  ;;  %v17162_v13 = vld [vmem:[#allocation3 + $0x14] sm:$0xf] }
 0xd17   :  { %v4968_v63 = vpack.c.bf16 %v17134_v29, %v17134_v29 }
 0xd19   :  { %v4976_v60 = vrot.slane %v4968_v63, %v16191_v45 }
 0xd1b   :  { %v4984_v28 = vrot.slane %v4976_v60, %v16191_v45  ;;  %v4977_v15 = vcombine.high %v4976_v60, %v4976_v60 }
 0xd1d   :  { %v12806_v39 = vpack.i.b16 %v4984_v28, %v4984_v28  ;;  %v4995_v51 = vunpack.i.h.s16 %v4984_v28  ;;  %v4991_v11 = vrot.slane %v4977_v15, %v16191_v45  ;;  %v4992_v25 = vcombine.high %v4984_v28, %v4984_v28 }
 0xd1f   :  { %v5006_v27 = vrot.slane %v12806_v39, %v18599_v4  ;;  %v5048_v5 = vpack.i.b16 %v4995_v51, %v4995_v51  ;;  %v4997_v19 = vunpack.i.h.s16 %v4991_v11  ;;  %v12807_v31 = vpack.i.b16 %v4991_v11, %v4991_v11  ;;  %v17170_v39 = vld [vmem:[#allocation3 + $0x18] sm:$0xf] }
 0xd20   :  { %v4999_v9 = vunpack.i.h.s16 %v4992_v25  ;;  %v12808_v63 = vpack.i.b16 %v4992_v25, %v4992_v25  ;;  %v4993_v28 = vcombine.high %v4991_v11, %v4991_v11  ;;  %v5516_v25 = vsel %vm4327_vm6, %v17114_v0, 0 }
 0xd21   :  { %13278 = vmatmul.mubr.bf16.vlgmr.msra.gmra.mrb[68].mxu0 %v5006_v27  ;;  %v5052_v35 = vrot.slane %v5048_v5, %v18599_v4  ;;  %v5140_v43 = vpack.i.b16 %v4997_v19, %v4997_v19  ;;  %v5098_v44 = vrot.slane %v12807_v31, %v18599_v4  ;;  %v17176_v5 = vld [vmem:[#allocation3 + $0x1c] sm:$0xf]  ;;  %v5470_v31 = vsel %vm4327_vm6, %v17108_v55, 0 }
 0xd22   :  { %13288 = vmatpush3.bf16.xpose.msra.mxu0 %v17142_v32  ;;  %13289 = vmatprep.mubr.msk.bf16.mxu0 %vm15799_vm4, %v18564_v34  ;;  %v5232_v60 = vpack.i.b16 %v4999_v9, %v4999_v9  ;;  %v5190_v15 = vrot.slane %v12808_v63, %v18599_v4  ;;  %v5001_v27 = vunpack.i.h.s16 %v4993_v28 }
 0xd23   :  { %13284 = vmatmul.mubr.bf16.vlgmr.msra.gmra.mrb[68].mxu1 %v5052_v35  ;;  %13299 = vmatprep.subr.bf16.mxu0 %v18564_v34  ;;  %v5144_v23 = vrot.slane %v5140_v43, %v18599_v4  ;;  %v12809_v35 = vpack.i.b16 %v4993_v28, %v4993_v28 }
 0xd24   :  { %13294 = vmatpush3.bf16.xpose.msra.mxu1 %v17148_v24  ;;  %13295 = vmatprep.mubr.msk.bf16.mxu1 %vm15799_vm4, %v18564_v34  ;;  %v5236_v51 = vrot.slane %v5232_v60, %v18599_v4  ;;  %v5324_v11 = vpack.i.b16 %v5001_v27, %v5001_v27 }
 0xd25   :  { %13305 = vmatprep.subr.bf16.mxu1 %v18564_v34  ;;  %v5282_v19 = vrot.slane %v12809_v35, %v18599_v4 }
 0xd26   :  { %v5328_v43 = vrot.slane %v5324_v11, %v18599_v4 }
 0xd29   :  { %13290 = vmatmul.mubr.bf16.vlgmr.msra.gmra.mrb[72].mxu0 %v5098_v44 }
 0xd2a   :  { %13300 = vmatpush3.bf16.xpose.msra.mxu0 %v17156_v42  ;;  %13301 = vmatprep.mubr.msk.bf16.mxu0 %vm15799_vm4, %v18564_v34 }
 0xd2b   :  { %13296 = vmatmul.mubr.bf16.vlgmr.msra.gmra.mrb[72].mxu1 %v5144_v23  ;;  %13311 = vmatprep.subr.bf16.mxu0 %v18564_v34 }
 0xd2c   :  { %13306 = vmatpush3.bf16.xpose.msra.mxu1 %v17162_v13  ;;  %13307 = vmatprep.mubr.msk.bf16.mxu1 %vm15799_vm4, %v18564_v34 }
 0xd2d   :  { %13317 = vmatprep.subr.bf16.mxu1 %v18564_v34 }
 0xd31   :  { %13302 = vmatmul.mubr.bf16.vlgmr.msra.gmra.mrb[76].mxu0 %v5190_v15 }
 0xd32   :  { %13312 = vmatpush3.bf16.xpose.msra.mxu0 %v17170_v39  ;;  %13313 = vmatprep.mubr.msk.bf16.mxu0 %vm15799_vm4, %v18564_v34 }
 0xd33   :  { %13308 = vmatmul.mubr.bf16.vlgmr.msra.gmra.mrb[76].mxu1 %v5236_v51  ;;  %13323 = vmatprep.subr.bf16.mxu0 %v18564_v34 }
 0xd34   :  { %13318 = vmatpush3.bf16.xpose.msra.mxu1 %v17176_v5  ;;  %13319 = vmatprep.mubr.msk.bf16.mxu1 %vm15799_vm4, %v18564_v34 }
 0xd35   :  { %13329 = vmatprep.subr.bf16.mxu1 %v18564_v34 }
 0xd39   :  { %13314 = vmatmul.mubr.bf16.vlgmr.msra.gmra.mrb[80].mxu0 %v5282_v19 }
 0xd3a   :  { %13324 = vmatpush3.bf16.msra.mxu0 %v5470_v31  ;;  %13325 = vmatprep.mubr.msk.bf16.mxu0 %vm15799_vm4, %v18564_v34 }
 0xd3b   :  { %13320 = vmatmul.mubr.bf16.vlgmr.msra.gmra.mrb[80].mxu1 %v5328_v43  ;;  %13335 = vmatprep.subr.bf16.mxu0 %v18564_v34 }
 0xd3c   :  { %13330 = vmatpush3.bf16.msra.mxu1 %v5516_v25  ;;  %13331 = vmatprep.mubr.msk.bf16.mxu1 %vm15799_vm4, %v18564_v34 }
 0xd3d   :  { %13341 = vmatprep.subr.bf16.mxu1 %v18564_v34 }
 0xdf4   :  { %v5042_v44 = vpop.f32.mrb[68].mxu0 }
 0xdf5   :  { %v13279_v55 = vpop.f32.mrb[69].mxu0  ;;  %v5370_v23 = vsel %vm4226_vm7, %v5042_v44, -inf }
 0xdf6   :  { %5371 = vmax.xlane.f32.xlu0 %v5370_v23  ;;  %v5045_v9 = vpop.f32.mrb[70].mxu0  ;;  %v5088_v63 = vpop.f32.mrb[68].mxu1 }
 0xdf7   :  { %v13280_v60 = vpop.f32.mrb[71].mxu0  ;;  %v13285_v28 = vpop.f32.mrb[69].mxu1  ;;  %v5373_v0 = vsel %vm4226_vm7, %v5088_v63, -inf }
 0xdf8   :  { %v5091_v15 = vpop.f32.mrb[70].mxu1 }
 0xdf9   :  { %v13286_v51 = vpop.f32.mrb[71].mxu1 }
 0xdfa   :  { %5374 = vmax.xlane.f32.xlu0 %v5373_v0 }
 0xdfc   :  { %v5134_v27 = vpop.f32.mrb[72].mxu0 }
 0xdfd   :  { %v13291_v35 = vpop.f32.mrb[73].mxu0  ;;  %v5376_v11 = vsel %vm4226_vm7, %v5134_v27, -inf }
 0xdfe   :  { %5377 = vmax.xlane.f32.xlu1 %v5376_v11  ;;  %v5137_v19 = vpop.f32.mrb[74].mxu0  ;;  %v5180_v31 = vpop.f32.mrb[72].mxu1 }
 0xdff   :  { %v13292_v43 = vpop.f32.mrb[75].mxu0  ;;  %v13297_v25 = vpop.f32.mrb[73].mxu1  ;;  %v5379_v55 = vsel %vm4226_vm7, %v5180_v31, -inf }
 0xe00   :  { %5380 = vmax.xlane.f32.xlu0 %v5379_v55  ;;  %v5183_v23 = vpop.f32.mrb[74].mxu1 }
 0xe01   :  { %v13298_v9 = vpop.f32.mrb[75].mxu1 }
 0xe04   :  { %v5226_v60 = vpop.f32.mrb[76].mxu0 }
 0xe05   :  { %v13303_v28 = vpop.f32.mrb[77].mxu0  ;;  %v5382_v15 = vsel %vm4226_vm7, %v5226_v60, -inf }
 0xe06   :  { %5383 = vmax.xlane.f32.xlu1 %v5382_v15  ;;  %v5229_v51 = vpop.f32.mrb[78].mxu0  ;;  %v5272_v0 = vpop.f32.mrb[76].mxu1 }
 0xe07   :  { %v13304_v35 = vpop.f32.mrb[79].mxu0  ;;  %v13309_v4 = vpop.f32.mrb[77].mxu1  ;;  %v5385_v11 = vsel %vm4226_vm7, %v5272_v0, -inf }
 0xe08   :  { %5386 = vmax.xlane.f32.xlu0 %v5385_v11  ;;  %v5275_v19 = vpop.f32.mrb[78].mxu1 }
 0xe09   :  { %v13310_v43 = vpop.f32.mrb[79].mxu1 }
 0xe0c   :  { %v5318_v25 = vpop.f32.mrb[80].mxu0 }
 0xe0d   :  { %v13315_v45 = vpop.f32.mrb[81].mxu0  ;;  %v5388_v55 = vsel %vm4226_vm7, %v5318_v25, -inf }
 0xe0e   :  { %5389 = vmax.xlane.f32.xlu1 %v5388_v55  ;;  %v5321_v23 = vpop.f32.mrb[82].mxu0  ;;  %v5364_v9 = vpop.f32.mrb[80].mxu1 }
 0xe0f   :  { %v13316_v28 = vpop.f32.mrb[83].mxu0  ;;  %v13321_v18 = vpop.f32.mrb[81].mxu1  ;;  %v5391_v51 = vsel %vm4226_vm7, %v5364_v9, -inf }
 0xe10   :  { %v5367_v14 = vpop.f32.mrb[82].mxu1 }
 0xe11   :  { %v13322_v15 = vpop.f32.mrb[83].mxu1 }
 0xe12   :  { %5392 = vmax.xlane.f32.xlu1 %v5391_v51 }
 0xe83   :  { %v5372_v4 = vpop.xlane.xlu0 %5371 }
 0xe84   :  { %v5394_v35 = vsub.f32 %v5042_v44, %v5372_v4 }
 0xe86   :  { %v5402_v8 = vmul.f32 1.442695, %v5394_v35 }
 0xe87   :  { %v5375_v11 = vpop.xlane.xlu0 %5374 }
 0xe88   :  { %15299 = vpow2.f32 %v5402_v8  ;;  %v5395_v19 = vsub.f32 %v5088_v63, %v5375_v11 }
 0xe8a   :  { %v5404_v43 = vmul.f32 1.442695, %v5395_v19 }
 0xe8b   :  { %v5378_v45 = vpop.xlane.xlu1 %5377 }
 0xe8c   :  { %15301 = vpow2.f32 %v5404_v43  ;;  %v5396_v46 = vsub.f32 %v5134_v27, %v5378_v45 }
 0xe8d   :  { %v5381_v55 = vpop.xlane.xlu0 %5380 }
 0xe8e   :  { %v5406_v23 = vmul.f32 1.442695, %v5396_v46  ;;  %v5397_v12 = vsub.f32 %v5180_v31, %v5381_v55 }
 0xe90   :  { %15303 = vpow2.f32 %v5406_v23  ;;  %v5408_v18 = vmul.f32 1.442695, %v5397_v12 }
 0xe92   :  { %v15300_v14 = vpop.eup %15299  ;;  %15305 = vpow2.f32 %v5408_v18 }
 0xe93   :  { %v5384_v28 = vpop.xlane.xlu1 %5383  ;;  %v5418_v15 = vsel %vm4226_vm7, %v15300_v14, 0.0 }
 0xe94   :  { %v5398_v51 = vsub.f32 %v5226_v60, %v5384_v28  ;;  %5419 = vadd.xlane.f32.xlu0 %v5418_v15 }
 0xe95   :  { %v5387_v44 = vpop.xlane.xlu0 %5386 }
 0xe96   :  { %v15302_v4 = vpop.eup %15301  ;;  %v5410_v8 = vmul.f32 1.442695, %v5398_v51  ;;  %v5399_v63 = vsub.f32 %v5272_v0, %v5387_v44 }
 0xe97   :  { %v5421_v35 = vsel %vm4226_vm7, %v15302_v4, 0.0 }
 0xe98   :  { %15307 = vpow2.f32 %v5410_v8  ;;  %v5412_v27 = vmul.f32 1.442695, %v5399_v63  ;;  %5422 = vadd.xlane.f32.xlu0 %v5421_v35 }
 0xe9a   :  { %v15304_v46 = vpop.eup %15303  ;;  %15309 = vpow2.f32 %v5412_v27 }
 0xe9b   :  { %v5390_v31 = vpop.xlane.xlu1 %5389  ;;  %v5424_v12 = vsel %vm4226_vm7, %v15304_v46, 0.0 }
 0xe9c   :  { %v15306_v11 = vpop.eup %15305  ;;  %v5400_v19 = vsub.f32 %v5318_v25, %v5390_v31  ;;  %5425 = vadd.xlane.f32.xlu1 %v5424_v12 }
 0xe9d   :  { %v5427_v60 = vsel %vm4226_vm7, %v15306_v11, 0.0 }
 0xe9e   :  { %v5414_v43 = vmul.f32 1.442695, %v5400_v19  ;;  %5428 = vadd.xlane.f32.xlu0 %v5427_v60 }
 0xe9f   :  { %v5393_v45 = vpop.xlane.xlu1 %5392 }
 0xea0   :  { %15311 = vpow2.f32 %v5414_v43  ;;  %v5401_v0 = vsub.f32 %v5364_v9, %v5393_v45  ;;  %v5562_v43 = vsel %vm4327_vm6, %v17142_v32, 0 }
 0xea2   :  { %v15308_v55 = vpop.eup %15307  ;;  %v5416_v23 = vmul.f32 1.442695, %v5401_v0 }
 0xea3   :  { %v5430_v18 = vsel %vm4226_vm7, %v15308_v55, 0.0 }
 0xea4   :  { %v15310_v28 = vpop.eup %15309  ;;  %15313 = vpow2.f32 %v5416_v23  ;;  %5431 = vadd.xlane.f32.xlu1 %v5430_v18 }
 0xea5   :  { %v5433_v15 = vsel %vm4226_vm7, %v15310_v28, 0.0 }
 0xea6   :  { %5434 = vadd.xlane.f32.xlu0 %v5433_v15 }
 0xeaa   :  { %v17209_v51 = vpop.eup %15311 }
 0xeab   :  { %v5436_v25 = vsel %vm4226_vm7, %v17209_v51, 0.0 }
 0xeac   :  { %5437 = vadd.xlane.f32.xlu1 %v5436_v25 }
 0xeae   :  { %v17213_v44 = vpop.eup %15313 }
 0xeaf   :  { %v5439_v9 = vsel %vm4226_vm7, %v17213_v44, 0.0 }
 0xeb0   :  { %5440 = vadd.xlane.f32.xlu1 %v5439_v9 }
 0xf21   :  { %v5420_v8 = vpop.xlane.xlu0 %5419 }
 0xf22   :  { %15315 = vrcp.f32 %v5420_v8  ;;  %v5654_v8 = vsel %vm4327_vm6, %v17156_v42, 0 }
 0xf25   :  { %v5423_v63 = vpop.xlane.xlu0 %5422 }
 0xf26   :  { %15317 = vrcp.f32 %v5423_v63 }
 0xf29   :  { %v5426_v35 = vpop.xlane.xlu1 %5425 }
 0xf2a   :  { %15319 = vrcp.f32 %v5426_v35 }
 0xf2b   :  { %v5429_v27 = vpop.xlane.xlu0 %5428 }
 0xf2c   :  { %v15316_v31 = vpop.eup %15315  ;;  %15321 = vrcp.f32 %v5429_v27 }
 0xf2d   :  { %v5450_v12 = vmul.f32 %v15316_v31, %v15300_v14  ;;  %v5608_v14 = vsel %vm4327_vm6, %v17148_v24, 0 }
 0xf2f   :  { %v5458_v19 = vpack.c.bf16 %v5450_v12, %v5450_v12 }
 0xf30   :  { %v15318_v60 = vpop.eup %15317 }
 0xf31   :  { %13326 = vmatmul.mubr.msk.bf16.vlgmr.msra.gmra.mrb[84].mxu0 %vm4323_vm8, %v5458_v19  ;;  %v5432_v45 = vpop.xlane.xlu1 %5431  ;;  %v5451_v0 = vmul.f32 %v15318_v60, %v15302_v4  ;;  %v5746_v19 = vsel %vm4327_vm6, %v17170_v39, 0 }
 0xf32   :  { %13336 = vmatpush3.bf16.msra.mxu0 %v5562_v43  ;;  %15323 = vrcp.f32 %v5432_v45  ;;  %13337 = vmatprep.mubr.msk.bf16.mxu0 %vm15799_vm4, %v18564_v34 }
 0xf33   :  { %v5435_v23 = vpop.xlane.xlu0 %5434  ;;  %v5459_v18 = vpack.c.bf16 %v5451_v0, %v5451_v0  ;;  %13347 = vmatprep.subr.bf16.mxu0 %v18564_v34 }
 0xf34   :  { %v15320_v15 = vpop.eup %15319  ;;  %15325 = vrcp.f32 %v5435_v23 }
 0xf35   :  { %13332 = vmatmul.mubr.msk.bf16.vlgmr.msra.gmra.mrb[84].mxu1 %vm4323_vm8, %v5459_v18  ;;  %v5452_v25 = vmul.f32 %v15320_v15, %v15304_v46 }
 0xf36   :  { %v15322_v32 = vpop.eup %15321  ;;  %13342 = vmatpush3.bf16.msra.mxu1 %v5608_v14  ;;  %13343 = vmatprep.mubr.msk.bf16.mxu1 %vm15799_vm4, %v18564_v34 }
 0xf37   :  { %v5460_v4 = vpack.c.bf16 %v5452_v25, %v5452_v25  ;;  %13353 = vmatprep.subr.bf16.mxu1 %v18564_v34  ;;  %v5453_v9 = vmul.f32 %v15322_v32, %v15306_v11  ;;  %v5700_v11 = vsel %vm4327_vm6, %v17162_v13, 0 }
 0xf39   :  { %13338 = vmatmul.mubr.msk.bf16.vlgmr.msra.gmra.mrb[88].mxu0 %vm4323_vm8, %v5460_v4  ;;  %v5438_v63 = vpop.xlane.xlu1 %5437  ;;  %v5461_v24 = vpack.c.bf16 %v5453_v9, %v5453_v9 }
 0xf3a   :  { %13348 = vmatpush3.bf16.msra.mxu0 %v5654_v8  ;;  %15327 = vrcp.f32 %v5438_v63  ;;  %13349 = vmatprep.mubr.msk.bf16.mxu0 %vm15799_vm4, %v18564_v34 }
 0xf3b   :  { %13359 = vmatprep.subr.bf16.mxu0 %v18564_v34 }
 0xf3c   :  { %v15324_v46 = vpop.eup %15323 }
 0xf3d   :  { %13344 = vmatmul.mubr.msk.bf16.vlgmr.msra.gmra.mrb[88].mxu1 %vm4323_vm8, %v5461_v24  ;;  %v5441_v35 = vpop.xlane.xlu1 %5440  ;;  %v5454_v27 = vmul.f32 %v15324_v46, %v15308_v55 }
 0xf3e   :  { %v15326_v31 = vpop.eup %15325  ;;  %13354 = vmatpush3.bf16.msra.mxu1 %v5700_v11  ;;  %15329 = vrcp.f32 %v5441_v35  ;;  %13355 = vmatprep.mubr.msk.bf16.mxu1 %vm15799_vm4, %v18564_v34 }
 0xf3f   :  { %v5455_v42 = vmul.f32 %v15326_v31, %v15310_v28  ;;  %v5462_v12 = vpack.c.bf16 %v5454_v27, %v5454_v27  ;;  %13365 = vmatprep.subr.bf16.mxu1 %v18564_v34  ;;  %v5792_v28 = vsel %vm4327_vm6, %v17176_v5, 0  ;;  %v18608_v31 = vld [vmem:[#allocation22_spill] sm:$0xff] }
 0xf41   :  { %13350 = vmatmul.mubr.msk.bf16.vlgmr.msra.gmra.mrb[92].mxu0 %vm4323_vm8, %v5462_v12  ;;  %v5463_v13 = vpack.c.bf16 %v5455_v42, %v5455_v42 }
 0xf42   :  { %13360 = vmatpush3.bf16.msra.mxu0 %v5746_v19  ;;  %13361 = vmatprep.mubr.msk.bf16.mxu0 %vm15799_vm4, %v18564_v34  ;;  %v18609_v19 = vld [vmem:[#allocation23_spill] sm:$0xff] }
 0xf43   :  { %14652 = vmatprep.subr.bf16.mxu0 %v16990_v59 }
 0xf44   :  { %v15328_v55 = vpop.eup %15327 }
 0xf45   :  { %13356 = vmatmul.mubr.msk.bf16.vlgmr.msra.gmra.mrb[92].mxu1 %vm4323_vm8, %v5463_v13  ;;  %v5456_v60 = vmul.f32 %v15328_v55, %v17209_v51 }
 0xf46   :  { %13366 = vmatpush3.bf16.msra.mxu1 %v5792_v28  ;;  %13367 = vmatprep.mubr.msk.bf16.mxu1 %vm15799_vm4, %v18564_v34 }
 0xf47   :  { %v5464_v39 = vpack.c.bf16 %v5456_v60, %v5456_v60  ;;  %14684 = vmatprep.subr.bf16.mxu1 %v16998_v62  ;;  %v17295_v62 = vld [vmem:[#allocation3] sm:$0xf] }
 0xf48   :  { %v15330_v43 = vpop.eup %15329 }
 0xf49   :  { %v5457_v45 = vmul.f32 %v15330_v43, %v17213_v44  ;;  %13362 = vmatmul.mubr.msk.bf16.vlgmr.msra.gmra.mrb[96].mxu0 %vm4323_vm8, %v5464_v39  ;;  %v18610_v43 = vld [vmem:[#allocation24_spill] sm:$0xff] }
 0xf4a   :  { %14654 = vmatpush1.bf16.msra.mxu0 %v17004_v40  ;;  %5993 = vmatprep.mubr.f32.mxu0 %v18564_v34  ;;  %v17301_v40 = vld [vmem:[#allocation3 + $0x4] sm:$0xf] }
 0xf4b   :  { %14656 = vmatprep.subr.bf16.mxu0 %v17008_v37  ;;  %v5465_v59 = vpack.c.bf16 %v5457_v45, %v5457_v45 }
 0xf4d   :  { %13368 = vmatmul.mubr.msk.bf16.vlgmr.msra.gmra.mrb[96].mxu1 %vm4323_vm8, %v5465_v59 }
 0xf4e   :  { %14658 = vmatpush1.bf16.msra.mxu0 %v17014_v30  ;;  %14686 = vmatpush1.bf16.msra.mxu1 %v17016_v3 }
 0xf4f   :  { %14660 = vmatprep.subr.bf16.mxu0 %v17020_v41  ;;  %14688 = vmatprep.subr.bf16.mxu1 %v17022_v6 }
 0xf50   :  { %6064 = vmatprep.mubr.f32.mxu1 %v18564_v34 }
 0xf52   :  { %14662 = vmatpush1.bf16.msra.mxu0 %v17027_v1  ;;  %14690 = vmatpush1.bf16.msra.mxu1 %v17029_v20 }
 0xf53   :  { %14664 = vmatprep.subr.bf16.mxu0 %v17033_v61  ;;  %14692 = vmatprep.subr.bf16.mxu1 %v17035_v53 }
 0xf56   :  { %14666 = vmatpush1.bf16.msra.mxu0 %v17040_v57  ;;  %14694 = vmatpush1.bf16.msra.mxu1 %v17042_v33 }
 0xf57   :  { %14668 = vmatprep.subr.bf16.mxu0 %v17046_v47  ;;  %14696 = vmatprep.subr.bf16.mxu1 %v17048_v16 }
 0xf5a   :  { %14670 = vmatpush1.bf16.msra.mxu0 %v17052_v17  ;;  %14698 = vmatpush1.bf16.msra.mxu1 %v17054_v50 }
 0xf5b   :  { %14672 = vmatprep.subr.bf16.mxu0 %v17058_v10  ;;  %14700 = vmatprep.subr.bf16.mxu1 %v17060_v54 }
 0xf5e   :  { %14674 = vmatpush1.bf16.msra.mxu0 %v17064_v49  ;;  %14702 = vmatpush1.bf16.msra.mxu1 %v17066_v52 }
 0xf5f   :  { %14676 = vmatprep.subr.bf16.mxu0 %v17070_v58  ;;  %14704 = vmatprep.subr.bf16.mxu1 %v17072_v38 }
 0xf62   :  { %14678 = vmatpush1.bf16.msra.mxu0 %v17076_v7  ;;  %14706 = vmatpush1.bf16.msra.mxu1 %v17078_v26 }
 0xf63   :  { %14680 = vmatprep.subr.bf16.mxu0 %v17082_v56  ;;  %14708 = vmatprep.subr.bf16.mxu1 %v17084_v21 }
 0xf66   :  { %14682 = vmatpush1.bf16.msra.mxu0 %v17088_v22  ;;  %14710 = vmatpush1.bf16.msra.mxu1 %v17090_v2 }
 0xf67   :  { %14712 = vmatprep.subr.bf16.mxu1 %v17094_v36  ;;  %13371 = vmatprep.subr.bf16.mxu0 %v18564_v34 }
 0xf69   :  { %5994 = vmatmul.mubr.f32.vlgmr.msra.gmra.mrb[100].mxu0 %v17134_v29 }
 0xf6a   :  { %14714 = vmatpush1.bf16.msra.mxu1 %v17098_v48  ;;  %13373 = vmatprep.mubr.msk.bf16.mxu0 %vm15799_vm4, %v18564_v34 }
 0xf6b   :  { %13377 = vmatprep.subr.bf16.mxu1 %v18564_v34 }
 0xf6d   :  { %6065 = vmatmul.mubr.f32.vlgmr.msra.gmra.mrb[100].mxu1 %v17134_v29 }
 0xf6e   :  { %13379 = vmatprep.mubr.msk.bf16.mxu1 %vm15799_vm4, %v18564_v34 }
 0xf6f   :  { %13372 = vmatpush3.bf16.xpose.msra.mxu0 %v17295_v62 }
 0xf70   :  { %13383 = vmatprep.subr.bf16.mxu0 %v18564_v34 }
 0xf73   :  { %13378 = vmatpush3.bf16.xpose.msra.mxu1 %v17301_v40 }
 0xf74   :  { %13389 = vmatprep.subr.bf16.mxu1 %v18564_v34 }
0x1004   :  { %v5506_v37 = vpop.f32.mrb[84].mxu0 }
0x1005   :  { %v13327_v30 = vpop.f32.mrb[85].mxu0 }
0x1006   :  { %v5509_v3 = vpop.f32.mrb[86].mxu0 }
0x1007   :  { %v13328_v41 = vpop.f32.mrb[87].mxu0 }
0x1008   :  { %v5552_v6 = vpop.f32.mrb[84].mxu1 }
0x1009   :  { %v5842_v1 = vrot.slane %v5552_v6, 7  ;;  %v13333_v20 = vpop.f32.mrb[85].mxu1 }
0x100a   :  { %v5555_v61 = vpop.f32.mrb[86].mxu1 }
0x100b   :  { %v5843_v53 = vsel %vm1620_vm5, %v5842_v1, %v5506_v37  ;;  %v13334_v57 = vpop.f32.mrb[87].mxu1  ;;  %v18611_v37 = vld [vmem:[#allocation25_spill] sm:$0xff] }
0x100c   :  { %v5598_v33 = vpop.f32.mrb[88].mxu0 }
0x100d   :  { %v5844_v47 = vrot.slane %v5598_v33, 6  ;;  %v13339_v16 = vpop.f32.mrb[89].mxu0 }
0x100e   :  { %v5601_v17 = vpop.f32.mrb[90].mxu0 }
0x100f   :  { %v5845_v50 = vsel %vm2361_vm10, %v5844_v47, %v5843_v53  ;;  %v13340_v10 = vpop.f32.mrb[91].mxu0  ;;  %v18612_v47 = vld [vmem:[#allocation26_spill] sm:$0xff] }
0x1010   :  { %v5644_v54 = vpop.f32.mrb[88].mxu1 }
0x1011   :  { %v5846_v49 = vrot.slane %v5644_v54, 5  ;;  %v13345_v52 = vpop.f32.mrb[89].mxu1 }
0x1012   :  { %v5647_v58 = vpop.f32.mrb[90].mxu1  ;;  %v18613_v52 = vld [vmem:[#allocation40_spill] sm:$0xff] }
0x1013   :  { %v5847_v38 = vsel %vm3102_vm15, %v5846_v49, %v5845_v50  ;;  %v13346_v7 = vpop.f32.mrb[91].mxu1 }
0x1014   :  { %v5690_v26 = vpop.f32.mrb[92].mxu0 }
0x1015   :  { %v5848_v56 = vrot.slane %v5690_v26, 4  ;;  %v13351_v21 = vpop.f32.mrb[93].mxu0 }
0x1016   :  { %v5693_v22 = vpop.f32.mrb[94].mxu0 }
0x1017   :  { %v5849_v2 = vsel %vm4711_vm9, %v5848_v56, %v5847_v38  ;;  %v13352_v36 = vpop.f32.mrb[95].mxu0  ;;  %v18614_v22 = vld [vmem:[#allocation21_spill] sm:$0xff] }
0x1018   :  { %v5736_v48 = vpop.f32.mrb[92].mxu1 }
0x1019   :  { %v5850_v5 = vrot.slane %v5736_v48, 3  ;;  %v13357_v51 = vpop.f32.mrb[93].mxu1  ;;  %v17329_v48 = vld [vmem:[#allocation3 + $0x8] sm:$0xf] }
0x101a   :  { %v5739_v44 = vpop.f32.mrb[94].mxu1 }
0x101b   :  { %v5851_v0 = vsel %vm4714_vm11, %v5850_v5, %v5849_v2  ;;  %v13358_v23 = vpop.f32.mrb[95].mxu1  ;;  %v17335_v44 = vld [vmem:[#allocation3 + $0xc] sm:$0xf] }
0x101c   :  { %v5782_v18 = vpop.f32.mrb[96].mxu0 }
0x101d   :  { %v5852_v15 = vrot.slane %v5782_v18, 2  ;;  %v13363_v14 = vpop.f32.mrb[97].mxu0 }
0x101e   :  { %v5785_v25 = vpop.f32.mrb[98].mxu0  ;;  %v17343_v14 = vld [vmem:[#allocation3 + $0x10] sm:$0xf] }
0x101f   :  { %v5853_v32 = vsel %vm4717_vm12, %v5852_v15, %v5851_v0  ;;  %v13364_v4 = vpop.f32.mrb[99].mxu0 }
0x1020   :  { %v5828_v9 = vpop.f32.mrb[96].mxu1  ;;  %v17349_v4 = vld [vmem:[#allocation3 + $0x14] sm:$0xf] }
0x1021   :  { %v5854_v8 = vrot.slane %v5828_v9, 1  ;;  %v13369_v63 = vpop.f32.mrb[97].mxu1 }
0x1022   :  { %v5831_v24 = vpop.f32.mrb[98].mxu1 }
0x1023   :  { %v5855_v46 = vsel %vm4720_vm13, %v5854_v8, %v5853_v32  ;;  %v13370_v11 = vpop.f32.mrb[99].mxu1 }
0x1024   :  { %v12916_v35 = vpack.c.bf16 %v5855_v46, %v17134_v29  ;;  %v17357_v46 = vld [vmem:[#allocation3 + $0x18] sm:$0xf] }
0x1026   :  { %5864 = vst [vmem:[#allocation15 + $0x8] sm:$0xff] %v12916_v35 }
0x103c   :  { %v5995_v27 = vpop.f32.mrb[100].mxu0 }
0x103d   :  { %v5996_v42 = vadd.f32 %v5995_v27, %v18608_v31  ;;  %v5997_v12 = vpop.f32.mrb[101].mxu0  ;;  %v17363_v27 = vld [vmem:[#allocation3 + $0x1c] sm:$0xf] }
0x103e   :  { %v5998_v13 = vadd.f32 %v5997_v12, %v18609_v19 }
0x103f   :  { %v12819_v55 = vmul.f32 -1.442695, %v5996_v42 }
0x1040   :  { %v12820_v28 = vmul.f32 -1.442695, %v5998_v13  ;;  %v6066_v60 = vpop.f32.mrb[100].mxu1 }
0x1041   :  { %15331 = vpow2.f32 %v12819_v55  ;;  %v6068_v39 = vpop.f32.mrb[101].mxu1  ;;  %v6067_v45 = vadd.f32 %v6066_v60, %v18610_v43  ;;  %v6605_v55 = vsel %vm4327_vm6, %v17295_v62, 0  ;;  %v6651_v60 = vsel %vm4327_vm6, %v17301_v40, 0 }
0x1042   :  { %15333 = vpow2.f32 %v12820_v28  ;;  %v6069_v30 = vadd.f32 %v6068_v39, %v18611_v37 }
0x1043   :  { %v12821_v59 = vmul.f32 -1.442695, %v6067_v45 }
0x1045   :  { %15335 = vpow2.f32 %v12821_v59 }
0x1046   :  { %15337 = vtanh.f32 %v6069_v30 }
0x104b   :  { %v15332_v3 = vpop.eup %15331 }
0x104c   :  { %v15334_v29 = vpop.eup %15333  ;;  %v6080_v41 = vadd.f32 1.0, %v15332_v3 }
0x104d   :  { %v6081_v6 = vadd.f32 1.0, %v15334_v29 }
0x104e   :  { %15339 = vrcp.f32 %v6080_v41 }
0x104f   :  { %15341 = vrcp.f32 %v6081_v6  ;;  %v15336_v1 = vpop.eup %15335 }
0x1050   :  { %v15338_v20 = vpop.eup %15337  ;;  %v6082_v57 = vadd.f32 1.0, %v15336_v1 }
0x1052   :  { %15343 = vrcp.f32 %v6082_v57 }
0x1058   :  { %v15340_v61 = vpop.eup %15339 }
0x1059   :  { %v15342_v53 = vpop.eup %15341  ;;  %v6091_v33 = vmul.f32 %v15340_v61, %v15338_v20 }
0x105a   :  { %v6090_v16 = vmul.f32 %v15342_v53, %v18612_v47 }
0x105c   :  { %v17318_v17 = vadd.f32 %v6091_v33, %v6090_v16  ;;  %v15344_v50 = vpop.eup %15343 }
0x105e   :  { %15345 = vtanh.f32 %v17318_v17 }
0x1068   :  { %v15346_v10 = vpop.eup %15345 }
0x1069   :  { %v17321_v54 = vmul.f32 %v15346_v10, %v15344_v50 }
0x106b   :  { %v6103_v49 = vpack.c.bf16 %v17321_v54, %v17321_v54 }
0x106d   :  { %v6111_v58 = vrot.slane %v6103_v49, %v18613_v52 }
0x106f   :  { %v6119_v38 = vrot.slane %v6111_v58, %v18613_v52  ;;  %v6112_v7 = vcombine.high %v6111_v58, %v6111_v58 }
0x1071   :  { %v12822_v26 = vpack.i.b16 %v6119_v38, %v6119_v38  ;;  %v6130_v56 = vunpack.i.h.s16 %v6119_v38  ;;  %v6126_v21 = vrot.slane %v6112_v7, %v18613_v52  ;;  %v6127_v18 = vcombine.high %v6119_v38, %v6119_v38 }
0x1073   :  { %v6141_v2 = vrot.slane %v12822_v26, %v18614_v22  ;;  %v6183_v36 = vpack.i.b16 %v6130_v56, %v6130_v56  ;;  %v6132_v51 = vunpack.i.h.s16 %v6126_v21  ;;  %v12823_v0 = vpack.i.b16 %v6126_v21, %v6126_v21 }
0x1074   :  { %v6134_v32 = vunpack.i.h.s16 %v6127_v18  ;;  %v12824_v9 = vpack.i.b16 %v6127_v18, %v6127_v18  ;;  %v6128_v63 = vcombine.high %v6126_v21, %v6126_v21 }
0x1075   :  { %13374 = vmatmul.mubr.bf16.vlgmr.msra.gmra.mrb[104].mxu0 %v6141_v2  ;;  %v6187_v5 = vrot.slane %v6183_v36, %v18614_v22  ;;  %v6275_v23 = vpack.i.b16 %v6132_v51, %v6132_v51  ;;  %v6233_v15 = vrot.slane %v12823_v0, %v18614_v22 }
0x1076   :  { %13384 = vmatpush3.bf16.xpose.msra.mxu0 %v17329_v48  ;;  %13385 = vmatprep.mubr.msk.bf16.mxu0 %vm15799_vm4, %v18564_v34  ;;  %v6367_v8 = vpack.i.b16 %v6134_v32, %v6134_v32  ;;  %v6325_v24 = vrot.slane %v12824_v9, %v18614_v22  ;;  %v6136_v35 = vunpack.i.h.s16 %v6128_v63  ;;  %v12825_v42 = vpack.i.b16 %v6128_v63, %v6128_v63 }
0x1077   :  { %13380 = vmatmul.mubr.bf16.vlgmr.msra.gmra.mrb[104].mxu1 %v6187_v5  ;;  %13395 = vmatprep.subr.bf16.mxu0 %v18564_v34  ;;  %v6279_v25 = vrot.slane %v6275_v23, %v18614_v22 }
0x1078   :  { %13390 = vmatpush3.bf16.xpose.msra.mxu1 %v17335_v44  ;;  %13391 = vmatprep.mubr.msk.bf16.mxu1 %vm15799_vm4, %v18564_v34  ;;  %v6371_v11 = vrot.slane %v6367_v8, %v18614_v22  ;;  %v6459_v12 = vpack.i.b16 %v6136_v35, %v6136_v35  ;;  %v6417_v13 = vrot.slane %v12825_v42, %v18614_v22 }
0x1079   :  { %13401 = vmatprep.subr.bf16.mxu1 %v18564_v34 }
0x107a   :  { %v6463_v28 = vrot.slane %v6459_v12, %v18614_v22 }
0x107d   :  { %13386 = vmatmul.mubr.bf16.vlgmr.msra.gmra.mrb[108].mxu0 %v6233_v15 }
0x107e   :  { %13396 = vmatpush3.bf16.xpose.msra.mxu0 %v17343_v14  ;;  %13397 = vmatprep.mubr.msk.bf16.mxu0 %vm15799_vm4, %v18564_v34 }
0x107f   :  { %13392 = vmatmul.mubr.bf16.vlgmr.msra.gmra.mrb[108].mxu1 %v6279_v25  ;;  %13407 = vmatprep.subr.bf16.mxu0 %v18564_v34 }
0x1080   :  { %13402 = vmatpush3.bf16.xpose.msra.mxu1 %v17349_v4  ;;  %13403 = vmatprep.mubr.msk.bf16.mxu1 %vm15799_vm4, %v18564_v34 }
0x1081   :  { %13413 = vmatprep.subr.bf16.mxu1 %v18564_v34 }
0x1085   :  { %13398 = vmatmul.mubr.bf16.vlgmr.msra.gmra.mrb[112].mxu0 %v6325_v24 }
0x1086   :  { %13408 = vmatpush3.bf16.xpose.msra.mxu0 %v17357_v46  ;;  %13409 = vmatprep.mubr.msk.bf16.mxu0 %vm15799_vm4, %v18564_v34 }
0x1087   :  { %13404 = vmatmul.mubr.bf16.vlgmr.msra.gmra.mrb[112].mxu1 %v6371_v11  ;;  %13419 = vmatprep.subr.bf16.mxu0 %v18564_v34 }
0x1088   :  { %13414 = vmatpush3.bf16.xpose.msra.mxu1 %v17363_v27  ;;  %13415 = vmatprep.mubr.msk.bf16.mxu1 %vm15799_vm4, %v18564_v34 }
0x1089   :  { %13425 = vmatprep.subr.bf16.mxu1 %v18564_v34 }
0x108d   :  { %13410 = vmatmul.mubr.bf16.vlgmr.msra.gmra.mrb[116].mxu0 %v6417_v13 }
0x108e   :  { %13420 = vmatpush3.bf16.msra.mxu0 %v6605_v55  ;;  %13421 = vmatprep.mubr.msk.bf16.mxu0 %vm15799_vm4, %v18564_v34 }
0x108f   :  { %13416 = vmatmul.mubr.bf16.vlgmr.msra.gmra.mrb[116].mxu1 %v6463_v28  ;;  %13431 = vmatprep.subr.bf16.mxu0 %v18564_v34 }
0x1090   :  { %13426 = vmatpush3.bf16.msra.mxu1 %v6651_v60  ;;  %13427 = vmatprep.mubr.msk.bf16.mxu1 %vm15799_vm4, %v18564_v34 }
0x1091   :  { %13437 = vmatprep.subr.bf16.mxu1 %v18564_v34 }
0x1148   :  { %v6177_v39 = vpop.f32.mrb[104].mxu0 }
0x1149   :  { %v13375_v62 = vpop.f32.mrb[105].mxu0  ;;  %v6505_v45 = vsel %vm4226_vm7, %v6177_v39, -inf }
0x114a   :  { %6506 = vmax.xlane.f32.xlu0 %v6505_v45  ;;  %v6180_v59 = vpop.f32.mrb[106].mxu0  ;;  %v6223_v30 = vpop.f32.mrb[104].mxu1 }
0x114b   :  { %v13376_v3 = vpop.f32.mrb[107].mxu0  ;;  %v13381_v29 = vpop.f32.mrb[105].mxu1  ;;  %v6508_v40 = vsel %vm4226_vm7, %v6223_v30, -inf }
0x114c   :  { %v6226_v41 = vpop.f32.mrb[106].mxu1 }
0x114d   :  { %v13382_v6 = vpop.f32.mrb[107].mxu1 }
0x114e   :  { %6509 = vmax.xlane.f32.xlu0 %v6508_v40 }
0x1150   :  { %v6269_v1 = vpop.f32.mrb[108].mxu0 }
0x1151   :  { %v13387_v20 = vpop.f32.mrb[109].mxu0  ;;  %v6511_v61 = vsel %vm4226_vm7, %v6269_v1, -inf }
0x1152   :  { %6512 = vmax.xlane.f32.xlu1 %v6511_v61  ;;  %v6272_v53 = vpop.f32.mrb[110].mxu0  ;;  %v6315_v57 = vpop.f32.mrb[108].mxu1 }
0x1153   :  { %v13388_v33 = vpop.f32.mrb[111].mxu0  ;;  %v13393_v47 = vpop.f32.mrb[109].mxu1  ;;  %v6514_v16 = vsel %vm4226_vm7, %v6315_v57, -inf }
0x1154   :  { %6515 = vmax.xlane.f32.xlu0 %v6514_v16  ;;  %v6318_v50 = vpop.f32.mrb[110].mxu1 }
0x1155   :  { %v13394_v10 = vpop.f32.mrb[111].mxu1 }
0x1158   :  { %v6361_v49 = vpop.f32.mrb[112].mxu0 }
0x1159   :  { %v13399_v58 = vpop.f32.mrb[113].mxu0  ;;  %v6517_v38 = vsel %vm4226_vm7, %v6361_v49, -inf }
0x115a   :  { %6518 = vmax.xlane.f32.xlu1 %v6517_v38  ;;  %v6364_v7 = vpop.f32.mrb[114].mxu0  ;;  %v6407_v26 = vpop.f32.mrb[112].mxu1 }
0x115b   :  { %v13400_v56 = vpop.f32.mrb[115].mxu0  ;;  %v13405_v21 = vpop.f32.mrb[113].mxu1  ;;  %v6520_v2 = vsel %vm4226_vm7, %v6407_v26, -inf }
0x115c   :  { %6521 = vmax.xlane.f32.xlu0 %v6520_v2  ;;  %v6410_v36 = vpop.f32.mrb[114].mxu1 }
0x115d   :  { %v13406_v5 = vpop.f32.mrb[115].mxu1 }
0x1160   :  { %v6453_v51 = vpop.f32.mrb[116].mxu0 }
0x1161   :  { %v13411_v0 = vpop.f32.mrb[117].mxu0  ;;  %v6523_v23 = vsel %vm4226_vm7, %v6453_v51, -inf }
0x1162   :  { %6524 = vmax.xlane.f32.xlu1 %v6523_v23  ;;  %v6456_v18 = vpop.f32.mrb[118].mxu0  ;;  %v6499_v15 = vpop.f32.mrb[116].mxu1 }
0x1163   :  { %v13412_v25 = vpop.f32.mrb[119].mxu0  ;;  %v13417_v32 = vpop.f32.mrb[117].mxu1  ;;  %v6526_v63 = vsel %vm4226_vm7, %v6499_v15, -inf }
0x1164   :  { %v6502_v9 = vpop.f32.mrb[118].mxu1 }
0x1165   :  { %v13418_v8 = vpop.f32.mrb[119].mxu1 }
0x1166   :  { %6527 = vmax.xlane.f32.xlu1 %v6526_v63 }
0x11d7   :  { %v6507_v24 = vpop.xlane.xlu0 %6506 }
0x11d8   :  { %v6529_v11 = vsub.f32 %v6177_v39, %v6507_v24  ;;  %v6697_v24 = vsel %vm4327_vm6, %v17329_v48, 0 }
0x11da   :  { %v6537_v35 = vmul.f32 1.442695, %v6529_v11 }
0x11db   :  { %v6510_v42 = vpop.xlane.xlu0 %6509 }
0x11dc   :  { %15347 = vpow2.f32 %v6537_v35  ;;  %v6530_v12 = vsub.f32 %v6223_v30, %v6510_v42 }
0x11de   :  { %v6539_v13 = vmul.f32 1.442695, %v6530_v12 }
0x11df   :  { %v6513_v55 = vpop.xlane.xlu1 %6512 }
0x11e0   :  { %15349 = vpow2.f32 %v6539_v13  ;;  %v6531_v28 = vsub.f32 %v6269_v1, %v6513_v55  ;;  %v6743_v55 = vsel %vm4327_vm6, %v17335_v44, 0 }
0x11e1   :  { %v6516_v60 = vpop.xlane.xlu0 %6515 }
0x11e2   :  { %v6541_v62 = vmul.f32 1.442695, %v6531_v28  ;;  %v6532_v45 = vsub.f32 %v6315_v57, %v6516_v60 }
0x11e4   :  { %15351 = vpow2.f32 %v6541_v62  ;;  %v6543_v59 = vmul.f32 1.442695, %v6532_v45  ;;  %v6789_v62 = vsel %vm4327_vm6, %v17343_v14, 0 }
0x11e6   :  { %v15348_v3 = vpop.eup %15347  ;;  %15353 = vpow2.f32 %v6543_v59 }
0x11e7   :  { %v6519_v29 = vpop.xlane.xlu1 %6518  ;;  %v6553_v41 = vsel %vm4226_vm7, %v15348_v3, 0.0 }
0x11e8   :  { %v6533_v6 = vsub.f32 %v6361_v49, %v6519_v29  ;;  %6554 = vadd.xlane.f32.xlu0 %v6553_v41  ;;  %v7005_v29 = vld [vmem:[#allocation13 + $0x28] sm:$0xff] }
0x11e9   :  { %v6522_v39 = vpop.xlane.xlu0 %6521 }
0x11ea   :  { %v15350_v40 = vpop.eup %15349  ;;  %v6545_v20 = vmul.f32 1.442695, %v6533_v6  ;;  %v6534_v30 = vsub.f32 %v6407_v26, %v6522_v39  ;;  %v6835_v6 = vsel %vm4327_vm6, %v17349_v4, 0  ;;  %v6881_v4 = vsel %vm4327_vm6, %v17357_v46, 0 }
0x11eb   :  { %v6556_v61 = vsel %vm4226_vm7, %v15350_v40, 0.0  ;;  %v6927_v46 = vsel %vm4327_vm6, %v17363_v27, 0  ;;  %v7015_v27 = vld [vmem:[#allocation13 + $0x78] sm:$0xff] }
0x11ec   :  { %15355 = vpow2.f32 %v6545_v20  ;;  %v6547_v1 = vmul.f32 1.442695, %v6534_v30  ;;  %6557 = vadd.xlane.f32.xlu0 %v6556_v61  ;;  %v7003_v61 = vld [vmem:[#allocation13 + $0x18] sm:$0xff] }
0x11ee   :  { %v15352_v53 = vpop.eup %15351  ;;  %15357 = vpow2.f32 %v6547_v1  ;;  %v7007_v1 = vld [vmem:[#allocation13 + $0x38] sm:$0xff] }
0x11ef   :  { %v6525_v57 = vpop.xlane.xlu1 %6524  ;;  %v6559_v33 = vsel %vm4226_vm7, %v15352_v53, 0.0 }
0x11f0   :  { %v15354_v47 = vpop.eup %15353  ;;  %v6535_v16 = vsub.f32 %v6453_v51, %v6525_v57  ;;  %6560 = vadd.xlane.f32.xlu1 %v6559_v33  ;;  %v7000_v57 = vld [vmem:[#allocation13] sm:$0xff] }
0x11f1   :  { %v6562_v50 = vsel %vm4226_vm7, %v15354_v47, 0.0  ;;  %v7004_v33 = vld [vmem:[#allocation13 + $0x20] sm:$0xff] }
0x11f2   :  { %v6549_v10 = vmul.f32 1.442695, %v6535_v16  ;;  %6563 = vadd.xlane.f32.xlu0 %v6562_v50  ;;  %v7009_v50 = vld [vmem:[#allocation13 + $0x48] sm:$0xff] }
0x11f3   :  { %v6528_v49 = vpop.xlane.xlu1 %6527 }
0x11f4   :  { %15359 = vpow2.f32 %v6549_v10  ;;  %v6536_v58 = vsub.f32 %v6499_v15, %v6528_v49  ;;  %v7013_v10 = vld [vmem:[#allocation13 + $0x68] sm:$0xff] }
0x11f6   :  { %v15356_v38 = vpop.eup %15355  ;;  %v6551_v7 = vmul.f32 1.442695, %v6536_v58  ;;  %v17446_v58 = vpack.c.bf16 %v7004_v33, %v7000_v57  ;;  %v7041_v57 = vld [vmem:[#allocation13 + $0x148] sm:$0xff] }
0x11f7   :  { %v6565_v26 = vsel %vm4226_vm7, %v15356_v38, 0.0  ;;  %v7045_v33 = vld [vmem:[#allocation13 + $0x168] sm:$0xff] }
0x11f8   :  { %v17395_v56 = vpop.eup %15357  ;;  %15361 = vpow2.f32 %v6551_v7  ;;  %6566 = vadd.xlane.f32.xlu1 %v6565_v26  ;;  %v7012_v7 = vld [vmem:[#allocation13 + $0x60] sm:$0xff] }
0x11f9   :  { %v6568_v21 = vsel %vm4226_vm7, %v17395_v56, 0.0 }
0x11fa   :  { %6569 = vadd.xlane.f32.xlu0 %v6568_v21  ;;  %v7002_v21 = vld [vmem:[#allocation13 + $0x10] sm:$0xff] }
0x11fe   :  { %v17399_v2 = vpop.eup %15359 }
0x11ff   :  { %v6571_v36 = vsel %vm4226_vm7, %v17399_v2, 0.0 }
0x1200   :  { %6572 = vadd.xlane.f32.xlu1 %v6571_v36  ;;  %v7017_v36 = vld [vmem:[#allocation13 + $0x88] sm:$0xff] }
0x1202   :  { %v17403_v5 = vpop.eup %15361 }
0x1203   :  { %v6574_v51 = vsel %vm4226_vm7, %v17403_v5, 0.0 }
0x1204   :  { %6575 = vadd.xlane.f32.xlu1 %v6574_v51 }
0x1275   :  { %v6555_v0 = vpop.xlane.xlu0 %6554 }
0x1276   :  { %15363 = vrcp.f32 %v6555_v0  ;;  %v7021_v0 = vld [vmem:[#allocation13 + $0xa8] sm:$0xff] }
0x1279   :  { %v6558_v23 = vpop.xlane.xlu0 %6557 }
0x127a   :  { %15365 = vrcp.f32 %v6558_v23  ;;  %v7011_v23 = vld [vmem:[#allocation13 + $0x58] sm:$0xff] }
0x127d   :  { %v6561_v18 = vpop.xlane.xlu1 %6560 }
0x127e   :  { %15367 = vrcp.f32 %v6561_v18 }
0x127f   :  { %v6564_v15 = vpop.xlane.xlu0 %6563 }
0x1280   :  { %v15364_v25 = vpop.eup %15363  ;;  %15369 = vrcp.f32 %v6564_v15 }
0x1281   :  { %v6585_v32 = vmul.f32 %v15364_v25, %v15348_v3  ;;  %v7001_v3 = vld [vmem:[#allocation13 + $0x8] sm:$0xff] }
0x1282   :  { %v17432_v30 = vpack.c.bf16 %v7005_v29, %v7001_v3  ;;  %v7033_v3 = vld [vmem:[#allocation13 + $0x108] sm:$0xff] }
0x1283   :  { %v6593_v9 = vpack.c.bf16 %v6585_v32, %v6585_v32  ;;  %v7016_v32 = vld [vmem:[#allocation13 + $0x80] sm:$0xff]  ;;  %v7037_v29 = vld [vmem:[#allocation13 + $0x128] sm:$0xff] }
0x1284   :  { %v15366_v8 = vpop.eup %15365 }
0x1285   :  { %v6586_v63 = vmul.f32 %v15366_v8, %v15350_v40  ;;  %13422 = vmatmul.mubr.msk.bf16.vlgmr.msra.gmra.mrb[120].mxu0 %vm4323_vm8, %v6593_v9  ;;  %v6567_v11 = vpop.xlane.xlu1 %6566  ;;  %v7020_v9 = vld [vmem:[#allocation13 + $0xa0] sm:$0xff] }
0x1286   :  { %13432 = vmatpush3.bf16.msra.mxu0 %v6697_v24  ;;  %15371 = vrcp.f32 %v6567_v11  ;;  %13433 = vmatprep.mubr.msk.bf16.mxu0 %vm15799_vm4, %v18564_v34  ;;  %v17464_v24 = vpack.c.bf16 %v7015_v27, %v7011_v23  ;;  %v7014_v11 = vld [vmem:[#allocation13 + $0x70] sm:$0xff]  ;;  %v7047_v23 = vld [vmem:[#allocation13 + $0x178] sm:$0xff] }
0x1287   :  { %v6570_v35 = vpop.xlane.xlu0 %6569  ;;  %v6594_v42 = vpack.c.bf16 %v6586_v63, %v6586_v63  ;;  %13443 = vmatprep.subr.bf16.mxu0 %v18564_v34  ;;  %v17462_v63 = vpack.c.bf16 %v7021_v0, %v7017_v36  ;;  %v7049_v36 = vld [vmem:[#allocation13 + $0x188] sm:$0xff]  ;;  %v7043_v0 = vld [vmem:[#allocation13 + $0x158] sm:$0xff] }
0x1288   :  { %v15368_v12 = vpop.eup %15367  ;;  %15373 = vrcp.f32 %v6570_v35  ;;  %v7025_v35 = vld [vmem:[#allocation13 + $0xc8] sm:$0xff] }
0x1289   :  { %v6587_v13 = vmul.f32 %v15368_v12, %v15352_v53  ;;  %13428 = vmatmul.mubr.msk.bf16.vlgmr.msra.gmra.mrb[120].mxu1 %vm4323_vm8, %v6594_v42  ;;  %v7029_v42 = vld [vmem:[#allocation13 + $0xe8] sm:$0xff]  ;;  %v7019_v12 = vld [vmem:[#allocation13 + $0x98] sm:$0xff] }
0x128a   :  { %v15370_v28 = vpop.eup %15369  ;;  %13438 = vmatpush3.bf16.msra.mxu1 %v6743_v55  ;;  %13439 = vmatprep.mubr.msk.bf16.mxu1 %vm15799_vm4, %v18564_v34  ;;  %v17469_v55 = vpack.c.bf16 %v7020_v9, %v7016_v32  ;;  %v7048_v32 = vld [vmem:[#allocation13 + $0x180] sm:$0xff] }
0x128b   :  { %v6588_v48 = vmul.f32 %v15370_v28, %v15354_v47  ;;  %v6595_v60 = vpack.c.bf16 %v6587_v13, %v6587_v13  ;;  %13449 = vmatprep.subr.bf16.mxu1 %v18564_v34  ;;  %v17440_v47 = vpack.c.bf16 %v7007_v1, %v7003_v61  ;;  %v7023_v13 = vld [vmem:[#allocation13 + $0xb8] sm:$0xff]  ;;  %v17488_v61 = vpack.c.bf16 %v7037_v29, %v7033_v3  ;;  %v7052_v9 = vld [vmem:[#allocation13 + $0x1a0] sm:$0xff] }
0x128d   :  { %13434 = vmatmul.mubr.msk.bf16.vlgmr.msra.gmra.mrb[124].mxu0 %vm4323_vm8, %v6595_v60  ;;  %v6573_v45 = vpop.xlane.xlu1 %6572  ;;  %v6596_v44 = vpack.c.bf16 %v6588_v48, %v6588_v48  ;;  %v7024_v48 = vld [vmem:[#allocation13 + $0xc0] sm:$0xff] }
0x128e   :  { %13444 = vmatpush3.bf16.msra.mxu0 %v6789_v62  ;;  %15375 = vrcp.f32 %v6573_v45  ;;  %13445 = vmatprep.mubr.msk.bf16.mxu0 %vm15799_vm4, %v18564_v34  ;;  %v7028_v60 = vld [vmem:[#allocation13 + $0xe0] sm:$0xff]  ;;  %v17475_v62 = vpack.c.bf16 %v7029_v42, %v7025_v35  ;;  %v17477_v45 = vpack.c.bf16 %v7023_v13, %v7019_v12  ;;  %v7046_v35 = vld [vmem:[#allocation13 + $0x170] sm:$0xff]  ;;  %v7057_v42 = vld [vmem:[#allocation13 + $0x1c8] sm:$0xff] }
0x128f   :  { %13455 = vmatprep.subr.bf16.mxu0 %v18564_v34  ;;  %v7061_v12 = vld [vmem:[#allocation13 + $0x1e8] sm:$0xff]  ;;  %v7051_v13 = vld [vmem:[#allocation13 + $0x198] sm:$0xff] }
0x1290   :  { %v15372_v59 = vpop.eup %15371  ;;  %v17524_v3 = vpack.c.bf16 %v7061_v12, %v7057_v42 }
0x1291   :  { %v6589_v41 = vmul.f32 %v15372_v59, %v15356_v38  ;;  %13440 = vmatmul.mubr.msk.bf16.vlgmr.msra.gmra.mrb[124].mxu1 %vm4323_vm8, %v6596_v44  ;;  %v6576_v39 = vpop.xlane.xlu1 %6575  ;;  %v7008_v38 = vld [vmem:[#allocation13 + $0x40] sm:$0xff]  ;;  %v7018_v44 = vld [vmem:[#allocation13 + $0x90] sm:$0xff] }
0x1292   :  { %v15374_v14 = vpop.eup %15373  ;;  %13450 = vmatpush3.bf16.msra.mxu1 %v6835_v6  ;;  %15377 = vrcp.f32 %v6576_v39  ;;  %13451 = vmatprep.mubr.msk.bf16.mxu1 %vm15799_vm4, %v18564_v34  ;;  %v17456_v15 = vpack.c.bf16 %v7012_v7, %v7008_v38  ;;  %v7022_v59 = vld [vmem:[#allocation13 + $0xb0] sm:$0xff]  ;;  %v7031_v6 = vld [vmem:[#allocation13 + $0xf8] sm:$0xff]  ;;  %v17482_v39 = vpack.c.bf16 %v7028_v60, %v7024_v48  ;;  %v7044_v38 = vld [vmem:[#allocation13 + $0x160] sm:$0xff]  ;;  %v17500_v7 = vpack.c.bf16 %v7045_v33, %v7041_v57 }
0x1293   :  { %v6590_v40 = vmul.f32 %v15374_v14, %v17395_v56  ;;  %v6597_v20 = vpack.c.bf16 %v6589_v41, %v6589_v41  ;;  %13461 = vmatprep.subr.bf16.mxu1 %v18564_v34  ;;  %v17450_v56 = vpack.c.bf16 %v7013_v10, %v7009_v50  ;;  %v7027_v41 = vld [vmem:[#allocation13 + $0xd8] sm:$0xff]  ;;  %v17484_v14 = vpack.c.bf16 %v7022_v59, %v7018_v44  ;;  %v7056_v59 = vld [vmem:[#allocation13 + $0x1c0] sm:$0xff] }
0x1294   :  { %v17490_v1 = vpack.c.bf16 %v7031_v6, %v7027_v41  ;;  %v7039_v50 = vld [vmem:[#allocation13 + $0x138] sm:$0xff]  ;;  %v17518_v60 = vpack.c.bf16 %v7052_v9, %v7048_v32  ;;  %v7060_v41 = vld [vmem:[#allocation13 + $0x1e0] sm:$0xff]  ;;  %v7050_v6 = vld [vmem:[#allocation13 + $0x190] sm:$0xff] }
0x1295   :  { %13446 = vmatmul.mubr.msk.bf16.vlgmr.msra.gmra.mrb[128].mxu0 %vm4323_vm8, %v6597_v20  ;;  %v6598_v53 = vpack.c.bf16 %v6590_v40, %v6590_v40  ;;  %v7032_v40 = vld [vmem:[#allocation13 + $0x100] sm:$0xff]  ;;  %v7055_v48 = vld [vmem:[#allocation13 + $0x1b8] sm:$0xff] }
0x1296   :  { %13456 = vmatpush3.bf16.msra.mxu0 %v6881_v4  ;;  %13457 = vmatprep.mubr.msk.bf16.mxu0 %vm15799_vm4, %v18564_v34  ;;  %v7036_v20 = vld [vmem:[#allocation13 + $0x120] sm:$0xff]  ;;  %v7026_v4 = vld [vmem:[#allocation13 + $0xd0] sm:$0xff]  ;;  %v17526_v29 = vpack.c.bf16 %v7055_v48, %v7051_v13 }
0x1297   :  { %14716 = vmatprep.subr.bf16.mxu0 %v17432_v30  ;;  %v17494_v10 = vpack.c.bf16 %v7036_v20, %v7032_v40  ;;  %v7054_v40 = vld [vmem:[#allocation13 + $0x1b0] sm:$0xff]  ;;  %v7059_v20 = vld [vmem:[#allocation13 + $0x1d8] sm:$0xff] }
0x1298   :  { %v15376_v16 = vpop.eup %15375  ;;  %v17532_v57 = vpack.c.bf16 %v7054_v40, %v7050_v6 }
0x1299   :  { %v6591_v49 = vmul.f32 %v15376_v16, %v17399_v2  ;;  %13452 = vmatmul.mubr.msk.bf16.vlgmr.msra.gmra.mrb[128].mxu1 %vm4323_vm8, %v6598_v53  ;;  %v7006_v2 = vld [vmem:[#allocation13 + $0x30] sm:$0xff]  ;;  %v7035_v16 = vld [vmem:[#allocation13 + $0x118] sm:$0xff] }
0x129a   :  { %13462 = vmatpush3.bf16.msra.mxu1 %v6927_v46  ;;  %13463 = vmatprep.mubr.msk.bf16.mxu1 %vm15799_vm4, %v18564_v34  ;;  %v17458_v25 = vpack.c.bf16 %v7006_v2, %v7002_v21  ;;  %v7030_v53 = vld [vmem:[#allocation13 + $0xf0] sm:$0xff]  ;;  %v7040_v46 = vld [vmem:[#allocation13 + $0x140] sm:$0xff] }
0x129b   :  { %v6599_v26 = vpack.c.bf16 %v6591_v49, %v6591_v49  ;;  %14748 = vmatprep.subr.bf16.mxu1 %v17440_v47  ;;  %v17496_v49 = vpack.c.bf16 %v7030_v53, %v7026_v4  ;;  %v7034_v21 = vld [vmem:[#allocation13 + $0x110] sm:$0xff]  ;;  %v17506_v27 = vpack.c.bf16 %v7044_v38, %v7040_v46  ;;  %v7063_v4 = vld [vmem:[#allocation13 + $0x1f8] sm:$0xff]  ;;  %v17530_v53 = vpack.c.bf16 %v7060_v41, %v7056_v59 }
0x129c   :  { %v15378_v51 = vpop.eup %15377  ;;  %v7038_v2 = vld [vmem:[#allocation13 + $0x130] sm:$0xff]  ;;  %v17536_v33 = vpack.c.bf16 %v7063_v4, %v7059_v20  ;;  %v17550_v38 = vld [vmem:[#allocation3] sm:$0xf] }
0x129d   :  { %v6592_v18 = vmul.f32 %v15378_v51, %v17403_v5  ;;  %13458 = vmatmul.mubr.msk.bf16.vlgmr.msra.gmra.mrb[132].mxu0 %vm4323_vm8, %v6599_v26  ;;  %v7010_v5 = vld [vmem:[#allocation13 + $0x50] sm:$0xff]  ;;  %v17502_v26 = vpack.c.bf16 %v7039_v50, %v7035_v16  ;;  %v7053_v51 = vld [vmem:[#allocation13 + $0x1a8] sm:$0xff] }
0x129e   :  { %14718 = vmatpush1.bf16.msra.mxu0 %v17446_v58  ;;  %7128 = vmatprep.mubr.f32.mxu0 %v18564_v34  ;;  %v17471_v28 = vpack.c.bf16 %v7014_v11, %v7010_v5  ;;  %v17514_v5 = vpack.c.bf16 %v7047_v23, %v7043_v0  ;;  %v7042_v11 = vld [vmem:[#allocation13 + $0x150] sm:$0xff] }
0x129f   :  { %14720 = vmatprep.subr.bf16.mxu0 %v17450_v56  ;;  %v6600_v8 = vpack.c.bf16 %v6592_v18, %v6592_v18  ;;  %v17508_v18 = vpack.c.bf16 %v7038_v2, %v7034_v21  ;;  %v17520_v44 = vpack.c.bf16 %v7046_v35, %v7042_v11  ;;  %v7058_v16 = vld [vmem:[#allocation13 + $0x1d0] sm:$0xff]  ;;  %v17556_v21 = vld [vmem:[#allocation3 + $0x4] sm:$0xf] }
0x12a0   :  { %v7062_v50 = vld [vmem:[#allocation13 + $0x1f0] sm:$0xff] }
0x12a1   :  { %13464 = vmatmul.mubr.msk.bf16.vlgmr.msra.gmra.mrb[132].mxu1 %vm4323_vm8, %v6600_v8  ;;  %v17512_v8 = vpack.c.bf16 %v7053_v51, %v7049_v36  ;;  %v17540_v46 = vpack.c.bf16 %v7062_v50, %v7058_v16 }
0x12a2   :  { %14722 = vmatpush1.bf16.msra.mxu0 %v17456_v15  ;;  %14750 = vmatpush1.bf16.msra.mxu1 %v17458_v25 }
0x12a3   :  { %14724 = vmatprep.subr.bf16.mxu0 %v17462_v63  ;;  %14752 = vmatprep.subr.bf16.mxu1 %v17464_v24 }
0x12a4   :  { %7199 = vmatprep.mubr.f32.mxu1 %v18564_v34 }
0x12a6   :  { %14726 = vmatpush1.bf16.msra.mxu0 %v17469_v55  ;;  %14754 = vmatpush1.bf16.msra.mxu1 %v17471_v28 }
0x12a7   :  { %14728 = vmatprep.subr.bf16.mxu0 %v17475_v62  ;;  %14756 = vmatprep.subr.bf16.mxu1 %v17477_v45 }
0x12aa   :  { %14730 = vmatpush1.bf16.msra.mxu0 %v17482_v39  ;;  %14758 = vmatpush1.bf16.msra.mxu1 %v17484_v14 }
0x12ab   :  { %14732 = vmatprep.subr.bf16.mxu0 %v17488_v61  ;;  %14760 = vmatprep.subr.bf16.mxu1 %v17490_v1 }
0x12ae   :  { %14734 = vmatpush1.bf16.msra.mxu0 %v17494_v10  ;;  %14762 = vmatpush1.bf16.msra.mxu1 %v17496_v49 }
0x12af   :  { %14736 = vmatprep.subr.bf16.mxu0 %v17500_v7  ;;  %14764 = vmatprep.subr.bf16.mxu1 %v17502_v26 }
0x12b2   :  { %14738 = vmatpush1.bf16.msra.mxu0 %v17506_v27  ;;  %14766 = vmatpush1.bf16.msra.mxu1 %v17508_v18 }
0x12b3   :  { %14740 = vmatprep.subr.bf16.mxu0 %v17512_v8  ;;  %14768 = vmatprep.subr.bf16.mxu1 %v17514_v5 }
0x12b6   :  { %14742 = vmatpush1.bf16.msra.mxu0 %v17518_v60  ;;  %14770 = vmatpush1.bf16.msra.mxu1 %v17520_v44 }
0x12b7   :  { %14744 = vmatprep.subr.bf16.mxu0 %v17524_v3  ;;  %14772 = vmatprep.subr.bf16.mxu1 %v17526_v29 }
0x12ba   :  { %14746 = vmatpush1.bf16.msra.mxu0 %v17530_v53  ;;  %14774 = vmatpush1.bf16.msra.mxu1 %v17532_v57 }
0x12bb   :  { %14776 = vmatprep.subr.bf16.mxu1 %v17536_v33  ;;  %13467 = vmatprep.subr.bf16.mxu0 %v18564_v34 }
0x12bd   :  { %7129 = vmatmul.mubr.f32.vlgmr.msra.gmra.mrb[102].mxu0 %v17321_v54 }
0x12be   :  { %14778 = vmatpush1.bf16.msra.mxu1 %v17540_v46  ;;  %13469 = vmatprep.mubr.msk.bf16.mxu0 %vm15799_vm4, %v18564_v34 }
0x12bf   :  { %13473 = vmatprep.subr.bf16.mxu1 %v18564_v34 }
0x12c1   :  { %7200 = vmatmul.mubr.f32.vlgmr.msra.gmra.mrb[102].mxu1 %v17321_v54 }
0x12c2   :  { %13475 = vmatprep.mubr.msk.bf16.mxu1 %vm15799_vm4, %v18564_v34 }
0x12c3   :  { %13468 = vmatpush3.bf16.xpose.msra.mxu0 %v17550_v38 }
0x12c4   :  { %13479 = vmatprep.subr.bf16.mxu0 %v18564_v34 }
0x12c7   :  { %13474 = vmatpush3.bf16.xpose.msra.mxu1 %v17556_v21 }
0x12c8   :  { %13485 = vmatprep.subr.bf16.mxu1 %v18564_v34 }
0x1358   :  { %v6641_v2 = vpop.f32.mrb[120].mxu0 }
0x1359   :  { %v13423_v36 = vpop.f32.mrb[121].mxu0 }
0x135a   :  { %v6644_v51 = vpop.f32.mrb[122].mxu0 }
0x135b   :  { %v13424_v0 = vpop.f32.mrb[123].mxu0 }
0x135c   :  { %v6687_v23 = vpop.f32.mrb[120].mxu1 }
0x135d   :  { %v6977_v32 = vrot.slane %v6687_v23, 7  ;;  %v13429_v9 = vpop.f32.mrb[121].mxu1 }
0x135e   :  { %v6690_v11 = vpop.f32.mrb[122].mxu1 }
0x135f   :  { %v6978_v35 = vsel %vm1620_vm5, %v6977_v32, %v6641_v2  ;;  %v13430_v42 = vpop.f32.mrb[123].mxu1 }
0x1360   :  { %v6733_v12 = vpop.f32.mrb[124].mxu0 }
0x1361   :  { %v6979_v13 = vrot.slane %v6733_v12, 6  ;;  %v13435_v48 = vpop.f32.mrb[125].mxu0 }
0x1362   :  { %v6736_v59 = vpop.f32.mrb[126].mxu0 }
0x1363   :  { %v6980_v41 = vsel %vm2361_vm10, %v6979_v13, %v6978_v35  ;;  %v13436_v6 = vpop.f32.mrb[127].mxu0 }
0x1364   :  { %v6779_v40 = vpop.f32.mrb[124].mxu1 }
0x1365   :  { %v6981_v20 = vrot.slane %v6779_v40, 5  ;;  %v13441_v4 = vpop.f32.mrb[125].mxu1 }
0x1366   :  { %v6782_v16 = vpop.f32.mrb[126].mxu1 }
0x1367   :  { %v6982_v50 = vsel %vm3102_vm15, %v6981_v20, %v6980_v41  ;;  %v13442_v36 = vpop.f32.mrb[127].mxu1 }
0x1368   :  { %v6825_v51 = vpop.f32.mrb[128].mxu0 }
0x1369   :  { %v6983_v0 = vrot.slane %v6825_v51, 4  ;;  %v13447_v23 = vpop.f32.mrb[129].mxu0 }
0x136a   :  { %v6828_v9 = vpop.f32.mrb[130].mxu0 }
0x136b   :  { %v6984_v2 = vsel %vm4711_vm9, %v6983_v0, %v6982_v50  ;;  %v13448_v32 = vpop.f32.mrb[131].mxu0 }
0x136c   :  { %v6871_v11 = vpop.f32.mrb[128].mxu1 }
0x136d   :  { %v6985_v42 = vrot.slane %v6871_v11, 3  ;;  %v13453_v12 = vpop.f32.mrb[129].mxu1 }
0x136e   :  { %v6874_v48 = vpop.f32.mrb[130].mxu1 }
0x136f   :  { %v6986_v35 = vsel %vm4714_vm11, %v6985_v42, %v6984_v2  ;;  %v13454_v13 = vpop.f32.mrb[131].mxu1 }
0x1370   :  { %v6917_v59 = vpop.f32.mrb[132].mxu0 }
0x1371   :  { %v6987_v6 = vrot.slane %v6917_v59, 2  ;;  %v13459_v40 = vpop.f32.mrb[133].mxu0 }
0x1372   :  { %v6920_v4 = vpop.f32.mrb[134].mxu0 }
0x1373   :  { %v6988_v41 = vsel %vm4717_vm12, %v6987_v6, %v6986_v35  ;;  %v13460_v20 = vpop.f32.mrb[135].mxu0 }
0x1374   :  { %v6963_v16 = vpop.f32.mrb[132].mxu1 }
0x1375   :  { %v6989_v36 = vrot.slane %v6963_v16, 1  ;;  %v13465_v51 = vpop.f32.mrb[133].mxu1 }
0x1376   :  { %v6966_v23 = vpop.f32.mrb[134].mxu1 }
0x1377   :  { %v6990_v50 = vsel %vm4720_vm13, %v6989_v36, %v6988_v41  ;;  %v13466_v0 = vpop.f32.mrb[135].mxu1 }
0x1378   :  { %v12917_v9 = vpack.c.bf16 %v6990_v50, %v17321_v54 }
0x137a   :  { %6999 = vst [vmem:[#allocation15 + $0x10] sm:$0xff] %v12917_v9 }
0x1390   :  { %v7130_v32 = vpop.f32.mrb[102].mxu0 }
0x1391   :  { %v7131_v2 = vadd.f32 %v7130_v32, %v18608_v31  ;;  %v7132_v11 = vpop.f32.mrb[103].mxu0 }
0x1392   :  { %v7133_v42 = vadd.f32 %v7132_v11, %v18609_v19 }
0x1393   :  { %v12835_v12 = vmul.f32 -1.442695, %v7131_v2 }
0x1394   :  { %v12836_v48 = vmul.f32 -1.442695, %v7133_v42  ;;  %v7201_v35 = vpop.f32.mrb[102].mxu1 }
0x1395   :  { %15379 = vpow2.f32 %v12835_v12  ;;  %v7203_v13 = vpop.f32.mrb[103].mxu1  ;;  %v7202_v59 = vadd.f32 %v7201_v35, %v18610_v43 }
0x1396   :  { %15381 = vpow2.f32 %v12836_v48  ;;  %v7204_v40 = vadd.f32 %v7203_v13, %v18611_v37 }
0x1397   :  { %v12837_v6 = vmul.f32 -1.442695, %v7202_v59 }
0x1399   :  { %15383 = vpow2.f32 %v12837_v6 }
0x139a   :  { %15385 = vtanh.f32 %v7204_v40 }
0x139f   :  { %v15380_v4 = vpop.eup %15379 }
0x13a0   :  { %v15382_v54 = vpop.eup %15381  ;;  %v7215_v41 = vadd.f32 1.0, %v15380_v4 }
0x13a1   :  { %v7216_v20 = vadd.f32 1.0, %v15382_v54  ;;  %v17584_v54 = vld [vmem:[#allocation3 + $0x8] sm:$0xf] }
0x13a2   :  { %15387 = vrcp.f32 %v7215_v41 }
0x13a3   :  { %15389 = vrcp.f32 %v7216_v20  ;;  %v15384_v16 = vpop.eup %15383 }
0x13a4   :  { %v15386_v36 = vpop.eup %15385  ;;  %v7217_v50 = vadd.f32 1.0, %v15384_v16  ;;  %v17590_v16 = vld [vmem:[#allocation3 + $0xc] sm:$0xf] }
0x13a6   :  { %15391 = vrcp.f32 %v7217_v50 }
0x13ac   :  { %v15388_v51 = vpop.eup %15387 }
0x13ad   :  { %v15390_v23 = vpop.eup %15389  ;;  %v7226_v0 = vmul.f32 %v15388_v51, %v15386_v36 }
0x13ae   :  { %v7225_v9 = vmul.f32 %v15390_v23, %v17318_v17 }
0x13b0   :  { %v17573_v32 = vadd.f32 %v7226_v0, %v7225_v9  ;;  %v15392_v2 = vpop.eup %15391  ;;  %v17598_v0 = vld [vmem:[#allocation3 + $0x10] sm:$0xf] }
0x13b2   :  { %18615 = vst [vmem:[#allocation27_spill] sm:$0xff] %v17573_v32  ;;  %15393 = vtanh.f32 %v17573_v32 }
0x13bc   :  { %v15394_v11 = vpop.eup %15393 }
0x13bd   :  { %v17576_v42 = vmul.f32 %v15394_v11, %v15392_v2  ;;  %v17604_v11 = vld [vmem:[#allocation3 + $0x14] sm:$0xf] }
0x13bf   :  { %v7238_v12 = vpack.c.bf16 %v17576_v42, %v17576_v42 }
0x13c1   :  { %v7246_v48 = vrot.slane %v7238_v12, %v18613_v52 }
0x13c3   :  { %v7254_v35 = vrot.slane %v7246_v48, %v18613_v52  ;;  %v7247_v13 = vcombine.high %v7246_v48, %v7246_v48 }
0x13c5   :  { %v12838_v59 = vpack.i.b16 %v7254_v35, %v7254_v35  ;;  %v7265_v6 = vunpack.i.h.s16 %v7254_v35  ;;  %v7261_v17 = vrot.slane %v7247_v13, %v18613_v52  ;;  %v7262_v23 = vcombine.high %v7254_v35, %v7254_v35 }
0x13c7   :  { %v7276_v40 = vrot.slane %v12838_v59, %v18614_v22  ;;  %v7318_v4 = vpack.i.b16 %v7265_v6, %v7265_v6  ;;  %v7267_v20 = vunpack.i.h.s16 %v7261_v17  ;;  %v12839_v36 = vpack.i.b16 %v7261_v17, %v7261_v17  ;;  %v17612_v59 = vld [vmem:[#allocation3 + $0x18] sm:$0xf] }
0x13c8   :  { %v7269_v2 = vunpack.i.h.s16 %v7262_v23  ;;  %v12840_v12 = vpack.i.b16 %v7262_v23, %v7262_v23  ;;  %v7263_v35 = vcombine.high %v7261_v17, %v7261_v17  ;;  %v7786_v23 = vsel %vm4327_vm6, %v17556_v21, 0 }
0x13c9   :  { %13470 = vmatmul.mubr.bf16.vlgmr.msra.gmra.mrb[136].mxu0 %v7276_v40  ;;  %v7322_v41 = vrot.slane %v7318_v4, %v18614_v22  ;;  %v7410_v51 = vpack.i.b16 %v7267_v20, %v7267_v20  ;;  %v7368_v50 = vrot.slane %v12839_v36, %v18614_v22  ;;  %v17618_v4 = vld [vmem:[#allocation3 + $0x1c] sm:$0xf]  ;;  %v7740_v36 = vsel %vm4327_vm6, %v17550_v38, 0 }
0x13ca   :  { %13480 = vmatpush3.bf16.xpose.msra.mxu0 %v17584_v54  ;;  %13481 = vmatprep.mubr.msk.bf16.mxu0 %vm15799_vm4, %v18564_v34  ;;  %v7502_v48 = vpack.i.b16 %v7269_v2, %v7269_v2  ;;  %v7460_v13 = vrot.slane %v12840_v12, %v18614_v22  ;;  %v7271_v40 = vunpack.i.h.s16 %v7263_v35 }
0x13cb   :  { %13476 = vmatmul.mubr.bf16.vlgmr.msra.gmra.mrb[136].mxu1 %v7322_v41  ;;  %13491 = vmatprep.subr.bf16.mxu0 %v18564_v34  ;;  %v7414_v9 = vrot.slane %v7410_v51, %v18614_v22  ;;  %v12841_v41 = vpack.i.b16 %v7263_v35, %v7263_v35 }
0x13cc   :  { %13486 = vmatpush3.bf16.xpose.msra.mxu1 %v17590_v16  ;;  %13487 = vmatprep.mubr.msk.bf16.mxu1 %vm15799_vm4, %v18564_v34  ;;  %v7506_v6 = vrot.slane %v7502_v48, %v18614_v22  ;;  %v7594_v17 = vpack.i.b16 %v7271_v40, %v7271_v40 }
0x13cd   :  { %13497 = vmatprep.subr.bf16.mxu1 %v18564_v34  ;;  %v7552_v20 = vrot.slane %v12841_v41, %v18614_v22 }
0x13ce   :  { %v7598_v51 = vrot.slane %v7594_v17, %v18614_v22 }
0x13d1   :  { %13482 = vmatmul.mubr.bf16.vlgmr.msra.gmra.mrb[140].mxu0 %v7368_v50 }
0x13d2   :  { %13492 = vmatpush3.bf16.xpose.msra.mxu0 %v17598_v0  ;;  %13493 = vmatprep.mubr.msk.bf16.mxu0 %vm15799_vm4, %v18564_v34 }
0x13d3   :  { %13488 = vmatmul.mubr.bf16.vlgmr.msra.gmra.mrb[140].mxu1 %v7414_v9  ;;  %13503 = vmatprep.subr.bf16.mxu0 %v18564_v34 }
0x13d4   :  { %13498 = vmatpush3.bf16.xpose.msra.mxu1 %v17604_v11  ;;  %13499 = vmatprep.mubr.msk.bf16.mxu1 %vm15799_vm4, %v18564_v34 }
0x13d5   :  { %13509 = vmatprep.subr.bf16.mxu1 %v18564_v34 }
0x13d9   :  { %13494 = vmatmul.mubr.bf16.vlgmr.msra.gmra.mrb[144].mxu0 %v7460_v13 }
0x13da   :  { %13504 = vmatpush3.bf16.xpose.msra.mxu0 %v17612_v59  ;;  %13505 = vmatprep.mubr.msk.bf16.mxu0 %vm15799_vm4, %v18564_v34 }
0x13db   :  { %13500 = vmatmul.mubr.bf16.vlgmr.msra.gmra.mrb[144].mxu1 %v7506_v6  ;;  %13515 = vmatprep.subr.bf16.mxu0 %v18564_v34 }
0x13dc   :  { %13510 = vmatpush3.bf16.xpose.msra.mxu1 %v17618_v4  ;;  %13511 = vmatprep.mubr.msk.bf16.mxu1 %vm15799_vm4, %v18564_v34 }
0x13dd   :  { %13521 = vmatprep.subr.bf16.mxu1 %v18564_v34 }
0x13e1   :  { %13506 = vmatmul.mubr.bf16.vlgmr.msra.gmra.mrb[148].mxu0 %v7552_v20 }
0x13e2   :  { %13516 = vmatpush3.bf16.msra.mxu0 %v7740_v36  ;;  %13517 = vmatprep.mubr.msk.bf16.mxu0 %vm15799_vm4, %v18564_v34 }
0x13e3   :  { %13512 = vmatmul.mubr.bf16.vlgmr.msra.gmra.mrb[148].mxu1 %v7598_v51  ;;  %13527 = vmatprep.subr.bf16.mxu0 %v18564_v34 }
0x13e4   :  { %13522 = vmatpush3.bf16.msra.mxu1 %v7786_v23  ;;  %13523 = vmatprep.mubr.msk.bf16.mxu1 %vm15799_vm4, %v18564_v34 }
0x13e5   :  { %13533 = vmatprep.subr.bf16.mxu1 %v18564_v34 }
0x149c   :  { %v7312_v50 = vpop.f32.mrb[136].mxu0 }
0x149d   :  { %v13471_v38 = vpop.f32.mrb[137].mxu0  ;;  %v7640_v9 = vsel %vm4226_vm7, %v7312_v50, -inf }
0x149e   :  { %7641 = vmax.xlane.f32.xlu0 %v7640_v9  ;;  %v7315_v2 = vpop.f32.mrb[138].mxu0  ;;  %v7358_v12 = vpop.f32.mrb[136].mxu1 }
0x149f   :  { %v13472_v48 = vpop.f32.mrb[139].mxu0  ;;  %v13477_v35 = vpop.f32.mrb[137].mxu1  ;;  %v7643_v21 = vsel %vm4226_vm7, %v7358_v12, -inf }
0x14a0   :  { %v7361_v13 = vpop.f32.mrb[138].mxu1 }
0x14a1   :  { %v13478_v6 = vpop.f32.mrb[139].mxu1 }
0x14a2   :  { %7644 = vmax.xlane.f32.xlu0 %v7643_v21 }
0x14a4   :  { %v7404_v40 = vpop.f32.mrb[140].mxu0 }
0x14a5   :  { %v13483_v41 = vpop.f32.mrb[141].mxu0  ;;  %v7646_v17 = vsel %vm4226_vm7, %v7404_v40, -inf }
0x14a6   :  { %7647 = vmax.xlane.f32.xlu1 %v7646_v17  ;;  %v7407_v20 = vpop.f32.mrb[142].mxu0  ;;  %v7450_v36 = vpop.f32.mrb[140].mxu1 }
0x14a7   :  { %v13484_v51 = vpop.f32.mrb[143].mxu0  ;;  %v13489_v23 = vpop.f32.mrb[141].mxu1  ;;  %v7649_v38 = vsel %vm4226_vm7, %v7450_v36, -inf }
0x14a8   :  { %7650 = vmax.xlane.f32.xlu0 %v7649_v38  ;;  %v7453_v9 = vpop.f32.mrb[142].mxu1 }
0x14a9   :  { %v13490_v2 = vpop.f32.mrb[143].mxu1 }
0x14ac   :  { %v7496_v48 = vpop.f32.mrb[144].mxu0 }
0x14ad   :  { %v13495_v35 = vpop.f32.mrb[145].mxu0  ;;  %v7652_v13 = vsel %vm4226_vm7, %v7496_v48, -inf }
0x14ae   :  { %7653 = vmax.xlane.f32.xlu1 %v7652_v13  ;;  %v7499_v6 = vpop.f32.mrb[146].mxu0  ;;  %v7542_v21 = vpop.f32.mrb[144].mxu1 }
0x14af   :  { %v13496_v41 = vpop.f32.mrb[147].mxu0  ;;  %v13501_v22 = vpop.f32.mrb[145].mxu1  ;;  %v7655_v17 = vsel %vm4226_vm7, %v7542_v21, -inf }
0x14b0   :  { %7656 = vmax.xlane.f32.xlu0 %v7655_v17  ;;  %v7545_v20 = vpop.f32.mrb[146].mxu1 }
0x14b1   :  { %v13502_v51 = vpop.f32.mrb[147].mxu1 }
0x14b4   :  { %v7588_v23 = vpop.f32.mrb[148].mxu0 }
0x14b5   :  { %v13507_v52 = vpop.f32.mrb[149].mxu0  ;;  %v7658_v38 = vsel %vm4226_vm7, %v7588_v23, -inf }
0x14b6   :  { %7659 = vmax.xlane.f32.xlu1 %v7658_v38  ;;  %v7591_v9 = vpop.f32.mrb[150].mxu0  ;;  %v7634_v2 = vpop.f32.mrb[148].mxu1 }
0x14b7   :  { %v13508_v35 = vpop.f32.mrb[151].mxu0  ;;  %v13513_v32 = vpop.f32.mrb[149].mxu1  ;;  %v7661_v6 = vsel %vm4226_vm7, %v7634_v2, -inf }
0x14b8   :  { %v7637_v37 = vpop.f32.mrb[150].mxu1 }
0x14b9   :  { %v13514_v13 = vpop.f32.mrb[151].mxu1 }
0x14ba   :  { %7662 = vmax.xlane.f32.xlu1 %v7661_v6 }
0x152b   :  { %v7642_v22 = vpop.xlane.xlu0 %7641 }
0x152c   :  { %v7664_v41 = vsub.f32 %v7312_v50, %v7642_v22 }
0x152e   :  { %v7672_v43 = vmul.f32 1.442695, %v7664_v41 }
0x152f   :  { %v7645_v17 = vpop.xlane.xlu0 %7644 }
0x1530   :  { %15395 = vpow2.f32 %v7672_v43  ;;  %v7665_v20 = vsub.f32 %v7358_v12, %v7645_v17 }
0x1532   :  { %v7674_v51 = vmul.f32 1.442695, %v7665_v20 }
0x1533   :  { %v7648_v52 = vpop.xlane.xlu1 %7647 }
0x1534   :  { %15397 = vpow2.f32 %v7674_v51  ;;  %v7666_v19 = vsub.f32 %v7404_v40, %v7648_v52 }
0x1535   :  { %v7651_v38 = vpop.xlane.xlu0 %7650 }
0x1536   :  { %v7676_v9 = vmul.f32 1.442695, %v7666_v19  ;;  %v7667_v31 = vsub.f32 %v7450_v36, %v7651_v38 }
0x1538   :  { %15399 = vpow2.f32 %v7676_v9  ;;  %v7678_v32 = vmul.f32 1.442695, %v7667_v31 }
0x153a   :  { %v15396_v37 = vpop.eup %15395  ;;  %15401 = vpow2.f32 %v7678_v32 }
0x153b   :  { %v7654_v35 = vpop.xlane.xlu1 %7653  ;;  %v7688_v13 = vsel %vm4226_vm7, %v15396_v37, 0.0 }
0x153c   :  { %v7668_v6 = vsub.f32 %v7496_v48, %v7654_v35  ;;  %7689 = vadd.xlane.f32.xlu0 %v7688_v13 }
0x153d   :  { %v7657_v50 = vpop.xlane.xlu0 %7656 }
0x153e   :  { %v15398_v22 = vpop.eup %15397  ;;  %v7680_v43 = vmul.f32 1.442695, %v7668_v6  ;;  %v7669_v12 = vsub.f32 %v7542_v21, %v7657_v50 }
0x153f   :  { %v7691_v41 = vsel %vm4226_vm7, %v15398_v22, 0.0 }
0x1540   :  { %15403 = vpow2.f32 %v7680_v43  ;;  %v7682_v40 = vmul.f32 1.442695, %v7669_v12  ;;  %7692 = vadd.xlane.f32.xlu0 %v7691_v41 }
0x1542   :  { %v15400_v19 = vpop.eup %15399  ;;  %15405 = vpow2.f32 %v7682_v40 }
0x1543   :  { %v7660_v36 = vpop.xlane.xlu1 %7659  ;;  %v7694_v31 = vsel %vm4226_vm7, %v15400_v19, 0.0 }
0x1544   :  { %v15402_v17 = vpop.eup %15401  ;;  %v7670_v20 = vsub.f32 %v7588_v23, %v7660_v36  ;;  %7695 = vadd.xlane.f32.xlu1 %v7694_v31 }
0x1545   :  { %v7697_v48 = vsel %vm4226_vm7, %v15402_v17, 0.0 }
0x1546   :  { %v7684_v51 = vmul.f32 1.442695, %v7670_v20  ;;  %7698 = vadd.xlane.f32.xlu0 %v7697_v48 }
0x1547   :  { %v7663_v52 = vpop.xlane.xlu1 %7662 }
0x1548   :  { %15407 = vpow2.f32 %v7684_v51  ;;  %v7671_v21 = vsub.f32 %v7634_v2, %v7663_v52  ;;  %v7832_v52 = vsel %vm4327_vm6, %v17584_v54, 0 }
0x154a   :  { %v15404_v38 = vpop.eup %15403  ;;  %v7686_v9 = vmul.f32 1.442695, %v7671_v21 }
0x154b   :  { %v7700_v32 = vsel %vm4226_vm7, %v15404_v38, 0.0 }
0x154c   :  { %v15406_v35 = vpop.eup %15405  ;;  %15409 = vpow2.f32 %v7686_v9  ;;  %7701 = vadd.xlane.f32.xlu1 %v7700_v32 }
0x154d   :  { %v7703_v13 = vsel %vm4226_vm7, %v15406_v35, 0.0 }
0x154e   :  { %7704 = vadd.xlane.f32.xlu0 %v7703_v13 }
0x1552   :  { %v17651_v6 = vpop.eup %15407 }
0x1553   :  { %v7706_v23 = vsel %vm4226_vm7, %v17651_v6, 0.0 }
0x1554   :  { %7707 = vadd.xlane.f32.xlu1 %v7706_v23 }
0x1556   :  { %v17655_v50 = vpop.eup %15409 }
0x1557   :  { %v7709_v2 = vsel %vm4226_vm7, %v17655_v50, 0.0 }
0x1558   :  { %7710 = vadd.xlane.f32.xlu1 %v7709_v2 }
0x15c9   :  { %v7690_v43 = vpop.xlane.xlu0 %7689 }
0x15ca   :  { %15411 = vrcp.f32 %v7690_v43  ;;  %v7924_v43 = vsel %vm4327_vm6, %v17598_v0, 0 }
0x15cd   :  { %v7693_v12 = vpop.xlane.xlu0 %7692 }
0x15ce   :  { %15413 = vrcp.f32 %v7693_v12 }
0x15d1   :  { %v7696_v41 = vpop.xlane.xlu1 %7695 }
0x15d2   :  { %15415 = vrcp.f32 %v7696_v41 }
0x15d3   :  { %v7699_v40 = vpop.xlane.xlu0 %7698 }
0x15d4   :  { %v15412_v36 = vpop.eup %15411  ;;  %15417 = vrcp.f32 %v7699_v40 }
0x15d5   :  { %v7720_v31 = vmul.f32 %v15412_v36, %v15396_v37 }
0x15d7   :  { %v7728_v20 = vpack.c.bf16 %v7720_v31, %v7720_v31 }
0x15d8   :  { %v15414_v48 = vpop.eup %15413 }
0x15d9   :  { %v7721_v51 = vmul.f32 %v15414_v48, %v15398_v22  ;;  %13518 = vmatmul.mubr.msk.bf16.vlgmr.msra.gmra.mrb[152].mxu0 %vm4323_vm8, %v7728_v20  ;;  %v7702_v21 = vpop.xlane.xlu1 %7701  ;;  %v7878_v22 = vsel %vm4327_vm6, %v17590_v16, 0 }
0x15da   :  { %13528 = vmatpush3.bf16.msra.mxu0 %v7832_v52  ;;  %15419 = vrcp.f32 %v7702_v21  ;;  %13529 = vmatprep.mubr.msk.bf16.mxu0 %vm15799_vm4, %v18564_v34 }
0x15db   :  { %v7705_v9 = vpop.xlane.xlu0 %7704  ;;  %v7729_v32 = vpack.c.bf16 %v7721_v51, %v7721_v51  ;;  %13539 = vmatprep.subr.bf16.mxu0 %v18564_v34 }
0x15dc   :  { %v15416_v13 = vpop.eup %15415  ;;  %15421 = vrcp.f32 %v7705_v9 }
0x15dd   :  { %v7722_v37 = vmul.f32 %v15416_v13, %v15400_v19  ;;  %13524 = vmatmul.mubr.msk.bf16.vlgmr.msra.gmra.mrb[152].mxu1 %vm4323_vm8, %v7729_v32 }
0x15de   :  { %v15418_v23 = vpop.eup %15417  ;;  %13534 = vmatpush3.bf16.msra.mxu1 %v7878_v22  ;;  %13535 = vmatprep.mubr.msk.bf16.mxu1 %vm15799_vm4, %v18564_v34 }
0x15df   :  { %v7723_v54 = vmul.f32 %v15418_v23, %v15402_v17  ;;  %v7730_v2 = vpack.c.bf16 %v7722_v37, %v7722_v37  ;;  %13545 = vmatprep.subr.bf16.mxu1 %v18564_v34  ;;  %v7970_v17 = vsel %vm4327_vm6, %v17604_v11, 0 }
0x15e1   :  { %13530 = vmatmul.mubr.msk.bf16.vlgmr.msra.gmra.mrb[156].mxu0 %vm4323_vm8, %v7730_v2  ;;  %v7708_v19 = vpop.xlane.xlu1 %7707  ;;  %v7731_v16 = vpack.c.bf16 %v7723_v54, %v7723_v54 }
0x15e2   :  { %13540 = vmatpush3.bf16.msra.mxu0 %v7924_v43  ;;  %15423 = vrcp.f32 %v7708_v19  ;;  %13541 = vmatprep.mubr.msk.bf16.mxu0 %vm15799_vm4, %v18564_v34 }
0x15e3   :  { %13551 = vmatprep.subr.bf16.mxu0 %v18564_v34 }
0x15e4   :  { %v15420_v12 = vpop.eup %15419 }
0x15e5   :  { %v7724_v41 = vmul.f32 %v15420_v12, %v15404_v38  ;;  %13536 = vmatmul.mubr.msk.bf16.vlgmr.msra.gmra.mrb[156].mxu1 %vm4323_vm8, %v7731_v16  ;;  %v7711_v40 = vpop.xlane.xlu1 %7710  ;;  %v8016_v38 = vsel %vm4327_vm6, %v17612_v59, 0 }
0x15e6   :  { %v15422_v36 = vpop.eup %15421  ;;  %13546 = vmatpush3.bf16.msra.mxu1 %v7970_v17  ;;  %15425 = vrcp.f32 %v7711_v40  ;;  %13547 = vmatprep.mubr.msk.bf16.mxu1 %vm15799_vm4, %v18564_v34 }
0x15e7   :  { %v7725_v0 = vmul.f32 %v15422_v36, %v15406_v35  ;;  %v7732_v31 = vpack.c.bf16 %v7724_v41, %v7724_v41  ;;  %13557 = vmatprep.subr.bf16.mxu1 %v18564_v34  ;;  %v8062_v35 = vsel %vm4327_vm6, %v17618_v4, 0  ;;  %v18616_v36 = vld [vmem:[#allocation22_spill] sm:$0xff] }
0x15e9   :  { %13542 = vmatmul.mubr.msk.bf16.vlgmr.msra.gmra.mrb[160].mxu0 %vm4323_vm8, %v7732_v31  ;;  %v7733_v11 = vpack.c.bf16 %v7725_v0, %v7725_v0 }
0x15ea   :  { %13552 = vmatpush3.bf16.msra.mxu0 %v8016_v38  ;;  %13553 = vmatprep.mubr.msk.bf16.mxu0 %vm15799_vm4, %v18564_v34  ;;  %v18617_v38 = vld [vmem:[#allocation23_spill] sm:$0xff] }
0x15eb   :  { %14780 = vmatprep.subr.bf16.mxu0 %v17432_v30 }
0x15ec   :  { %v15424_v20 = vpop.eup %15423 }
0x15ed   :  { %v7726_v48 = vmul.f32 %v15424_v20, %v17651_v6  ;;  %13548 = vmatmul.mubr.msk.bf16.vlgmr.msra.gmra.mrb[160].mxu1 %vm4323_vm8, %v7733_v11 }
0x15ee   :  { %13558 = vmatpush3.bf16.msra.mxu1 %v8062_v35  ;;  %13559 = vmatprep.mubr.msk.bf16.mxu1 %vm15799_vm4, %v18564_v34 }
0x15ef   :  { %v7734_v59 = vpack.c.bf16 %v7726_v48, %v7726_v48  ;;  %14812 = vmatprep.subr.bf16.mxu1 %v17440_v47  ;;  %v17737_v47 = vld [vmem:[#allocation3] sm:$0xf] }
0x15f0   :  { %v15426_v51 = vpop.eup %15425 }
0x15f1   :  { %v7727_v52 = vmul.f32 %v15426_v51, %v17655_v50  ;;  %13554 = vmatmul.mubr.msk.bf16.vlgmr.msra.gmra.mrb[164].mxu0 %vm4323_vm8, %v7734_v59  ;;  %v18618_v51 = vld [vmem:[#allocation24_spill] sm:$0xff] }
0x15f2   :  { %14782 = vmatpush1.bf16.msra.mxu0 %v17446_v58  ;;  %8263 = vmatprep.mubr.f32.mxu0 %v18564_v34  ;;  %v17743_v58 = vld [vmem:[#allocation3 + $0x4] sm:$0xf] }
0x15f3   :  { %14784 = vmatprep.subr.bf16.mxu0 %v17450_v56  ;;  %v7735_v30 = vpack.c.bf16 %v7727_v52, %v7727_v52 }
0x15f5   :  { %13560 = vmatmul.mubr.msk.bf16.vlgmr.msra.gmra.mrb[164].mxu1 %vm4323_vm8, %v7735_v30 }
0x15f6   :  { %14786 = vmatpush1.bf16.msra.mxu0 %v17456_v15  ;;  %14814 = vmatpush1.bf16.msra.mxu1 %v17458_v25 }
0x15f7   :  { %14788 = vmatprep.subr.bf16.mxu0 %v17462_v63  ;;  %14816 = vmatprep.subr.bf16.mxu1 %v17464_v24 }
0x15f8   :  { %8334 = vmatprep.mubr.f32.mxu1 %v18564_v34 }
0x15fa   :  { %14790 = vmatpush1.bf16.msra.mxu0 %v17469_v55  ;;  %14818 = vmatpush1.bf16.msra.mxu1 %v17471_v28 }
0x15fb   :  { %14792 = vmatprep.subr.bf16.mxu0 %v17475_v62  ;;  %14820 = vmatprep.subr.bf16.mxu1 %v17477_v45 }
0x15fe   :  { %14794 = vmatpush1.bf16.msra.mxu0 %v17482_v39  ;;  %14822 = vmatpush1.bf16.msra.mxu1 %v17484_v14 }
0x15ff   :  { %14796 = vmatprep.subr.bf16.mxu0 %v17488_v61  ;;  %14824 = vmatprep.subr.bf16.mxu1 %v17490_v1 }
0x1602   :  { %14798 = vmatpush1.bf16.msra.mxu0 %v17494_v10  ;;  %14826 = vmatpush1.bf16.msra.mxu1 %v17496_v49 }
0x1603   :  { %14800 = vmatprep.subr.bf16.mxu0 %v17500_v7  ;;  %14828 = vmatprep.subr.bf16.mxu1 %v17502_v26 }
0x1606   :  { %14802 = vmatpush1.bf16.msra.mxu0 %v17506_v27  ;;  %14830 = vmatpush1.bf16.msra.mxu1 %v17508_v18 }
0x1607   :  { %14804 = vmatprep.subr.bf16.mxu0 %v17512_v8  ;;  %14832 = vmatprep.subr.bf16.mxu1 %v17514_v5 }
0x160a   :  { %14806 = vmatpush1.bf16.msra.mxu0 %v17518_v60  ;;  %14834 = vmatpush1.bf16.msra.mxu1 %v17520_v44 }
0x160b   :  { %14808 = vmatprep.subr.bf16.mxu0 %v17524_v3  ;;  %14836 = vmatprep.subr.bf16.mxu1 %v17526_v29 }
0x160e   :  { %14810 = vmatpush1.bf16.msra.mxu0 %v17530_v53  ;;  %14838 = vmatpush1.bf16.msra.mxu1 %v17532_v57 }
0x160f   :  { %14840 = vmatprep.subr.bf16.mxu1 %v17536_v33  ;;  %13563 = vmatprep.subr.bf16.mxu0 %v18564_v34 }
0x1611   :  { %8264 = vmatmul.mubr.f32.vlgmr.msra.gmra.mrb[168].mxu0 %v17576_v42 }
0x1612   :  { %14842 = vmatpush1.bf16.msra.mxu1 %v17540_v46  ;;  %13565 = vmatprep.mubr.msk.bf16.mxu0 %vm15799_vm4, %v18564_v34 }
0x1613   :  { %13569 = vmatprep.subr.bf16.mxu1 %v18564_v34 }
0x1615   :  { %8335 = vmatmul.mubr.f32.vlgmr.msra.gmra.mrb[168].mxu1 %v17576_v42 }
0x1616   :  { %13571 = vmatprep.mubr.msk.bf16.mxu1 %vm15799_vm4, %v18564_v34 }
0x1617   :  { %13564 = vmatpush3.bf16.xpose.msra.mxu0 %v17737_v47 }
0x1618   :  { %13575 = vmatprep.subr.bf16.mxu0 %v18564_v34 }
0x161b   :  { %13570 = vmatpush3.bf16.xpose.msra.mxu1 %v17743_v58 }
0x161c   :  { %13581 = vmatprep.subr.bf16.mxu1 %v18564_v34 }
0x16ac   :  { %v7776_v56 = vpop.f32.mrb[152].mxu0 }
0x16ad   :  { %v13519_v15 = vpop.f32.mrb[153].mxu0 }
0x16ae   :  { %v7779_v25 = vpop.f32.mrb[154].mxu0 }
0x16af   :  { %v13520_v63 = vpop.f32.mrb[155].mxu0 }
0x16b0   :  { %v7822_v24 = vpop.f32.mrb[152].mxu1 }
0x16b1   :  { %v8112_v55 = vrot.slane %v7822_v24, 7  ;;  %v13525_v28 = vpop.f32.mrb[153].mxu1 }
0x16b2   :  { %v7825_v62 = vpop.f32.mrb[154].mxu1 }
0x16b3   :  { %v8113_v45 = vsel %vm1620_vm5, %v8112_v55, %v7776_v56  ;;  %v13526_v39 = vpop.f32.mrb[155].mxu1  ;;  %v18619_v56 = vld [vmem:[#allocation25_spill] sm:$0xff] }
0x16b4   :  { %v7868_v14 = vpop.f32.mrb[156].mxu0 }
0x16b5   :  { %v8114_v61 = vrot.slane %v7868_v14, 6  ;;  %v13531_v1 = vpop.f32.mrb[157].mxu0 }
0x16b6   :  { %v7871_v10 = vpop.f32.mrb[158].mxu0 }
0x16b7   :  { %v8115_v49 = vsel %vm2361_vm10, %v8114_v61, %v8113_v45  ;;  %v13532_v7 = vpop.f32.mrb[159].mxu0  ;;  %v18620_v61 = vld [vmem:[#allocation27_spill] sm:$0xff] }
0x16b8   :  { %v7914_v26 = vpop.f32.mrb[156].mxu1 }
0x16b9   :  { %v8116_v27 = vrot.slane %v7914_v26, 5  ;;  %v13537_v18 = vpop.f32.mrb[157].mxu1 }
0x16ba   :  { %v7917_v8 = vpop.f32.mrb[158].mxu1  ;;  %v18621_v18 = vld [vmem:[#allocation40_spill] sm:$0xff] }
0x16bb   :  { %v8117_v5 = vsel %vm3102_vm15, %v8116_v27, %v8115_v49  ;;  %v13538_v60 = vpop.f32.mrb[159].mxu1 }
0x16bc   :  { %v7960_v44 = vpop.f32.mrb[160].mxu0 }
0x16bd   :  { %v8118_v3 = vrot.slane %v7960_v44, 4  ;;  %v13543_v29 = vpop.f32.mrb[161].mxu0 }
0x16be   :  { %v7963_v53 = vpop.f32.mrb[162].mxu0 }
0x16bf   :  { %v8119_v57 = vsel %vm4711_vm9, %v8118_v3, %v8117_v5  ;;  %v13544_v33 = vpop.f32.mrb[163].mxu0  ;;  %v18622_v53 = vld [vmem:[#allocation21_spill] sm:$0xff] }
0x16c0   :  { %v8006_v46 = vpop.f32.mrb[160].mxu1 }
0x16c1   :  { %v8120_v4 = vrot.slane %v8006_v46, 3  ;;  %v13549_v6 = vpop.f32.mrb[161].mxu1  ;;  %v17771_v46 = vld [vmem:[#allocation3 + $0x8] sm:$0xf] }
0x16c2   :  { %v8009_v50 = vpop.f32.mrb[162].mxu1 }
0x16c3   :  { %v8121_v21 = vsel %vm4714_vm11, %v8120_v4, %v8119_v57  ;;  %v13550_v9 = vpop.f32.mrb[163].mxu1  ;;  %v17777_v50 = vld [vmem:[#allocation3 + $0xc] sm:$0xf] }
0x16c4   :  { %v8052_v32 = vpop.f32.mrb[164].mxu0 }
0x16c5   :  { %v8122_v13 = vrot.slane %v8052_v32, 2  ;;  %v13555_v37 = vpop.f32.mrb[165].mxu0 }
0x16c6   :  { %v8055_v22 = vpop.f32.mrb[166].mxu0  ;;  %v17785_v37 = vld [vmem:[#allocation3 + $0x10] sm:$0xf] }
0x16c7   :  { %v8123_v23 = vsel %vm4717_vm12, %v8122_v13, %v8121_v21  ;;  %v13556_v54 = vpop.f32.mrb[167].mxu0 }
0x16c8   :  { %v8098_v2 = vpop.f32.mrb[164].mxu1  ;;  %v17791_v54 = vld [vmem:[#allocation3 + $0x14] sm:$0xf] }
0x16c9   :  { %v8124_v43 = vrot.slane %v8098_v2, 1  ;;  %v13561_v19 = vpop.f32.mrb[165].mxu1 }
0x16ca   :  { %v8101_v16 = vpop.f32.mrb[166].mxu1 }
0x16cb   :  { %v8125_v12 = vsel %vm4720_vm13, %v8124_v43, %v8123_v23  ;;  %v13562_v41 = vpop.f32.mrb[167].mxu1 }
0x16cc   :  { %v12918_v17 = vpack.c.bf16 %v8125_v12, %v17576_v42  ;;  %v17799_v12 = vld [vmem:[#allocation3 + $0x18] sm:$0xf] }
0x16ce   :  { %8134 = vst [vmem:[#allocation15 + $0x18] sm:$0xff] %v12918_v17 }
0x16e4   :  { %v8265_v40 = vpop.f32.mrb[168].mxu0 }
0x16e5   :  { %v8266_v0 = vadd.f32 %v8265_v40, %v18616_v36  ;;  %v8267_v31 = vpop.f32.mrb[169].mxu0  ;;  %v17805_v40 = vld [vmem:[#allocation3 + $0x1c] sm:$0xf] }
0x16e6   :  { %v8268_v11 = vadd.f32 %v8267_v31, %v18617_v38 }
0x16e7   :  { %v12851_v20 = vmul.f32 -1.442695, %v8266_v0 }
0x16e8   :  { %v12852_v48 = vmul.f32 -1.442695, %v8268_v11  ;;  %v8336_v35 = vpop.f32.mrb[168].mxu1 }
0x16e9   :  { %15427 = vpow2.f32 %v12851_v20  ;;  %v8338_v59 = vpop.f32.mrb[169].mxu1  ;;  %v8337_v52 = vadd.f32 %v8336_v35, %v18618_v51  ;;  %v8875_v20 = vsel %vm4327_vm6, %v17737_v47, 0  ;;  %v8921_v35 = vsel %vm4327_vm6, %v17743_v58, 0 }
0x16ea   :  { %15429 = vpow2.f32 %v12852_v48  ;;  %v8339_v15 = vadd.f32 %v8338_v59, %v18619_v56 }
0x16eb   :  { %v12853_v30 = vmul.f32 -1.442695, %v8337_v52 }
0x16ed   :  { %15431 = vpow2.f32 %v12853_v30 }
0x16ee   :  { %15433 = vtanh.f32 %v8339_v15 }
0x16f3   :  { %v15428_v25 = vpop.eup %15427 }
0x16f4   :  { %v15430_v42 = vpop.eup %15429  ;;  %v8350_v63 = vadd.f32 1.0, %v15428_v25 }
0x16f5   :  { %v8351_v24 = vadd.f32 1.0, %v15430_v42 }
0x16f6   :  { %15435 = vrcp.f32 %v8350_v63 }
0x16f7   :  { %15437 = vrcp.f32 %v8351_v24  ;;  %v15432_v55 = vpop.eup %15431 }
0x16f8   :  { %v15434_v28 = vpop.eup %15433  ;;  %v8352_v39 = vadd.f32 1.0, %v15432_v55 }
0x16fa   :  { %15439 = vrcp.f32 %v8352_v39 }
0x1700   :  { %v15436_v62 = vpop.eup %15435 }
0x1701   :  { %v15438_v45 = vpop.eup %15437  ;;  %v8361_v14 = vmul.f32 %v15436_v62, %v15434_v28 }
0x1702   :  { %v8360_v1 = vmul.f32 %v15438_v45, %v18620_v61 }
0x1704   :  { %v17760_v10 = vadd.f32 %v8361_v14, %v8360_v1  ;;  %v15440_v49 = vpop.eup %15439 }
0x1706   :  { %15441 = vtanh.f32 %v17760_v10 }
0x1710   :  { %v15442_v7 = vpop.eup %15441 }
0x1711   :  { %v17763_v26 = vmul.f32 %v15442_v7, %v15440_v49 }
0x1713   :  { %v8373_v27 = vpack.c.bf16 %v17763_v26, %v17763_v26 }
0x1715   :  { %v8381_v8 = vrot.slane %v8373_v27, %v18621_v18 }
0x1717   :  { %v8389_v5 = vrot.slane %v8381_v8, %v18621_v18  ;;  %v8382_v60 = vcombine.high %v8381_v8, %v8381_v8 }
0x1719   :  { %v12854_v44 = vpack.i.b16 %v8389_v5, %v8389_v5  ;;  %v8400_v3 = vunpack.i.h.s16 %v8389_v5  ;;  %v8396_v29 = vrot.slane %v8382_v60, %v18621_v18  ;;  %v8397_v32 = vcombine.high %v8389_v5, %v8389_v5 }
0x171b   :  { %v8411_v57 = vrot.slane %v12854_v44, %v18622_v53  ;;  %v8453_v33 = vpack.i.b16 %v8400_v3, %v8400_v3  ;;  %v8402_v6 = vunpack.i.h.s16 %v8396_v29  ;;  %v12855_v21 = vpack.i.b16 %v8396_v29, %v8396_v29 }
0x171c   :  { %v8404_v23 = vunpack.i.h.s16 %v8397_v32  ;;  %v12856_v2 = vpack.i.b16 %v8397_v32, %v8397_v32  ;;  %v8398_v19 = vcombine.high %v8396_v29, %v8396_v29 }
0x171d   :  { %13566 = vmatmul.mubr.bf16.vlgmr.msra.gmra.mrb[172].mxu0 %v8411_v57  ;;  %v8457_v4 = vrot.slane %v8453_v33, %v18622_v53  ;;  %v8545_v9 = vpack.i.b16 %v8402_v6, %v8402_v6  ;;  %v8503_v13 = vrot.slane %v12855_v21, %v18622_v53 }
0x171e   :  { %13576 = vmatpush3.bf16.xpose.msra.mxu0 %v17771_v46  ;;  %13577 = vmatprep.mubr.msk.bf16.mxu0 %vm15799_vm4, %v18564_v34  ;;  %v8637_v43 = vpack.i.b16 %v8404_v23, %v8404_v23  ;;  %v8595_v16 = vrot.slane %v12856_v2, %v18622_v53  ;;  %v8406_v17 = vunpack.i.h.s16 %v8398_v19  ;;  %v12857_v0 = vpack.i.b16 %v8398_v19, %v8398_v19 }
0x171f   :  { %13572 = vmatmul.mubr.bf16.vlgmr.msra.gmra.mrb[172].mxu1 %v8457_v4  ;;  %13587 = vmatprep.subr.bf16.mxu0 %v18564_v34  ;;  %v8549_v22 = vrot.slane %v8545_v9, %v18622_v53 }
0x1720   :  { %13582 = vmatpush3.bf16.xpose.msra.mxu1 %v17777_v50  ;;  %13583 = vmatprep.mubr.msk.bf16.mxu1 %vm15799_vm4, %v18564_v34  ;;  %v8641_v41 = vrot.slane %v8637_v43, %v18622_v53  ;;  %v8729_v31 = vpack.i.b16 %v8406_v17, %v8406_v17  ;;  %v8687_v11 = vrot.slane %v12857_v0, %v18622_v53 }
0x1721   :  { %13593 = vmatprep.subr.bf16.mxu1 %v18564_v34 }
0x1722   :  { %v8733_v48 = vrot.slane %v8729_v31, %v18622_v53 }
0x1725   :  { %13578 = vmatmul.mubr.bf16.vlgmr.msra.gmra.mrb[176].mxu0 %v8503_v13 }
0x1726   :  { %13588 = vmatpush3.bf16.xpose.msra.mxu0 %v17785_v37  ;;  %13589 = vmatprep.mubr.msk.bf16.mxu0 %vm15799_vm4, %v18564_v34 }
0x1727   :  { %13584 = vmatmul.mubr.bf16.vlgmr.msra.gmra.mrb[176].mxu1 %v8549_v22  ;;  %13599 = vmatprep.subr.bf16.mxu0 %v18564_v34 }
0x1728   :  { %13594 = vmatpush3.bf16.xpose.msra.mxu1 %v17791_v54  ;;  %13595 = vmatprep.mubr.msk.bf16.mxu1 %vm15799_vm4, %v18564_v34 }
0x1729   :  { %13605 = vmatprep.subr.bf16.mxu1 %v18564_v34 }
0x172d   :  { %13590 = vmatmul.mubr.bf16.vlgmr.msra.gmra.mrb[180].mxu0 %v8595_v16 }
0x172e   :  { %13600 = vmatpush3.bf16.xpose.msra.mxu0 %v17799_v12  ;;  %13601 = vmatprep.mubr.msk.bf16.mxu0 %vm15799_vm4, %v18564_v34 }
0x172f   :  { %13596 = vmatmul.mubr.bf16.vlgmr.msra.gmra.mrb[180].mxu1 %v8641_v41  ;;  %13611 = vmatprep.subr.bf16.mxu0 %v18564_v34 }
0x1730   :  { %13606 = vmatpush3.bf16.xpose.msra.mxu1 %v17805_v40  ;;  %13607 = vmatprep.mubr.msk.bf16.mxu1 %vm15799_vm4, %v18564_v34 }
0x1731   :  { %13617 = vmatprep.subr.bf16.mxu1 %v18564_v34 }
0x1735   :  { %13602 = vmatmul.mubr.bf16.vlgmr.msra.gmra.mrb[184].mxu0 %v8687_v11 }
0x1736   :  { %13612 = vmatpush3.bf16.msra.mxu0 %v8875_v20  ;;  %13613 = vmatprep.mubr.msk.bf16.mxu0 %vm15799_vm4, %v18564_v34 }
0x1737   :  { %13608 = vmatmul.mubr.bf16.vlgmr.msra.gmra.mrb[184].mxu1 %v8733_v48  ;;  %13623 = vmatprep.subr.bf16.mxu0 %v18564_v34 }
0x1738   :  { %13618 = vmatpush3.bf16.msra.mxu1 %v8921_v35  ;;  %13619 = vmatprep.mubr.msk.bf16.mxu1 %vm15799_vm4, %v18564_v34 }
0x1739   :  { %13629 = vmatprep.subr.bf16.mxu1 %v18564_v34 }
0x17f0   :  { %v8447_v59 = vpop.f32.mrb[172].mxu0 }
0x17f1   :  { %v13567_v47 = vpop.f32.mrb[173].mxu0  ;;  %v8775_v52 = vsel %vm4226_vm7, %v8447_v59, -inf }
0x17f2   :  { %8776 = vmax.xlane.f32.xlu0 %v8775_v52  ;;  %v8450_v30 = vpop.f32.mrb[174].mxu0  ;;  %v8493_v15 = vpop.f32.mrb[172].mxu1 }
0x17f3   :  { %v13568_v25 = vpop.f32.mrb[175].mxu0  ;;  %v13573_v42 = vpop.f32.mrb[173].mxu1  ;;  %v8778_v58 = vsel %vm4226_vm7, %v8493_v15, -inf }
0x17f4   :  { %v8496_v63 = vpop.f32.mrb[174].mxu1 }
0x17f5   :  { %v13574_v24 = vpop.f32.mrb[175].mxu1 }
0x17f6   :  { %8779 = vmax.xlane.f32.xlu0 %v8778_v58 }
0x17f8   :  { %v8539_v55 = vpop.f32.mrb[176].mxu0 }
0x17f9   :  { %v13579_v28 = vpop.f32.mrb[177].mxu0  ;;  %v8781_v62 = vsel %vm4226_vm7, %v8539_v55, -inf }
0x17fa   :  { %8782 = vmax.xlane.f32.xlu1 %v8781_v62  ;;  %v8542_v45 = vpop.f32.mrb[178].mxu0  ;;  %v8585_v39 = vpop.f32.mrb[176].mxu1 }
0x17fb   :  { %v13580_v14 = vpop.f32.mrb[179].mxu0  ;;  %v13585_v61 = vpop.f32.mrb[177].mxu1  ;;  %v8784_v1 = vsel %vm4226_vm7, %v8585_v39, -inf }
0x17fc   :  { %8785 = vmax.xlane.f32.xlu0 %v8784_v1  ;;  %v8588_v49 = vpop.f32.mrb[178].mxu1 }
0x17fd   :  { %v13586_v7 = vpop.f32.mrb[179].mxu1 }
0x1800   :  { %v8631_v27 = vpop.f32.mrb[180].mxu0 }
0x1801   :  { %v13591_v8 = vpop.f32.mrb[181].mxu0  ;;  %v8787_v5 = vsel %vm4226_vm7, %v8631_v27, -inf }
0x1802   :  { %8788 = vmax.xlane.f32.xlu1 %v8787_v5  ;;  %v8634_v60 = vpop.f32.mrb[182].mxu0  ;;  %v8677_v44 = vpop.f32.mrb[180].mxu1 }
0x1803   :  { %v13592_v3 = vpop.f32.mrb[183].mxu0  ;;  %v13597_v29 = vpop.f32.mrb[181].mxu1  ;;  %v8790_v57 = vsel %vm4226_vm7, %v8677_v44, -inf }
0x1804   :  { %8791 = vmax.xlane.f32.xlu0 %v8790_v57  ;;  %v8680_v33 = vpop.f32.mrb[182].mxu1 }
0x1805   :  { %v13598_v4 = vpop.f32.mrb[183].mxu1 }
0x1808   :  { %v8723_v6 = vpop.f32.mrb[184].mxu0 }
0x1809   :  { %v13603_v21 = vpop.f32.mrb[185].mxu0  ;;  %v8793_v9 = vsel %vm4226_vm7, %v8723_v6, -inf }
0x180a   :  { %8794 = vmax.xlane.f32.xlu1 %v8793_v9  ;;  %v8726_v32 = vpop.f32.mrb[186].mxu0  ;;  %v8769_v13 = vpop.f32.mrb[184].mxu1 }
0x180b   :  { %v13604_v22 = vpop.f32.mrb[187].mxu0  ;;  %v13609_v23 = vpop.f32.mrb[185].mxu1  ;;  %v8796_v19 = vsel %vm4226_vm7, %v8769_v13, -inf }
0x180c   :  { %v8772_v2 = vpop.f32.mrb[186].mxu1 }
0x180d   :  { %v13610_v43 = vpop.f32.mrb[187].mxu1 }
0x180e   :  { %8797 = vmax.xlane.f32.xlu1 %v8796_v19 }
0x187f   :  { %v8777_v16 = vpop.xlane.xlu0 %8776 }
0x1880   :  { %v8799_v41 = vsub.f32 %v8447_v59, %v8777_v16  ;;  %v8967_v16 = vsel %vm4327_vm6, %v17771_v46, 0 }
0x1882   :  { %v8807_v17 = vmul.f32 1.442695, %v8799_v41 }
0x1883   :  { %v8780_v0 = vpop.xlane.xlu0 %8779 }
0x1884   :  { %15443 = vpow2.f32 %v8807_v17  ;;  %v8800_v31 = vsub.f32 %v8493_v15, %v8780_v0 }
0x1886   :  { %v8809_v11 = vmul.f32 1.442695, %v8800_v31 }
0x1887   :  { %v8783_v20 = vpop.xlane.xlu1 %8782 }
0x1888   :  { %15445 = vpow2.f32 %v8809_v11  ;;  %v8801_v48 = vsub.f32 %v8539_v55, %v8783_v20  ;;  %v9013_v20 = vsel %vm4327_vm6, %v17777_v50, 0 }
0x1889   :  { %v8786_v35 = vpop.xlane.xlu0 %8785 }
0x188a   :  { %v8811_v47 = vmul.f32 1.442695, %v8801_v48  ;;  %v8802_v52 = vsub.f32 %v8585_v39, %v8786_v35 }
0x188c   :  { %15447 = vpow2.f32 %v8811_v47  ;;  %v8813_v30 = vmul.f32 1.442695, %v8802_v52  ;;  %v9059_v47 = vsel %vm4327_vm6, %v17785_v37, 0 }
0x188e   :  { %v15444_v25 = vpop.eup %15443  ;;  %15449 = vpow2.f32 %v8813_v30 }
0x188f   :  { %v8789_v42 = vpop.xlane.xlu1 %8788  ;;  %v8823_v63 = vsel %vm4226_vm7, %v15444_v25, 0.0 }
0x1890   :  { %v8803_v24 = vsub.f32 %v8631_v27, %v8789_v42  ;;  %8824 = vadd.xlane.f32.xlu0 %v8823_v63  ;;  %v9275_v42 = vld [vmem:[#allocation13 + $0x28] sm:$0xff] }
0x1891   :  { %v8792_v59 = vpop.xlane.xlu0 %8791 }
0x1892   :  { %v15446_v58 = vpop.eup %15445  ;;  %v8815_v28 = vmul.f32 1.442695, %v8803_v24  ;;  %v8804_v15 = vsub.f32 %v8677_v44, %v8792_v59  ;;  %v9105_v24 = vsel %vm4327_vm6, %v17791_v54, 0  ;;  %v9151_v54 = vsel %vm4327_vm6, %v17799_v12, 0 }
0x1893   :  { %v8826_v62 = vsel %vm4226_vm7, %v15446_v58, 0.0  ;;  %v9197_v12 = vsel %vm4327_vm6, %v17805_v40, 0  ;;  %v9285_v40 = vld [vmem:[#allocation13 + $0x78] sm:$0xff] }
0x1894   :  { %15451 = vpow2.f32 %v8815_v28  ;;  %v8817_v55 = vmul.f32 1.442695, %v8804_v15  ;;  %8827 = vadd.xlane.f32.xlu0 %v8826_v62  ;;  %v9273_v62 = vld [vmem:[#allocation13 + $0x18] sm:$0xff] }
0x1896   :  { %v15448_v45 = vpop.eup %15447  ;;  %15453 = vpow2.f32 %v8817_v55  ;;  %v9277_v55 = vld [vmem:[#allocation13 + $0x38] sm:$0xff] }
0x1897   :  { %v8795_v39 = vpop.xlane.xlu1 %8794  ;;  %v8829_v14 = vsel %vm4226_vm7, %v15448_v45, 0.0 }
0x1898   :  { %v15450_v61 = vpop.eup %15449  ;;  %v8805_v1 = vsub.f32 %v8723_v6, %v8795_v39  ;;  %8830 = vadd.xlane.f32.xlu1 %v8829_v14  ;;  %v9270_v39 = vld [vmem:[#allocation13] sm:$0xff] }
0x1899   :  { %v8832_v49 = vsel %vm4226_vm7, %v15450_v61, 0.0  ;;  %v9274_v14 = vld [vmem:[#allocation13 + $0x20] sm:$0xff] }
0x189a   :  { %v8819_v7 = vmul.f32 1.442695, %v8805_v1  ;;  %8833 = vadd.xlane.f32.xlu0 %v8832_v49  ;;  %v9279_v49 = vld [vmem:[#allocation13 + $0x48] sm:$0xff] }
0x189b   :  { %v8798_v27 = vpop.xlane.xlu1 %8797 }
0x189c   :  { %15455 = vpow2.f32 %v8819_v7  ;;  %v8806_v8 = vsub.f32 %v8769_v13, %v8798_v27  ;;  %v9283_v7 = vld [vmem:[#allocation13 + $0x68] sm:$0xff] }
0x189e   :  { %v15452_v5 = vpop.eup %15451  ;;  %v8821_v60 = vmul.f32 1.442695, %v8806_v8  ;;  %v17888_v8 = vpack.c.bf16 %v9274_v14, %v9270_v39  ;;  %v9311_v39 = vld [vmem:[#allocation13 + $0x148] sm:$0xff] }
0x189f   :  { %v8835_v44 = vsel %vm4226_vm7, %v15452_v5, 0.0  ;;  %v9315_v14 = vld [vmem:[#allocation13 + $0x168] sm:$0xff] }
0x18a0   :  { %v17837_v3 = vpop.eup %15453  ;;  %15457 = vpow2.f32 %v8821_v60  ;;  %8836 = vadd.xlane.f32.xlu1 %v8835_v44  ;;  %v9282_v60 = vld [vmem:[#allocation13 + $0x60] sm:$0xff] }
0x18a1   :  { %v8838_v29 = vsel %vm4226_vm7, %v17837_v3, 0.0 }
0x18a2   :  { %8839 = vadd.xlane.f32.xlu0 %v8838_v29  ;;  %v9272_v29 = vld [vmem:[#allocation13 + $0x10] sm:$0xff] }
0x18a6   :  { %v17841_v57 = vpop.eup %15455 }
0x18a7   :  { %v8841_v33 = vsel %vm4226_vm7, %v17841_v57, 0.0 }
0x18a8   :  { %8842 = vadd.xlane.f32.xlu1 %v8841_v33  ;;  %v9287_v33 = vld [vmem:[#allocation13 + $0x88] sm:$0xff] }
0x18aa   :  { %v17845_v4 = vpop.eup %15457 }
0x18ab   :  { %v8844_v6 = vsel %vm4226_vm7, %v17845_v4, 0.0 }
0x18ac   :  { %8845 = vadd.xlane.f32.xlu1 %v8844_v6 }
0x191d   :  { %v8825_v21 = vpop.xlane.xlu0 %8824 }
0x191e   :  { %15459 = vrcp.f32 %v8825_v21  ;;  %v9291_v21 = vld [vmem:[#allocation13 + $0xa8] sm:$0xff] }
0x1921   :  { %v8828_v9 = vpop.xlane.xlu0 %8827 }
0x1922   :  { %15461 = vrcp.f32 %v8828_v9  ;;  %v9281_v9 = vld [vmem:[#allocation13 + $0x58] sm:$0xff] }
0x1925   :  { %v8831_v32 = vpop.xlane.xlu1 %8830 }
0x1926   :  { %15463 = vrcp.f32 %v8831_v32 }
0x1927   :  { %v8834_v13 = vpop.xlane.xlu0 %8833 }
0x1928   :  { %v15460_v22 = vpop.eup %15459  ;;  %15465 = vrcp.f32 %v8834_v13 }
0x1929   :  { %v8855_v23 = vmul.f32 %v15460_v22, %v15444_v25  ;;  %v9271_v25 = vld [vmem:[#allocation13 + $0x8] sm:$0xff] }
0x192a   :  { %v17874_v15 = vpack.c.bf16 %v9275_v42, %v9271_v25  ;;  %v9303_v25 = vld [vmem:[#allocation13 + $0x108] sm:$0xff] }
0x192b   :  { %v8863_v2 = vpack.c.bf16 %v8855_v23, %v8855_v23  ;;  %v9286_v23 = vld [vmem:[#allocation13 + $0x80] sm:$0xff]  ;;  %v9307_v42 = vld [vmem:[#allocation13 + $0x128] sm:$0xff] }
0x192c   :  { %v15462_v43 = vpop.eup %15461 }
0x192d   :  { %v8856_v19 = vmul.f32 %v15462_v43, %v15446_v58  ;;  %13614 = vmatmul.mubr.msk.bf16.vlgmr.msra.gmra.mrb[188].mxu0 %vm4323_vm8, %v8863_v2  ;;  %v8837_v41 = vpop.xlane.xlu1 %8836  ;;  %v9290_v2 = vld [vmem:[#allocation13 + $0xa0] sm:$0xff] }
0x192e   :  { %13624 = vmatpush3.bf16.msra.mxu0 %v8967_v16  ;;  %15467 = vrcp.f32 %v8837_v41  ;;  %13625 = vmatprep.mubr.msk.bf16.mxu0 %vm15799_vm4, %v18564_v34  ;;  %v17906_v16 = vpack.c.bf16 %v9285_v40, %v9281_v9  ;;  %v9284_v41 = vld [vmem:[#allocation13 + $0x70] sm:$0xff]  ;;  %v9317_v9 = vld [vmem:[#allocation13 + $0x178] sm:$0xff] }
0x192f   :  { %v8840_v17 = vpop.xlane.xlu0 %8839  ;;  %v8864_v0 = vpack.c.bf16 %v8856_v19, %v8856_v19  ;;  %13635 = vmatprep.subr.bf16.mxu0 %v18564_v34  ;;  %v17904_v19 = vpack.c.bf16 %v9291_v21, %v9287_v33  ;;  %v9319_v33 = vld [vmem:[#allocation13 + $0x188] sm:$0xff]  ;;  %v9313_v21 = vld [vmem:[#allocation13 + $0x158] sm:$0xff] }
0x1930   :  { %v15464_v31 = vpop.eup %15463  ;;  %15469 = vrcp.f32 %v8840_v17  ;;  %v9295_v17 = vld [vmem:[#allocation13 + $0xc8] sm:$0xff] }
0x1931   :  { %v8857_v11 = vmul.f32 %v15464_v31, %v15448_v45  ;;  %13620 = vmatmul.mubr.msk.bf16.vlgmr.msra.gmra.mrb[188].mxu1 %vm4323_vm8, %v8864_v0  ;;  %v9299_v0 = vld [vmem:[#allocation13 + $0xe8] sm:$0xff]  ;;  %v9289_v31 = vld [vmem:[#allocation13 + $0x98] sm:$0xff] }
0x1932   :  { %v15466_v48 = vpop.eup %15465  ;;  %13630 = vmatpush3.bf16.msra.mxu1 %v9013_v20  ;;  %13631 = vmatprep.mubr.msk.bf16.mxu1 %vm15799_vm4, %v18564_v34  ;;  %v17911_v20 = vpack.c.bf16 %v9290_v2, %v9286_v23  ;;  %v9318_v23 = vld [vmem:[#allocation13 + $0x180] sm:$0xff] }
0x1933   :  { %v8858_v46 = vmul.f32 %v15466_v48, %v15450_v61  ;;  %v8865_v35 = vpack.c.bf16 %v8857_v11, %v8857_v11  ;;  %13641 = vmatprep.subr.bf16.mxu1 %v18564_v34  ;;  %v17882_v61 = vpack.c.bf16 %v9277_v55, %v9273_v62  ;;  %v9293_v11 = vld [vmem:[#allocation13 + $0xb8] sm:$0xff]  ;;  %v17930_v62 = vpack.c.bf16 %v9307_v42, %v9303_v25  ;;  %v9322_v2 = vld [vmem:[#allocation13 + $0x1a0] sm:$0xff] }
0x1935   :  { %13626 = vmatmul.mubr.msk.bf16.vlgmr.msra.gmra.mrb[192].mxu0 %vm4323_vm8, %v8865_v35  ;;  %v8843_v52 = vpop.xlane.xlu1 %8842  ;;  %v8866_v50 = vpack.c.bf16 %v8858_v46, %v8858_v46  ;;  %v9294_v46 = vld [vmem:[#allocation13 + $0xc0] sm:$0xff] }
0x1936   :  { %13636 = vmatpush3.bf16.msra.mxu0 %v9059_v47  ;;  %15471 = vrcp.f32 %v8843_v52  ;;  %13637 = vmatprep.mubr.msk.bf16.mxu0 %vm15799_vm4, %v18564_v34  ;;  %v9298_v35 = vld [vmem:[#allocation13 + $0xe0] sm:$0xff]  ;;  %v17917_v47 = vpack.c.bf16 %v9299_v0, %v9295_v17  ;;  %v17919_v52 = vpack.c.bf16 %v9293_v11, %v9289_v31  ;;  %v9316_v17 = vld [vmem:[#allocation13 + $0x170] sm:$0xff]  ;;  %v9327_v0 = vld [vmem:[#allocation13 + $0x1c8] sm:$0xff] }
0x1937   :  { %13647 = vmatprep.subr.bf16.mxu0 %v18564_v34  ;;  %v9331_v31 = vld [vmem:[#allocation13 + $0x1e8] sm:$0xff]  ;;  %v9321_v11 = vld [vmem:[#allocation13 + $0x198] sm:$0xff] }
0x1938   :  { %v15468_v30 = vpop.eup %15467  ;;  %v17966_v25 = vpack.c.bf16 %v9331_v31, %v9327_v0 }
0x1939   :  { %v8859_v63 = vmul.f32 %v15468_v30, %v15452_v5  ;;  %13632 = vmatmul.mubr.msk.bf16.vlgmr.msra.gmra.mrb[192].mxu1 %vm4323_vm8, %v8866_v50  ;;  %v8846_v59 = vpop.xlane.xlu1 %8845  ;;  %v9278_v5 = vld [vmem:[#allocation13 + $0x40] sm:$0xff]  ;;  %v9288_v50 = vld [vmem:[#allocation13 + $0x90] sm:$0xff] }
0x193a   :  { %v15470_v37 = vpop.eup %15469  ;;  %13642 = vmatpush3.bf16.msra.mxu1 %v9105_v24  ;;  %15473 = vrcp.f32 %v8846_v59  ;;  %13643 = vmatprep.mubr.msk.bf16.mxu1 %vm15799_vm4, %v18564_v34  ;;  %v17898_v13 = vpack.c.bf16 %v9282_v60, %v9278_v5  ;;  %v9292_v30 = vld [vmem:[#allocation13 + $0xb0] sm:$0xff]  ;;  %v9301_v24 = vld [vmem:[#allocation13 + $0xf8] sm:$0xff]  ;;  %v17924_v59 = vpack.c.bf16 %v9298_v35, %v9294_v46  ;;  %v9314_v5 = vld [vmem:[#allocation13 + $0x160] sm:$0xff]  ;;  %v17942_v60 = vpack.c.bf16 %v9315_v14, %v9311_v39 }
0x193b   :  { %v8860_v58 = vmul.f32 %v15470_v37, %v17837_v3  ;;  %v8867_v28 = vpack.c.bf16 %v8859_v63, %v8859_v63  ;;  %13653 = vmatprep.subr.bf16.mxu1 %v18564_v34  ;;  %v17892_v3 = vpack.c.bf16 %v9283_v7, %v9279_v49  ;;  %v9297_v63 = vld [vmem:[#allocation13 + $0xd8] sm:$0xff]  ;;  %v17926_v37 = vpack.c.bf16 %v9292_v30, %v9288_v50  ;;  %v9326_v30 = vld [vmem:[#allocation13 + $0x1c0] sm:$0xff] }
0x193c   :  { %v17932_v55 = vpack.c.bf16 %v9301_v24, %v9297_v63  ;;  %v9309_v49 = vld [vmem:[#allocation13 + $0x138] sm:$0xff]  ;;  %v17960_v35 = vpack.c.bf16 %v9322_v2, %v9318_v23  ;;  %v9330_v63 = vld [vmem:[#allocation13 + $0x1e0] sm:$0xff]  ;;  %v9320_v24 = vld [vmem:[#allocation13 + $0x190] sm:$0xff] }
0x193d   :  { %13638 = vmatmul.mubr.msk.bf16.vlgmr.msra.gmra.mrb[196].mxu0 %vm4323_vm8, %v8867_v28  ;;  %v8868_v45 = vpack.c.bf16 %v8860_v58, %v8860_v58  ;;  %v9302_v58 = vld [vmem:[#allocation13 + $0x100] sm:$0xff]  ;;  %v9325_v46 = vld [vmem:[#allocation13 + $0x1b8] sm:$0xff] }
0x193e   :  { %13648 = vmatpush3.bf16.msra.mxu0 %v9151_v54  ;;  %13649 = vmatprep.mubr.msk.bf16.mxu0 %vm15799_vm4, %v18564_v34  ;;  %v9306_v28 = vld [vmem:[#allocation13 + $0x120] sm:$0xff]  ;;  %v9296_v54 = vld [vmem:[#allocation13 + $0xd0] sm:$0xff]  ;;  %v17968_v42 = vpack.c.bf16 %v9325_v46, %v9321_v11 }
0x193f   :  { %14844 = vmatprep.subr.bf16.mxu0 %v17874_v15  ;;  %v17936_v7 = vpack.c.bf16 %v9306_v28, %v9302_v58  ;;  %v9324_v58 = vld [vmem:[#allocation13 + $0x1b0] sm:$0xff]  ;;  %v9329_v28 = vld [vmem:[#allocation13 + $0x1d8] sm:$0xff] }
0x1940   :  { %v15472_v1 = vpop.eup %15471  ;;  %v17974_v39 = vpack.c.bf16 %v9324_v58, %v9320_v24 }
0x1941   :  { %v8861_v27 = vmul.f32 %v15472_v1, %v17841_v57  ;;  %13644 = vmatmul.mubr.msk.bf16.vlgmr.msra.gmra.mrb[196].mxu1 %vm4323_vm8, %v8868_v45  ;;  %v9276_v57 = vld [vmem:[#allocation13 + $0x30] sm:$0xff]  ;;  %v9305_v1 = vld [vmem:[#allocation13 + $0x118] sm:$0xff] }
0x1942   :  { %13654 = vmatpush3.bf16.msra.mxu1 %v9197_v12  ;;  %13655 = vmatprep.mubr.msk.bf16.mxu1 %vm15799_vm4, %v18564_v34  ;;  %v17900_v22 = vpack.c.bf16 %v9276_v57, %v9272_v29  ;;  %v9300_v45 = vld [vmem:[#allocation13 + $0xf0] sm:$0xff]  ;;  %v9310_v12 = vld [vmem:[#allocation13 + $0x140] sm:$0xff] }
0x1943   :  { %v8869_v44 = vpack.c.bf16 %v8861_v27, %v8861_v27  ;;  %14876 = vmatprep.subr.bf16.mxu1 %v17882_v61  ;;  %v17938_v27 = vpack.c.bf16 %v9300_v45, %v9296_v54  ;;  %v9304_v29 = vld [vmem:[#allocation13 + $0x110] sm:$0xff]  ;;  %v17948_v40 = vpack.c.bf16 %v9314_v5, %v9310_v12  ;;  %v9333_v54 = vld [vmem:[#allocation13 + $0x1f8] sm:$0xff]  ;;  %v17972_v45 = vpack.c.bf16 %v9330_v63, %v9326_v30 }
0x1944   :  { %v15474_v6 = vpop.eup %15473  ;;  %v9308_v57 = vld [vmem:[#allocation13 + $0x130] sm:$0xff]  ;;  %v17978_v14 = vpack.c.bf16 %v9333_v54, %v9329_v28  ;;  %v17992_v5 = vld [vmem:[#allocation3] sm:$0xf] }
0x1945   :  { %v8862_v32 = vmul.f32 %v15474_v6, %v17845_v4  ;;  %13650 = vmatmul.mubr.msk.bf16.vlgmr.msra.gmra.mrb[200].mxu0 %vm4323_vm8, %v8869_v44  ;;  %v9280_v4 = vld [vmem:[#allocation13 + $0x50] sm:$0xff]  ;;  %v17944_v44 = vpack.c.bf16 %v9309_v49, %v9305_v1  ;;  %v9323_v6 = vld [vmem:[#allocation13 + $0x1a8] sm:$0xff] }
0x1946   :  { %14846 = vmatpush1.bf16.msra.mxu0 %v17888_v8  ;;  %9398 = vmatprep.mubr.f32.mxu0 %v18564_v34  ;;  %v17913_v48 = vpack.c.bf16 %v9284_v41, %v9280_v4  ;;  %v17956_v4 = vpack.c.bf16 %v9317_v9, %v9313_v21  ;;  %v9312_v41 = vld [vmem:[#allocation13 + $0x150] sm:$0xff] }
0x1947   :  { %14848 = vmatprep.subr.bf16.mxu0 %v17892_v3  ;;  %v8870_v43 = vpack.c.bf16 %v8862_v32, %v8862_v32  ;;  %v17950_v32 = vpack.c.bf16 %v9308_v57, %v9304_v29  ;;  %v17962_v50 = vpack.c.bf16 %v9316_v17, %v9312_v41  ;;  %v9328_v1 = vld [vmem:[#allocation13 + $0x1d0] sm:$0xff]  ;;  %v17998_v29 = vld [vmem:[#allocation3 + $0x4] sm:$0xf] }
0x1948   :  { %v9332_v49 = vld [vmem:[#allocation13 + $0x1f0] sm:$0xff] }
0x1949   :  { %13656 = vmatmul.mubr.msk.bf16.vlgmr.msra.gmra.mrb[200].mxu1 %vm4323_vm8, %v8870_v43  ;;  %v17954_v43 = vpack.c.bf16 %v9323_v6, %v9319_v33  ;;  %v17982_v12 = vpack.c.bf16 %v9332_v49, %v9328_v1 }
0x194a   :  { %14850 = vmatpush1.bf16.msra.mxu0 %v17898_v13  ;;  %14878 = vmatpush1.bf16.msra.mxu1 %v17900_v22 }
0x194b   :  { %14852 = vmatprep.subr.bf16.mxu0 %v17904_v19  ;;  %14880 = vmatprep.subr.bf16.mxu1 %v17906_v16 }
0x194c   :  { %9469 = vmatprep.mubr.f32.mxu1 %v18564_v34 }
0x194e   :  { %14854 = vmatpush1.bf16.msra.mxu0 %v17911_v20  ;;  %14882 = vmatpush1.bf16.msra.mxu1 %v17913_v48 }
0x194f   :  { %14856 = vmatprep.subr.bf16.mxu0 %v17917_v47  ;;  %14884 = vmatprep.subr.bf16.mxu1 %v17919_v52 }
0x1952   :  { %14858 = vmatpush1.bf16.msra.mxu0 %v17924_v59  ;;  %14886 = vmatpush1.bf16.msra.mxu1 %v17926_v37 }
0x1953   :  { %14860 = vmatprep.subr.bf16.mxu0 %v17930_v62  ;;  %14888 = vmatprep.subr.bf16.mxu1 %v17932_v55 }
0x1956   :  { %14862 = vmatpush1.bf16.msra.mxu0 %v17936_v7  ;;  %14890 = vmatpush1.bf16.msra.mxu1 %v17938_v27 }
0x1957   :  { %14864 = vmatprep.subr.bf16.mxu0 %v17942_v60  ;;  %14892 = vmatprep.subr.bf16.mxu1 %v17944_v44 }
0x195a   :  { %14866 = vmatpush1.bf16.msra.mxu0 %v17948_v40  ;;  %14894 = vmatpush1.bf16.msra.mxu1 %v17950_v32 }
0x195b   :  { %14868 = vmatprep.subr.bf16.mxu0 %v17954_v43  ;;  %14896 = vmatprep.subr.bf16.mxu1 %v17956_v4 }
0x195e   :  { %14870 = vmatpush1.bf16.msra.mxu0 %v17960_v35  ;;  %14898 = vmatpush1.bf16.msra.mxu1 %v17962_v50 }
0x195f   :  { %14872 = vmatprep.subr.bf16.mxu0 %v17966_v25  ;;  %14900 = vmatprep.subr.bf16.mxu1 %v17968_v42 }
0x1962   :  { %14874 = vmatpush1.bf16.msra.mxu0 %v17972_v45  ;;  %14902 = vmatpush1.bf16.msra.mxu1 %v17974_v39 }
0x1963   :  { %14904 = vmatprep.subr.bf16.mxu1 %v17978_v14  ;;  %13659 = vmatprep.subr.bf16.mxu0 %v18564_v34 }
0x1965   :  { %9399 = vmatmul.mubr.f32.vlgmr.msra.gmra.mrb[170].mxu0 %v17763_v26 }
0x1966   :  { %14906 = vmatpush1.bf16.msra.mxu1 %v17982_v12  ;;  %13661 = vmatprep.mubr.msk.bf16.mxu0 %vm15799_vm4, %v18564_v34 }
0x1967   :  { %13665 = vmatprep.subr.bf16.mxu1 %v18564_v34 }
0x1969   :  { %9470 = vmatmul.mubr.f32.vlgmr.msra.gmra.mrb[170].mxu1 %v17763_v26 }
0x196a   :  { %13667 = vmatprep.mubr.msk.bf16.mxu1 %vm15799_vm4, %v18564_v34 }
0x196b   :  { %13660 = vmatpush3.bf16.xpose.msra.mxu0 %v17992_v5 }
0x196c   :  { %13671 = vmatprep.subr.bf16.mxu0 %v18564_v34 }
0x196f   :  { %13666 = vmatpush3.bf16.xpose.msra.mxu1 %v17998_v29 }
0x1970   :  { %13677 = vmatprep.subr.bf16.mxu1 %v18564_v34 }
0x1a00   :  { %v8911_v57 = vpop.f32.mrb[188].mxu0 }
0x1a01   :  { %v13615_v33 = vpop.f32.mrb[189].mxu0 }
0x1a02   :  { %v8914_v6 = vpop.f32.mrb[190].mxu0 }
0x1a03   :  { %v13616_v21 = vpop.f32.mrb[191].mxu0 }
0x1a04   :  { %v8957_v9 = vpop.f32.mrb[188].mxu1 }
0x1a05   :  { %v9247_v23 = vrot.slane %v8957_v9, 7  ;;  %v13621_v2 = vpop.f32.mrb[189].mxu1 }
0x1a06   :  { %v8960_v41 = vpop.f32.mrb[190].mxu1 }
0x1a07   :  { %v9248_v17 = vsel %vm1620_vm5, %v9247_v23, %v8911_v57  ;;  %v13622_v0 = vpop.f32.mrb[191].mxu1 }
0x1a08   :  { %v9003_v31 = vpop.f32.mrb[192].mxu0 }
0x1a09   :  { %v9249_v11 = vrot.slane %v9003_v31, 6  ;;  %v13627_v46 = vpop.f32.mrb[193].mxu0 }
0x1a0a   :  { %v9006_v30 = vpop.f32.mrb[194].mxu0 }
0x1a0b   :  { %v9250_v63 = vsel %vm2361_vm10, %v9249_v11, %v9248_v17  ;;  %v13628_v24 = vpop.f32.mrb[195].mxu0 }
0x1a0c   :  { %v9049_v58 = vpop.f32.mrb[192].mxu1 }
0x1a0d   :  { %v9251_v28 = vrot.slane %v9049_v58, 5  ;;  %v13633_v54 = vpop.f32.mrb[193].mxu1 }
0x1a0e   :  { %v9052_v1 = vpop.f32.mrb[194].mxu1 }
0x1a0f   :  { %v9252_v49 = vsel %vm3102_vm15, %v9251_v28, %v9250_v63  ;;  %v13634_v33 = vpop.f32.mrb[195].mxu1 }
0x1a10   :  { %v9095_v6 = vpop.f32.mrb[196].mxu0 }
0x1a11   :  { %v9253_v21 = vrot.slane %v9095_v6, 4  ;;  %v13639_v9 = vpop.f32.mrb[197].mxu0 }
0x1a12   :  { %v9098_v2 = vpop.f32.mrb[198].mxu0 }
0x1a13   :  { %v9254_v57 = vsel %vm4711_vm9, %v9253_v21, %v9252_v49  ;;  %v13640_v23 = vpop.f32.mrb[199].mxu0 }
0x1a14   :  { %v9141_v41 = vpop.f32.mrb[196].mxu1 }
0x1a15   :  { %v9255_v0 = vrot.slane %v9141_v41, 3  ;;  %v13645_v31 = vpop.f32.mrb[197].mxu1 }
0x1a16   :  { %v9144_v46 = vpop.f32.mrb[198].mxu1 }
0x1a17   :  { %v9256_v17 = vsel %vm4714_vm11, %v9255_v0, %v9254_v57  ;;  %v13646_v11 = vpop.f32.mrb[199].mxu1 }
0x1a18   :  { %v9187_v30 = vpop.f32.mrb[200].mxu0 }
0x1a19   :  { %v9257_v24 = vrot.slane %v9187_v30, 2  ;;  %v13651_v58 = vpop.f32.mrb[201].mxu0 }
0x1a1a   :  { %v9190_v54 = vpop.f32.mrb[202].mxu0 }
0x1a1b   :  { %v9258_v63 = vsel %vm4717_vm12, %v9257_v24, %v9256_v17  ;;  %v13652_v28 = vpop.f32.mrb[203].mxu0 }
0x1a1c   :  { %v9233_v1 = vpop.f32.mrb[200].mxu1 }
0x1a1d   :  { %v9259_v33 = vrot.slane %v9233_v1, 1  ;;  %v13657_v6 = vpop.f32.mrb[201].mxu1 }
0x1a1e   :  { %v9236_v9 = vpop.f32.mrb[202].mxu1 }
0x1a1f   :  { %v9260_v49 = vsel %vm4720_vm13, %v9259_v33, %v9258_v63  ;;  %v13658_v21 = vpop.f32.mrb[203].mxu1 }
0x1a20   :  { %v12919_v2 = vpack.c.bf16 %v9260_v49, %v17763_v26 }
0x1a22   :  { %9269 = vst [vmem:[#allocation15 + $0x20] sm:$0xff] %v12919_v2 }
0x1a38   :  { %v9400_v23 = vpop.f32.mrb[170].mxu0 }
0x1a39   :  { %v9401_v57 = vadd.f32 %v9400_v23, %v18616_v36  ;;  %v9402_v41 = vpop.f32.mrb[171].mxu0 }
0x1a3a   :  { %v9403_v0 = vadd.f32 %v9402_v41, %v18617_v38 }
0x1a3b   :  { %v12867_v31 = vmul.f32 -1.442695, %v9401_v57 }
0x1a3c   :  { %v12868_v46 = vmul.f32 -1.442695, %v9403_v0  ;;  %v9471_v17 = vpop.f32.mrb[170].mxu1 }
0x1a3d   :  { %15475 = vpow2.f32 %v12867_v31  ;;  %v9473_v11 = vpop.f32.mrb[171].mxu1  ;;  %v9472_v30 = vadd.f32 %v9471_v17, %v18618_v51 }
0x1a3e   :  { %15477 = vpow2.f32 %v12868_v46  ;;  %v9474_v58 = vadd.f32 %v9473_v11, %v18619_v56 }
0x1a3f   :  { %v12869_v24 = vmul.f32 -1.442695, %v9472_v30 }
0x1a41   :  { %15479 = vpow2.f32 %v12869_v24 }
0x1a42   :  { %15481 = vtanh.f32 %v9474_v58 }
0x1a47   :  { %v15476_v54 = vpop.eup %15475 }
0x1a48   :  { %v15478_v26 = vpop.eup %15477  ;;  %v9485_v63 = vadd.f32 1.0, %v15476_v54 }
0x1a49   :  { %v9486_v28 = vadd.f32 1.0, %v15478_v26  ;;  %v18026_v26 = vld [vmem:[#allocation3 + $0x8] sm:$0xf] }
0x1a4a   :  { %15483 = vrcp.f32 %v9485_v63 }
0x1a4b   :  { %15485 = vrcp.f32 %v9486_v28  ;;  %v15480_v1 = vpop.eup %15479 }
0x1a4c   :  { %v15482_v33 = vpop.eup %15481  ;;  %v9487_v49 = vadd.f32 1.0, %v15480_v1  ;;  %v18032_v1 = vld [vmem:[#allocation3 + $0xc] sm:$0xf] }
0x1a4e   :  { %15487 = vrcp.f32 %v9487_v49 }
0x1a54   :  { %v15484_v6 = vpop.eup %15483 }
0x1a55   :  { %v15486_v9 = vpop.eup %15485  ;;  %v9496_v21 = vmul.f32 %v15484_v6, %v15482_v33 }
0x1a56   :  { %v9495_v2 = vmul.f32 %v15486_v9, %v17760_v10 }
0x1a58   :  { %v18015_v23 = vadd.f32 %v9496_v21, %v9495_v2  ;;  %v15488_v57 = vpop.eup %15487  ;;  %v18040_v21 = vld [vmem:[#allocation3 + $0x10] sm:$0xf] }
0x1a5a   :  { %18623 = vst [vmem:[#allocation28_spill] sm:$0xff] %v18015_v23  ;;  %15489 = vtanh.f32 %v18015_v23 }
0x1a64   :  { %v15490_v41 = vpop.eup %15489 }
0x1a65   :  { %v18018_v0 = vmul.f32 %v15490_v41, %v15488_v57  ;;  %v18046_v41 = vld [vmem:[#allocation3 + $0x14] sm:$0xf] }
0x1a67   :  { %v9508_v31 = vpack.c.bf16 %v18018_v0, %v18018_v0 }
0x1a69   :  { %v9516_v46 = vrot.slane %v9508_v31, %v18621_v18 }
0x1a6b   :  { %v9524_v17 = vrot.slane %v9516_v46, %v18621_v18  ;;  %v9517_v11 = vcombine.high %v9516_v46, %v9516_v46 }
0x1a6d   :  { %v12870_v30 = vpack.i.b16 %v9524_v17, %v9524_v17  ;;  %v9535_v24 = vunpack.i.h.s16 %v9524_v17  ;;  %v9531_v10 = vrot.slane %v9517_v11, %v18621_v18  ;;  %v9532_v9 = vcombine.high %v9524_v17, %v9524_v17 }
0x1a6f   :  { %v9546_v58 = vrot.slane %v12870_v30, %v18622_v53  ;;  %v9588_v54 = vpack.i.b16 %v9535_v24, %v9535_v24  ;;  %v9537_v28 = vunpack.i.h.s16 %v9531_v10  ;;  %v12871_v33 = vpack.i.b16 %v9531_v10, %v9531_v10  ;;  %v18054_v30 = vld [vmem:[#allocation3 + $0x18] sm:$0xf] }
0x1a70   :  { %v9539_v57 = vunpack.i.h.s16 %v9532_v9  ;;  %v12872_v31 = vpack.i.b16 %v9532_v9, %v9532_v9  ;;  %v9533_v17 = vcombine.high %v9531_v10, %v9531_v10  ;;  %v10056_v9 = vsel %vm4327_vm6, %v17998_v29, 0 }
0x1a71   :  { %13662 = vmatmul.mubr.bf16.vlgmr.msra.gmra.mrb[204].mxu0 %v9546_v58  ;;  %v9592_v63 = vrot.slane %v9588_v54, %v18622_v53  ;;  %v9680_v6 = vpack.i.b16 %v9537_v28, %v9537_v28  ;;  %v9638_v49 = vrot.slane %v12871_v33, %v18622_v53  ;;  %v18060_v54 = vld [vmem:[#allocation3 + $0x1c] sm:$0xf]  ;;  %v10010_v33 = vsel %vm4327_vm6, %v17992_v5, 0 }
0x1a72   :  { %13672 = vmatpush3.bf16.xpose.msra.mxu0 %v18026_v26  ;;  %13673 = vmatprep.mubr.msk.bf16.mxu0 %vm15799_vm4, %v18564_v34  ;;  %v9772_v46 = vpack.i.b16 %v9539_v57, %v9539_v57  ;;  %v9730_v11 = vrot.slane %v12872_v31, %v18622_v53  ;;  %v9541_v58 = vunpack.i.h.s16 %v9533_v17 }
0x1a73   :  { %13668 = vmatmul.mubr.bf16.vlgmr.msra.gmra.mrb[204].mxu1 %v9592_v63  ;;  %13683 = vmatprep.subr.bf16.mxu0 %v18564_v34  ;;  %v9684_v2 = vrot.slane %v9680_v6, %v18622_v53  ;;  %v12873_v63 = vpack.i.b16 %v9533_v17, %v9533_v17 }
0x1a74   :  { %13678 = vmatpush3.bf16.xpose.msra.mxu1 %v18032_v1  ;;  %13679 = vmatprep.mubr.msk.bf16.mxu1 %vm15799_vm4, %v18564_v34  ;;  %v9776_v24 = vrot.slane %v9772_v46, %v18622_v53  ;;  %v9864_v10 = vpack.i.b16 %v9541_v58, %v9541_v58 }
0x1a75   :  { %13689 = vmatprep.subr.bf16.mxu1 %v18564_v34  ;;  %v9822_v28 = vrot.slane %v12873_v63, %v18622_v53 }
0x1a76   :  { %v9868_v6 = vrot.slane %v9864_v10, %v18622_v53 }
0x1a79   :  { %13674 = vmatmul.mubr.bf16.vlgmr.msra.gmra.mrb[208].mxu0 %v9638_v49 }
0x1a7a   :  { %13684 = vmatpush3.bf16.xpose.msra.mxu0 %v18040_v21  ;;  %13685 = vmatprep.mubr.msk.bf16.mxu0 %vm15799_vm4, %v18564_v34 }
0x1a7b   :  { %13680 = vmatmul.mubr.bf16.vlgmr.msra.gmra.mrb[208].mxu1 %v9684_v2  ;;  %13695 = vmatprep.subr.bf16.mxu0 %v18564_v34 }
0x1a7c   :  { %13690 = vmatpush3.bf16.xpose.msra.mxu1 %v18046_v41  ;;  %13691 = vmatprep.mubr.msk.bf16.mxu1 %vm15799_vm4, %v18564_v34 }
0x1a7d   :  { %13701 = vmatprep.subr.bf16.mxu1 %v18564_v34 }
0x1a81   :  { %13686 = vmatmul.mubr.bf16.vlgmr.msra.gmra.mrb[212].mxu0 %v9730_v11 }
0x1a82   :  { %13696 = vmatpush3.bf16.xpose.msra.mxu0 %v18054_v30  ;;  %13697 = vmatprep.mubr.msk.bf16.mxu0 %vm15799_vm4, %v18564_v34 }
0x1a83   :  { %13692 = vmatmul.mubr.bf16.vlgmr.msra.gmra.mrb[212].mxu1 %v9776_v24  ;;  %13707 = vmatprep.subr.bf16.mxu0 %v18564_v34 }
0x1a84   :  { %13702 = vmatpush3.bf16.xpose.msra.mxu1 %v18060_v54  ;;  %13703 = vmatprep.mubr.msk.bf16.mxu1 %vm15799_vm4, %v18564_v34 }
0x1a85   :  { %13713 = vmatprep.subr.bf16.mxu1 %v18564_v34 }
0x1a89   :  { %13698 = vmatmul.mubr.bf16.vlgmr.msra.gmra.mrb[216].mxu0 %v9822_v28 }
0x1a8a   :  { %13708 = vmatpush3.bf16.msra.mxu0 %v10010_v33  ;;  %13709 = vmatprep.mubr.msk.bf16.mxu0 %vm15799_vm4, %v18564_v34 }
0x1a8b   :  { %13704 = vmatmul.mubr.bf16.vlgmr.msra.gmra.mrb[216].mxu1 %v9868_v6  ;;  %13719 = vmatprep.subr.bf16.mxu0 %v18564_v34 }
0x1a8c   :  { %13714 = vmatpush3.bf16.msra.mxu1 %v10056_v9  ;;  %13715 = vmatprep.mubr.msk.bf16.mxu1 %vm15799_vm4, %v18564_v34 }
0x1a8d   :  { %13725 = vmatprep.subr.bf16.mxu1 %v18564_v34 }
0x1b44   :  { %v9582_v49 = vpop.f32.mrb[204].mxu0 }
0x1b45   :  { %v13663_v5 = vpop.f32.mrb[205].mxu0  ;;  %v9910_v2 = vsel %vm4226_vm7, %v9582_v49, -inf }
0x1b46   :  { %9911 = vmax.xlane.f32.xlu0 %v9910_v2  ;;  %v9585_v57 = vpop.f32.mrb[206].mxu0  ;;  %v9628_v31 = vpop.f32.mrb[204].mxu1 }
0x1b47   :  { %v13664_v46 = vpop.f32.mrb[207].mxu0  ;;  %v13669_v17 = vpop.f32.mrb[205].mxu1  ;;  %v9913_v29 = vsel %vm4226_vm7, %v9628_v31, -inf }
0x1b48   :  { %v9631_v11 = vpop.f32.mrb[206].mxu1 }
0x1b49   :  { %v13670_v24 = vpop.f32.mrb[207].mxu1 }
0x1b4a   :  { %9914 = vmax.xlane.f32.xlu0 %v9913_v29 }
0x1b4c   :  { %v9674_v58 = vpop.f32.mrb[208].mxu0 }
0x1b4d   :  { %v13675_v63 = vpop.f32.mrb[209].mxu0  ;;  %v9916_v10 = vsel %vm4226_vm7, %v9674_v58, -inf }
0x1b4e   :  { %9917 = vmax.xlane.f32.xlu1 %v9916_v10  ;;  %v9677_v28 = vpop.f32.mrb[210].mxu0  ;;  %v9720_v33 = vpop.f32.mrb[208].mxu1 }
0x1b4f   :  { %v13676_v6 = vpop.f32.mrb[211].mxu0  ;;  %v13681_v9 = vpop.f32.mrb[209].mxu1  ;;  %v9919_v5 = vsel %vm4226_vm7, %v9720_v33, -inf }
0x1b50   :  { %9920 = vmax.xlane.f32.xlu0 %v9919_v5  ;;  %v9723_v2 = vpop.f32.mrb[210].mxu1 }
0x1b51   :  { %v13682_v57 = vpop.f32.mrb[211].mxu1 }
0x1b54   :  { %v9766_v46 = vpop.f32.mrb[212].mxu0 }
0x1b55   :  { %v13687_v17 = vpop.f32.mrb[213].mxu0  ;;  %v9922_v11 = vsel %vm4226_vm7, %v9766_v46, -inf }
0x1b56   :  { %9923 = vmax.xlane.f32.xlu1 %v9922_v11  ;;  %v9769_v24 = vpop.f32.mrb[214].mxu0  ;;  %v9812_v29 = vpop.f32.mrb[212].mxu1 }
0x1b57   :  { %v13688_v63 = vpop.f32.mrb[215].mxu0  ;;  %v13693_v53 = vpop.f32.mrb[213].mxu1  ;;  %v9925_v10 = vsel %vm4226_vm7, %v9812_v29, -inf }
0x1b58   :  { %9926 = vmax.xlane.f32.xlu0 %v9925_v10  ;;  %v9815_v28 = vpop.f32.mrb[214].mxu1 }
0x1b59   :  { %v13694_v6 = vpop.f32.mrb[215].mxu1 }
0x1b5c   :  { %v9858_v9 = vpop.f32.mrb[216].mxu0 }
0x1b5d   :  { %v13699_v18 = vpop.f32.mrb[217].mxu0  ;;  %v9928_v5 = vsel %vm4226_vm7, %v9858_v9, -inf }
0x1b5e   :  { %9929 = vmax.xlane.f32.xlu1 %v9928_v5  ;;  %v9861_v2 = vpop.f32.mrb[218].mxu0  ;;  %v9904_v57 = vpop.f32.mrb[216].mxu1 }
0x1b5f   :  { %v13700_v17 = vpop.f32.mrb[219].mxu0  ;;  %v13705_v23 = vpop.f32.mrb[217].mxu1  ;;  %v9931_v24 = vsel %vm4226_vm7, %v9904_v57, -inf }
0x1b60   :  { %v9907_v56 = vpop.f32.mrb[218].mxu1 }
0x1b61   :  { %v13706_v11 = vpop.f32.mrb[219].mxu1 }
0x1b62   :  { %9932 = vmax.xlane.f32.xlu1 %v9931_v24 }
0x1bd3   :  { %v9912_v53 = vpop.xlane.xlu0 %9911 }
0x1bd4   :  { %v9934_v63 = vsub.f32 %v9582_v49, %v9912_v53 }
0x1bd6   :  { %v9942_v51 = vmul.f32 1.442695, %v9934_v63 }
0x1bd7   :  { %v9915_v10 = vpop.xlane.xlu0 %9914 }
0x1bd8   :  { %15491 = vpow2.f32 %v9942_v51  ;;  %v9935_v28 = vsub.f32 %v9628_v31, %v9915_v10 }
0x1bda   :  { %v9944_v6 = vmul.f32 1.442695, %v9935_v28 }
0x1bdb   :  { %v9918_v18 = vpop.xlane.xlu1 %9917 }
0x1bdc   :  { %15493 = vpow2.f32 %v9944_v6  ;;  %v9936_v38 = vsub.f32 %v9674_v58, %v9918_v18 }
0x1bdd   :  { %v9921_v5 = vpop.xlane.xlu0 %9920 }
0x1bde   :  { %v9946_v2 = vmul.f32 1.442695, %v9936_v38  ;;  %v9937_v36 = vsub.f32 %v9720_v33, %v9921_v5 }
0x1be0   :  { %15495 = vpow2.f32 %v9946_v2  ;;  %v9948_v23 = vmul.f32 1.442695, %v9937_v36 }
0x1be2   :  { %v15492_v56 = vpop.eup %15491  ;;  %15497 = vpow2.f32 %v9948_v23 }
0x1be3   :  { %v9924_v17 = vpop.xlane.xlu1 %9923  ;;  %v9958_v11 = vsel %vm4226_vm7, %v15492_v56, 0.0 }
0x1be4   :  { %v9938_v24 = vsub.f32 %v9766_v46, %v9924_v17  ;;  %9959 = vadd.xlane.f32.xlu0 %v9958_v11 }
0x1be5   :  { %v9927_v49 = vpop.xlane.xlu0 %9926 }
0x1be6   :  { %v15494_v53 = vpop.eup %15493  ;;  %v9950_v51 = vmul.f32 1.442695, %v9938_v24  ;;  %v9939_v31 = vsub.f32 %v9812_v29, %v9927_v49 }
0x1be7   :  { %v9961_v63 = vsel %vm4226_vm7, %v15494_v53, 0.0 }
0x1be8   :  { %15499 = vpow2.f32 %v9950_v51  ;;  %v9952_v58 = vmul.f32 1.442695, %v9939_v31  ;;  %9962 = vadd.xlane.f32.xlu0 %v9961_v63 }
0x1bea   :  { %v15496_v38 = vpop.eup %15495  ;;  %15501 = vpow2.f32 %v9952_v58 }
0x1beb   :  { %v9930_v33 = vpop.xlane.xlu1 %9929  ;;  %v9964_v36 = vsel %vm4226_vm7, %v15496_v38, 0.0 }
0x1bec   :  { %v15498_v10 = vpop.eup %15497  ;;  %v9940_v28 = vsub.f32 %v9858_v9, %v9930_v33  ;;  %9965 = vadd.xlane.f32.xlu1 %v9964_v36 }
0x1bed   :  { %v9967_v46 = vsel %vm4226_vm7, %v15498_v10, 0.0 }
0x1bee   :  { %v9954_v6 = vmul.f32 1.442695, %v9940_v28  ;;  %9968 = vadd.xlane.f32.xlu0 %v9967_v46 }
0x1bef   :  { %v9933_v18 = vpop.xlane.xlu1 %9932 }
0x1bf0   :  { %15503 = vpow2.f32 %v9954_v6  ;;  %v9941_v29 = vsub.f32 %v9904_v57, %v9933_v18  ;;  %v10102_v18 = vsel %vm4327_vm6, %v18026_v26, 0 }
0x1bf2   :  { %v15500_v5 = vpop.eup %15499  ;;  %v9956_v2 = vmul.f32 1.442695, %v9941_v29 }
0x1bf3   :  { %v9970_v23 = vsel %vm4226_vm7, %v15500_v5, 0.0 }
0x1bf4   :  { %v15502_v17 = vpop.eup %15501  ;;  %15505 = vpow2.f32 %v9956_v2  ;;  %9971 = vadd.xlane.f32.xlu1 %v9970_v23 }
0x1bf5   :  { %v9973_v11 = vsel %vm4226_vm7, %v15502_v17, 0.0 }
0x1bf6   :  { %9974 = vadd.xlane.f32.xlu0 %v9973_v11 }
0x1bfa   :  { %v18093_v24 = vpop.eup %15503 }
0x1bfb   :  { %v9976_v9 = vsel %vm4226_vm7, %v18093_v24, 0.0 }
0x1bfc   :  { %9977 = vadd.xlane.f32.xlu1 %v9976_v9 }
0x1bfe   :  { %v18097_v49 = vpop.eup %15505 }
0x1bff   :  { %v9979_v57 = vsel %vm4226_vm7, %v18097_v49, 0.0 }
0x1c00   :  { %9980 = vadd.xlane.f32.xlu1 %v9979_v57 }
0x1c71   :  { %v9960_v51 = vpop.xlane.xlu0 %9959 }
0x1c72   :  { %15507 = vrcp.f32 %v9960_v51  ;;  %v10194_v51 = vsel %vm4327_vm6, %v18040_v21, 0 }
0x1c75   :  { %v9963_v31 = vpop.xlane.xlu0 %9962 }
0x1c76   :  { %15509 = vrcp.f32 %v9963_v31 }
0x1c79   :  { %v9966_v63 = vpop.xlane.xlu1 %9965 }
0x1c7a   :  { %15511 = vrcp.f32 %v9966_v63 }
0x1c7b   :  { %v9969_v58 = vpop.xlane.xlu0 %9968 }
0x1c7c   :  { %v15508_v33 = vpop.eup %15507  ;;  %15513 = vrcp.f32 %v9969_v58 }
0x1c7d   :  { %v9990_v36 = vmul.f32 %v15508_v33, %v15492_v56 }
0x1c7f   :  { %v9998_v28 = vpack.c.bf16 %v9990_v36, %v9990_v36 }
0x1c80   :  { %v15510_v46 = vpop.eup %15509 }
0x1c81   :  { %v9991_v6 = vmul.f32 %v15510_v46, %v15494_v53  ;;  %13710 = vmatmul.mubr.msk.bf16.vlgmr.msra.gmra.mrb[220].mxu0 %vm4323_vm8, %v9998_v28  ;;  %v9972_v29 = vpop.xlane.xlu1 %9971  ;;  %v10148_v53 = vsel %vm4327_vm6, %v18032_v1, 0 }
0x1c82   :  { %13720 = vmatpush3.bf16.msra.mxu0 %v10102_v18  ;;  %15515 = vrcp.f32 %v9972_v29  ;;  %13721 = vmatprep.mubr.msk.bf16.mxu0 %vm15799_vm4, %v18564_v34 }
0x1c83   :  { %v9975_v2 = vpop.xlane.xlu0 %9974  ;;  %v9999_v23 = vpack.c.bf16 %v9991_v6, %v9991_v6  ;;  %13731 = vmatprep.subr.bf16.mxu0 %v18564_v34 }
0x1c84   :  { %v15512_v11 = vpop.eup %15511  ;;  %15517 = vrcp.f32 %v9975_v2 }
0x1c85   :  { %v9992_v56 = vmul.f32 %v15512_v11, %v15496_v38  ;;  %13716 = vmatmul.mubr.msk.bf16.vlgmr.msra.gmra.mrb[220].mxu1 %vm4323_vm8, %v9999_v23 }
0x1c86   :  { %v15514_v9 = vpop.eup %15513  ;;  %13726 = vmatpush3.bf16.msra.mxu1 %v10148_v53  ;;  %13727 = vmatprep.mubr.msk.bf16.mxu1 %vm15799_vm4, %v18564_v34 }
0x1c87   :  { %v9993_v26 = vmul.f32 %v15514_v9, %v15498_v10  ;;  %v10000_v57 = vpack.c.bf16 %v9992_v56, %v9992_v56  ;;  %13737 = vmatprep.subr.bf16.mxu1 %v18564_v34  ;;  %v10240_v10 = vsel %vm4327_vm6, %v18046_v41, 0 }
0x1c89   :  { %13722 = vmatmul.mubr.msk.bf16.vlgmr.msra.gmra.mrb[224].mxu0 %vm4323_vm8, %v10000_v57  ;;  %v9978_v38 = vpop.xlane.xlu1 %9977  ;;  %v10001_v1 = vpack.c.bf16 %v9993_v26, %v9993_v26 }
0x1c8a   :  { %13732 = vmatpush3.bf16.msra.mxu0 %v10194_v51  ;;  %15519 = vrcp.f32 %v9978_v38  ;;  %13733 = vmatprep.mubr.msk.bf16.mxu0 %vm15799_vm4, %v18564_v34 }
0x1c8b   :  { %13743 = vmatprep.subr.bf16.mxu0 %v18564_v34 }
0x1c8c   :  { %v15516_v31 = vpop.eup %15515 }
0x1c8d   :  { %v9994_v63 = vmul.f32 %v15516_v31, %v15500_v5  ;;  %13728 = vmatmul.mubr.msk.bf16.vlgmr.msra.gmra.mrb[224].mxu1 %vm4323_vm8, %v10001_v1  ;;  %v9981_v58 = vpop.xlane.xlu1 %9980  ;;  %v10286_v5 = vsel %vm4327_vm6, %v18054_v30, 0 }
0x1c8e   :  { %v15518_v33 = vpop.eup %15517  ;;  %13738 = vmatpush3.bf16.msra.mxu1 %v10240_v10  ;;  %15521 = vrcp.f32 %v9981_v58  ;;  %13739 = vmatprep.mubr.msk.bf16.mxu1 %vm15799_vm4, %v18564_v34 }
0x1c8f   :  { %v9995_v21 = vmul.f32 %v15518_v33, %v15502_v17  ;;  %v10002_v36 = vpack.c.bf16 %v9994_v63, %v9994_v63  ;;  %13749 = vmatprep.subr.bf16.mxu1 %v18564_v34  ;;  %v10332_v17 = vsel %vm4327_vm6, %v18060_v54, 0  ;;  %v18624_v33 = vld [vmem:[#allocation22_spill] sm:$0xff] }
0x1c91   :  { %13734 = vmatmul.mubr.msk.bf16.vlgmr.msra.gmra.mrb[228].mxu0 %vm4323_vm8, %v10002_v36  ;;  %v10003_v41 = vpack.c.bf16 %v9995_v21, %v9995_v21 }
0x1c92   :  { %13744 = vmatpush3.bf16.msra.mxu0 %v10286_v5  ;;  %13745 = vmatprep.mubr.msk.bf16.mxu0 %vm15799_vm4, %v18564_v34  ;;  %v18625_v5 = vld [vmem:[#allocation23_spill] sm:$0xff] }
0x1c93   :  { %14908 = vmatprep.subr.bf16.mxu0 %v17874_v15 }
0x1c94   :  { %v15520_v28 = vpop.eup %15519 }
0x1c95   :  { %v9996_v46 = vmul.f32 %v15520_v28, %v18093_v24  ;;  %13740 = vmatmul.mubr.msk.bf16.vlgmr.msra.gmra.mrb[228].mxu1 %vm4323_vm8, %v10003_v41 }
0x1c96   :  { %13750 = vmatpush3.bf16.msra.mxu1 %v10332_v17  ;;  %13751 = vmatprep.mubr.msk.bf16.mxu1 %vm15799_vm4, %v18564_v34 }
0x1c97   :  { %v10004_v30 = vpack.c.bf16 %v9996_v46, %v9996_v46  ;;  %14940 = vmatprep.subr.bf16.mxu1 %v17882_v61  ;;  %v18179_v61 = vld [vmem:[#allocation3] sm:$0xf] }
0x1c98   :  { %v15522_v6 = vpop.eup %15521 }
0x1c99   :  { %v9997_v18 = vmul.f32 %v15522_v6, %v18097_v49  ;;  %13746 = vmatmul.mubr.msk.bf16.vlgmr.msra.gmra.mrb[232].mxu0 %vm4323_vm8, %v10004_v30  ;;  %v18626_v6 = vld [vmem:[#allocation24_spill] sm:$0xff] }
0x1c9a   :  { %14910 = vmatpush1.bf16.msra.mxu0 %v17888_v8  ;;  %10533 = vmatprep.mubr.f32.mxu0 %v18564_v34  ;;  %v18185_v8 = vld [vmem:[#allocation3 + $0x4] sm:$0xf] }
0x1c9b   :  { %14912 = vmatprep.subr.bf16.mxu0 %v17892_v3  ;;  %v10005_v15 = vpack.c.bf16 %v9997_v18, %v9997_v18 }
0x1c9d   :  { %13752 = vmatmul.mubr.msk.bf16.vlgmr.msra.gmra.mrb[232].mxu1 %vm4323_vm8, %v10005_v15 }
0x1c9e   :  { %14914 = vmatpush1.bf16.msra.mxu0 %v17898_v13  ;;  %14942 = vmatpush1.bf16.msra.mxu1 %v17900_v22 }
0x1c9f   :  { %14916 = vmatprep.subr.bf16.mxu0 %v17904_v19  ;;  %14944 = vmatprep.subr.bf16.mxu1 %v17906_v16 }
0x1ca0   :  { %10604 = vmatprep.mubr.f32.mxu1 %v18564_v34 }
0x1ca2   :  { %14918 = vmatpush1.bf16.msra.mxu0 %v17911_v20  ;;  %14946 = vmatpush1.bf16.msra.mxu1 %v17913_v48 }
0x1ca3   :  { %14920 = vmatprep.subr.bf16.mxu0 %v17917_v47  ;;  %14948 = vmatprep.subr.bf16.mxu1 %v17919_v52 }
0x1ca6   :  { %14922 = vmatpush1.bf16.msra.mxu0 %v17924_v59  ;;  %14950 = vmatpush1.bf16.msra.mxu1 %v17926_v37 }
0x1ca7   :  { %14924 = vmatprep.subr.bf16.mxu0 %v17930_v62  ;;  %14952 = vmatprep.subr.bf16.mxu1 %v17932_v55 }
0x1caa   :  { %14926 = vmatpush1.bf16.msra.mxu0 %v17936_v7  ;;  %14954 = vmatpush1.bf16.msra.mxu1 %v17938_v27 }
0x1cab   :  { %14928 = vmatprep.subr.bf16.mxu0 %v17942_v60  ;;  %14956 = vmatprep.subr.bf16.mxu1 %v17944_v44 }
0x1cae   :  { %14930 = vmatpush1.bf16.msra.mxu0 %v17948_v40  ;;  %14958 = vmatpush1.bf16.msra.mxu1 %v17950_v32 }
0x1caf   :  { %14932 = vmatprep.subr.bf16.mxu0 %v17954_v43  ;;  %14960 = vmatprep.subr.bf16.mxu1 %v17956_v4 }
0x1cb2   :  { %14934 = vmatpush1.bf16.msra.mxu0 %v17960_v35  ;;  %14962 = vmatpush1.bf16.msra.mxu1 %v17962_v50 }
0x1cb3   :  { %14936 = vmatprep.subr.bf16.mxu0 %v17966_v25  ;;  %14964 = vmatprep.subr.bf16.mxu1 %v17968_v42 }
0x1cb6   :  { %14938 = vmatpush1.bf16.msra.mxu0 %v17972_v45  ;;  %14966 = vmatpush1.bf16.msra.mxu1 %v17974_v39 }
0x1cb7   :  { %14968 = vmatprep.subr.bf16.mxu1 %v17978_v14  ;;  %13755 = vmatprep.subr.bf16.mxu0 %v18564_v34 }
0x1cb9   :  { %10534 = vmatmul.mubr.f32.vlgmr.msra.gmra.mrb[236].mxu0 %v18018_v0 }
0x1cba   :  { %14970 = vmatpush1.bf16.msra.mxu1 %v17982_v12  ;;  %13757 = vmatprep.mubr.msk.bf16.mxu0 %vm15799_vm4, %v18564_v34 }
0x1cbb   :  { %13761 = vmatprep.subr.bf16.mxu1 %v18564_v34 }
0x1cbd   :  { %10605 = vmatmul.mubr.f32.vlgmr.msra.gmra.mrb[236].mxu1 %v18018_v0 }
0x1cbe   :  { %13763 = vmatprep.mubr.msk.bf16.mxu1 %vm15799_vm4, %v18564_v34 }
0x1cbf   :  { %13756 = vmatpush3.bf16.xpose.msra.mxu0 %v18179_v61 }
0x1cc0   :  { %13767 = vmatprep.subr.bf16.mxu0 %v18564_v34 }
0x1cc3   :  { %13762 = vmatpush3.bf16.xpose.msra.mxu1 %v18185_v8 }
0x1cc4   :  { %13773 = vmatprep.subr.bf16.mxu1 %v18564_v34 }
0x1d54   :  { %v10046_v3 = vpop.f32.mrb[220].mxu0 }
0x1d55   :  { %v13711_v13 = vpop.f32.mrb[221].mxu0 }
0x1d56   :  { %v10049_v22 = vpop.f32.mrb[222].mxu0 }
0x1d57   :  { %v13712_v19 = vpop.f32.mrb[223].mxu0 }
0x1d58   :  { %v10092_v16 = vpop.f32.mrb[220].mxu1 }
0x1d59   :  { %v10382_v20 = vrot.slane %v10092_v16, 7  ;;  %v13717_v48 = vpop.f32.mrb[221].mxu1 }
0x1d5a   :  { %v10095_v47 = vpop.f32.mrb[222].mxu1 }
0x1d5b   :  { %v10383_v52 = vsel %vm1620_vm5, %v10382_v20, %v10046_v3  ;;  %v13718_v59 = vpop.f32.mrb[223].mxu1  ;;  %v18627_v3 = vld [vmem:[#allocation25_spill] sm:$0xff] }
0x1d5c   :  { %v10138_v37 = vpop.f32.mrb[224].mxu0 }
0x1d5d   :  { %v10384_v62 = vrot.slane %v10138_v37, 6  ;;  %v13723_v55 = vpop.f32.mrb[225].mxu0 }
0x1d5e   :  { %v10141_v7 = vpop.f32.mrb[226].mxu0 }
0x1d5f   :  { %v10385_v27 = vsel %vm2361_vm10, %v10384_v62, %v10383_v52  ;;  %v13724_v60 = vpop.f32.mrb[227].mxu0  ;;  %v18628_v62 = vld [vmem:[#allocation28_spill] sm:$0xff] }
0x1d60   :  { %v10184_v44 = vpop.f32.mrb[224].mxu1 }
0x1d61   :  { %v10386_v40 = vrot.slane %v10184_v44, 5  ;;  %v13729_v32 = vpop.f32.mrb[225].mxu1 }
0x1d62   :  { %v10187_v43 = vpop.f32.mrb[226].mxu1  ;;  %v18629_v32 = vld [vmem:[#allocation40_spill] sm:$0xff] }
0x1d63   :  { %v10387_v4 = vsel %vm3102_vm15, %v10386_v40, %v10385_v27  ;;  %v13730_v35 = vpop.f32.mrb[227].mxu1 }
0x1d64   :  { %v10230_v50 = vpop.f32.mrb[228].mxu0 }
0x1d65   :  { %v10388_v25 = vrot.slane %v10230_v50, 4  ;;  %v13735_v42 = vpop.f32.mrb[229].mxu0 }
0x1d66   :  { %v10233_v45 = vpop.f32.mrb[230].mxu0 }
0x1d67   :  { %v10389_v39 = vsel %vm4711_vm9, %v10388_v25, %v10387_v4  ;;  %v13736_v14 = vpop.f32.mrb[231].mxu0  ;;  %v18630_v45 = vld [vmem:[#allocation21_spill] sm:$0xff] }
0x1d68   :  { %v10276_v12 = vpop.f32.mrb[228].mxu1 }
0x1d69   :  { %v10390_v54 = vrot.slane %v10276_v12, 3  ;;  %v13741_v24 = vpop.f32.mrb[229].mxu1  ;;  %v18213_v12 = vld [vmem:[#allocation3 + $0x8] sm:$0xf] }
0x1d6a   :  { %v10279_v49 = vpop.f32.mrb[230].mxu1 }
0x1d6b   :  { %v10391_v29 = vsel %vm4714_vm11, %v10390_v54, %v10389_v39  ;;  %v13742_v2 = vpop.f32.mrb[231].mxu1  ;;  %v18219_v49 = vld [vmem:[#allocation3 + $0xc] sm:$0xf] }
0x1d6c   :  { %v10322_v23 = vpop.f32.mrb[232].mxu0 }
0x1d6d   :  { %v10392_v11 = vrot.slane %v10322_v23, 2  ;;  %v13747_v56 = vpop.f32.mrb[233].mxu0 }
0x1d6e   :  { %v10325_v53 = vpop.f32.mrb[234].mxu0  ;;  %v18227_v56 = vld [vmem:[#allocation3 + $0x10] sm:$0xf] }
0x1d6f   :  { %v10393_v9 = vsel %vm4717_vm12, %v10392_v11, %v10391_v29  ;;  %v13748_v26 = vpop.f32.mrb[235].mxu0 }
0x1d70   :  { %v10368_v57 = vpop.f32.mrb[232].mxu1  ;;  %v18233_v26 = vld [vmem:[#allocation3 + $0x14] sm:$0xf] }
0x1d71   :  { %v10394_v51 = vrot.slane %v10368_v57, 1  ;;  %v13753_v38 = vpop.f32.mrb[233].mxu1 }
0x1d72   :  { %v10371_v1 = vpop.f32.mrb[234].mxu1 }
0x1d73   :  { %v10395_v31 = vsel %vm4720_vm13, %v10394_v51, %v10393_v9  ;;  %v13754_v63 = vpop.f32.mrb[235].mxu1 }
0x1d74   :  { %v12920_v10 = vpack.c.bf16 %v10395_v31, %v18018_v0  ;;  %v18241_v31 = vld [vmem:[#allocation3 + $0x18] sm:$0xf] }
0x1d76   :  { %10404 = vst [vmem:[#allocation15 + $0x28] sm:$0xff] %v12920_v10 }
0x1d8c   :  { %v10535_v58 = vpop.f32.mrb[236].mxu0 }
0x1d8d   :  { %v10536_v21 = vadd.f32 %v10535_v58, %v18624_v33  ;;  %v10537_v36 = vpop.f32.mrb[237].mxu0  ;;  %v18247_v58 = vld [vmem:[#allocation3 + $0x1c] sm:$0xf] }
0x1d8e   :  { %v10538_v41 = vadd.f32 %v10537_v36, %v18625_v5 }
0x1d8f   :  { %v12883_v28 = vmul.f32 -1.442695, %v10536_v21 }
0x1d90   :  { %v12884_v46 = vmul.f32 -1.442695, %v10538_v41  ;;  %v10606_v17 = vpop.f32.mrb[236].mxu1 }
0x1d91   :  { %15523 = vpow2.f32 %v12883_v28  ;;  %v10608_v30 = vpop.f32.mrb[237].mxu1  ;;  %v10607_v18 = vadd.f32 %v10606_v17, %v18626_v6  ;;  %v11145_v28 = vsel %vm4327_vm6, %v18179_v61, 0  ;;  %v11191_v17 = vsel %vm4327_vm6, %v18185_v8, 0 }
0x1d92   :  { %15525 = vpow2.f32 %v12884_v46  ;;  %v10609_v13 = vadd.f32 %v10608_v30, %v18627_v3 }
0x1d93   :  { %v12885_v15 = vmul.f32 -1.442695, %v10607_v18 }
0x1d95   :  { %15527 = vpow2.f32 %v12885_v15 }
0x1d96   :  { %15529 = vtanh.f32 %v10609_v13 }
0x1d9b   :  { %v15524_v22 = vpop.eup %15523 }
0x1d9c   :  { %v15526_v0 = vpop.eup %15525  ;;  %v10620_v19 = vadd.f32 1.0, %v15524_v22 }
0x1d9d   :  { %v10621_v16 = vadd.f32 1.0, %v15526_v0 }
0x1d9e   :  { %15531 = vrcp.f32 %v10620_v19 }
0x1d9f   :  { %15533 = vrcp.f32 %v10621_v16  ;;  %v15528_v20 = vpop.eup %15527 }
0x1da0   :  { %v15530_v48 = vpop.eup %15529  ;;  %v10622_v59 = vadd.f32 1.0, %v15528_v20 }
0x1da2   :  { %15535 = vrcp.f32 %v10622_v59 }
0x1da8   :  { %v15532_v47 = vpop.eup %15531 }
0x1da9   :  { %v15534_v52 = vpop.eup %15533  ;;  %v10631_v37 = vmul.f32 %v15532_v47, %v15530_v48 }
0x1daa   :  { %v10630_v55 = vmul.f32 %v15534_v52, %v18628_v62 }
0x1dac   :  { %v18202_v7 = vadd.f32 %v10631_v37, %v10630_v55  ;;  %v15536_v27 = vpop.eup %15535 }
0x1dae   :  { %15537 = vtanh.f32 %v18202_v7 }
0x1db8   :  { %v15538_v60 = vpop.eup %15537 }
0x1db9   :  { %v18205_v44 = vmul.f32 %v15538_v60, %v15536_v27 }
0x1dbb   :  { %v10643_v40 = vpack.c.bf16 %v18205_v44, %v18205_v44 }
0x1dbd   :  { %v10651_v43 = vrot.slane %v10643_v40, %v18629_v32 }
0x1dbf   :  { %v10659_v4 = vrot.slane %v10651_v43, %v18629_v32  ;;  %v10652_v35 = vcombine.high %v10651_v43, %v10651_v43 }
0x1dc1   :  { %v12886_v50 = vpack.i.b16 %v10659_v4, %v10659_v4  ;;  %v10670_v25 = vunpack.i.h.s16 %v10659_v4  ;;  %v10666_v42 = vrot.slane %v10652_v35, %v18629_v32  ;;  %v10667_v23 = vcombine.high %v10659_v4, %v10659_v4 }
0x1dc3   :  { %v10681_v39 = vrot.slane %v12886_v50, %v18630_v45  ;;  %v10723_v14 = vpack.i.b16 %v10670_v25, %v10670_v25  ;;  %v10672_v24 = vunpack.i.h.s16 %v10666_v42  ;;  %v12887_v29 = vpack.i.b16 %v10666_v42, %v10666_v42 }
0x1dc4   :  { %v10674_v9 = vunpack.i.h.s16 %v10667_v23  ;;  %v12888_v57 = vpack.i.b16 %v10667_v23, %v10667_v23  ;;  %v10668_v38 = vcombine.high %v10666_v42, %v10666_v42 }
0x1dc5   :  { %13758 = vmatmul.mubr.bf16.vlgmr.msra.gmra.mrb[240].mxu0 %v10681_v39  ;;  %v10727_v54 = vrot.slane %v10723_v14, %v18630_v45  ;;  %v10815_v2 = vpack.i.b16 %v10672_v24, %v10672_v24  ;;  %v10773_v11 = vrot.slane %v12887_v29, %v18630_v45 }
0x1dc6   :  { %13768 = vmatpush3.bf16.xpose.msra.mxu0 %v18213_v12  ;;  %13769 = vmatprep.mubr.msk.bf16.mxu0 %vm15799_vm4, %v18564_v34  ;;  %v10907_v51 = vpack.i.b16 %v10674_v9, %v10674_v9  ;;  %v10865_v1 = vrot.slane %v12888_v57, %v18630_v45  ;;  %v10676_v10 = vunpack.i.h.s16 %v10668_v38  ;;  %v12889_v21 = vpack.i.b16 %v10668_v38, %v10668_v38 }
0x1dc7   :  { %13764 = vmatmul.mubr.bf16.vlgmr.msra.gmra.mrb[240].mxu1 %v10727_v54  ;;  %13779 = vmatprep.subr.bf16.mxu0 %v18564_v34  ;;  %v10819_v53 = vrot.slane %v10815_v2, %v18630_v45 }
0x1dc8   :  { %13774 = vmatpush3.bf16.xpose.msra.mxu1 %v18219_v49  ;;  %13775 = vmatprep.mubr.msk.bf16.mxu1 %vm15799_vm4, %v18564_v34  ;;  %v10911_v63 = vrot.slane %v10907_v51, %v18630_v45  ;;  %v10999_v36 = vpack.i.b16 %v10676_v10, %v10676_v10  ;;  %v10957_v41 = vrot.slane %v12889_v21, %v18630_v45 }
0x1dc9   :  { %13785 = vmatprep.subr.bf16.mxu1 %v18564_v34 }
0x1dca   :  { %v11003_v46 = vrot.slane %v10999_v36, %v18630_v45 }
0x1dcd   :  { %13770 = vmatmul.mubr.bf16.vlgmr.msra.gmra.mrb[244].mxu0 %v10773_v11 }
0x1dce   :  { %13780 = vmatpush3.bf16.xpose.msra.mxu0 %v18227_v56  ;;  %13781 = vmatprep.mubr.msk.bf16.mxu0 %vm15799_vm4, %v18564_v34 }
0x1dcf   :  { %13776 = vmatmul.mubr.bf16.vlgmr.msra.gmra.mrb[244].mxu1 %v10819_v53  ;;  %13791 = vmatprep.subr.bf16.mxu0 %v18564_v34 }
0x1dd0   :  { %13786 = vmatpush3.bf16.xpose.msra.mxu1 %v18233_v26  ;;  %13787 = vmatprep.mubr.msk.bf16.mxu1 %vm15799_vm4, %v18564_v34 }
0x1dd1   :  { %13797 = vmatprep.subr.bf16.mxu1 %v18564_v34 }
0x1dd5   :  { %13782 = vmatmul.mubr.bf16.vlgmr.msra.gmra.mrb[248].mxu0 %v10865_v1 }
0x1dd6   :  { %13792 = vmatpush3.bf16.xpose.msra.mxu0 %v18241_v31  ;;  %13793 = vmatprep.mubr.msk.bf16.mxu0 %vm15799_vm4, %v18564_v34 }
0x1dd7   :  { %13788 = vmatmul.mubr.bf16.vlgmr.msra.gmra.mrb[248].mxu1 %v10911_v63  ;;  %13803 = vmatprep.subr.bf16.mxu0 %v18564_v34 }
0x1dd8   :  { %13798 = vmatpush3.bf16.xpose.msra.mxu1 %v18247_v58  ;;  %13799 = vmatprep.mubr.msk.bf16.mxu1 %vm15799_vm4, %v18564_v34 }
0x1dd9   :  { %13809 = vmatprep.subr.bf16.mxu1 %v18564_v34 }
0x1ddd   :  { %13794 = vmatmul.mubr.bf16.vlgmr.msra.gmra.mrb[252].mxu0 %v10957_v41 }
0x1dde   :  { %13804 = vmatpush3.bf16.msra.mxu0 %v11145_v28  ;;  %13805 = vmatprep.mubr.msk.bf16.mxu0 %vm15799_vm4, %v18564_v34 }
0x1ddf   :  { %13800 = vmatmul.mubr.bf16.vlgmr.msra.gmra.mrb[252].mxu1 %v11003_v46  ;;  %13815 = vmatprep.subr.bf16.mxu0 %v18564_v34 }
0x1de0   :  { %13810 = vmatpush3.bf16.msra.mxu1 %v11191_v17  ;;  %13811 = vmatprep.mubr.msk.bf16.mxu1 %vm15799_vm4, %v18564_v34 }
0x1de1   :  { %13821 = vmatprep.subr.bf16.mxu1 %v18564_v34 }
0x1e98   :  { %v10717_v30 = vpop.f32.mrb[240].mxu0 }
0x1e99   :  { %v13759_v61 = vpop.f32.mrb[241].mxu0  ;;  %v11045_v18 = vsel %vm4226_vm7, %v10717_v30, -inf }
0x1e9a   :  { %11046 = vmax.xlane.f32.xlu0 %v11045_v18  ;;  %v10720_v15 = vpop.f32.mrb[242].mxu0  ;;  %v10763_v13 = vpop.f32.mrb[240].mxu1 }
0x1e9b   :  { %v13760_v22 = vpop.f32.mrb[243].mxu0  ;;  %v13765_v0 = vpop.f32.mrb[241].mxu1  ;;  %v11048_v8 = vsel %vm4226_vm7, %v10763_v13, -inf }
0x1e9c   :  { %v10766_v19 = vpop.f32.mrb[242].mxu1 }
0x1e9d   :  { %v13766_v16 = vpop.f32.mrb[243].mxu1 }
0x1e9e   :  { %11049 = vmax.xlane.f32.xlu0 %v11048_v8 }
0x1ea0   :  { %v10809_v20 = vpop.f32.mrb[244].mxu0 }
0x1ea1   :  { %v13771_v48 = vpop.f32.mrb[245].mxu0  ;;  %v11051_v47 = vsel %vm4226_vm7, %v10809_v20, -inf }
0x1ea2   :  { %11052 = vmax.xlane.f32.xlu1 %v11051_v47  ;;  %v10812_v52 = vpop.f32.mrb[246].mxu0  ;;  %v10855_v59 = vpop.f32.mrb[244].mxu1 }
0x1ea3   :  { %v13772_v37 = vpop.f32.mrb[247].mxu0  ;;  %v13777_v62 = vpop.f32.mrb[245].mxu1  ;;  %v11054_v55 = vsel %vm4226_vm7, %v10855_v59, -inf }
0x1ea4   :  { %11055 = vmax.xlane.f32.xlu0 %v11054_v55  ;;  %v10858_v27 = vpop.f32.mrb[246].mxu1 }
0x1ea5   :  { %v13778_v60 = vpop.f32.mrb[247].mxu1 }
0x1ea8   :  { %v10901_v40 = vpop.f32.mrb[248].mxu0 }
0x1ea9   :  { %v13783_v43 = vpop.f32.mrb[249].mxu0  ;;  %v11057_v4 = vsel %vm4226_vm7, %v10901_v40, -inf }
0x1eaa   :  { %11058 = vmax.xlane.f32.xlu1 %v11057_v4  ;;  %v10904_v35 = vpop.f32.mrb[250].mxu0  ;;  %v10947_v50 = vpop.f32.mrb[248].mxu1 }
0x1eab   :  { %v13784_v25 = vpop.f32.mrb[251].mxu0  ;;  %v13789_v42 = vpop.f32.mrb[249].mxu1  ;;  %v11060_v39 = vsel %vm4226_vm7, %v10947_v50, -inf }
0x1eac   :  { %11061 = vmax.xlane.f32.xlu0 %v11060_v39  ;;  %v10950_v14 = vpop.f32.mrb[250].mxu1 }
0x1ead   :  { %v13790_v54 = vpop.f32.mrb[251].mxu1 }
0x1eb0   :  { %v10993_v24 = vpop.f32.mrb[252].mxu0 }
0x1eb1   :  { %v13795_v29 = vpop.f32.mrb[253].mxu0  ;;  %v11063_v2 = vsel %vm4226_vm7, %v10993_v24, -inf }
0x1eb2   :  { %11064 = vmax.xlane.f32.xlu1 %v11063_v2  ;;  %v10996_v23 = vpop.f32.mrb[254].mxu0  ;;  %v11039_v11 = vpop.f32.mrb[252].mxu1 }
0x1eb3   :  { %v13796_v53 = vpop.f32.mrb[255].mxu0  ;;  %v13801_v9 = vpop.f32.mrb[253].mxu1  ;;  %v11066_v38 = vsel %vm4226_vm7, %v11039_v11, -inf }
0x1eb4   :  { %v11042_v57 = vpop.f32.mrb[254].mxu1 }
0x1eb5   :  { %v13802_v51 = vpop.f32.mrb[255].mxu1 }
0x1eb6   :  { %11067 = vmax.xlane.f32.xlu1 %v11066_v38 }
0x1f27   :  { %v11047_v1 = vpop.xlane.xlu0 %11046 }
0x1f28   :  { %v11069_v63 = vsub.f32 %v10717_v30, %v11047_v1  ;;  %v11237_v1 = vsel %vm4327_vm6, %v18213_v12, 0 }
0x1f2a   :  { %v11077_v10 = vmul.f32 1.442695, %v11069_v63 }
0x1f2b   :  { %v11050_v21 = vpop.xlane.xlu0 %11049 }
0x1f2c   :  { %15539 = vpow2.f32 %v11077_v10  ;;  %v11070_v36 = vsub.f32 %v10763_v13, %v11050_v21 }
0x1f2e   :  { %v11079_v41 = vmul.f32 1.442695, %v11070_v36 }
0x1f2f   :  { %v11053_v28 = vpop.xlane.xlu1 %11052 }
0x1f30   :  { %15541 = vpow2.f32 %v11079_v41  ;;  %v11071_v46 = vsub.f32 %v10809_v20, %v11053_v28  ;;  %v11283_v28 = vsel %vm4327_vm6, %v18219_v49, 0 }
0x1f31   :  { %v11056_v17 = vpop.xlane.xlu0 %11055 }
0x1f32   :  { %v11081_v61 = vmul.f32 1.442695, %v11071_v46  ;;  %v11072_v18 = vsub.f32 %v10855_v59, %v11056_v17 }
0x1f34   :  { %15543 = vpow2.f32 %v11081_v61  ;;  %v11083_v15 = vmul.f32 1.442695, %v11072_v18  ;;  %v11329_v61 = vsel %vm4327_vm6, %v18227_v56, 0 }
0x1f36   :  { %v15540_v22 = vpop.eup %15539  ;;  %15545 = vpow2.f32 %v11083_v15 }
0x1f37   :  { %v11059_v0 = vpop.xlane.xlu1 %11058  ;;  %v11093_v19 = vsel %vm4226_vm7, %v15540_v22, 0.0 }
0x1f38   :  { %v11073_v16 = vsub.f32 %v10901_v40, %v11059_v0  ;;  %11094 = vadd.xlane.f32.xlu0 %v11093_v19  ;;  %v11545_v0 = vld [vmem:[#allocation13 + $0x28] sm:$0xff] }
0x1f39   :  { %v11062_v30 = vpop.xlane.xlu0 %11061 }
0x1f3a   :  { %v15542_v8 = vpop.eup %15541  ;;  %v11085_v48 = vmul.f32 1.442695, %v11073_v16  ;;  %v11074_v13 = vsub.f32 %v10947_v50, %v11062_v30  ;;  %v11375_v16 = vsel %vm4327_vm6, %v18233_v26, 0  ;;  %v11421_v26 = vsel %vm4327_vm6, %v18241_v31, 0 }
0x1f3b   :  { %v11096_v47 = vsel %vm4226_vm7, %v15542_v8, 0.0 }
0x1f3c   :  { %15547 = vpow2.f32 %v11085_v48  ;;  %v11087_v20 = vmul.f32 1.442695, %v11074_v13  ;;  %11097 = vadd.xlane.f32.xlu0 %v11096_v47  ;;  %v11543_v47 = vld [vmem:[#allocation13 + $0x18] sm:$0xff] }
0x1f3e   :  { %v15544_v52 = vpop.eup %15543  ;;  %15549 = vpow2.f32 %v11087_v20  ;;  %v11547_v20 = vld [vmem:[#allocation13 + $0x38] sm:$0xff] }
0x1f3f   :  { %v11065_v59 = vpop.xlane.xlu1 %11064  ;;  %v11099_v37 = vsel %vm4226_vm7, %v15544_v52, 0.0 }
0x1f40   :  { %v15546_v62 = vpop.eup %15545  ;;  %v11075_v55 = vsub.f32 %v10993_v24, %v11065_v59  ;;  %11100 = vadd.xlane.f32.xlu1 %v11099_v37  ;;  %v11540_v59 = vld [vmem:[#allocation13] sm:$0xff] }
0x1f41   :  { %v11102_v27 = vsel %vm4226_vm7, %v15546_v62, 0.0  ;;  %v11544_v37 = vld [vmem:[#allocation13 + $0x20] sm:$0xff] }
0x1f42   :  { %v11089_v60 = vmul.f32 1.442695, %v11075_v55  ;;  %11103 = vadd.xlane.f32.xlu0 %v11102_v27  ;;  %v11549_v27 = vld [vmem:[#allocation13 + $0x48] sm:$0xff]  ;;  %v14973_v31 = vpack.c.bf16 %v11544_v37, %v11540_v59  ;;  %v11575_v37 = vld [vmem:[#allocation13 + $0x118] sm:$0xff] }
0x1f43   :  { %v11068_v40 = vpop.xlane.xlu1 %11067  ;;  %v11585_v59 = vld [vmem:[#allocation13 + $0x168] sm:$0xff] }
0x1f44   :  { %15551 = vpow2.f32 %v11089_v60  ;;  %v11076_v43 = vsub.f32 %v11039_v11, %v11068_v40  ;;  %v11553_v60 = vld [vmem:[#allocation13 + $0x68] sm:$0xff] }
0x1f46   :  { %v15548_v4 = vpop.eup %15547  ;;  %v11091_v35 = vmul.f32 1.442695, %v11076_v43  ;;  %v11467_v43 = vsel %vm4327_vm6, %v18247_v58, 0 }
0x1f47   :  { %v11105_v50 = vsel %vm4226_vm7, %v15548_v4, 0.0 }
0x1f48   :  { %v18279_v25 = vpop.eup %15549  ;;  %15553 = vpow2.f32 %v11091_v35  ;;  %11106 = vadd.xlane.f32.xlu1 %v11105_v50  ;;  %v11552_v35 = vld [vmem:[#allocation13 + $0x60] sm:$0xff] }
0x1f49   :  { %v11108_v42 = vsel %vm4226_vm7, %v18279_v25, 0.0 }
0x1f4a   :  { %11109 = vadd.xlane.f32.xlu0 %v11108_v42  ;;  %v11542_v42 = vld [vmem:[#allocation13 + $0x10] sm:$0xff] }
0x1f4e   :  { %v18283_v39 = vpop.eup %15551 }
0x1f4f   :  { %v11111_v14 = vsel %vm4226_vm7, %v18283_v39, 0.0 }
0x1f50   :  { %11112 = vadd.xlane.f32.xlu1 %v11111_v14  ;;  %v11546_v14 = vld [vmem:[#allocation13 + $0x30] sm:$0xff] }
0x1f52   :  { %v18287_v54 = vpop.eup %15553 }
0x1f53   :  { %v11114_v24 = vsel %vm4226_vm7, %v18287_v54, 0.0 }
0x1f54   :  { %11115 = vadd.xlane.f32.xlu1 %v11114_v24  ;;  %v11557_v24 = vld [vmem:[#allocation13 + $0x88] sm:$0xff] }
0x1fc5   :  { %v11095_v29 = vpop.xlane.xlu0 %11094 }
0x1fc6   :  { %15555 = vrcp.f32 %v11095_v29 }
0x1fc9   :  { %v11098_v2 = vpop.xlane.xlu0 %11097 }
0x1fca   :  { %15557 = vrcp.f32 %v11098_v2  ;;  %v11551_v2 = vld [vmem:[#allocation13 + $0x58] sm:$0xff] }
0x1fcd   :  { %v11101_v23 = vpop.xlane.xlu1 %11100 }
0x1fce   :  { %15559 = vrcp.f32 %v11101_v23  ;;  %v11555_v23 = vld [vmem:[#allocation13 + $0x78] sm:$0xff] }
0x1fcf   :  { %v11104_v11 = vpop.xlane.xlu0 %11103 }
0x1fd0   :  { %v15556_v53 = vpop.eup %15555  ;;  %15561 = vrcp.f32 %v11104_v11 }
0x1fd1   :  { %v11125_v9 = vmul.f32 %v15556_v53, %v15540_v22  ;;  %v11541_v22 = vld [vmem:[#allocation13 + $0x8] sm:$0xff]  ;;  %v15005_v53 = vpack.c.bf16 %v11546_v14, %v11542_v42  ;;  %v11583_v42 = vld [vmem:[#allocation13 + $0x158] sm:$0xff] }
0x1fd2   :  { %v14971_v13 = vpack.c.bf16 %v11545_v0, %v11541_v22  ;;  %v11573_v22 = vld [vmem:[#allocation13 + $0x108] sm:$0xff]  ;;  %v11587_v14 = vld [vmem:[#allocation13 + $0x178] sm:$0xff] }
0x1fd3   :  { %v11133_v57 = vpack.c.bf16 %v11125_v9, %v11125_v9  ;;  %v11556_v9 = vld [vmem:[#allocation13 + $0x80] sm:$0xff]  ;;  %v11577_v0 = vld [vmem:[#allocation13 + $0x128] sm:$0xff] }
0x1fd4   :  { %v15558_v51 = vpop.eup %15557 }
0x1fd5   :  { %v11126_v38 = vmul.f32 %v15558_v51, %v15542_v8  ;;  %13806 = vmatmul.mubr.msk.bf16.vlgmr.msra.gmra.mrb[0].mxu0 %vm4323_vm8, %v11133_v57  ;;  %v11107_v63 = vpop.xlane.xlu1 %11106  ;;  %v11560_v57 = vld [vmem:[#allocation13 + $0xa0] sm:$0xff] }
0x1fd6   :  { %13816 = vmatpush3.bf16.msra.mxu0 %v11237_v1  ;;  %15563 = vrcp.f32 %v11107_v63  ;;  %13817 = vmatprep.mubr.msk.bf16.mxu0 %vm15799_vm4, %v18564_v34  ;;  %v15007_v1 = vpack.c.bf16 %v11555_v23, %v11551_v2  ;;  %v11550_v63 = vld [vmem:[#allocation13 + $0x50] sm:$0xff]  ;;  %v11592_v2 = vld [vmem:[#allocation13 + $0x1a0] sm:$0xff] }
0x1fd7   :  { %v11134_v10 = vpack.c.bf16 %v11126_v38, %v11126_v38  ;;  %v11110_v21 = vpop.xlane.xlu0 %11109  ;;  %13827 = vmatprep.subr.bf16.mxu0 %v18564_v34 }
0x1fd8   :  { %v15560_v36 = vpop.eup %15559  ;;  %15565 = vrcp.f32 %v11110_v21  ;;  %v11565_v21 = vld [vmem:[#allocation13 + $0xc8] sm:$0xff] }
0x1fd9   :  { %v11127_v41 = vmul.f32 %v15560_v36, %v15544_v52  ;;  %13812 = vmatmul.mubr.msk.bf16.vlgmr.msra.gmra.mrb[0].mxu1 %vm4323_vm8, %v11134_v10  ;;  %v11554_v10 = vld [vmem:[#allocation13 + $0x70] sm:$0xff]  ;;  %v11569_v36 = vld [vmem:[#allocation13 + $0xe8] sm:$0xff] }
0x1fda   :  { %v15562_v46 = vpop.eup %15561  ;;  %13822 = vmatpush3.bf16.msra.mxu1 %v11283_v28  ;;  %13823 = vmatprep.mubr.msk.bf16.mxu1 %vm15799_vm4, %v18564_v34  ;;  %v11563_v28 = vld [vmem:[#allocation13 + $0xb8] sm:$0xff] }
0x1fdb   :  { %v11135_v12 = vpack.c.bf16 %v11127_v41, %v11127_v41  ;;  %v11128_v17 = vmul.f32 %v15562_v46, %v15546_v62  ;;  %13833 = vmatprep.subr.bf16.mxu1 %v18564_v34  ;;  %v15003_v62 = vpack.c.bf16 %v11547_v20, %v11543_v47  ;;  %v11559_v41 = vld [vmem:[#allocation13 + $0x98] sm:$0xff]  ;;  %v15009_v46 = vpack.c.bf16 %v11554_v10, %v11550_v63  ;;  %v11566_v20 = vld [vmem:[#allocation13 + $0xd0] sm:$0xff]  ;;  %v11596_v10 = vld [vmem:[#allocation13 + $0x1c0] sm:$0xff] }
0x1fdd   :  { %13818 = vmatmul.mubr.msk.bf16.vlgmr.msra.gmra.mrb[4].mxu0 %vm4323_vm8, %v11135_v12  ;;  %v11113_v18 = vpop.xlane.xlu1 %11112  ;;  %v11136_v49 = vpack.c.bf16 %v11128_v17, %v11128_v17  ;;  %v11564_v12 = vld [vmem:[#allocation13 + $0xc0] sm:$0xff] }
0x1fde   :  { %13828 = vmatpush3.bf16.msra.mxu0 %v11329_v61  ;;  %15567 = vrcp.f32 %v11113_v18  ;;  %13829 = vmatprep.mubr.msk.bf16.mxu0 %vm15799_vm4, %v18564_v34  ;;  %v11568_v17 = vld [vmem:[#allocation13 + $0xe0] sm:$0xff]  ;;  %v14983_v61 = vpack.c.bf16 %v11569_v36, %v11565_v21  ;;  %v15011_v18 = vpack.c.bf16 %v11563_v28, %v11559_v41  ;;  %v11590_v28 = vld [vmem:[#allocation13 + $0x190] sm:$0xff] }
0x1fdf   :  { %13839 = vmatprep.subr.bf16.mxu0 %v18564_v34  ;;  %v11600_v41 = vld [vmem:[#allocation13 + $0x1e0] sm:$0xff] }
0x1fe0   :  { %v15564_v15 = vpop.eup %15563 }
0x1fe1   :  { %v11129_v19 = vmul.f32 %v15564_v15, %v15548_v4  ;;  %13824 = vmatmul.mubr.msk.bf16.vlgmr.msra.gmra.mrb[4].mxu1 %vm4323_vm8, %v11136_v49  ;;  %v11116_v30 = vpop.xlane.xlu1 %11115  ;;  %v11548_v4 = vld [vmem:[#allocation13 + $0x40] sm:$0xff]  ;;  %v11558_v49 = vld [vmem:[#allocation13 + $0x90] sm:$0xff] }
0x1fe2   :  { %v15566_v56 = vpop.eup %15565  ;;  %13834 = vmatpush3.bf16.msra.mxu1 %v11375_v16  ;;  %15569 = vrcp.f32 %v11116_v30  ;;  %13835 = vmatprep.mubr.msk.bf16.mxu1 %vm15799_vm4, %v18564_v34  ;;  %v14977_v58 = vpack.c.bf16 %v11552_v35, %v11548_v4  ;;  %v11562_v15 = vld [vmem:[#allocation13 + $0xb0] sm:$0xff]  ;;  %v11571_v16 = vld [vmem:[#allocation13 + $0xf8] sm:$0xff]  ;;  %v14985_v30 = vpack.c.bf16 %v11568_v17, %v11564_v12  ;;  %v15001_v17 = vpack.c.bf16 %v11600_v41, %v11596_v10 }
0x1fe3   :  { %v11137_v8 = vpack.c.bf16 %v11129_v19, %v11129_v19  ;;  %v11130_v48 = vmul.f32 %v15566_v56, %v18279_v25  ;;  %13845 = vmatprep.subr.bf16.mxu1 %v18564_v34  ;;  %v14975_v25 = vpack.c.bf16 %v11553_v60, %v11549_v27  ;;  %v11567_v19 = vld [vmem:[#allocation13 + $0xd8] sm:$0xff]  ;;  %v15013_v56 = vpack.c.bf16 %v11562_v15, %v11558_v49  ;;  %v11580_v60 = vld [vmem:[#allocation13 + $0x140] sm:$0xff]  ;;  %v11574_v4 = vld [vmem:[#allocation13 + $0x110] sm:$0xff] }
0x1fe4   :  { %v15015_v47 = vpack.c.bf16 %v11571_v16, %v11567_v19  ;;  %v11578_v35 = vld [vmem:[#allocation13 + $0x130] sm:$0xff]  ;;  %v11603_v12 = vld [vmem:[#allocation13 + $0x1f8] sm:$0xff] }
0x1fe5   :  { %13830 = vmatmul.mubr.msk.bf16.vlgmr.msra.gmra.mrb[8].mxu0 %vm4323_vm8, %v11137_v8  ;;  %v11138_v52 = vpack.c.bf16 %v11130_v48, %v11130_v48  ;;  %v11572_v8 = vld [vmem:[#allocation13 + $0x100] sm:$0xff]  ;;  %v11598_v49 = vld [vmem:[#allocation13 + $0x1d0] sm:$0xff]  ;;  %v18344_v19 = vld [vmem:[#allocation3 + $0x4] sm:$0xf] }
0x1fe6   :  { %13840 = vmatpush3.bf16.msra.mxu0 %v11421_v26  ;;  %13841 = vmatprep.mubr.msk.bf16.mxu0 %vm15799_vm4, %v18564_v34  ;;  %v11576_v48 = vld [vmem:[#allocation13 + $0x120] sm:$0xff]  ;;  %v11570_v26 = vld [vmem:[#allocation13 + $0xf0] sm:$0xff] }
0x1fe7   :  { %14972 = vmatprep.subr.bf16.mxu0 %v14971_v13  ;;  %v14987_v13 = vpack.c.bf16 %v11577_v0, %v11573_v22  ;;  %v15017_v27 = vpack.c.bf16 %v11570_v26, %v11566_v20  ;;  %v11602_v15 = vld [vmem:[#allocation13 + $0x1f0] sm:$0xff]  ;;  %v18338_v0 = vld [vmem:[#allocation3] sm:$0xf] }
0x1fe8   :  { %v15568_v55 = vpop.eup %15567  ;;  %v15033_v22 = vpack.c.bf16 %v11602_v15, %v11598_v49 }
0x1fe9   :  { %v11131_v40 = vmul.f32 %v15568_v55, %v18283_v39  ;;  %13836 = vmatmul.mubr.msk.bf16.vlgmr.msra.gmra.mrb[8].mxu1 %vm4323_vm8, %v11138_v52  ;;  %v11561_v39 = vld [vmem:[#allocation13 + $0xa8] sm:$0xff]  ;;  %v14989_v55 = vpack.c.bf16 %v11576_v48, %v11572_v8 }
0x1fea   :  { %13846 = vmatpush3.bf16.msra.mxu1 %v11467_v43  ;;  %13847 = vmatprep.mubr.msk.bf16.mxu1 %vm15799_vm4, %v18564_v34  ;;  %v14979_v38 = vpack.c.bf16 %v11561_v39, %v11557_v24  ;;  %v11581_v52 = vld [vmem:[#allocation13 + $0x148] sm:$0xff]  ;;  %v11588_v39 = vld [vmem:[#allocation13 + $0x180] sm:$0xff] }
0x1feb   :  { %v11139_v50 = vpack.c.bf16 %v11131_v40, %v11131_v40  ;;  %15004 = vmatprep.subr.bf16.mxu1 %v15003_v62  ;;  %v11579_v62 = vld [vmem:[#allocation13 + $0x138] sm:$0xff]  ;;  %v11584_v40 = vld [vmem:[#allocation13 + $0x160] sm:$0xff]  ;;  %v14991_v43 = vpack.c.bf16 %v11585_v59, %v11581_v52 }
0x1fec   :  { %v15570_v29 = vpop.eup %15569  ;;  %v14993_v24 = vpack.c.bf16 %v11584_v40, %v11580_v60 }
0x1fed   :  { %v11132_v11 = vmul.f32 %v15570_v29, %v18287_v54  ;;  %13842 = vmatmul.mubr.msk.bf16.vlgmr.msra.gmra.mrb[12].mxu0 %vm4323_vm8, %v11139_v50  ;;  %v14981_v54 = vpack.c.bf16 %v11560_v57, %v11556_v9  ;;  %v11589_v50 = vld [vmem:[#allocation13 + $0x188] sm:$0xff]  ;;  %v15021_v29 = vpack.c.bf16 %v11578_v35, %v11574_v4 }
0x1fee   :  { %14974 = vmatpush1.bf16.msra.mxu0 %v14973_v31  ;;  %11668 = vmatprep.mubr.f32.mxu0 %v18564_v34  ;;  %v15019_v31 = vpack.c.bf16 %v11579_v62, %v11575_v37  ;;  %v11597_v9 = vld [vmem:[#allocation13 + $0x1c8] sm:$0xff] }
0x1fef   :  { %v11140_v51 = vpack.c.bf16 %v11132_v11, %v11132_v11  ;;  %14976 = vmatprep.subr.bf16.mxu0 %v14975_v25  ;;  %v11593_v25 = vld [vmem:[#allocation13 + $0x1a8] sm:$0xff]  ;;  %v15023_v11 = vpack.c.bf16 %v11587_v14, %v11583_v42 }
0x1ff0   :  { %v14995_v23 = vpack.c.bf16 %v11593_v25, %v11589_v50  ;;  %v11601_v57 = vld [vmem:[#allocation13 + $0x1e8] sm:$0xff] }
0x1ff1   :  { %13848 = vmatmul.mubr.msk.bf16.vlgmr.msra.gmra.mrb[12].mxu1 %vm4323_vm8, %v11140_v51  ;;  %v11591_v51 = vld [vmem:[#allocation13 + $0x198] sm:$0xff]  ;;  %v14999_v21 = vpack.c.bf16 %v11601_v57, %v11597_v9 }
0x1ff2   :  { %14978 = vmatpush1.bf16.msra.mxu0 %v14977_v58  ;;  %15006 = vmatpush1.bf16.msra.mxu1 %v15005_v53  ;;  %v11582_v58 = vld [vmem:[#allocation13 + $0x150] sm:$0xff] }
0x1ff3   :  { %14980 = vmatprep.subr.bf16.mxu0 %v14979_v38  ;;  %15008 = vmatprep.subr.bf16.mxu1 %v15007_v1  ;;  %v11586_v53 = vld [vmem:[#allocation13 + $0x170] sm:$0xff]  ;;  %v11595_v38 = vld [vmem:[#allocation13 + $0x1b8] sm:$0xff]  ;;  %v14997_v1 = vpack.c.bf16 %v11592_v2, %v11588_v39 }
0x1ff4   :  { %11739 = vmatprep.mubr.f32.mxu1 %v18564_v34  ;;  %v15025_v63 = vpack.c.bf16 %v11586_v53, %v11582_v58  ;;  %v15027_v36 = vpack.c.bf16 %v11595_v38, %v11591_v51 }
0x1ff6   :  { %14982 = vmatpush1.bf16.msra.mxu0 %v14981_v54  ;;  %15010 = vmatpush1.bf16.msra.mxu1 %v15009_v46  ;;  %v11594_v54 = vld [vmem:[#allocation13 + $0x1b0] sm:$0xff]  ;;  %v11599_v46 = vld [vmem:[#allocation13 + $0x1d8] sm:$0xff] }
0x1ff7   :  { %14984 = vmatprep.subr.bf16.mxu0 %v14983_v61  ;;  %15012 = vmatprep.subr.bf16.mxu1 %v15011_v18  ;;  %v15029_v61 = vpack.c.bf16 %v11594_v54, %v11590_v28  ;;  %v15031_v18 = vpack.c.bf16 %v11603_v12, %v11599_v46 }
0x1ffa   :  { %14986 = vmatpush1.bf16.msra.mxu0 %v14985_v30  ;;  %15014 = vmatpush1.bf16.msra.mxu1 %v15013_v56 }
0x1ffb   :  { %14988 = vmatprep.subr.bf16.mxu0 %v14987_v13  ;;  %15016 = vmatprep.subr.bf16.mxu1 %v15015_v47 }
0x1ffe   :  { %14990 = vmatpush1.bf16.msra.mxu0 %v14989_v55  ;;  %15018 = vmatpush1.bf16.msra.mxu1 %v15017_v27 }
0x1fff   :  { %14992 = vmatprep.subr.bf16.mxu0 %v14991_v43  ;;  %15020 = vmatprep.subr.bf16.mxu1 %v15019_v31 }
0x2002   :  { %14994 = vmatpush1.bf16.msra.mxu0 %v14993_v24  ;;  %15022 = vmatpush1.bf16.msra.mxu1 %v15021_v29 }
0x2003   :  { %14996 = vmatprep.subr.bf16.mxu0 %v14995_v23  ;;  %15024 = vmatprep.subr.bf16.mxu1 %v15023_v11 }
0x2006   :  { %14998 = vmatpush1.bf16.msra.mxu0 %v14997_v1  ;;  %15026 = vmatpush1.bf16.msra.mxu1 %v15025_v63 }
0x2007   :  { %15000 = vmatprep.subr.bf16.mxu0 %v14999_v21  ;;  %15028 = vmatprep.subr.bf16.mxu1 %v15027_v36 }
0x200a   :  { %15002 = vmatpush1.bf16.msra.mxu0 %v15001_v17  ;;  %15030 = vmatpush1.bf16.msra.mxu1 %v15029_v61 }
0x200b   :  { %15032 = vmatprep.subr.bf16.mxu1 %v15031_v18  ;;  %13851 = vmatprep.subr.bf16.mxu0 %v18564_v34 }
0x200d   :  { %11669 = vmatmul.mubr.f32.vlgmr.msra.gmra.mrb[238].mxu0 %v18205_v44 }
0x200e   :  { %15034 = vmatpush1.bf16.msra.mxu1 %v15033_v22  ;;  %13853 = vmatprep.mubr.msk.bf16.mxu0 %vm15799_vm4, %v18564_v34 }
0x200f   :  { %13857 = vmatprep.subr.bf16.mxu1 %v18564_v34 }
0x2011   :  { %11740 = vmatmul.mubr.f32.vlgmr.msra.gmra.mrb[238].mxu1 %v18205_v44 }
0x2012   :  { %13859 = vmatprep.mubr.msk.bf16.mxu1 %vm15799_vm4, %v18564_v34 }
0x2013   :  { %13852 = vmatpush3.bf16.xpose.msra.mxu0 %v18338_v0 }
0x2014   :  { %13863 = vmatprep.subr.bf16.mxu0 %v18564_v34 }
0x2017   :  { %13858 = vmatpush3.bf16.xpose.msra.mxu1 %v18344_v19 }
0x2018   :  { %13869 = vmatprep.subr.bf16.mxu1 %v18564_v34 }
0x20a8   :  { %v11181_v16 = vpop.f32.mrb[0].mxu0 }
0x20a9   :  { %v13807_v30 = vpop.f32.mrb[1].mxu0 }
0x20aa   :  { %v11184_v56 = vpop.f32.mrb[2].mxu0 }
0x20ab   :  { %v13808_v8 = vpop.f32.mrb[3].mxu0 }
0x20ac   :  { %v11227_v48 = vpop.f32.mrb[0].mxu1 }
0x20ad   :  { %v11517_v13 = vrot.slane %v11227_v48, 7  ;;  %v13813_v47 = vpop.f32.mrb[1].mxu1 }
0x20ae   :  { %v11230_v20 = vpop.f32.mrb[2].mxu1 }
0x20af   :  { %v11518_v26 = vsel %vm1620_vm5, %v11517_v13, %v11181_v16  ;;  %v13814_v52 = vpop.f32.mrb[3].mxu1 }
0x20b0   :  { %v11273_v59 = vpop.f32.mrb[4].mxu0 }
0x20b1   :  { %v11519_v37 = vrot.slane %v11273_v59, 6  ;;  %v13819_v62 = vpop.f32.mrb[5].mxu0 }
0x20b2   :  { %v11276_v55 = vpop.f32.mrb[6].mxu0 }
0x20b3   :  { %v11520_v27 = vsel %vm2361_vm10, %v11519_v37, %v11518_v26  ;;  %v13820_v60 = vpop.f32.mrb[7].mxu0 }
0x20b4   :  { %v11319_v40 = vpop.f32.mrb[4].mxu1 }
0x20b5   :  { %v11521_v43 = vrot.slane %v11319_v40, 5  ;;  %v13825_v31 = vpop.f32.mrb[5].mxu1 }
0x20b6   :  { %v11322_v4 = vpop.f32.mrb[6].mxu1 }
0x20b7   :  { %v11522_v35 = vsel %vm3102_vm15, %v11521_v43, %v11520_v27  ;;  %v13826_v50 = vpop.f32.mrb[7].mxu1 }
0x20b8   :  { %v11365_v25 = vpop.f32.mrb[8].mxu0 }
0x20b9   :  { %v11523_v42 = vrot.slane %v11365_v25, 4  ;;  %v13831_v14 = vpop.f32.mrb[9].mxu0 }
0x20ba   :  { %v11368_v24 = vpop.f32.mrb[10].mxu0 }
0x20bb   :  { %v11524_v29 = vsel %vm4711_vm9, %v11523_v42, %v11522_v35  ;;  %v13832_v39 = vpop.f32.mrb[11].mxu0  ;;  %v18369_v42 = vld [vmem:[#allocation3 + $0x8] sm:$0xf] }
0x20bc   :  { %v11411_v2 = vpop.f32.mrb[8].mxu1 }
0x20bd   :  { %v11525_v23 = vrot.slane %v11411_v2, 3  ;;  %v13837_v11 = vpop.f32.mrb[9].mxu1 }
0x20be   :  { %v11414_v58 = vpop.f32.mrb[10].mxu1  ;;  %v18383_v11 = vld [vmem:[#allocation3 + $0x10] sm:$0xf] }
0x20bf   :  { %v11526_v53 = vsel %vm4714_vm11, %v11525_v23, %v11524_v29  ;;  %v13838_v9 = vpop.f32.mrb[11].mxu1  ;;  %v18375_v29 = vld [vmem:[#allocation3 + $0xc] sm:$0xf] }
0x20c0   :  { %v11457_v57 = vpop.f32.mrb[12].mxu0  ;;  %v18389_v9 = vld [vmem:[#allocation3 + $0x14] sm:$0xf] }
0x20c1   :  { %v11527_v51 = vrot.slane %v11457_v57, 2  ;;  %v13843_v38 = vpop.f32.mrb[13].mxu0 }
0x20c2   :  { %v11460_v1 = vpop.f32.mrb[14].mxu0 }
0x20c3   :  { %v11528_v63 = vsel %vm4717_vm12, %v11527_v51, %v11526_v53  ;;  %v13844_v10 = vpop.f32.mrb[15].mxu0 }
0x20c4   :  { %v11503_v21 = vpop.f32.mrb[12].mxu1 }
0x20c5   :  { %v11529_v36 = vrot.slane %v11503_v21, 1  ;;  %v13849_v41 = vpop.f32.mrb[13].mxu1 }
0x20c6   :  { %v11506_v28 = vpop.f32.mrb[14].mxu1 }
0x20c7   :  { %v11530_v54 = vsel %vm4720_vm13, %v11529_v36, %v11528_v63  ;;  %v13850_v46 = vpop.f32.mrb[15].mxu1  ;;  %v18397_v63 = vld [vmem:[#allocation3 + $0x18] sm:$0xf]  ;;  %v18403_v36 = vld [vmem:[#allocation3 + $0x1c] sm:$0xf] }
0x20c8   :  { %v12921_v12 = vpack.c.bf16 %v11530_v54, %v18205_v44  ;;  %v12280_v46 = vsel %vm4327_vm6, %v18338_v0, 0 }
0x20ca   :  { %11539 = vst [vmem:[#allocation15 + $0x30] sm:$0xff] %v12921_v12 }
0x20e0   :  { %v11670_v17 = vpop.f32.mrb[238].mxu0 }
0x20e1   :  { %v11671_v61 = vadd.f32 %v11670_v17, %v18624_v33  ;;  %v11672_v18 = vpop.f32.mrb[239].mxu0  ;;  %v12326_v17 = vsel %vm4327_vm6, %v18344_v19, 0 }
0x20e2   :  { %v11673_v49 = vadd.f32 %v11672_v18, %v18625_v5 }
0x20e3   :  { %v12899_v15 = vmul.f32 -1.442695, %v11671_v61 }
0x20e4   :  { %v12900_v22 = vmul.f32 -1.442695, %v11673_v49  ;;  %v11741_v16 = vpop.f32.mrb[238].mxu1 }
0x20e5   :  { %15571 = vpow2.f32 %v12899_v15  ;;  %v11743_v30 = vpop.f32.mrb[239].mxu1  ;;  %v11742_v56 = vadd.f32 %v11741_v16, %v18626_v6 }
0x20e6   :  { %15573 = vpow2.f32 %v12900_v22  ;;  %v11744_v48 = vadd.f32 %v11743_v30, %v18627_v3 }
0x20e7   :  { %v12901_v8 = vmul.f32 -1.442695, %v11742_v56 }
0x20e9   :  { %15575 = vpow2.f32 %v12901_v8 }
0x20ea   :  { %15577 = vtanh.f32 %v11744_v48 }
0x20ef   :  { %v15572_v13 = vpop.eup %15571 }
0x20f0   :  { %v15574_v44 = vpop.eup %15573  ;;  %v11755_v47 = vadd.f32 1.0, %v15572_v13 }
0x20f1   :  { %v11756_v20 = vadd.f32 1.0, %v15574_v44 }
0x20f2   :  { %15579 = vrcp.f32 %v11755_v47 }
0x20f3   :  { %15581 = vrcp.f32 %v11756_v20  ;;  %v15576_v33 = vpop.eup %15575 }
0x20f4   :  { %v15578_v5 = vpop.eup %15577  ;;  %v11757_v59 = vadd.f32 1.0, %v15576_v33 }
0x20f6   :  { %15583 = vrcp.f32 %v11757_v59 }
0x20fc   :  { %v15580_v26 = vpop.eup %15579 }
0x20fd   :  { %v15582_v52 = vpop.eup %15581  ;;  %v11766_v37 = vmul.f32 %v15580_v26, %v15578_v5 }
0x20fe   :  { %v11765_v62 = vmul.f32 %v15582_v52, %v18202_v7 }
0x2100   :  { %v11767_v6 = vadd.f32 %v11766_v37, %v11765_v62  ;;  %v15584_v3 = vpop.eup %15583 }
0x2102   :  { %15585 = vtanh.f32 %v11767_v6 }
0x210c   :  { %v15586_v55 = vpop.eup %15585 }
0x210d   :  { %v18361_v27 = vmul.f32 %v15586_v55, %v15584_v3 }
0x210f   :  { %v11778_v60 = vpack.c.bf16 %v18361_v27, %v18361_v27 }
0x2111   :  { %v11786_v40 = vrot.slane %v11778_v60, %v18629_v32 }
0x2113   :  { %v11787_v43 = vcombine.high %v11786_v40, %v11786_v40  ;;  %v11794_v31 = vrot.slane %v11786_v40, %v18629_v32 }
0x2115   :  { %v11801_v4 = vrot.slane %v11787_v43, %v18629_v32  ;;  %v12902_v35 = vpack.i.b16 %v11794_v31, %v11794_v31  ;;  %v11805_v50 = vunpack.i.h.s16 %v11794_v31  ;;  %v11802_v2 = vcombine.high %v11794_v31, %v11794_v31 }
0x2117   :  { %v11816_v7 = vrot.slane %v12902_v35, %v18630_v45  ;;  %v11858_v25 = vpack.i.b16 %v11805_v50, %v11805_v50  ;;  %v11807_v24 = vunpack.i.h.s16 %v11801_v4  ;;  %v12903_v32 = vpack.i.b16 %v11801_v4, %v11801_v4 }
0x2118   :  { %v11809_v53 = vunpack.i.h.s16 %v11802_v2  ;;  %v12904_v57 = vpack.i.b16 %v11802_v2, %v11802_v2  ;;  %v11803_v38 = vcombine.high %v11801_v4, %v11801_v4 }
0x2119   :  { %13854 = vmatmul.mubr.bf16.vlgmr.msra.gmra.mrb[16].mxu0 %v11816_v7  ;;  %v11862_v14 = vrot.slane %v11858_v25, %v18630_v45  ;;  %v11950_v39 = vpack.i.b16 %v11807_v24, %v11807_v24  ;;  %v11908_v23 = vrot.slane %v12903_v32, %v18630_v45 }
0x211a   :  { %13864 = vmatpush3.bf16.xpose.msra.mxu0 %v18369_v42  ;;  %13865 = vmatprep.mubr.msk.bf16.mxu0 %vm15799_vm4, %v18564_v34  ;;  %v12042_v51 = vpack.i.b16 %v11809_v53, %v11809_v53  ;;  %v12000_v1 = vrot.slane %v12904_v57, %v18630_v45  ;;  %v11811_v21 = vunpack.i.h.s16 %v11803_v38  ;;  %v12905_v41 = vpack.i.b16 %v11803_v38, %v11803_v38 }
0x211b   :  { %13860 = vmatmul.mubr.bf16.vlgmr.msra.gmra.mrb[16].mxu1 %v11862_v14  ;;  %13875 = vmatprep.subr.bf16.mxu0 %v18564_v34  ;;  %v11954_v58 = vrot.slane %v11950_v39, %v18630_v45 }
0x211c   :  { %13870 = vmatpush3.bf16.xpose.msra.mxu1 %v18375_v29  ;;  %13871 = vmatprep.mubr.msk.bf16.mxu1 %vm15799_vm4, %v18564_v34  ;;  %v12046_v10 = vrot.slane %v12042_v51, %v18630_v45  ;;  %v12134_v28 = vpack.i.b16 %v11811_v21, %v11811_v21  ;;  %v12092_v54 = vrot.slane %v12905_v41, %v18630_v45 }
0x211d   :  { %13881 = vmatprep.subr.bf16.mxu1 %v18564_v34 }
0x211e   :  { %v12138_v12 = vrot.slane %v12134_v28, %v18630_v45 }
0x2121   :  { %13866 = vmatmul.mubr.bf16.vlgmr.msra.gmra.mrb[20].mxu0 %v11908_v23 }
0x2122   :  { %13876 = vmatpush3.bf16.xpose.msra.mxu0 %v18383_v11  ;;  %13877 = vmatprep.mubr.msk.bf16.mxu0 %vm15799_vm4, %v18564_v34 }
0x2123   :  { %13872 = vmatmul.mubr.bf16.vlgmr.msra.gmra.mrb[20].mxu1 %v11954_v58  ;;  %13887 = vmatprep.subr.bf16.mxu0 %v18564_v34 }
0x2124   :  { %13882 = vmatpush3.bf16.xpose.msra.mxu1 %v18389_v9  ;;  %13883 = vmatprep.mubr.msk.bf16.mxu1 %vm15799_vm4, %v18564_v34 }
0x2125   :  { %13893 = vmatprep.subr.bf16.mxu1 %v18564_v34 }
0x2129   :  { %13878 = vmatmul.mubr.bf16.vlgmr.msra.gmra.mrb[24].mxu0 %v12000_v1 }
0x212a   :  { %13888 = vmatpush3.bf16.xpose.msra.mxu0 %v18397_v63  ;;  %13889 = vmatprep.mubr.msk.bf16.mxu0 %vm15799_vm4, %v18564_v34 }
0x212b   :  { %13884 = vmatmul.mubr.bf16.vlgmr.msra.gmra.mrb[24].mxu1 %v12046_v10  ;;  %13899 = vmatprep.subr.bf16.mxu0 %v18564_v34 }
0x212c   :  { %13894 = vmatpush3.bf16.xpose.msra.mxu1 %v18403_v36  ;;  %13895 = vmatprep.mubr.msk.bf16.mxu1 %vm15799_vm4, %v18564_v34 }
0x212d   :  { %13905 = vmatprep.subr.bf16.mxu1 %v18564_v34 }
0x2131   :  { %13890 = vmatmul.mubr.bf16.vlgmr.msra.gmra.mrb[28].mxu0 %v12092_v54 }
0x2132   :  { %13900 = vmatpush3.bf16.msra.mxu0 %v12280_v46  ;;  %13901 = vmatprep.mubr.msk.bf16.mxu0 %vm15799_vm4, %v18564_v34 }
0x2133   :  { %13896 = vmatmul.mubr.bf16.vlgmr.msra.gmra.mrb[28].mxu1 %v12138_v12  ;;  %13911 = vmatprep.subr.bf16.mxu0 %v18564_v34 }
0x2134   :  { %13906 = vmatpush3.bf16.msra.mxu1 %v12326_v17  ;;  %13907 = vmatprep.mubr.msk.bf16.mxu1 %vm15799_vm4, %v18564_v34 }
0x2135   :  { %13917 = vmatprep.subr.bf16.mxu1 %v18564_v34 }
0x21ec   :  { %v11852_v61 = vpop.f32.mrb[16].mxu0 }
0x21ed   :  { %v13855_v0 = vpop.f32.mrb[17].mxu0  ;;  %v12180_v45 = vsel %vm4226_vm7, %v11852_v61, -inf }
0x21ee   :  { %12181 = vmax.xlane.f32.xlu0 %v12180_v45  ;;  %v11855_v18 = vpop.f32.mrb[18].mxu0  ;;  %v11898_v49 = vpop.f32.mrb[16].mxu1 }
0x21ef   :  { %v13856_v15 = vpop.f32.mrb[19].mxu0  ;;  %v13861_v22 = vpop.f32.mrb[17].mxu1  ;;  %v12183_v16 = vsel %vm4226_vm7, %v11898_v49, -inf }
0x21f0   :  { %12184 = vmax.xlane.f32.xlu1 %v12183_v16  ;;  %v11901_v19 = vpop.f32.mrb[18].mxu1 }
0x21f1   :  { %v13862_v30 = vpop.f32.mrb[19].mxu1 }
0x21f4   :  { %v11944_v56 = vpop.f32.mrb[20].mxu0 }
0x21f5   :  { %v13867_v8 = vpop.f32.mrb[21].mxu0  ;;  %v12186_v48 = vsel %vm4226_vm7, %v11944_v56, -inf }
0x21f6   :  { %12187 = vmax.xlane.f32.xlu0 %v12186_v48  ;;  %v11947_v13 = vpop.f32.mrb[22].mxu0  ;;  %v11990_v44 = vpop.f32.mrb[20].mxu1 }
0x21f7   :  { %v13868_v47 = vpop.f32.mrb[23].mxu0  ;;  %v13873_v20 = vpop.f32.mrb[21].mxu1  ;;  %v12189_v33 = vsel %vm4226_vm7, %v11990_v44, -inf }
0x21f8   :  { %12190 = vmax.xlane.f32.xlu1 %v12189_v33  ;;  %v11993_v5 = vpop.f32.mrb[22].mxu1 }
0x21f9   :  { %v13874_v26 = vpop.f32.mrb[23].mxu1 }
0x21fc   :  { %v12036_v52 = vpop.f32.mrb[24].mxu0 }
0x21fd   :  { %v13879_v59 = vpop.f32.mrb[25].mxu0  ;;  %v12192_v37 = vsel %vm4226_vm7, %v12036_v52, -inf }
0x21fe   :  { %12193 = vmax.xlane.f32.xlu0 %v12192_v37  ;;  %v12039_v62 = vpop.f32.mrb[26].mxu0  ;;  %v12082_v6 = vpop.f32.mrb[24].mxu1 }
0x21ff   :  { %v13880_v3 = vpop.f32.mrb[27].mxu0  ;;  %v13885_v55 = vpop.f32.mrb[25].mxu1  ;;  %v12195_v60 = vsel %vm4226_vm7, %v12082_v6, -inf }
0x2200   :  { %12196 = vmax.xlane.f32.xlu1 %v12195_v60  ;;  %v12085_v40 = vpop.f32.mrb[26].mxu1 }
0x2201   :  { %v13886_v43 = vpop.f32.mrb[27].mxu1 }
0x2204   :  { %v12128_v31 = vpop.f32.mrb[28].mxu0 }
0x2205   :  { %v13891_v4 = vpop.f32.mrb[29].mxu0  ;;  %v12198_v35 = vsel %vm4226_vm7, %v12128_v31, -inf }
0x2206   :  { %12199 = vmax.xlane.f32.xlu0 %v12198_v35  ;;  %v12131_v50 = vpop.f32.mrb[30].mxu0  ;;  %v12174_v7 = vpop.f32.mrb[28].mxu1 }
0x2207   :  { %v13892_v25 = vpop.f32.mrb[31].mxu0  ;;  %v13897_v14 = vpop.f32.mrb[29].mxu1  ;;  %v12201_v24 = vsel %vm4226_vm7, %v12174_v7, -inf }
0x2208   :  { %12202 = vmax.xlane.f32.xlu1 %v12201_v24  ;;  %v12177_v32 = vpop.f32.mrb[30].mxu1  ;;  %v12418_v14 = vsel %vm4327_vm6, %v18375_v29, 0  ;;  %v12464_v29 = vsel %vm4327_vm6, %v18383_v11, 0 }
0x2209   :  { %v13898_v39 = vpop.f32.mrb[31].mxu1 }
0x227b   :  { %v12182_v2 = vpop.xlane.xlu0 %12181 }
0x227c   :  { %v12204_v23 = vsub.f32 %v11852_v61, %v12182_v2 }
0x227d   :  { %v12185_v58 = vpop.xlane.xlu1 %12184 }
0x227e   :  { %v12212_v53 = vmul.f32 1.442695, %v12204_v23  ;;  %v12205_v57 = vsub.f32 %v11898_v49, %v12185_v58 }
0x2280   :  { %15587 = vpow2.f32 %v12212_v53  ;;  %v12214_v51 = vmul.f32 1.442695, %v12205_v57  ;;  %v12510_v57 = vsel %vm4327_vm6, %v18389_v9, 0  ;;  %v12556_v9 = vsel %vm4327_vm6, %v18397_v63, 0 }
0x2282   :  { %15589 = vpow2.f32 %v12214_v51 }
0x2283   :  { %v12188_v38 = vpop.xlane.xlu0 %12187 }
0x2284   :  { %v12206_v1 = vsub.f32 %v11944_v56, %v12188_v38 }
0x2285   :  { %v12191_v10 = vpop.xlane.xlu1 %12190 }
0x2286   :  { %v12216_v21 = vmul.f32 1.442695, %v12206_v1  ;;  %v12207_v41 = vsub.f32 %v11990_v44, %v12191_v10 }
0x2288   :  { %15591 = vpow2.f32 %v12216_v21  ;;  %v12218_v28 = vmul.f32 1.442695, %v12207_v41 }
0x228a   :  { %v15588_v54 = vpop.eup %15587  ;;  %15593 = vpow2.f32 %v12218_v28  ;;  %v12602_v28 = vsel %vm4327_vm6, %v18403_v36, 0 }
0x228b   :  { %v12194_v46 = vpop.xlane.xlu0 %12193  ;;  %v12228_v12 = vsel %vm4226_vm7, %v15588_v54, 0.0 }
0x228c   :  { %v15590_v17 = vpop.eup %15589  ;;  %v12208_v61 = vsub.f32 %v12036_v52, %v12194_v46  ;;  %12229 = vadd.xlane.f32.xlu0 %v12228_v12 }
0x228d   :  { %v12197_v0 = vpop.xlane.xlu1 %12196  ;;  %v12231_v45 = vsel %vm4226_vm7, %v15590_v17, 0.0 }
0x228e   :  { %v12220_v18 = vmul.f32 1.442695, %v12208_v61  ;;  %v12209_v49 = vsub.f32 %v12082_v6, %v12197_v0  ;;  %12232 = vadd.xlane.f32.xlu1 %v12231_v45 }
0x2290   :  { %15595 = vpow2.f32 %v12220_v18  ;;  %v12222_v15 = vmul.f32 1.442695, %v12209_v49 }
0x2292   :  { %v15592_v22 = vpop.eup %15591  ;;  %15597 = vpow2.f32 %v12222_v15 }
0x2293   :  { %v12200_v16 = vpop.xlane.xlu0 %12199  ;;  %v12234_v19 = vsel %vm4226_vm7, %v15592_v22, 0.0 }
0x2294   :  { %v15594_v30 = vpop.eup %15593  ;;  %v12210_v56 = vsub.f32 %v12128_v31, %v12200_v16  ;;  %12235 = vadd.xlane.f32.xlu0 %v12234_v19 }
0x2295   :  { %v12203_v8 = vpop.xlane.xlu1 %12202  ;;  %v12237_v48 = vsel %vm4226_vm7, %v15594_v30, 0.0 }
0x2296   :  { %v12224_v13 = vmul.f32 1.442695, %v12210_v56  ;;  %v12211_v44 = vsub.f32 %v12174_v7, %v12203_v8  ;;  %12238 = vadd.xlane.f32.xlu1 %v12237_v48  ;;  %v12372_v7 = vsel %vm4327_vm6, %v18369_v42, 0 }
0x2298   :  { %15599 = vpow2.f32 %v12224_v13  ;;  %v12226_v47 = vmul.f32 1.442695, %v12211_v44 }
0x229a   :  { %v15596_v20 = vpop.eup %15595  ;;  %15601 = vpow2.f32 %v12226_v47 }
0x229b   :  { %v12240_v33 = vsel %vm4226_vm7, %v15596_v20, 0.0 }
0x229c   :  { %v15598_v5 = vpop.eup %15597  ;;  %12241 = vadd.xlane.f32.xlu0 %v12240_v33 }
0x229d   :  { %v12243_v26 = vsel %vm4226_vm7, %v15598_v5, 0.0 }
0x229e   :  { %12244 = vadd.xlane.f32.xlu1 %v12243_v26 }
0x22a2   :  { %v18436_v52 = vpop.eup %15599 }
0x22a3   :  { %v12246_v59 = vsel %vm4226_vm7, %v18436_v52, 0.0 }
0x22a4   :  { %v18440_v37 = vpop.eup %15601  ;;  %12247 = vadd.xlane.f32.xlu0 %v12246_v59 }
0x22a5   :  { %v12249_v62 = vsel %vm4226_vm7, %v18440_v37, 0.0 }
0x22a6   :  { %12250 = vadd.xlane.f32.xlu1 %v12249_v62 }
0x2319   :  { %v12230_v6 = vpop.xlane.xlu0 %12229 }
0x231a   :  { %15603 = vrcp.f32 %v12230_v6 }
0x231b   :  { %v12233_v3 = vpop.xlane.xlu1 %12232 }
0x231c   :  { %15605 = vrcp.f32 %v12233_v3 }
0x2321   :  { %v12236_v55 = vpop.xlane.xlu0 %12235 }
0x2322   :  { %15607 = vrcp.f32 %v12236_v55 }
0x2323   :  { %v12239_v60 = vpop.xlane.xlu1 %12238 }
0x2324   :  { %v15604_v40 = vpop.eup %15603  ;;  %15609 = vrcp.f32 %v12239_v60 }
0x2325   :  { %v12260_v43 = vmul.f32 %v15604_v40, %v15588_v54 }
0x2326   :  { %v15606_v31 = vpop.eup %15605 }
0x2327   :  { %v12268_v4 = vpack.c.bf16 %v12260_v43, %v12260_v43  ;;  %v12261_v35 = vmul.f32 %v15606_v31, %v15590_v17 }
0x2329   :  { %v12269_v50 = vpack.c.bf16 %v12261_v35, %v12261_v35  ;;  %13902 = vmatmul.mubr.msk.bf16.vlgmr.msra.gmra.mrb[36].mxu0 %vm4323_vm8, %v12268_v4  ;;  %v12242_v25 = vpop.xlane.xlu0 %12241 }
0x232a   :  { %13912 = vmatpush3.bf16.msra.mxu0 %v12372_v7  ;;  %15611 = vrcp.f32 %v12242_v25  ;;  %13913 = vmatprep.mubr.msk.bf16.mxu0 %vm15799_vm4, %v18564_v34 }
0x232b   :  { %13908 = vmatmul.mubr.msk.bf16.vlgmr.msra.gmra.mrb[36].mxu1 %vm4323_vm8, %v12269_v50  ;;  %v12245_v24 = vpop.xlane.xlu1 %12244  ;;  %13923 = vmatprep.subr.bf16.mxu0 %v18564_v34 }
0x232c   :  { %v15608_v32 = vpop.eup %15607  ;;  %13918 = vmatpush3.bf16.msra.mxu1 %v12418_v14  ;;  %15613 = vrcp.f32 %v12245_v24  ;;  %13919 = vmatprep.mubr.msk.bf16.mxu1 %vm15799_vm4, %v18564_v34 }
0x232d   :  { %v12262_v42 = vmul.f32 %v15608_v32, %v15592_v22  ;;  %13929 = vmatprep.subr.bf16.mxu1 %v18564_v34 }
0x232e   :  { %v15610_v39 = vpop.eup %15609 }
0x232f   :  { %v12270_v2 = vpack.c.bf16 %v12262_v42, %v12262_v42  ;;  %v12263_v23 = vmul.f32 %v15610_v39, %v15594_v30 }
0x2331   :  { %v12271_v58 = vpack.c.bf16 %v12263_v23, %v12263_v23  ;;  %13914 = vmatmul.mubr.msk.bf16.vlgmr.msra.gmra.mrb[40].mxu0 %vm4323_vm8, %v12270_v2  ;;  %v12248_v53 = vpop.xlane.xlu0 %12247 }
0x2332   :  { %13924 = vmatpush3.bf16.msra.mxu0 %v12464_v29  ;;  %15615 = vrcp.f32 %v12248_v53  ;;  %13925 = vmatprep.mubr.msk.bf16.mxu0 %vm15799_vm4, %v18564_v34 }
0x2333   :  { %13920 = vmatmul.mubr.msk.bf16.vlgmr.msra.gmra.mrb[40].mxu1 %vm4323_vm8, %v12271_v58  ;;  %v12251_v51 = vpop.xlane.xlu1 %12250  ;;  %13935 = vmatprep.subr.bf16.mxu0 %v18564_v34 }
0x2334   :  { %v15612_v38 = vpop.eup %15611  ;;  %13930 = vmatpush3.bf16.msra.mxu1 %v12510_v57  ;;  %15617 = vrcp.f32 %v12251_v51  ;;  %13931 = vmatprep.mubr.msk.bf16.mxu1 %vm15799_vm4, %v18564_v34 }
0x2335   :  { %v12264_v11 = vmul.f32 %v15612_v38, %v15596_v20  ;;  %13941 = vmatprep.subr.bf16.mxu1 %v18564_v34 }
0x2336   :  { %v15614_v1 = vpop.eup %15613 }
0x2337   :  { %v12272_v10 = vpack.c.bf16 %v12264_v11, %v12264_v11  ;;  %v12265_v21 = vmul.f32 %v15614_v1, %v15598_v5 }
0x2339   :  { %v12273_v41 = vpack.c.bf16 %v12265_v21, %v12265_v21  ;;  %13926 = vmatmul.mubr.msk.bf16.vlgmr.msra.gmra.mrb[44].mxu0 %vm4323_vm8, %v12272_v10 }
0x233a   :  { %13936 = vmatpush3.bf16.msra.mxu0 %v12556_v9  ;;  %13937 = vmatprep.mubr.msk.bf16.mxu0 %vm15799_vm4, %v18564_v34 }
0x233b   :  { %13932 = vmatmul.mubr.msk.bf16.vlgmr.msra.gmra.mrb[44].mxu1 %vm4323_vm8, %v12273_v41 }
0x233c   :  { %v15616_v54 = vpop.eup %15615  ;;  %13942 = vmatpush3.bf16.msra.mxu1 %v12602_v28  ;;  %13943 = vmatprep.mubr.msk.bf16.mxu1 %vm15799_vm4, %v18564_v34 }
0x233d   :  { %v12266_v46 = vmul.f32 %v15616_v54, %v18436_v52 }
0x233e   :  { %v15618_v12 = vpop.eup %15617 }
0x233f   :  { %v12274_v17 = vpack.c.bf16 %v12266_v46, %v12266_v46  ;;  %v12267_v63 = vmul.f32 %v15618_v12, %v18440_v37 }
0x2341   :  { %v12275_v61 = vpack.c.bf16 %v12267_v63, %v12267_v63  ;;  %13938 = vmatmul.mubr.msk.bf16.vlgmr.msra.gmra.mrb[48].mxu0 %vm4323_vm8, %v12274_v17 }
0x2343   :  { %13944 = vmatmul.mubr.msk.bf16.vlgmr.msra.gmra.mrb[48].mxu1 %vm4323_vm8, %v12275_v61 }
0x23fc   :  { %v12316_v0 = vpop.f32.mrb[36].mxu0 }
0x23fd   :  { %v13903_v45 = vpop.f32.mrb[37].mxu0 }
0x23fe   :  { %v12319_v18 = vpop.f32.mrb[38].mxu0  ;;  %v12362_v36 = vpop.f32.mrb[36].mxu1 }
0x23ff   :  { %v12652_v49 = vrot.slane %v12362_v36, 7  ;;  %v13904_v15 = vpop.f32.mrb[39].mxu0  ;;  %v13909_v22 = vpop.f32.mrb[37].mxu1 }
0x2400   :  { %v12365_v16 = vpop.f32.mrb[38].mxu1 }
0x2401   :  { %v12653_v34 = vsel %vm1620_vm5, %v12652_v49, %v12316_v0  ;;  %v13910_v19 = vpop.f32.mrb[39].mxu1 }
0x2404   :  { %v12408_v30 = vpop.f32.mrb[40].mxu0 }
0x2405   :  { %v12654_v56 = vrot.slane %v12408_v30, 6  ;;  %v13915_v8 = vpop.f32.mrb[41].mxu0 }
0x2406   :  { %v12411_v48 = vpop.f32.mrb[42].mxu0  ;;  %v12454_v13 = vpop.f32.mrb[40].mxu1 }
0x2407   :  { %v12655_v44 = vsel %vm2361_vm10, %v12654_v56, %v12653_v34  ;;  %v12656_v47 = vrot.slane %v12454_v13, 5  ;;  %v13916_v20 = vpop.f32.mrb[43].mxu0  ;;  %v13921_v33 = vpop.f32.mrb[41].mxu1 }
0x2408   :  { %v12457_v5 = vpop.f32.mrb[42].mxu1 }
0x2409   :  { %v12657_v26 = vsel %vm3102_vm15, %v12656_v47, %v12655_v44  ;;  %v13922_v52 = vpop.f32.mrb[43].mxu1 }
0x240c   :  { %v12500_v59 = vpop.f32.mrb[44].mxu0 }
0x240d   :  { %v12658_v37 = vrot.slane %v12500_v59, 4  ;;  %v13927_v62 = vpop.f32.mrb[45].mxu0 }
0x240e   :  { %v12503_v6 = vpop.f32.mrb[46].mxu0  ;;  %v12546_v3 = vpop.f32.mrb[44].mxu1 }
0x240f   :  { %v12659_v55 = vsel %vm4711_vm9, %v12658_v37, %v12657_v26  ;;  %v12660_v60 = vrot.slane %v12546_v3, 3  ;;  %v13928_v40 = vpop.f32.mrb[47].mxu0  ;;  %v13933_v43 = vpop.f32.mrb[45].mxu1 }
0x2410   :  { %v12549_v31 = vpop.f32.mrb[46].mxu1 }
0x2411   :  { %v12661_v4 = vsel %vm4714_vm11, %v12660_v60, %v12659_v55  ;;  %v13934_v35 = vpop.f32.mrb[47].mxu1 }
0x2414   :  { %v12592_v50 = vpop.f32.mrb[48].mxu0 }
0x2415   :  { %v12662_v7 = vrot.slane %v12592_v50, 2  ;;  %v13939_v25 = vpop.f32.mrb[49].mxu0 }
0x2416   :  { %v12595_v14 = vpop.f32.mrb[50].mxu0  ;;  %v12638_v24 = vpop.f32.mrb[48].mxu1 }
0x2417   :  { %v12663_v32 = vsel %vm4717_vm12, %v12662_v7, %v12661_v4  ;;  %v12664_v42 = vrot.slane %v12638_v24, 1  ;;  %v13940_v39 = vpop.f32.mrb[51].mxu0  ;;  %v13945_v2 = vpop.f32.mrb[49].mxu1 }
0x2418   :  { %v12641_v23 = vpop.f32.mrb[50].mxu1 }
0x2419   :  { %v12665_v58 = vsel %vm4720_vm13, %v12664_v42, %v12663_v32  ;;  %v13946_v29 = vpop.f32.mrb[51].mxu1 }
0x241a   :  { %v12922_v53 = vpack.c.bf16 %v12665_v58, %v18361_v27 }
0x241c   :  { %12674 = vst [vmem:[#allocation15 + $0x38] sm:$0xff] %v12922_v53 }
0x241d   :  { %15762 = shalt.err (!%p15759_p10)
}
0x241e   :  { %s15763_s17 = scalar_lea.hbm %s18510_s8, 1024 }
0x241f   :  { %p15764_p11 = scmp.ne.s32.totalorder %s18510_s8, %s15763_s17  ;;  %p15767_p12 = scmp.lt.u32.totalorder %s15763_s17, %s18510_s8 }
0x2421   :  { %p15769_p13 = pnand %p15767_p12, %p15764_p11 }
0x2423   :  { %15772 = shalt.err (!%p15769_p13)
}
0x2424   :  { %s15801_s20 = smov 128   ;;  %s15802_s21 = smov 8  }
0x2425   :  { %12686 = dma.vmem_to_hbm [thread:$0]  %s12681_s13, 1024, %s18510_s8, [#allocation6], %s15801_s20, %s15801_s20, %s15802_s21  }
0x2426   :  { %15781 = dma.done.wait [#allocation6], 1024  }
0x2427   :  { %15782 = vsyncadd [#allocation6], 4294966272 }
0x2428   :  { %12690 = vsyncpa [#allocation5], 1 }
0x2429   :  { %12691 = vsyncpa [#allocation8], 1 }
0x242a   :  { %12692 = vsyncpa [#allocation11], 1 }
0x242b   :  { %12693 = vsyncpa [#allocation14], 1 }
0x242c   :  { %12694 = vsyncpa [#allocation6], 1 }

</bundles_post_ra>
